<compile_context>
chip_gen: v7x
topology: tpu7x:2x2x1
jax: 0.10.0
libtpu: 0.0.40
codegen_flags: <defaults>
</compile_context>

<pallas_src>
import functools

import numpy as np
import jax
import jax.numpy as jnp
from jax.experimental import pallas as pl
from jax.experimental.pallas import tpu as pltpu

BN_EPS = 1e-5


# ---------------------------------------------------------------------------
# In-kernel 3x3 / stride-1 / pad-1 convolution on a channel-major flattened
# activation map x_cm of shape (Cin, M) with M = N*H*W in raster order.
#   w_ref:     (9, Cout, Cin) bf16   (BN scale already folded in)
#   b_ref:     (Cout, 1)      f32    (folded BN bias)
#   masks_ref: (9, M)         f32    (per-tap border validity masks)
# Returns the (Cout, M) f32 conv + bias.
# ---------------------------------------------------------------------------
def _conv3x3_cm(x_cm, w_ref, b_ref, masks_ref, wo):
    _, m = x_cm.shape
    cout = b_ref.shape[0]
    acc = jnp.zeros((cout, m), jnp.float32)
    for k in range(9):
        dy, dx = divmod(k, 3)
        d = (dy - 1) * wo + (dx - 1)              # flat-index offset of this tap
        if d == 0:
            shifted = x_cm
        else:
            # shifted[:, p] = x_cm[:, p + d]   (wrap-around is masked below)
            shifted = pltpu.roll(x_cm, (-d) % m, axis=1)
        if k != 4:                                # centre tap never crosses a border
            shifted = shifted * masks_ref[k:k + 1, :]
        acc = acc + jnp.dot(w_ref[k], shifted.astype(jnp.bfloat16),
                            preferred_element_type=jnp.float32)
    return acc + b_ref[...]


# ---------------------------------------------------------------------------
# Fused kernels: one per ResNet "layer".
# ---------------------------------------------------------------------------
def _first_layer_kernel(x_ref, masks_ref, *rest, n_blocks, wo, relu_flags):
    """stem conv+BN+ReLU followed by n_blocks stride-1 identity BasicBlocks."""
    out_ref = rest[-1]
    w = rest[:-1]
    h = jnp.maximum(_conv3x3_cm(x_ref[...], w[0], w[1], masks_ref, wo), 0.0)
    p = 2
    for b in range(n_blocks):
        w1, b1, w2, b2 = w[p], w[p + 1], w[p + 2], w[p + 3]
        p += 4
        t = jnp.maximum(_conv3x3_cm(h, w1, b1, masks_ref, wo), 0.0)
        t = _conv3x3_cm(t, w2, b2, masks_ref, wo) + h          # identity shortcut, f32
        h = jnp.maximum(t, 0.0) if relu_flags[b] else t
    out_ref[...] = h


def _down_layer_kernel(patches_ref, sc_ref, masks_ref, *rest, n_blocks, wo, relu_flags):
    """stride-2 first BasicBlock (conv1 from host im2col patches, option-A
    shortcut) followed by n_blocks-1 stride-1 identity BasicBlocks."""
    out_ref = rest[-1]
    w = rest[:-1]
    # block 0 / conv1 (stride 2): (Cout, 9*Cin) @ (9*Cin, M2)
    t = jnp.dot(w[0][...], patches_ref[...],
                preferred_element_type=jnp.float32) + w[1][...]
    t = jnp.maximum(t, 0.0)
    t = _conv3x3_cm(t, w[2], w[3], masks_ref, wo) + sc_ref[...]  # option-A shortcut, f32
    h = jnp.maximum(t, 0.0) if relu_flags[0] else t
    p = 4
    for b in range(1, n_blocks):
        w1, b1, w2, b2 = w[p], w[p + 1], w[p + 2], w[p + 3]
        p += 4
        t = jnp.maximum(_conv3x3_cm(h, w1, b1, masks_ref, wo), 0.0)
        t = _conv3x3_cm(t, w2, b2, masks_ref, wo) + h
        h = jnp.maximum(t, 0.0) if relu_flags[b] else t
    out_ref[...] = h


# ---------------------------------------------------------------------------
# pallas_call wrappers (no grid: whole layer in one invocation, all in VMEM).
# ---------------------------------------------------------------------------
def _vmem_spec():
    return pl.BlockSpec(memory_space=pltpu.MemorySpace.VMEM)


def _run_first_layer(x_cm, masks, weight_args, *, wo, relu_flags, c_out):
    cin, m = x_cm.shape
    n_blocks = (len(weight_args) - 2) // 4
    args = [x_cm, masks] + list(weight_args)
    flops = 2 * m * 9 * cin * c_out + n_blocks * 2 * (2 * m * 9 * c_out * c_out)
    bytes_acc = sum(int(a.size) * a.dtype.itemsize for a in args) + m * c_out * 4
    kernel = functools.partial(_first_layer_kernel, n_blocks=n_blocks, wo=wo,
                               relu_flags=tuple(relu_flags))
    return pl.pallas_call(
        kernel,
        out_shape=jax.ShapeDtypeStruct((c_out, m), jnp.float32),
        in_specs=[_vmem_spec() for _ in args],
        out_specs=_vmem_spec(),
        cost_estimate=pl.CostEstimate(flops=flops, transcendentals=0,
                                      bytes_accessed=bytes_acc),
    )(*args)


def _run_down_layer(patches, shortcut, masks, weight_args, *, wo, relu_flags, c_out):
    m = patches.shape[1]
    k1 = weight_args[0].shape[1]
    n_blocks = len(weight_args) // 4
    args = [patches, shortcut, masks] + list(weight_args)
    flops = 2 * m * k1 * c_out + (2 * n_blocks - 1) * 2 * m * 9 * c_out * c_out
    bytes_acc = sum(int(a.size) * a.dtype.itemsize for a in args) + m * c_out * 4
    kernel = functools.partial(_down_layer_kernel, n_blocks=n_blocks, wo=wo,
                               relu_flags=tuple(relu_flags))
    return pl.pallas_call(
        kernel,
        out_shape=jax.ShapeDtypeStruct((c_out, m), jnp.float32),
        in_specs=[_vmem_spec() for _ in args],
        out_specs=_vmem_spec(),
        cost_estimate=pl.CostEstimate(flops=flops, transcendentals=0,
                                      bytes_accessed=bytes_acc),
    )(*args)


# ---------------------------------------------------------------------------
# Parameter creation (PyTorch-equivalent init) and one-time BN folding.
# ---------------------------------------------------------------------------
def make_params(num_blocks, rate=1, seed=0):
    key = jax.random.PRNGKey(seed)

    def kaiming(k, cin, cout):
        # kaiming_normal_(mode='fan_out', nonlinearity='relu')
        fan_out = cout * 3 * 3
        return jax.random.normal(k, (3, 3, cin, cout), jnp.float32) * (2.0 / fan_out) ** 0.5

    def bn(c):
        # eval-mode BN with init stats: scale = 1/sqrt(var+eps), bias = 0
        return (jnp.full((c,), 1.0 / np.sqrt(1.0 + BN_EPS), jnp.float32),
                jnp.zeros((c,), jnp.float32))

    params = {}
    in_planes = int(16 * rate)
    key, k = jax.random.split(key)
    s, b = bn(in_planes)
    params["stem"] = {"w": kaiming(k, 3, in_planes), "s": s, "b": b}
    for li, (mult, nb) in enumerate(zip((16, 32, 64), num_blocks), start=1):
        planes = int(mult * rate)
        blocks = []
        for _ in range(nb):
            key, k1, k2 = jax.random.split(key, 3)
            s1, b1 = bn(planes)
            s2, b2 = bn(planes)
            blocks.append({"w1": kaiming(k1, in_planes, planes), "s1": s1, "b1": b1,
                           "w2": kaiming(k2, planes, planes), "s2": s2, "b2": b2})
            in_planes = planes
        params[f"layer{li}"] = blocks
    return params


def prepare_params(params):
    """Fold eval-mode BN into the conv weights and re-layout for the kernels.
    Done once, outside the jitted forward."""
    def fold_taps(w_hwio, scale):          # -> (9, Cout, Cin) bf16
        cin, cout = w_hwio.shape[2], w_hwio.shape[3]
        wk = w_hwio.reshape(9, cin, cout) * scale[None, None, :]
        return jnp.transpose(wk, (0, 2, 1)).astype(jnp.bfloat16)

    def fold_flat(w_hwio, scale):          # -> (Cout, 9*Cin) bf16
        cin, cout = w_hwio.shape[2], w_hwio.shape[3]
        wf = w_hwio.reshape(9 * cin, cout) * scale[None, :]
        return jnp.transpose(wf, (1, 0)).astype(jnp.bfloat16)

    def col(b):
        return b.astype(jnp.float32).reshape(-1, 1)

    kp = {"stem": (fold_taps(params["stem"]["w"], params["stem"]["s"]),
                   col(params["stem"]["b"]))}
    for li in (1, 2, 3):
        blocks = []
        for bi, blk in enumerate(params[f"layer{li}"]):
            first_down = (li > 1 and bi == 0)      # stride-2 block of layer2/3
            w1 = (fold_flat if first_down else fold_taps)(blk["w1"], blk["s1"])
            blocks.append((w1, col(blk["b1"]),
                           fold_taps(blk["w2"], blk["s2"]), col(blk["b2"])))
        kp[f"layer{li}"] = blocks
    return kp


# ---------------------------------------------------------------------------
# Host-side glue: tap masks, stride-2 im2col, option-A shortcut.
# ---------------------------------------------------------------------------
def _layer_relu_flags(n_blocks, last_relu):
    # last block of every layer is built with last_relu=False in the PyTorch model
    return [bool(last_relu)] * (n_blocks - 1) + [False]


def _tap_masks(n, ho, wo):
    idx = np.arange(n * ho * wo)
    i = (idx // wo) % ho
    j = idx % wo
    rows = []
    for dy in range(3):
        for dx in range(3):
            ip, jp = i + dy - 1, j + dx - 1
            rows.append(((ip >= 0) & (ip < ho) & (jp >= 0) & (jp < wo)).astype(np.float32))
    return jnp.asarray(np.stack(rows, axis=0))            # (9, M)


def _downsample_prep(x_cm, n, h, w, planes):
    """Stride-2 im2col patches for block-0 conv1 and the PyTorch option-A
    shortcut (x[:, :, ::2, ::2] + zero channel padding), channel-major."""
    cin = x_cm.shape[0]
    ho, wo = (h + 1) // 2, (w + 1) // 2
    x4 = x_cm.reshape(cin, n, h, w)
    xp = jnp.pad(x4, ((0, 0), (0, 0), (1, 1), (1, 1)))
    cols = []
    for dy in range(3):
        for dx in range(3):
            cols.append(xp[:, :, dy:dy + 2 * ho:2, dx:dx + 2 * wo:2].reshape(cin, -1))
    patches = jnp.concatenate(cols, axis=0).astype(jnp.bfloat16)       # (9*Cin, M2)
    sc = x4[:, :, ::2, ::2].reshape(cin, -1)                           # (Cin, M2) f32
    pad_c = planes // 4
    shortcut = jnp.pad(sc, ((pad_c, pad_c), (0, 0)))                   # (planes, M2)
    return patches, shortcut, ho, wo


# ---------------------------------------------------------------------------
# Forward pass (matches podnet_resnet_cifar.forward: returns x_1, x_2, x_3).
# ---------------------------------------------------------------------------
def podnet_resnet_cifar_forward(x_nchw, kparams, last_relu=True):
    n, _, h, w = x_nchw.shape
    x_cm = jnp.transpose(x_nchw.astype(jnp.float32), (1, 0, 2, 3)).reshape(-1, n * h * w)

    # stem + layer1 : one fused kernel
    stem_w, stem_b = kparams["stem"]
    blocks1 = kparams["layer1"]
    c1 = stem_w.shape[1]
    w_args = [stem_w, stem_b] + [a for blk in blocks1 for a in blk]
    x1_cm = _run_first_layer(x_cm, _tap_masks(n, h, w), w_args, wo=w,
                             relu_flags=_layer_relu_flags(len(blocks1), last_relu),
                             c_out=c1)

    # layer2 / layer3 : one fused kernel each
    def run_down(prev_cm, blocks, hp, wp):
        c_out = blocks[0][0].shape[0]
        y = jnp.maximum(prev_cm, 0.0) if last_relu else prev_cm        # end_relu
        patches, shortcut, ho, wo = _downsample_prep(y, n, hp, wp, c_out)
        w_args2 = [a for blk in blocks for a in blk]
        out_cm = _run_down_layer(patches, shortcut, _tap_masks(n, ho, wo), w_args2,
                                 wo=wo,
                                 relu_flags=_layer_relu_flags(len(blocks), last_relu),
                                 c_out=c_out)
        return out_cm, c_out, ho, wo

    x2_cm, c2, h2, w2 = run_down(x1_cm, kparams["layer2"], h, w)
    x3_cm, c3, h3, w3 = run_down(x2_cm, kparams["layer3"], h2, w2)

    def to_nchw(cm, c, hh, ww):
        return cm.reshape(c, n, hh, ww).transpose(1, 0, 2, 3)

    return to_nchw(x1_cm, c1, h, w), to_nchw(x2_cm, c2, h2, w2), to_nchw(x3_cm, c3, h3, w3)


# ---------------------------------------------------------------------------
# Pure-XLA f32 reference (for correctness checking).
# ---------------------------------------------------------------------------
def _ref_conv_bn(x, w, s, b, stride):
    y = jax.lax.conv_general_dilated(x, w, (stride, stride), ((1, 1), (1, 1)),
                                     dimension_numbers=("NCHW", "HWIO", "NCHW"))
    return y * s.reshape(1, -1, 1, 1) + b.reshape(1, -1, 1, 1)


def _ref_block(x, p, stride, relu_out):
    out = jax.nn.relu(_ref_conv_bn(x, p["w1"], p["s1"], p["b1"], stride))
    out = _ref_conv_bn(out, p["w2"], p["s2"], p["b2"], 1)
    in_planes, planes = p["w1"].shape[2], p["w1"].shape[3]
    if stride != 1 or in_planes != planes:
        sc = x[:, :, ::2, ::2]
        pc = planes // 4
        sc = jnp.pad(sc, ((0, 0), (pc, pc), (0, 0), (0, 0)))
    else:
        sc = x
    out = out + sc
    return jax.nn.relu(out) if relu_out else out


def _ref_forward(x, params, last_relu=True):
    out = jax.nn.relu(_ref_conv_bn(x, params["stem"]["w"], params["stem"]["s"],
                                   params["stem"]["b"], 1))

    def run(hh, blocks, stride):
        flags = [last_relu] * (len(blocks) - 1) + [False]
        strides = [stride] + [1] * (len(blocks) - 1)
        for p, s, f in zip(blocks, strides, flags):
            hh = _ref_block(hh, p, s, f)
        return hh

    x1 = run(out, params["layer1"], 1)
    er = (lambda t: jax.nn.relu(t)) if last_relu else (lambda t: t)
    x2 = run(er(x1), params["layer2"], 2)
    x3 = run(er(x2), params["layer3"], 2)
    return x1, x2, x3


# ---------------------------------------------------------------------------
if __name__ == "__main__":
    num_blocks = [2, 2, 2]       # small ResNet config (same structure as [5,5,5])
    rate, last_relu = 1, True

    x = jax.random.normal(jax.random.PRNGKey(0), (2, 3, 16, 16), jnp.float32)  # NCHW
    params = make_params(num_blocks, rate=rate, seed=0)
    kparams = prepare_params(params)                     # BN folding outside jit

    fwd = jax.jit(functools.partial(podnet_resnet_cifar_forward, last_relu=last_relu))
    x1, x2, x3 = fwd(x, kparams)
    jax.block_until_ready((x1, x2, x3))

    assert x1.shape == (2, 16, 16, 16)
    assert x2.shape == (2, 32, 8, 8)
    assert x3.shape == (2, 64, 4, 4)
    for t in (x1, x2, x3):
        assert bool(jnp.all(jnp.isfinite(t)))

    # correctness vs. an f32 XLA reference (bf16 MXU operands -> loose tolerance)
    r1, r2, r3 = jax.jit(functools.partial(_ref_forward, last_relu=last_relu))(x, params)
    for name, got, ref in (("x1", x1, r1), ("x2", x2, r2), ("x3", x3, r3)):
        scale = float(jnp.max(jnp.abs(ref))) + 1e-6
        err = float(jnp.max(jnp.abs(got - ref))) / scale
        assert err < 0.1, f"{name}: normalized max error {err:.4f}"

    print("KERNEL_OK")
</pallas_src>

<mosaic_0001>
module attributes {stable_mosaic.version = 11 : i64} {
  func.func @_first_layer_kernel(%arg0: memref<3x512xf32, #tpu.memory_space<vmem>>, %arg1: memref<9x512xf32, #tpu.memory_space<vmem>>, %arg2: memref<9x16x3xbf16, #tpu.memory_space<vmem>>, %arg3: memref<16x1xf32, #tpu.memory_space<vmem>>, %arg4: memref<9x16x16xbf16, #tpu.memory_space<vmem>>, %arg5: memref<16x1xf32, #tpu.memory_space<vmem>>, %arg6: memref<9x16x16xbf16, #tpu.memory_space<vmem>>, %arg7: memref<16x1xf32, #tpu.memory_space<vmem>>, %arg8: memref<9x16x16xbf16, #tpu.memory_space<vmem>>, %arg9: memref<16x1xf32, #tpu.memory_space<vmem>>, %arg10: memref<9x16x16xbf16, #tpu.memory_space<vmem>>, %arg11: memref<16x1xf32, #tpu.memory_space<vmem>>, %arg12: memref<16x512xf32, #tpu.memory_space<vmem>>) attributes {dimension_semantics = [], scalar_prefetch = 0 : i64, scratch_operands = 0 : i64, tpu.core_type = #tpu.core_type<tc>} {
    %c0 = arith.constant 0 : index
    %c0_0 = arith.constant 0 : index
    %0 = vector.load %arg0[%c0, %c0_0] : memref<3x512xf32, #tpu.memory_space<vmem>>, vector<3x512xf32>
    %cst = arith.constant 0.000000e+00 : f32
    %1 = vector.broadcast %cst : f32 to vector<16x512xf32>
    %c17_i32 = arith.constant 17 : i32
    %2 = tpu.dynamic_rotate %0 by %c17_i32 dim 1 : vector<3x512xf32>, i32 -> vector<3x512xf32>
    %c0_1 = arith.constant 0 : index
    %c0_2 = arith.constant 0 : index
    %3 = vector.load %arg1[%c0_1, %c0_2] : memref<9x512xf32, #tpu.memory_space<vmem>>, vector<1x512xf32>
    %4 = vector.broadcast %3 : vector<1x512xf32> to vector<3x512xf32>
    %5 = arith.mulf %2, %4 : vector<3x512xf32>
    %c0_3 = arith.constant 0 : index
    %c0_4 = arith.constant 0 : index
    %c0_5 = arith.constant 0 : index
    %6 = vector.load %arg2[%c0_3, %c0_4, %c0_5] : memref<9x16x3xbf16, #tpu.memory_space<vmem>>, vector<1x16x3xbf16>
    %7 = vector.shape_cast %6 : vector<1x16x3xbf16> to vector<16x3xbf16>
    %8 = arith.truncf %5 : vector<3x512xf32> to vector<3x512xbf16>
    %cst_6 = arith.constant dense<0.000000e+00> : vector<16x512xf32>
    %9 = tpu.matmul %7, %8, %cst_6 {dimension_numbers = #tpu.dot_dimension_numbers<[1], [0], [0], [1], [0, 0, 1, 1], [], []>} : vector<16x3xbf16>, vector<3x512xbf16>, vector<16x512xf32> -> vector<16x512xf32>
    %10 = arith.addf %1, %9 : vector<16x512xf32>
    %c16_i32 = arith.constant 16 : i32
    %11 = tpu.dynamic_rotate %0 by %c16_i32 dim 1 : vector<3x512xf32>, i32 -> vector<3x512xf32>
    %c1 = arith.constant 1 : index
    %c0_7 = arith.constant 0 : index
    %12 = vector.load %arg1[%c1, %c0_7] : memref<9x512xf32, #tpu.memory_space<vmem>>, vector<1x512xf32>
    %13 = vector.broadcast %12 : vector<1x512xf32> to vector<3x512xf32>
    %14 = arith.mulf %11, %13 : vector<3x512xf32>
    %c1_8 = arith.constant 1 : index
    %c0_9 = arith.constant 0 : index
    %c0_10 = arith.constant 0 : index
    %15 = vector.load %arg2[%c1_8, %c0_9, %c0_10] : memref<9x16x3xbf16, #tpu.memory_space<vmem>>, vector<1x16x3xbf16>
    %16 = vector.shape_cast %15 : vector<1x16x3xbf16> to vector<16x3xbf16>
    %17 = arith.truncf %14 : vector<3x512xf32> to vector<3x512xbf16>
    %cst_11 = arith.constant dense<0.000000e+00> : vector<16x512xf32>
    %18 = tpu.matmul %16, %17, %cst_11 {dimension_numbers = #tpu.dot_dimension_numbers<[1], [0], [0], [1], [0, 0, 1, 1], [], []>} : vector<16x3xbf16>, vector<3x512xbf16>, vector<16x512xf32> -> vector<16x512xf32>
    %19 = arith.addf %10, %18 : vector<16x512xf32>
    %c15_i32 = arith.constant 15 : i32
    %20 = tpu.dynamic_rotate %0 by %c15_i32 dim 1 : vector<3x512xf32>, i32 -> vector<3x512xf32>
    %c2 = arith.constant 2 : index
    %c0_12 = arith.constant 0 : index
    %21 = vector.load %arg1[%c2, %c0_12] : memref<9x512xf32, #tpu.memory_space<vmem>>, vector<1x512xf32>
    %22 = vector.broadcast %21 : vector<1x512xf32> to vector<3x512xf32>
    %23 = arith.mulf %20, %22 : vector<3x512xf32>
    %c2_13 = arith.constant 2 : index
    %c0_14 = arith.constant 0 : index
    %c0_15 = arith.constant 0 : index
    %24 = vector.load %arg2[%c2_13, %c0_14, %c0_15] : memref<9x16x3xbf16, #tpu.memory_space<vmem>>, vector<1x16x3xbf16>
    %25 = vector.shape_cast %24 : vector<1x16x3xbf16> to vector<16x3xbf16>
    %26 = arith.truncf %23 : vector<3x512xf32> to vector<3x512xbf16>
    %cst_16 = arith.constant dense<0.000000e+00> : vector<16x512xf32>
    %27 = tpu.matmul %25, %26, %cst_16 {dimension_numbers = #tpu.dot_dimension_numbers<[1], [0], [0], [1], [0, 0, 1, 1], [], []>} : vector<16x3xbf16>, vector<3x512xbf16>, vector<16x512xf32> -> vector<16x512xf32>
    %28 = arith.addf %19, %27 : vector<16x512xf32>
    %c1_i32 = arith.constant 1 : i32
    %29 = tpu.dynamic_rotate %0 by %c1_i32 dim 1 : vector<3x512xf32>, i32 -> vector<3x512xf32>
    %c3 = arith.constant 3 : index
    %c0_17 = arith.constant 0 : index
    %30 = vector.load %arg1[%c3, %c0_17] : memref<9x512xf32, #tpu.memory_space<vmem>>, vector<1x512xf32>
    %31 = vector.broadcast %30 : vector<1x512xf32> to vector<3x512xf32>
    %32 = arith.mulf %29, %31 : vector<3x512xf32>
    %c3_18 = arith.constant 3 : index
    %c0_19 = arith.constant 0 : index
    %c0_20 = arith.constant 0 : index
    %33 = vector.load %arg2[%c3_18, %c0_19, %c0_20] : memref<9x16x3xbf16, #tpu.memory_space<vmem>>, vector<1x16x3xbf16>
    %34 = vector.shape_cast %33 : vector<1x16x3xbf16> to vector<16x3xbf16>
    %35 = arith.truncf %32 : vector<3x512xf32> to vector<3x512xbf16>
    %cst_21 = arith.constant dense<0.000000e+00> : vector<16x512xf32>
    %36 = tpu.matmul %34, %35, %cst_21 {dimension_numbers = #tpu.dot_dimension_numbers<[1], [0], [0], [1], [0, 0, 1, 1], [], []>} : vector<16x3xbf16>, vector<3x512xbf16>, vector<16x512xf32> -> vector<16x512xf32>
    %37 = arith.addf %28, %36 : vector<16x512xf32>
    %c4 = arith.constant 4 : index
    %c0_22 = arith.constant 0 : index
    %c0_23 = arith.constant 0 : index
    %38 = vector.load %arg2[%c4, %c0_22, %c0_23] : memref<9x16x3xbf16, #tpu.memory_space<vmem>>, vector<1x16x3xbf16>
    %39 = vector.shape_cast %38 : vector<1x16x3xbf16> to vector<16x3xbf16>
    %40 = arith.truncf %0 : vector<3x512xf32> to vector<3x512xbf16>
    %cst_24 = arith.constant dense<0.000000e+00> : vector<16x512xf32>
    %41 = tpu.matmul %39, %40, %cst_24 {dimension_numbers = #tpu.dot_dimension_numbers<[1], [0], [0], [1], [0, 0, 1, 1], [], []>} : vector<16x3xbf16>, vector<3x512xbf16>, vector<16x512xf32> -> vector<16x512xf32>
    %42 = arith.addf %37, %41 : vector<16x512xf32>
    %c511_i32 = arith.constant 511 : i32
    %43 = tpu.dynamic_rotate %0 by %c511_i32 dim 1 : vector<3x512xf32>, i32 -> vector<3x512xf32>
    %c5 = arith.constant 5 : index
    %c0_25 = arith.constant 0 : index
    %44 = vector.load %arg1[%c5, %c0_25] : memref<9x512xf32, #tpu.memory_space<vmem>>, vector<1x512xf32>
    %45 = vector.broadcast %44 : vector<1x512xf32> to vector<3x512xf32>
    %46 = arith.mulf %43, %45 : vector<3x512xf32>
    %c5_26 = arith.constant 5 : index
    %c0_27 = arith.constant 0 : index
    %c0_28 = arith.constant 0 : index
    %47 = vector.load %arg2[%c5_26, %c0_27, %c0_28] : memref<9x16x3xbf16, #tpu.memory_space<vmem>>, vector<1x16x3xbf16>
    %48 = vector.shape_cast %47 : vector<1x16x3xbf16> to vector<16x3xbf16>
    %49 = arith.truncf %46 : vector<3x512xf32> to vector<3x512xbf16>
    %cst_29 = arith.constant dense<0.000000e+00> : vector<16x512xf32>
    %50 = tpu.matmul %48, %49, %cst_29 {dimension_numbers = #tpu.dot_dimension_numbers<[1], [0], [0], [1], [0, 0, 1, 1], [], []>} : vector<16x3xbf16>, vector<3x512xbf16>, vector<16x512xf32> -> vector<16x512xf32>
    %51 = arith.addf %42, %50 : vector<16x512xf32>
    %c497_i32 = arith.constant 497 : i32
    %52 = tpu.dynamic_rotate %0 by %c497_i32 dim 1 : vector<3x512xf32>, i32 -> vector<3x512xf32>
    %c6 = arith.constant 6 : index
    %c0_30 = arith.constant 0 : index
    %53 = vector.load %arg1[%c6, %c0_30] : memref<9x512xf32, #tpu.memory_space<vmem>>, vector<1x512xf32>
    %54 = vector.broadcast %53 : vector<1x512xf32> to vector<3x512xf32>
    %55 = arith.mulf %52, %54 : vector<3x512xf32>
    %c6_31 = arith.constant 6 : index
    %c0_32 = arith.constant 0 : index
    %c0_33 = arith.constant 0 : index
    %56 = vector.load %arg2[%c6_31, %c0_32, %c0_33] : memref<9x16x3xbf16, #tpu.memory_space<vmem>>, vector<1x16x3xbf16>
    %57 = vector.shape_cast %56 : vector<1x16x3xbf16> to vector<16x3xbf16>
    %58 = arith.truncf %55 : vector<3x512xf32> to vector<3x512xbf16>
    %cst_34 = arith.constant dense<0.000000e+00> : vector<16x512xf32>
    %59 = tpu.matmul %57, %58, %cst_34 {dimension_numbers = #tpu.dot_dimension_numbers<[1], [0], [0], [1], [0, 0, 1, 1], [], []>} : vector<16x3xbf16>, vector<3x512xbf16>, vector<16x512xf32> -> vector<16x512xf32>
    %60 = arith.addf %51, %59 : vector<16x512xf32>
    %c496_i32 = arith.constant 496 : i32
    %61 = tpu.dynamic_rotate %0 by %c496_i32 dim 1 : vector<3x512xf32>, i32 -> vector<3x512xf32>
    %c7 = arith.constant 7 : index
    %c0_35 = arith.constant 0 : index
    %62 = vector.load %arg1[%c7, %c0_35] : memref<9x512xf32, #tpu.memory_space<vmem>>, vector<1x512xf32>
    %63 = vector.broadcast %62 : vector<1x512xf32> to vector<3x512xf32>
    %64 = arith.mulf %61, %63 : vector<3x512xf32>
    %c7_36 = arith.constant 7 : index
    %c0_37 = arith.constant 0 : index
    %c0_38 = arith.constant 0 : index
    %65 = vector.load %arg2[%c7_36, %c0_37, %c0_38] : memref<9x16x3xbf16, #tpu.memory_space<vmem>>, vector<1x16x3xbf16>
    %66 = vector.shape_cast %65 : vector<1x16x3xbf16> to vector<16x3xbf16>
    %67 = arith.truncf %64 : vector<3x512xf32> to vector<3x512xbf16>
    %cst_39 = arith.constant dense<0.000000e+00> : vector<16x512xf32>
    %68 = tpu.matmul %66, %67, %cst_39 {dimension_numbers = #tpu.dot_dimension_numbers<[1], [0], [0], [1], [0, 0, 1, 1], [], []>} : vector<16x3xbf16>, vector<3x512xbf16>, vector<16x512xf32> -> vector<16x512xf32>
    %69 = arith.addf %60, %68 : vector<16x512xf32>
    %c495_i32 = arith.constant 495 : i32
    %70 = tpu.dynamic_rotate %0 by %c495_i32 dim 1 : vector<3x512xf32>, i32 -> vector<3x512xf32>
    %c8 = arith.constant 8 : index
    %c0_40 = arith.constant 0 : index
    %71 = vector.load %arg1[%c8, %c0_40] : memref<9x512xf32, #tpu.memory_space<vmem>>, vector<1x512xf32>
    %72 = vector.broadcast %71 : vector<1x512xf32> to vector<3x512xf32>
    %73 = arith.mulf %70, %72 : vector<3x512xf32>
    %c8_41 = arith.constant 8 : index
    %c0_42 = arith.constant 0 : index
    %c0_43 = arith.constant 0 : index
    %74 = vector.load %arg2[%c8_41, %c0_42, %c0_43] : memref<9x16x3xbf16, #tpu.memory_space<vmem>>, vector<1x16x3xbf16>
    %75 = vector.shape_cast %74 : vector<1x16x3xbf16> to vector<16x3xbf16>
    %76 = arith.truncf %73 : vector<3x512xf32> to vector<3x512xbf16>
    %cst_44 = arith.constant dense<0.000000e+00> : vector<16x512xf32>
    %77 = tpu.matmul %75, %76, %cst_44 {dimension_numbers = #tpu.dot_dimension_numbers<[1], [0], [0], [1], [0, 0, 1, 1], [], []>} : vector<16x3xbf16>, vector<3x512xbf16>, vector<16x512xf32> -> vector<16x512xf32>
    %78 = arith.addf %69, %77 : vector<16x512xf32>
    %c0_45 = arith.constant 0 : index
    %c0_46 = arith.constant 0 : index
    %79 = vector.load %arg3[%c0_45, %c0_46] : memref<16x1xf32, #tpu.memory_space<vmem>>, vector<16x1xf32>
    %80 = vector.broadcast %79 : vector<16x1xf32> to vector<16x512xf32>
    %81 = arith.addf %78, %80 : vector<16x512xf32>
    %cst_47 = arith.constant 0.000000e+00 : f32
    %82 = vector.broadcast %cst_47 : f32 to vector<16x512xf32>
    %83 = arith.maximumf %81, %82 : vector<16x512xf32>
    %cst_48 = arith.constant 0.000000e+00 : f32
    %84 = vector.broadcast %cst_48 : f32 to vector<16x512xf32>
    %c17_i32_49 = arith.constant 17 : i32
    %85 = tpu.dynamic_rotate %83 by %c17_i32_49 dim 1 : vector<16x512xf32>, i32 -> vector<16x512xf32>
    %c0_50 = arith.constant 0 : index
    %c0_51 = arith.constant 0 : index
    %86 = vector.load %arg1[%c0_50, %c0_51] : memref<9x512xf32, #tpu.memory_space<vmem>>, vector<1x512xf32>
    %87 = vector.broadcast %86 : vector<1x512xf32> to vector<16x512xf32>
    %88 = arith.mulf %85, %87 : vector<16x512xf32>
    %c0_52 = arith.constant 0 : index
    %c0_53 = arith.constant 0 : index
    %c0_54 = arith.constant 0 : index
    %89 = vector.load %arg4[%c0_52, %c0_53, %c0_54] : memref<9x16x16xbf16, #tpu.memory_space<vmem>>, vector<1x16x16xbf16>
    %90 = vector.shape_cast %89 : vector<1x16x16xbf16> to vector<16x16xbf16>
    %91 = arith.truncf %88 : vector<16x512xf32> to vector<16x512xbf16>
    %cst_55 = arith.constant dense<0.000000e+00> : vector<16x512xf32>
    %92 = tpu.matmul %90, %91, %cst_55 {dimension_numbers = #tpu.dot_dimension_numbers<[1], [0], [0], [1], [0, 0, 1, 1], [], []>} : vector<16x16xbf16>, vector<16x512xbf16>, vector<16x512xf32> -> vector<16x512xf32>
    %93 = arith.addf %84, %92 : vector<16x512xf32>
    %c16_i32_56 = arith.constant 16 : i32
    %94 = tpu.dynamic_rotate %83 by %c16_i32_56 dim 1 : vector<16x512xf32>, i32 -> vector<16x512xf32>
    %c1_57 = arith.constant 1 : index
    %c0_58 = arith.constant 0 : index
    %95 = vector.load %arg1[%c1_57, %c0_58] : memref<9x512xf32, #tpu.memory_space<vmem>>, vector<1x512xf32>
    %96 = vector.broadcast %95 : vector<1x512xf32> to vector<16x512xf32>
    %97 = arith.mulf %94, %96 : vector<16x512xf32>
    %c1_59 = arith.constant 1 : index
    %c0_60 = arith.constant 0 : index
    %c0_61 = arith.constant 0 : index
    %98 = vector.load %arg4[%c1_59, %c0_60, %c0_61] : memref<9x16x16xbf16, #tpu.memory_space<vmem>>, vector<1x16x16xbf16>
    %99 = vector.shape_cast %98 : vector<1x16x16xbf16> to vector<16x16xbf16>
    %100 = arith.truncf %97 : vector<16x512xf32> to vector<16x512xbf16>
    %cst_62 = arith.constant dense<0.000000e+00> : vector<16x512xf32>
    %101 = tpu.matmul %99, %100, %cst_62 {dimension_numbers = #tpu.dot_dimension_numbers<[1], [0], [0], [1], [0, 0, 1, 1], [], []>} : vector<16x16xbf16>, vector<16x512xbf16>, vector<16x512xf32> -> vector<16x512xf32>
    %102 = arith.addf %93, %101 : vector<16x512xf32>
    %c15_i32_63 = arith.constant 15 : i32
    %103 = tpu.dynamic_rotate %83 by %c15_i32_63 dim 1 : vector<16x512xf32>, i32 -> vector<16x512xf32>
    %c2_64 = arith.constant 2 : index
    %c0_65 = arith.constant 0 : index
    %104 = vector.load %arg1[%c2_64, %c0_65] : memref<9x512xf32, #tpu.memory_space<vmem>>, vector<1x512xf32>
    %105 = vector.broadcast %104 : vector<1x512xf32> to vector<16x512xf32>
    %106 = arith.mulf %103, %105 : vector<16x512xf32>
    %c2_66 = arith.constant 2 : index
    %c0_67 = arith.constant 0 : index
    %c0_68 = arith.constant 0 : index
    %107 = vector.load %arg4[%c2_66, %c0_67, %c0_68] : memref<9x16x16xbf16, #tpu.memory_space<vmem>>, vector<1x16x16xbf16>
    %108 = vector.shape_cast %107 : vector<1x16x16xbf16> to vector<16x16xbf16>
    %109 = arith.truncf %106 : vector<16x512xf32> to vector<16x512xbf16>
    %cst_69 = arith.constant dense<0.000000e+00> : vector<16x512xf32>
    %110 = tpu.matmul %108, %109, %cst_69 {dimension_numbers = #tpu.dot_dimension_numbers<[1], [0], [0], [1], [0, 0, 1, 1], [], []>} : vector<16x16xbf16>, vector<16x512xbf16>, vector<16x512xf32> -> vector<16x512xf32>
    %111 = arith.addf %102, %110 : vector<16x512xf32>
    %c1_i32_70 = arith.constant 1 : i32
    %112 = tpu.dynamic_rotate %83 by %c1_i32_70 dim 1 : vector<16x512xf32>, i32 -> vector<16x512xf32>
    %c3_71 = arith.constant 3 : index
    %c0_72 = arith.constant 0 : index
    %113 = vector.load %arg1[%c3_71, %c0_72] : memref<9x512xf32, #tpu.memory_space<vmem>>, vector<1x512xf32>
    %114 = vector.broadcast %113 : vector<1x512xf32> to vector<16x512xf32>
    %115 = arith.mulf %112, %114 : vector<16x512xf32>
    %c3_73 = arith.constant 3 : index
    %c0_74 = arith.constant 0 : index
    %c0_75 = arith.constant 0 : index
    %116 = vector.load %arg4[%c3_73, %c0_74, %c0_75] : memref<9x16x16xbf16, #tpu.memory_space<vmem>>, vector<1x16x16xbf16>
    %117 = vector.shape_cast %116 : vector<1x16x16xbf16> to vector<16x16xbf16>
    %118 = arith.truncf %115 : vector<16x512xf32> to vector<16x512xbf16>
    %cst_76 = arith.constant dense<0.000000e+00> : vector<16x512xf32>
    %119 = tpu.matmul %117, %118, %cst_76 {dimension_numbers = #tpu.dot_dimension_numbers<[1], [0], [0], [1], [0, 0, 1, 1], [], []>} : vector<16x16xbf16>, vector<16x512xbf16>, vector<16x512xf32> -> vector<16x512xf32>
    %120 = arith.addf %111, %119 : vector<16x512xf32>
    %c4_77 = arith.constant 4 : index
    %c0_78 = arith.constant 0 : index
    %c0_79 = arith.constant 0 : index
    %121 = vector.load %arg4[%c4_77, %c0_78, %c0_79] : memref<9x16x16xbf16, #tpu.memory_space<vmem>>, vector<1x16x16xbf16>
    %122 = vector.shape_cast %121 : vector<1x16x16xbf16> to vector<16x16xbf16>
    %123 = arith.truncf %83 : vector<16x512xf32> to vector<16x512xbf16>
    %cst_80 = arith.constant dense<0.000000e+00> : vector<16x512xf32>
    %124 = tpu.matmul %122, %123, %cst_80 {dimension_numbers = #tpu.dot_dimension_numbers<[1], [0], [0], [1], [0, 0, 1, 1], [], []>} : vector<16x16xbf16>, vector<16x512xbf16>, vector<16x512xf32> -> vector<16x512xf32>
    %125 = arith.addf %120, %124 : vector<16x512xf32>
    %c511_i32_81 = arith.constant 511 : i32
    %126 = tpu.dynamic_rotate %83 by %c511_i32_81 dim 1 : vector<16x512xf32>, i32 -> vector<16x512xf32>
    %c5_82 = arith.constant 5 : index
    %c0_83 = arith.constant 0 : index
    %127 = vector.load %arg1[%c5_82, %c0_83] : memref<9x512xf32, #tpu.memory_space<vmem>>, vector<1x512xf32>
    %128 = vector.broadcast %127 : vector<1x512xf32> to vector<16x512xf32>
    %129 = arith.mulf %126, %128 : vector<16x512xf32>
    %c5_84 = arith.constant 5 : index
    %c0_85 = arith.constant 0 : index
    %c0_86 = arith.constant 0 : index
    %130 = vector.load %arg4[%c5_84, %c0_85, %c0_86] : memref<9x16x16xbf16, #tpu.memory_space<vmem>>, vector<1x16x16xbf16>
    %131 = vector.shape_cast %130 : vector<1x16x16xbf16> to vector<16x16xbf16>
    %132 = arith.truncf %129 : vector<16x512xf32> to vector<16x512xbf16>
    %cst_87 = arith.constant dense<0.000000e+00> : vector<16x512xf32>
    %133 = tpu.matmul %131, %132, %cst_87 {dimension_numbers = #tpu.dot_dimension_numbers<[1], [0], [0], [1], [0, 0, 1, 1], [], []>} : vector<16x16xbf16>, vector<16x512xbf16>, vector<16x512xf32> -> vector<16x512xf32>
    %134 = arith.addf %125, %133 : vector<16x512xf32>
    %c497_i32_88 = arith.constant 497 : i32
    %135 = tpu.dynamic_rotate %83 by %c497_i32_88 dim 1 : vector<16x512xf32>, i32 -> vector<16x512xf32>
    %c6_89 = arith.constant 6 : index
    %c0_90 = arith.constant 0 : index
    %136 = vector.load %arg1[%c6_89, %c0_90] : memref<9x512xf32, #tpu.memory_space<vmem>>, vector<1x512xf32>
    %137 = vector.broadcast %136 : vector<1x512xf32> to vector<16x512xf32>
    %138 = arith.mulf %135, %137 : vector<16x512xf32>
    %c6_91 = arith.constant 6 : index
    %c0_92 = arith.constant 0 : index
    %c0_93 = arith.constant 0 : index
    %139 = vector.load %arg4[%c6_91, %c0_92, %c0_93] : memref<9x16x16xbf16, #tpu.memory_space<vmem>>, vector<1x16x16xbf16>
    %140 = vector.shape_cast %139 : vector<1x16x16xbf16> to vector<16x16xbf16>
    %141 = arith.truncf %138 : vector<16x512xf32> to vector<16x512xbf16>
    %cst_94 = arith.constant dense<0.000000e+00> : vector<16x512xf32>
    %142 = tpu.matmul %140, %141, %cst_94 {dimension_numbers = #tpu.dot_dimension_numbers<[1], [0], [0], [1], [0, 0, 1, 1], [], []>} : vector<16x16xbf16>, vector<16x512xbf16>, vector<16x512xf32> -> vector<16x512xf32>
    %143 = arith.addf %134, %142 : vector<16x512xf32>
    %c496_i32_95 = arith.constant 496 : i32
    %144 = tpu.dynamic_rotate %83 by %c496_i32_95 dim 1 : vector<16x512xf32>, i32 -> vector<16x512xf32>
    %c7_96 = arith.constant 7 : index
    %c0_97 = arith.constant 0 : index
    %145 = vector.load %arg1[%c7_96, %c0_97] : memref<9x512xf32, #tpu.memory_space<vmem>>, vector<1x512xf32>
    %146 = vector.broadcast %145 : vector<1x512xf32> to vector<16x512xf32>
    %147 = arith.mulf %144, %146 : vector<16x512xf32>
    %c7_98 = arith.constant 7 : index
    %c0_99 = arith.constant 0 : index
    %c0_100 = arith.constant 0 : index
    %148 = vector.load %arg4[%c7_98, %c0_99, %c0_100] : memref<9x16x16xbf16, #tpu.memory_space<vmem>>, vector<1x16x16xbf16>
    %149 = vector.shape_cast %148 : vector<1x16x16xbf16> to vector<16x16xbf16>
    %150 = arith.truncf %147 : vector<16x512xf32> to vector<16x512xbf16>
    %cst_101 = arith.constant dense<0.000000e+00> : vector<16x512xf32>
    %151 = tpu.matmul %149, %150, %cst_101 {dimension_numbers = #tpu.dot_dimension_numbers<[1], [0], [0], [1], [0, 0, 1, 1], [], []>} : vector<16x16xbf16>, vector<16x512xbf16>, vector<16x512xf32> -> vector<16x512xf32>
    %152 = arith.addf %143, %151 : vector<16x512xf32>
    %c495_i32_102 = arith.constant 495 : i32
    %153 = tpu.dynamic_rotate %83 by %c495_i32_102 dim 1 : vector<16x512xf32>, i32 -> vector<16x512xf32>
    %c8_103 = arith.constant 8 : index
    %c0_104 = arith.constant 0 : index
    %154 = vector.load %arg1[%c8_103, %c0_104] : memref<9x512xf32, #tpu.memory_space<vmem>>, vector<1x512xf32>
    %155 = vector.broadcast %154 : vector<1x512xf32> to vector<16x512xf32>
    %156 = arith.mulf %153, %155 : vector<16x512xf32>
    %c8_105 = arith.constant 8 : index
    %c0_106 = arith.constant 0 : index
    %c0_107 = arith.constant 0 : index
    %157 = vector.load %arg4[%c8_105, %c0_106, %c0_107] : memref<9x16x16xbf16, #tpu.memory_space<vmem>>, vector<1x16x16xbf16>
    %158 = vector.shape_cast %157 : vector<1x16x16xbf16> to vector<16x16xbf16>
    %159 = arith.truncf %156 : vector<16x512xf32> to vector<16x512xbf16>
    %cst_108 = arith.constant dense<0.000000e+00> : vector<16x512xf32>
    %160 = tpu.matmul %158, %159, %cst_108 {dimension_numbers = #tpu.dot_dimension_numbers<[1], [0], [0], [1], [0, 0, 1, 1], [], []>} : vector<16x16xbf16>, vector<16x512xbf16>, vector<16x512xf32> -> vector<16x512xf32>
    %161 = arith.addf %152, %160 : vector<16x512xf32>
    %c0_109 = arith.constant 0 : index
    %c0_110 = arith.constant 0 : index
    %162 = vector.load %arg5[%c0_109, %c0_110] : memref<16x1xf32, #tpu.memory_space<vmem>>, vector<16x1xf32>
    %163 = vector.broadcast %162 : vector<16x1xf32> to vector<16x512xf32>
    %164 = arith.addf %161, %163 : vector<16x512xf32>
    %cst_111 = arith.constant 0.000000e+00 : f32
    %165 = vector.broadcast %cst_111 : f32 to vector<16x512xf32>
    %166 = arith.maximumf %164, %165 : vector<16x512xf32>
    %cst_112 = arith.constant 0.000000e+00 : f32
    %167 = vector.broadcast %cst_112 : f32 to vector<16x512xf32>
    %c17_i32_113 = arith.constant 17 : i32
    %168 = tpu.dynamic_rotate %166 by %c17_i32_113 dim 1 : vector<16x512xf32>, i32 -> vector<16x512xf32>
    %c0_114 = arith.constant 0 : index
    %c0_115 = arith.constant 0 : index
    %169 = vector.load %arg1[%c0_114, %c0_115] : memref<9x512xf32, #tpu.memory_space<vmem>>, vector<1x512xf32>
    %170 = vector.broadcast %169 : vector<1x512xf32> to vector<16x512xf32>
    %171 = arith.mulf %168, %170 : vector<16x512xf32>
    %c0_116 = arith.constant 0 : index
    %c0_117 = arith.constant 0 : index
    %c0_118 = arith.constant 0 : index
    %172 = vector.load %arg6[%c0_116, %c0_117, %c0_118] : memref<9x16x16xbf16, #tpu.memory_space<vmem>>, vector<1x16x16xbf16>
    %173 = vector.shape_cast %172 : vector<1x16x16xbf16> to vector<16x16xbf16>
    %174 = arith.truncf %171 : vector<16x512xf32> to vector<16x512xbf16>
    %cst_119 = arith.constant dense<0.000000e+00> : vector<16x512xf32>
    %175 = tpu.matmul %173, %174, %cst_119 {dimension_numbers = #tpu.dot_dimension_numbers<[1], [0], [0], [1], [0, 0, 1, 1], [], []>} : vector<16x16xbf16>, vector<16x512xbf16>, vector<16x512xf32> -> vector<16x512xf32>
    %176 = arith.addf %167, %175 : vector<16x512xf32>
    %c16_i32_120 = arith.constant 16 : i32
    %177 = tpu.dynamic_rotate %166 by %c16_i32_120 dim 1 : vector<16x512xf32>, i32 -> vector<16x512xf32>
    %c1_121 = arith.constant 1 : index
    %c0_122 = arith.constant 0 : index
    %178 = vector.load %arg1[%c1_121, %c0_122] : memref<9x512xf32, #tpu.memory_space<vmem>>, vector<1x512xf32>
    %179 = vector.broadcast %178 : vector<1x512xf32> to vector<16x512xf32>
    %180 = arith.mulf %177, %179 : vector<16x512xf32>
    %c1_123 = arith.constant 1 : index
    %c0_124 = arith.constant 0 : index
    %c0_125 = arith.constant 0 : index
    %181 = vector.load %arg6[%c1_123, %c0_124, %c0_125] : memref<9x16x16xbf16, #tpu.memory_space<vmem>>, vector<1x16x16xbf16>
    %182 = vector.shape_cast %181 : vector<1x16x16xbf16> to vector<16x16xbf16>
    %183 = arith.truncf %180 : vector<16x512xf32> to vector<16x512xbf16>
    %cst_126 = arith.constant dense<0.000000e+00> : vector<16x512xf32>
    %184 = tpu.matmul %182, %183, %cst_126 {dimension_numbers = #tpu.dot_dimension_numbers<[1], [0], [0], [1], [0, 0, 1, 1], [], []>} : vector<16x16xbf16>, vector<16x512xbf16>, vector<16x512xf32> -> vector<16x512xf32>
    %185 = arith.addf %176, %184 : vector<16x512xf32>
    %c15_i32_127 = arith.constant 15 : i32
    %186 = tpu.dynamic_rotate %166 by %c15_i32_127 dim 1 : vector<16x512xf32>, i32 -> vector<16x512xf32>
    %c2_128 = arith.constant 2 : index
    %c0_129 = arith.constant 0 : index
    %187 = vector.load %arg1[%c2_128, %c0_129] : memref<9x512xf32, #tpu.memory_space<vmem>>, vector<1x512xf32>
    %188 = vector.broadcast %187 : vector<1x512xf32> to vector<16x512xf32>
    %189 = arith.mulf %186, %188 : vector<16x512xf32>
    %c2_130 = arith.constant 2 : index
    %c0_131 = arith.constant 0 : index
    %c0_132 = arith.constant 0 : index
    %190 = vector.load %arg6[%c2_130, %c0_131, %c0_132] : memref<9x16x16xbf16, #tpu.memory_space<vmem>>, vector<1x16x16xbf16>
    %191 = vector.shape_cast %190 : vector<1x16x16xbf16> to vector<16x16xbf16>
    %192 = arith.truncf %189 : vector<16x512xf32> to vector<16x512xbf16>
    %cst_133 = arith.constant dense<0.000000e+00> : vector<16x512xf32>
    %193 = tpu.matmul %191, %192, %cst_133 {dimension_numbers = #tpu.dot_dimension_numbers<[1], [0], [0], [1], [0, 0, 1, 1], [], []>} : vector<16x16xbf16>, vector<16x512xbf16>, vector<16x512xf32> -> vector<16x512xf32>
    %194 = arith.addf %185, %193 : vector<16x512xf32>
    %c1_i32_134 = arith.constant 1 : i32
    %195 = tpu.dynamic_rotate %166 by %c1_i32_134 dim 1 : vector<16x512xf32>, i32 -> vector<16x512xf32>
    %c3_135 = arith.constant 3 : index
    %c0_136 = arith.constant 0 : index
    %196 = vector.load %arg1[%c3_135, %c0_136] : memref<9x512xf32, #tpu.memory_space<vmem>>, vector<1x512xf32>
    %197 = vector.broadcast %196 : vector<1x512xf32> to vector<16x512xf32>
    %198 = arith.mulf %195, %197 : vector<16x512xf32>
    %c3_137 = arith.constant 3 : index
    %c0_138 = arith.constant 0 : index
    %c0_139 = arith.constant 0 : index
    %199 = vector.load %arg6[%c3_137, %c0_138, %c0_139] : memref<9x16x16xbf16, #tpu.memory_space<vmem>>, vector<1x16x16xbf16>
    %200 = vector.shape_cast %199 : vector<1x16x16xbf16> to vector<16x16xbf16>
    %201 = arith.truncf %198 : vector<16x512xf32> to vector<16x512xbf16>
    %cst_140 = arith.constant dense<0.000000e+00> : vector<16x512xf32>
    %202 = tpu.matmul %200, %201, %cst_140 {dimension_numbers = #tpu.dot_dimension_numbers<[1], [0], [0], [1], [0, 0, 1, 1], [], []>} : vector<16x16xbf16>, vector<16x512xbf16>, vector<16x512xf32> -> vector<16x512xf32>
    %203 = arith.addf %194, %202 : vector<16x512xf32>
    %c4_141 = arith.constant 4 : index
    %c0_142 = arith.constant 0 : index
    %c0_143 = arith.constant 0 : index
    %204 = vector.load %arg6[%c4_141, %c0_142, %c0_143] : memref<9x16x16xbf16, #tpu.memory_space<vmem>>, vector<1x16x16xbf16>
    %205 = vector.shape_cast %204 : vector<1x16x16xbf16> to vector<16x16xbf16>
    %206 = arith.truncf %166 : vector<16x512xf32> to vector<16x512xbf16>
    %cst_144 = arith.constant dense<0.000000e+00> : vector<16x512xf32>
    %207 = tpu.matmul %205, %206, %cst_144 {dimension_numbers = #tpu.dot_dimension_numbers<[1], [0], [0], [1], [0, 0, 1, 1], [], []>} : vector<16x16xbf16>, vector<16x512xbf16>, vector<16x512xf32> -> vector<16x512xf32>
    %208 = arith.addf %203, %207 : vector<16x512xf32>
    %c511_i32_145 = arith.constant 511 : i32
    %209 = tpu.dynamic_rotate %166 by %c511_i32_145 dim 1 : vector<16x512xf32>, i32 -> vector<16x512xf32>
    %c5_146 = arith.constant 5 : index
    %c0_147 = arith.constant 0 : index
    %210 = vector.load %arg1[%c5_146, %c0_147] : memref<9x512xf32, #tpu.memory_space<vmem>>, vector<1x512xf32>
    %211 = vector.broadcast %210 : vector<1x512xf32> to vector<16x512xf32>
    %212 = arith.mulf %209, %211 : vector<16x512xf32>
    %c5_148 = arith.constant 5 : index
    %c0_149 = arith.constant 0 : index
    %c0_150 = arith.constant 0 : index
    %213 = vector.load %arg6[%c5_148, %c0_149, %c0_150] : memref<9x16x16xbf16, #tpu.memory_space<vmem>>, vector<1x16x16xbf16>
    %214 = vector.shape_cast %213 : vector<1x16x16xbf16> to vector<16x16xbf16>
    %215 = arith.truncf %212 : vector<16x512xf32> to vector<16x512xbf16>
    %cst_151 = arith.constant dense<0.000000e+00> : vector<16x512xf32>
    %216 = tpu.matmul %214, %215, %cst_151 {dimension_numbers = #tpu.dot_dimension_numbers<[1], [0], [0], [1], [0, 0, 1, 1], [], []>} : vector<16x16xbf16>, vector<16x512xbf16>, vector<16x512xf32> -> vector<16x512xf32>
    %217 = arith.addf %208, %216 : vector<16x512xf32>
    %c497_i32_152 = arith.constant 497 : i32
    %218 = tpu.dynamic_rotate %166 by %c497_i32_152 dim 1 : vector<16x512xf32>, i32 -> vector<16x512xf32>
    %c6_153 = arith.constant 6 : index
    %c0_154 = arith.constant 0 : index
    %219 = vector.load %arg1[%c6_153, %c0_154] : memref<9x512xf32, #tpu.memory_space<vmem>>, vector<1x512xf32>
    %220 = vector.broadcast %219 : vector<1x512xf32> to vector<16x512xf32>
    %221 = arith.mulf %218, %220 : vector<16x512xf32>
    %c6_155 = arith.constant 6 : index
    %c0_156 = arith.constant 0 : index
    %c0_157 = arith.constant 0 : index
    %222 = vector.load %arg6[%c6_155, %c0_156, %c0_157] : memref<9x16x16xbf16, #tpu.memory_space<vmem>>, vector<1x16x16xbf16>
    %223 = vector.shape_cast %222 : vector<1x16x16xbf16> to vector<16x16xbf16>
    %224 = arith.truncf %221 : vector<16x512xf32> to vector<16x512xbf16>
    %cst_158 = arith.constant dense<0.000000e+00> : vector<16x512xf32>
    %225 = tpu.matmul %223, %224, %cst_158 {dimension_numbers = #tpu.dot_dimension_numbers<[1], [0], [0], [1], [0, 0, 1, 1], [], []>} : vector<16x16xbf16>, vector<16x512xbf16>, vector<16x512xf32> -> vector<16x512xf32>
    %226 = arith.addf %217, %225 : vector<16x512xf32>
    %c496_i32_159 = arith.constant 496 : i32
    %227 = tpu.dynamic_rotate %166 by %c496_i32_159 dim 1 : vector<16x512xf32>, i32 -> vector<16x512xf32>
    %c7_160 = arith.constant 7 : index
    %c0_161 = arith.constant 0 : index
    %228 = vector.load %arg1[%c7_160, %c0_161] : memref<9x512xf32, #tpu.memory_space<vmem>>, vector<1x512xf32>
    %229 = vector.broadcast %228 : vector<1x512xf32> to vector<16x512xf32>
    %230 = arith.mulf %227, %229 : vector<16x512xf32>
    %c7_162 = arith.constant 7 : index
    %c0_163 = arith.constant 0 : index
    %c0_164 = arith.constant 0 : index
    %231 = vector.load %arg6[%c7_162, %c0_163, %c0_164] : memref<9x16x16xbf16, #tpu.memory_space<vmem>>, vector<1x16x16xbf16>
    %232 = vector.shape_cast %231 : vector<1x16x16xbf16> to vector<16x16xbf16>
    %233 = arith.truncf %230 : vector<16x512xf32> to vector<16x512xbf16>
    %cst_165 = arith.constant dense<0.000000e+00> : vector<16x512xf32>
    %234 = tpu.matmul %232, %233, %cst_165 {dimension_numbers = #tpu.dot_dimension_numbers<[1], [0], [0], [1], [0, 0, 1, 1], [], []>} : vector<16x16xbf16>, vector<16x512xbf16>, vector<16x512xf32> -> vector<16x512xf32>
    %235 = arith.addf %226, %234 : vector<16x512xf32>
    %c495_i32_166 = arith.constant 495 : i32
    %236 = tpu.dynamic_rotate %166 by %c495_i32_166 dim 1 : vector<16x512xf32>, i32 -> vector<16x512xf32>
    %c8_167 = arith.constant 8 : index
    %c0_168 = arith.constant 0 : index
    %237 = vector.load %arg1[%c8_167, %c0_168] : memref<9x512xf32, #tpu.memory_space<vmem>>, vector<1x512xf32>
    %238 = vector.broadcast %237 : vector<1x512xf32> to vector<16x512xf32>
    %239 = arith.mulf %236, %238 : vector<16x512xf32>
    %c8_169 = arith.constant 8 : index
    %c0_170 = arith.constant 0 : index
    %c0_171 = arith.constant 0 : index
    %240 = vector.load %arg6[%c8_169, %c0_170, %c0_171] : memref<9x16x16xbf16, #tpu.memory_space<vmem>>, vector<1x16x16xbf16>
    %241 = vector.shape_cast %240 : vector<1x16x16xbf16> to vector<16x16xbf16>
    %242 = arith.truncf %239 : vector<16x512xf32> to vector<16x512xbf16>
    %cst_172 = arith.constant dense<0.000000e+00> : vector<16x512xf32>
    %243 = tpu.matmul %241, %242, %cst_172 {dimension_numbers = #tpu.dot_dimension_numbers<[1], [0], [0], [1], [0, 0, 1, 1], [], []>} : vector<16x16xbf16>, vector<16x512xbf16>, vector<16x512xf32> -> vector<16x512xf32>
    %244 = arith.addf %235, %243 : vector<16x512xf32>
    %c0_173 = arith.constant 0 : index
    %c0_174 = arith.constant 0 : index
    %245 = vector.load %arg7[%c0_173, %c0_174] : memref<16x1xf32, #tpu.memory_space<vmem>>, vector<16x1xf32>
    %246 = vector.broadcast %245 : vector<16x1xf32> to vector<16x512xf32>
    %247 = arith.addf %244, %246 : vector<16x512xf32>
    %248 = arith.addf %247, %83 : vector<16x512xf32>
    %cst_175 = arith.constant 0.000000e+00 : f32
    %249 = vector.broadcast %cst_175 : f32 to vector<16x512xf32>
    %250 = arith.maximumf %248, %249 : vector<16x512xf32>
    %cst_176 = arith.constant 0.000000e+00 : f32
    %251 = vector.broadcast %cst_176 : f32 to vector<16x512xf32>
    %c17_i32_177 = arith.constant 17 : i32
    %252 = tpu.dynamic_rotate %250 by %c17_i32_177 dim 1 : vector<16x512xf32>, i32 -> vector<16x512xf32>
    %c0_178 = arith.constant 0 : index
    %c0_179 = arith.constant 0 : index
    %253 = vector.load %arg1[%c0_178, %c0_179] : memref<9x512xf32, #tpu.memory_space<vmem>>, vector<1x512xf32>
    %254 = vector.broadcast %253 : vector<1x512xf32> to vector<16x512xf32>
    %255 = arith.mulf %252, %254 : vector<16x512xf32>
    %c0_180 = arith.constant 0 : index
    %c0_181 = arith.constant 0 : index
    %c0_182 = arith.constant 0 : index
    %256 = vector.load %arg8[%c0_180, %c0_181, %c0_182] : memref<9x16x16xbf16, #tpu.memory_space<vmem>>, vector<1x16x16xbf16>
    %257 = vector.shape_cast %256 : vector<1x16x16xbf16> to vector<16x16xbf16>
    %258 = arith.truncf %255 : vector<16x512xf32> to vector<16x512xbf16>
    %cst_183 = arith.constant dense<0.000000e+00> : vector<16x512xf32>
    %259 = tpu.matmul %257, %258, %cst_183 {dimension_numbers = #tpu.dot_dimension_numbers<[1], [0], [0], [1], [0, 0, 1, 1], [], []>} : vector<16x16xbf16>, vector<16x512xbf16>, vector<16x512xf32> -> vector<16x512xf32>
    %260 = arith.addf %251, %259 : vector<16x512xf32>
    %c16_i32_184 = arith.constant 16 : i32
    %261 = tpu.dynamic_rotate %250 by %c16_i32_184 dim 1 : vector<16x512xf32>, i32 -> vector<16x512xf32>
    %c1_185 = arith.constant 1 : index
    %c0_186 = arith.constant 0 : index
    %262 = vector.load %arg1[%c1_185, %c0_186] : memref<9x512xf32, #tpu.memory_space<vmem>>, vector<1x512xf32>
    %263 = vector.broadcast %262 : vector<1x512xf32> to vector<16x512xf32>
    %264 = arith.mulf %261, %263 : vector<16x512xf32>
    %c1_187 = arith.constant 1 : index
    %c0_188 = arith.constant 0 : index
    %c0_189 = arith.constant 0 : index
    %265 = vector.load %arg8[%c1_187, %c0_188, %c0_189] : memref<9x16x16xbf16, #tpu.memory_space<vmem>>, vector<1x16x16xbf16>
    %266 = vector.shape_cast %265 : vector<1x16x16xbf16> to vector<16x16xbf16>
    %267 = arith.truncf %264 : vector<16x512xf32> to vector<16x512xbf16>
    %cst_190 = arith.constant dense<0.000000e+00> : vector<16x512xf32>
    %268 = tpu.matmul %266, %267, %cst_190 {dimension_numbers = #tpu.dot_dimension_numbers<[1], [0], [0], [1], [0, 0, 1, 1], [], []>} : vector<16x16xbf16>, vector<16x512xbf16>, vector<16x512xf32> -> vector<16x512xf32>
    %269 = arith.addf %260, %268 : vector<16x512xf32>
    %c15_i32_191 = arith.constant 15 : i32
    %270 = tpu.dynamic_rotate %250 by %c15_i32_191 dim 1 : vector<16x512xf32>, i32 -> vector<16x512xf32>
    %c2_192 = arith.constant 2 : index
    %c0_193 = arith.constant 0 : index
    %271 = vector.load %arg1[%c2_192, %c0_193] : memref<9x512xf32, #tpu.memory_space<vmem>>, vector<1x512xf32>
    %272 = vector.broadcast %271 : vector<1x512xf32> to vector<16x512xf32>
    %273 = arith.mulf %270, %272 : vector<16x512xf32>
    %c2_194 = arith.constant 2 : index
    %c0_195 = arith.constant 0 : index
    %c0_196 = arith.constant 0 : index
    %274 = vector.load %arg8[%c2_194, %c0_195, %c0_196] : memref<9x16x16xbf16, #tpu.memory_space<vmem>>, vector<1x16x16xbf16>
    %275 = vector.shape_cast %274 : vector<1x16x16xbf16> to vector<16x16xbf16>
    %276 = arith.truncf %273 : vector<16x512xf32> to vector<16x512xbf16>
    %cst_197 = arith.constant dense<0.000000e+00> : vector<16x512xf32>
    %277 = tpu.matmul %275, %276, %cst_197 {dimension_numbers = #tpu.dot_dimension_numbers<[1], [0], [0], [1], [0, 0, 1, 1], [], []>} : vector<16x16xbf16>, vector<16x512xbf16>, vector<16x512xf32> -> vector<16x512xf32>
    %278 = arith.addf %269, %277 : vector<16x512xf32>
    %c1_i32_198 = arith.constant 1 : i32
    %279 = tpu.dynamic_rotate %250 by %c1_i32_198 dim 1 : vector<16x512xf32>, i32 -> vector<16x512xf32>
    %c3_199 = arith.constant 3 : index
    %c0_200 = arith.constant 0 : index
    %280 = vector.load %arg1[%c3_199, %c0_200] : memref<9x512xf32, #tpu.memory_space<vmem>>, vector<1x512xf32>
    %281 = vector.broadcast %280 : vector<1x512xf32> to vector<16x512xf32>
    %282 = arith.mulf %279, %281 : vector<16x512xf32>
    %c3_201 = arith.constant 3 : index
    %c0_202 = arith.constant 0 : index
    %c0_203 = arith.constant 0 : index
    %283 = vector.load %arg8[%c3_201, %c0_202, %c0_203] : memref<9x16x16xbf16, #tpu.memory_space<vmem>>, vector<1x16x16xbf16>
    %284 = vector.shape_cast %283 : vector<1x16x16xbf16> to vector<16x16xbf16>
    %285 = arith.truncf %282 : vector<16x512xf32> to vector<16x512xbf16>
    %cst_204 = arith.constant dense<0.000000e+00> : vector<16x512xf32>
    %286 = tpu.matmul %284, %285, %cst_204 {dimension_numbers = #tpu.dot_dimension_numbers<[1], [0], [0], [1], [0, 0, 1, 1], [], []>} : vector<16x16xbf16>, vector<16x512xbf16>, vector<16x512xf32> -> vector<16x512xf32>
    %287 = arith.addf %278, %286 : vector<16x512xf32>
    %c4_205 = arith.constant 4 : index
    %c0_206 = arith.constant 0 : index
    %c0_207 = arith.constant 0 : index
    %288 = vector.load %arg8[%c4_205, %c0_206, %c0_207] : memref<9x16x16xbf16, #tpu.memory_space<vmem>>, vector<1x16x16xbf16>
    %289 = vector.shape_cast %288 : vector<1x16x16xbf16> to vector<16x16xbf16>
    %290 = arith.truncf %250 : vector<16x512xf32> to vector<16x512xbf16>
    %cst_208 = arith.constant dense<0.000000e+00> : vector<16x512xf32>
    %291 = tpu.matmul %289, %290, %cst_208 {dimension_numbers = #tpu.dot_dimension_numbers<[1], [0], [0], [1], [0, 0, 1, 1], [], []>} : vector<16x16xbf16>, vector<16x512xbf16>, vector<16x512xf32> -> vector<16x512xf32>
    %292 = arith.addf %287, %291 : vector<16x512xf32>
    %c511_i32_209 = arith.constant 511 : i32
    %293 = tpu.dynamic_rotate %250 by %c511_i32_209 dim 1 : vector<16x512xf32>, i32 -> vector<16x512xf32>
    %c5_210 = arith.constant 5 : index
    %c0_211 = arith.constant 0 : index
    %294 = vector.load %arg1[%c5_210, %c0_211] : memref<9x512xf32, #tpu.memory_space<vmem>>, vector<1x512xf32>
    %295 = vector.broadcast %294 : vector<1x512xf32> to vector<16x512xf32>
    %296 = arith.mulf %293, %295 : vector<16x512xf32>
    %c5_212 = arith.constant 5 : index
    %c0_213 = arith.constant 0 : index
    %c0_214 = arith.constant 0 : index
    %297 = vector.load %arg8[%c5_212, %c0_213, %c0_214] : memref<9x16x16xbf16, #tpu.memory_space<vmem>>, vector<1x16x16xbf16>
    %298 = vector.shape_cast %297 : vector<1x16x16xbf16> to vector<16x16xbf16>
    %299 = arith.truncf %296 : vector<16x512xf32> to vector<16x512xbf16>
    %cst_215 = arith.constant dense<0.000000e+00> : vector<16x512xf32>
    %300 = tpu.matmul %298, %299, %cst_215 {dimension_numbers = #tpu.dot_dimension_numbers<[1], [0], [0], [1], [0, 0, 1, 1], [], []>} : vector<16x16xbf16>, vector<16x512xbf16>, vector<16x512xf32> -> vector<16x512xf32>
    %301 = arith.addf %292, %300 : vector<16x512xf32>
    %c497_i32_216 = arith.constant 497 : i32
    %302 = tpu.dynamic_rotate %250 by %c497_i32_216 dim 1 : vector<16x512xf32>, i32 -> vector<16x512xf32>
    %c6_217 = arith.constant 6 : index
    %c0_218 = arith.constant 0 : index
    %303 = vector.load %arg1[%c6_217, %c0_218] : memref<9x512xf32, #tpu.memory_space<vmem>>, vector<1x512xf32>
    %304 = vector.broadcast %303 : vector<1x512xf32> to vector<16x512xf32>
    %305 = arith.mulf %302, %304 : vector<16x512xf32>
    %c6_219 = arith.constant 6 : index
    %c0_220 = arith.constant 0 : index
    %c0_221 = arith.constant 0 : index
    %306 = vector.load %arg8[%c6_219, %c0_220, %c0_221] : memref<9x16x16xbf16, #tpu.memory_space<vmem>>, vector<1x16x16xbf16>
    %307 = vector.shape_cast %306 : vector<1x16x16xbf16> to vector<16x16xbf16>
    %308 = arith.truncf %305 : vector<16x512xf32> to vector<16x512xbf16>
    %cst_222 = arith.constant dense<0.000000e+00> : vector<16x512xf32>
    %309 = tpu.matmul %307, %308, %cst_222 {dimension_numbers = #tpu.dot_dimension_numbers<[1], [0], [0], [1], [0, 0, 1, 1], [], []>} : vector<16x16xbf16>, vector<16x512xbf16>, vector<16x512xf32> -> vector<16x512xf32>
    %310 = arith.addf %301, %309 : vector<16x512xf32>
    %c496_i32_223 = arith.constant 496 : i32
    %311 = tpu.dynamic_rotate %250 by %c496_i32_223 dim 1 : vector<16x512xf32>, i32 -> vector<16x512xf32>
    %c7_224 = arith.constant 7 : index
    %c0_225 = arith.constant 0 : index
    %312 = vector.load %arg1[%c7_224, %c0_225] : memref<9x512xf32, #tpu.memory_space<vmem>>, vector<1x512xf32>
    %313 = vector.broadcast %312 : vector<1x512xf32> to vector<16x512xf32>
    %314 = arith.mulf %311, %313 : vector<16x512xf32>
    %c7_226 = arith.constant 7 : index
    %c0_227 = arith.constant 0 : index
    %c0_228 = arith.constant 0 : index
    %315 = vector.load %arg8[%c7_226, %c0_227, %c0_228] : memref<9x16x16xbf16, #tpu.memory_space<vmem>>, vector<1x16x16xbf16>
    %316 = vector.shape_cast %315 : vector<1x16x16xbf16> to vector<16x16xbf16>
    %317 = arith.truncf %314 : vector<16x512xf32> to vector<16x512xbf16>
    %cst_229 = arith.constant dense<0.000000e+00> : vector<16x512xf32>
    %318 = tpu.matmul %316, %317, %cst_229 {dimension_numbers = #tpu.dot_dimension_numbers<[1], [0], [0], [1], [0, 0, 1, 1], [], []>} : vector<16x16xbf16>, vector<16x512xbf16>, vector<16x512xf32> -> vector<16x512xf32>
    %319 = arith.addf %310, %318 : vector<16x512xf32>
    %c495_i32_230 = arith.constant 495 : i32
    %320 = tpu.dynamic_rotate %250 by %c495_i32_230 dim 1 : vector<16x512xf32>, i32 -> vector<16x512xf32>
    %c8_231 = arith.constant 8 : index
    %c0_232 = arith.constant 0 : index
    %321 = vector.load %arg1[%c8_231, %c0_232] : memref<9x512xf32, #tpu.memory_space<vmem>>, vector<1x512xf32>
    %322 = vector.broadcast %321 : vector<1x512xf32> to vector<16x512xf32>
    %323 = arith.mulf %320, %322 : vector<16x512xf32>
    %c8_233 = arith.constant 8 : index
    %c0_234 = arith.constant 0 : index
    %c0_235 = arith.constant 0 : index
    %324 = vector.load %arg8[%c8_233, %c0_234, %c0_235] : memref<9x16x16xbf16, #tpu.memory_space<vmem>>, vector<1x16x16xbf16>
    %325 = vector.shape_cast %324 : vector<1x16x16xbf16> to vector<16x16xbf16>
    %326 = arith.truncf %323 : vector<16x512xf32> to vector<16x512xbf16>
    %cst_236 = arith.constant dense<0.000000e+00> : vector<16x512xf32>
    %327 = tpu.matmul %325, %326, %cst_236 {dimension_numbers = #tpu.dot_dimension_numbers<[1], [0], [0], [1], [0, 0, 1, 1], [], []>} : vector<16x16xbf16>, vector<16x512xbf16>, vector<16x512xf32> -> vector<16x512xf32>
    %328 = arith.addf %319, %327 : vector<16x512xf32>
    %c0_237 = arith.constant 0 : index
    %c0_238 = arith.constant 0 : index
    %329 = vector.load %arg9[%c0_237, %c0_238] : memref<16x1xf32, #tpu.memory_space<vmem>>, vector<16x1xf32>
    %330 = vector.broadcast %329 : vector<16x1xf32> to vector<16x512xf32>
    %331 = arith.addf %328, %330 : vector<16x512xf32>
    %cst_239 = arith.constant 0.000000e+00 : f32
    %332 = vector.broadcast %cst_239 : f32 to vector<16x512xf32>
    %333 = arith.maximumf %331, %332 : vector<16x512xf32>
    %cst_240 = arith.constant 0.000000e+00 : f32
    %334 = vector.broadcast %cst_240 : f32 to vector<16x512xf32>
    %c17_i32_241 = arith.constant 17 : i32
    %335 = tpu.dynamic_rotate %333 by %c17_i32_241 dim 1 : vector<16x512xf32>, i32 -> vector<16x512xf32>
    %c0_242 = arith.constant 0 : index
    %c0_243 = arith.constant 0 : index
    %336 = vector.load %arg1[%c0_242, %c0_243] : memref<9x512xf32, #tpu.memory_space<vmem>>, vector<1x512xf32>
    %337 = vector.broadcast %336 : vector<1x512xf32> to vector<16x512xf32>
    %338 = arith.mulf %335, %337 : vector<16x512xf32>
    %c0_244 = arith.constant 0 : index
    %c0_245 = arith.constant 0 : index
    %c0_246 = arith.constant 0 : index
    %339 = vector.load %arg10[%c0_244, %c0_245, %c0_246] : memref<9x16x16xbf16, #tpu.memory_space<vmem>>, vector<1x16x16xbf16>
    %340 = vector.shape_cast %339 : vector<1x16x16xbf16> to vector<16x16xbf16>
    %341 = arith.truncf %338 : vector<16x512xf32> to vector<16x512xbf16>
    %cst_247 = arith.constant dense<0.000000e+00> : vector<16x512xf32>
    %342 = tpu.matmul %340, %341, %cst_247 {dimension_numbers = #tpu.dot_dimension_numbers<[1], [0], [0], [1], [0, 0, 1, 1], [], []>} : vector<16x16xbf16>, vector<16x512xbf16>, vector<16x512xf32> -> vector<16x512xf32>
    %343 = arith.addf %334, %342 : vector<16x512xf32>
    %c16_i32_248 = arith.constant 16 : i32
    %344 = tpu.dynamic_rotate %333 by %c16_i32_248 dim 1 : vector<16x512xf32>, i32 -> vector<16x512xf32>
    %c1_249 = arith.constant 1 : index
    %c0_250 = arith.constant 0 : index
    %345 = vector.load %arg1[%c1_249, %c0_250] : memref<9x512xf32, #tpu.memory_space<vmem>>, vector<1x512xf32>
    %346 = vector.broadcast %345 : vector<1x512xf32> to vector<16x512xf32>
    %347 = arith.mulf %344, %346 : vector<16x512xf32>
    %c1_251 = arith.constant 1 : index
    %c0_252 = arith.constant 0 : index
    %c0_253 = arith.constant 0 : index
    %348 = vector.load %arg10[%c1_251, %c0_252, %c0_253] : memref<9x16x16xbf16, #tpu.memory_space<vmem>>, vector<1x16x16xbf16>
    %349 = vector.shape_cast %348 : vector<1x16x16xbf16> to vector<16x16xbf16>
    %350 = arith.truncf %347 : vector<16x512xf32> to vector<16x512xbf16>
    %cst_254 = arith.constant dense<0.000000e+00> : vector<16x512xf32>
    %351 = tpu.matmul %349, %350, %cst_254 {dimension_numbers = #tpu.dot_dimension_numbers<[1], [0], [0], [1], [0, 0, 1, 1], [], []>} : vector<16x16xbf16>, vector<16x512xbf16>, vector<16x512xf32> -> vector<16x512xf32>
    %352 = arith.addf %343, %351 : vector<16x512xf32>
    %c15_i32_255 = arith.constant 15 : i32
    %353 = tpu.dynamic_rotate %333 by %c15_i32_255 dim 1 : vector<16x512xf32>, i32 -> vector<16x512xf32>
    %c2_256 = arith.constant 2 : index
    %c0_257 = arith.constant 0 : index
    %354 = vector.load %arg1[%c2_256, %c0_257] : memref<9x512xf32, #tpu.memory_space<vmem>>, vector<1x512xf32>
    %355 = vector.broadcast %354 : vector<1x512xf32> to vector<16x512xf32>
    %356 = arith.mulf %353, %355 : vector<16x512xf32>
    %c2_258 = arith.constant 2 : index
    %c0_259 = arith.constant 0 : index
    %c0_260 = arith.constant 0 : index
    %357 = vector.load %arg10[%c2_258, %c0_259, %c0_260] : memref<9x16x16xbf16, #tpu.memory_space<vmem>>, vector<1x16x16xbf16>
    %358 = vector.shape_cast %357 : vector<1x16x16xbf16> to vector<16x16xbf16>
    %359 = arith.truncf %356 : vector<16x512xf32> to vector<16x512xbf16>
    %cst_261 = arith.constant dense<0.000000e+00> : vector<16x512xf32>
    %360 = tpu.matmul %358, %359, %cst_261 {dimension_numbers = #tpu.dot_dimension_numbers<[1], [0], [0], [1], [0, 0, 1, 1], [], []>} : vector<16x16xbf16>, vector<16x512xbf16>, vector<16x512xf32> -> vector<16x512xf32>
    %361 = arith.addf %352, %360 : vector<16x512xf32>
    %c1_i32_262 = arith.constant 1 : i32
    %362 = tpu.dynamic_rotate %333 by %c1_i32_262 dim 1 : vector<16x512xf32>, i32 -> vector<16x512xf32>
    %c3_263 = arith.constant 3 : index
    %c0_264 = arith.constant 0 : index
    %363 = vector.load %arg1[%c3_263, %c0_264] : memref<9x512xf32, #tpu.memory_space<vmem>>, vector<1x512xf32>
    %364 = vector.broadcast %363 : vector<1x512xf32> to vector<16x512xf32>
    %365 = arith.mulf %362, %364 : vector<16x512xf32>
    %c3_265 = arith.constant 3 : index
    %c0_266 = arith.constant 0 : index
    %c0_267 = arith.constant 0 : index
    %366 = vector.load %arg10[%c3_265, %c0_266, %c0_267] : memref<9x16x16xbf16, #tpu.memory_space<vmem>>, vector<1x16x16xbf16>
    %367 = vector.shape_cast %366 : vector<1x16x16xbf16> to vector<16x16xbf16>
    %368 = arith.truncf %365 : vector<16x512xf32> to vector<16x512xbf16>
    %cst_268 = arith.constant dense<0.000000e+00> : vector<16x512xf32>
    %369 = tpu.matmul %367, %368, %cst_268 {dimension_numbers = #tpu.dot_dimension_numbers<[1], [0], [0], [1], [0, 0, 1, 1], [], []>} : vector<16x16xbf16>, vector<16x512xbf16>, vector<16x512xf32> -> vector<16x512xf32>
    %370 = arith.addf %361, %369 : vector<16x512xf32>
    %c4_269 = arith.constant 4 : index
    %c0_270 = arith.constant 0 : index
    %c0_271 = arith.constant 0 : index
    %371 = vector.load %arg10[%c4_269, %c0_270, %c0_271] : memref<9x16x16xbf16, #tpu.memory_space<vmem>>, vector<1x16x16xbf16>
    %372 = vector.shape_cast %371 : vector<1x16x16xbf16> to vector<16x16xbf16>
    %373 = arith.truncf %333 : vector<16x512xf32> to vector<16x512xbf16>
    %cst_272 = arith.constant dense<0.000000e+00> : vector<16x512xf32>
    %374 = tpu.matmul %372, %373, %cst_272 {dimension_numbers = #tpu.dot_dimension_numbers<[1], [0], [0], [1], [0, 0, 1, 1], [], []>} : vector<16x16xbf16>, vector<16x512xbf16>, vector<16x512xf32> -> vector<16x512xf32>
    %375 = arith.addf %370, %374 : vector<16x512xf32>
    %c511_i32_273 = arith.constant 511 : i32
    %376 = tpu.dynamic_rotate %333 by %c511_i32_273 dim 1 : vector<16x512xf32>, i32 -> vector<16x512xf32>
    %c5_274 = arith.constant 5 : index
    %c0_275 = arith.constant 0 : index
    %377 = vector.load %arg1[%c5_274, %c0_275] : memref<9x512xf32, #tpu.memory_space<vmem>>, vector<1x512xf32>
    %378 = vector.broadcast %377 : vector<1x512xf32> to vector<16x512xf32>
    %379 = arith.mulf %376, %378 : vector<16x512xf32>
    %c5_276 = arith.constant 5 : index
    %c0_277 = arith.constant 0 : index
    %c0_278 = arith.constant 0 : index
    %380 = vector.load %arg10[%c5_276, %c0_277, %c0_278] : memref<9x16x16xbf16, #tpu.memory_space<vmem>>, vector<1x16x16xbf16>
    %381 = vector.shape_cast %380 : vector<1x16x16xbf16> to vector<16x16xbf16>
    %382 = arith.truncf %379 : vector<16x512xf32> to vector<16x512xbf16>
    %cst_279 = arith.constant dense<0.000000e+00> : vector<16x512xf32>
    %383 = tpu.matmul %381, %382, %cst_279 {dimension_numbers = #tpu.dot_dimension_numbers<[1], [0], [0], [1], [0, 0, 1, 1], [], []>} : vector<16x16xbf16>, vector<16x512xbf16>, vector<16x512xf32> -> vector<16x512xf32>
    %384 = arith.addf %375, %383 : vector<16x512xf32>
    %c497_i32_280 = arith.constant 497 : i32
    %385 = tpu.dynamic_rotate %333 by %c497_i32_280 dim 1 : vector<16x512xf32>, i32 -> vector<16x512xf32>
    %c6_281 = arith.constant 6 : index
    %c0_282 = arith.constant 0 : index
    %386 = vector.load %arg1[%c6_281, %c0_282] : memref<9x512xf32, #tpu.memory_space<vmem>>, vector<1x512xf32>
    %387 = vector.broadcast %386 : vector<1x512xf32> to vector<16x512xf32>
    %388 = arith.mulf %385, %387 : vector<16x512xf32>
    %c6_283 = arith.constant 6 : index
    %c0_284 = arith.constant 0 : index
    %c0_285 = arith.constant 0 : index
    %389 = vector.load %arg10[%c6_283, %c0_284, %c0_285] : memref<9x16x16xbf16, #tpu.memory_space<vmem>>, vector<1x16x16xbf16>
    %390 = vector.shape_cast %389 : vector<1x16x16xbf16> to vector<16x16xbf16>
    %391 = arith.truncf %388 : vector<16x512xf32> to vector<16x512xbf16>
    %cst_286 = arith.constant dense<0.000000e+00> : vector<16x512xf32>
    %392 = tpu.matmul %390, %391, %cst_286 {dimension_numbers = #tpu.dot_dimension_numbers<[1], [0], [0], [1], [0, 0, 1, 1], [], []>} : vector<16x16xbf16>, vector<16x512xbf16>, vector<16x512xf32> -> vector<16x512xf32>
    %393 = arith.addf %384, %392 : vector<16x512xf32>
    %c496_i32_287 = arith.constant 496 : i32
    %394 = tpu.dynamic_rotate %333 by %c496_i32_287 dim 1 : vector<16x512xf32>, i32 -> vector<16x512xf32>
    %c7_288 = arith.constant 7 : index
    %c0_289 = arith.constant 0 : index
    %395 = vector.load %arg1[%c7_288, %c0_289] : memref<9x512xf32, #tpu.memory_space<vmem>>, vector<1x512xf32>
    %396 = vector.broadcast %395 : vector<1x512xf32> to vector<16x512xf32>
    %397 = arith.mulf %394, %396 : vector<16x512xf32>
    %c7_290 = arith.constant 7 : index
    %c0_291 = arith.constant 0 : index
    %c0_292 = arith.constant 0 : index
    %398 = vector.load %arg10[%c7_290, %c0_291, %c0_292] : memref<9x16x16xbf16, #tpu.memory_space<vmem>>, vector<1x16x16xbf16>
    %399 = vector.shape_cast %398 : vector<1x16x16xbf16> to vector<16x16xbf16>
    %400 = arith.truncf %397 : vector<16x512xf32> to vector<16x512xbf16>
    %cst_293 = arith.constant dense<0.000000e+00> : vector<16x512xf32>
    %401 = tpu.matmul %399, %400, %cst_293 {dimension_numbers = #tpu.dot_dimension_numbers<[1], [0], [0], [1], [0, 0, 1, 1], [], []>} : vector<16x16xbf16>, vector<16x512xbf16>, vector<16x512xf32> -> vector<16x512xf32>
    %402 = arith.addf %393, %401 : vector<16x512xf32>
    %c495_i32_294 = arith.constant 495 : i32
    %403 = tpu.dynamic_rotate %333 by %c495_i32_294 dim 1 : vector<16x512xf32>, i32 -> vector<16x512xf32>
    %c8_295 = arith.constant 8 : index
    %c0_296 = arith.constant 0 : index
    %404 = vector.load %arg1[%c8_295, %c0_296] : memref<9x512xf32, #tpu.memory_space<vmem>>, vector<1x512xf32>
    %405 = vector.broadcast %404 : vector<1x512xf32> to vector<16x512xf32>
    %406 = arith.mulf %403, %405 : vector<16x512xf32>
    %c8_297 = arith.constant 8 : index
    %c0_298 = arith.constant 0 : index
    %c0_299 = arith.constant 0 : index
    %407 = vector.load %arg10[%c8_297, %c0_298, %c0_299] : memref<9x16x16xbf16, #tpu.memory_space<vmem>>, vector<1x16x16xbf16>
    %408 = vector.shape_cast %407 : vector<1x16x16xbf16> to vector<16x16xbf16>
    %409 = arith.truncf %406 : vector<16x512xf32> to vector<16x512xbf16>
    %cst_300 = arith.constant dense<0.000000e+00> : vector<16x512xf32>
    %410 = tpu.matmul %408, %409, %cst_300 {dimension_numbers = #tpu.dot_dimension_numbers<[1], [0], [0], [1], [0, 0, 1, 1], [], []>} : vector<16x16xbf16>, vector<16x512xbf16>, vector<16x512xf32> -> vector<16x512xf32>
    %411 = arith.addf %402, %410 : vector<16x512xf32>
    %c0_301 = arith.constant 0 : index
    %c0_302 = arith.constant 0 : index
    %412 = vector.load %arg11[%c0_301, %c0_302] : memref<16x1xf32, #tpu.memory_space<vmem>>, vector<16x1xf32>
    %413 = vector.broadcast %412 : vector<16x1xf32> to vector<16x512xf32>
    %414 = arith.addf %411, %413 : vector<16x512xf32>
    %415 = arith.addf %414, %250 : vector<16x512xf32>
    %c0_303 = arith.constant 0 : index
    %c0_304 = arith.constant 0 : index
    %416 = vector.load %arg12[%c0_303, %c0_304] : memref<16x512xf32, #tpu.memory_space<vmem>>, vector<16x512xf32>
    tpu.vector_store %arg12[%c0_303, %c0_304], %415 {strides = array<i32>} : memref<16x512xf32, #tpu.memory_space<vmem>>, vector<16x512xf32>,
    return
  }
}

module attributes {stable_mosaic.version = 11 : i64} {
  func.func @_down_layer_kernel(%arg0: memref<144x128xbf16, #tpu.memory_space<vmem>>, %arg1: memref<32x128xf32, #tpu.memory_space<vmem>>, %arg2: memref<9x128xf32, #tpu.memory_space<vmem>>, %arg3: memref<32x144xbf16, #tpu.memory_space<vmem>>, %arg4: memref<32x1xf32, #tpu.memory_space<vmem>>, %arg5: memref<9x32x32xbf16, #tpu.memory_space<vmem>>, %arg6: memref<32x1xf32, #tpu.memory_space<vmem>>, %arg7: memref<9x32x32xbf16, #tpu.memory_space<vmem>>, %arg8: memref<32x1xf32, #tpu.memory_space<vmem>>, %arg9: memref<9x32x32xbf16, #tpu.memory_space<vmem>>, %arg10: memref<32x1xf32, #tpu.memory_space<vmem>>, %arg11: memref<32x128xf32, #tpu.memory_space<vmem>>) attributes {dimension_semantics = [], scalar_prefetch = 0 : i64, scratch_operands = 0 : i64, tpu.core_type = #tpu.core_type<tc>} {
    %c0 = arith.constant 0 : index
    %c0_0 = arith.constant 0 : index
    %0 = vector.load %arg3[%c0, %c0_0] : memref<32x144xbf16, #tpu.memory_space<vmem>>, vector<32x144xbf16>
    %c0_1 = arith.constant 0 : index
    %c0_2 = arith.constant 0 : index
    %1 = vector.load %arg0[%c0_1, %c0_2] : memref<144x128xbf16, #tpu.memory_space<vmem>>, vector<144x128xbf16>
    %cst = arith.constant dense<0.000000e+00> : vector<32x128xf32>
    %2 = tpu.matmul %0, %1, %cst {dimension_numbers = #tpu.dot_dimension_numbers<[1], [0], [0], [1], [0, 0, 1, 1], [], []>} : vector<32x144xbf16>, vector<144x128xbf16>, vector<32x128xf32> -> vector<32x128xf32>
    %c0_3 = arith.constant 0 : index
    %c0_4 = arith.constant 0 : index
    %3 = vector.load %arg4[%c0_3, %c0_4] : memref<32x1xf32, #tpu.memory_space<vmem>>, vector<32x1xf32>
    %4 = vector.broadcast %3 : vector<32x1xf32> to vector<32x128xf32>
    %5 = arith.addf %2, %4 : vector<32x128xf32>
    %cst_5 = arith.constant 0.000000e+00 : f32
    %6 = vector.broadcast %cst_5 : f32 to vector<32x128xf32>
    %7 = arith.maximumf %5, %6 : vector<32x128xf32>
    %cst_6 = arith.constant 0.000000e+00 : f32
    %8 = vector.broadcast %cst_6 : f32 to vector<32x128xf32>
    %c9_i32 = arith.constant 9 : i32
    %9 = tpu.dynamic_rotate %7 by %c9_i32 dim 1 : vector<32x128xf32>, i32 -> vector<32x128xf32>
    %c0_7 = arith.constant 0 : index
    %c0_8 = arith.constant 0 : index
    %10 = vector.load %arg2[%c0_7, %c0_8] : memref<9x128xf32, #tpu.memory_space<vmem>>, vector<1x128xf32>
    %11 = vector.broadcast %10 : vector<1x128xf32> to vector<32x128xf32>
    %12 = arith.mulf %9, %11 : vector<32x128xf32>
    %c0_9 = arith.constant 0 : index
    %c0_10 = arith.constant 0 : index
    %c0_11 = arith.constant 0 : index
    %13 = vector.load %arg5[%c0_9, %c0_10, %c0_11] : memref<9x32x32xbf16, #tpu.memory_space<vmem>>, vector<1x32x32xbf16>
    %14 = vector.shape_cast %13 : vector<1x32x32xbf16> to vector<32x32xbf16>
    %15 = arith.truncf %12 : vector<32x128xf32> to vector<32x128xbf16>
    %cst_12 = arith.constant dense<0.000000e+00> : vector<32x128xf32>
    %16 = tpu.matmul %14, %15, %cst_12 {dimension_numbers = #tpu.dot_dimension_numbers<[1], [0], [0], [1], [0, 0, 1, 1], [], []>} : vector<32x32xbf16>, vector<32x128xbf16>, vector<32x128xf32> -> vector<32x128xf32>
    %17 = arith.addf %8, %16 : vector<32x128xf32>
    %c8_i32 = arith.constant 8 : i32
    %18 = tpu.dynamic_rotate %7 by %c8_i32 dim 1 : vector<32x128xf32>, i32 -> vector<32x128xf32>
    %c1 = arith.constant 1 : index
    %c0_13 = arith.constant 0 : index
    %19 = vector.load %arg2[%c1, %c0_13] : memref<9x128xf32, #tpu.memory_space<vmem>>, vector<1x128xf32>
    %20 = vector.broadcast %19 : vector<1x128xf32> to vector<32x128xf32>
    %21 = arith.mulf %18, %20 : vector<32x128xf32>
    %c1_14 = arith.constant 1 : index
    %c0_15 = arith.constant 0 : index
    %c0_16 = arith.constant 0 : index
    %22 = vector.load %arg5[%c1_14, %c0_15, %c0_16] : memref<9x32x32xbf16, #tpu.memory_space<vmem>>, vector<1x32x32xbf16>
    %23 = vector.shape_cast %22 : vector<1x32x32xbf16> to vector<32x32xbf16>
    %24 = arith.truncf %21 : vector<32x128xf32> to vector<32x128xbf16>
    %cst_17 = arith.constant dense<0.000000e+00> : vector<32x128xf32>
    %25 = tpu.matmul %23, %24, %cst_17 {dimension_numbers = #tpu.dot_dimension_numbers<[1], [0], [0], [1], [0, 0, 1, 1], [], []>} : vector<32x32xbf16>, vector<32x128xbf16>, vector<32x128xf32> -> vector<32x128xf32>
    %26 = arith.addf %17, %25 : vector<32x128xf32>
    %c7_i32 = arith.constant 7 : i32
    %27 = tpu.dynamic_rotate %7 by %c7_i32 dim 1 : vector<32x128xf32>, i32 -> vector<32x128xf32>
    %c2 = arith.constant 2 : index
    %c0_18 = arith.constant 0 : index
    %28 = vector.load %arg2[%c2, %c0_18] : memref<9x128xf32, #tpu.memory_space<vmem>>, vector<1x128xf32>
    %29 = vector.broadcast %28 : vector<1x128xf32> to vector<32x128xf32>
    %30 = arith.mulf %27, %29 : vector<32x128xf32>
    %c2_19 = arith.constant 2 : index
    %c0_20 = arith.constant 0 : index
    %c0_21 = arith.constant 0 : index
    %31 = vector.load %arg5[%c2_19, %c0_20, %c0_21] : memref<9x32x32xbf16, #tpu.memory_space<vmem>>, vector<1x32x32xbf16>
    %32 = vector.shape_cast %31 : vector<1x32x32xbf16> to vector<32x32xbf16>
    %33 = arith.truncf %30 : vector<32x128xf32> to vector<32x128xbf16>
    %cst_22 = arith.constant dense<0.000000e+00> : vector<32x128xf32>
    %34 = tpu.matmul %32, %33, %cst_22 {dimension_numbers = #tpu.dot_dimension_numbers<[1], [0], [0], [1], [0, 0, 1, 1], [], []>} : vector<32x32xbf16>, vector<32x128xbf16>, vector<32x128xf32> -> vector<32x128xf32>
    %35 = arith.addf %26, %34 : vector<32x128xf32>
    %c1_i32 = arith.constant 1 : i32
    %36 = tpu.dynamic_rotate %7 by %c1_i32 dim 1 : vector<32x128xf32>, i32 -> vector<32x128xf32>
    %c3 = arith.constant 3 : index
    %c0_23 = arith.constant 0 : index
    %37 = vector.load %arg2[%c3, %c0_23] : memref<9x128xf32, #tpu.memory_space<vmem>>, vector<1x128xf32>
    %38 = vector.broadcast %37 : vector<1x128xf32> to vector<32x128xf32>
    %39 = arith.mulf %36, %38 : vector<32x128xf32>
    %c3_24 = arith.constant 3 : index
    %c0_25 = arith.constant 0 : index
    %c0_26 = arith.constant 0 : index
    %40 = vector.load %arg5[%c3_24, %c0_25, %c0_26] : memref<9x32x32xbf16, #tpu.memory_space<vmem>>, vector<1x32x32xbf16>
    %41 = vector.shape_cast %40 : vector<1x32x32xbf16> to vector<32x32xbf16>
    %42 = arith.truncf %39 : vector<32x128xf32> to vector<32x128xbf16>
    %cst_27 = arith.constant dense<0.000000e+00> : vector<32x128xf32>
    %43 = tpu.matmul %41, %42, %cst_27 {dimension_numbers = #tpu.dot_dimension_numbers<[1], [0], [0], [1], [0, 0, 1, 1], [], []>} : vector<32x32xbf16>, vector<32x128xbf16>, vector<32x128xf32> -> vector<32x128xf32>
    %44 = arith.addf %35, %43 : vector<32x128xf32>
    %c4 = arith.constant 4 : index
    %c0_28 = arith.constant 0 : index
    %c0_29 = arith.constant 0 : index
    %45 = vector.load %arg5[%c4, %c0_28, %c0_29] : memref<9x32x32xbf16, #tpu.memory_space<vmem>>, vector<1x32x32xbf16>
    %46 = vector.shape_cast %45 : vector<1x32x32xbf16> to vector<32x32xbf16>
    %47 = arith.truncf %7 : vector<32x128xf32> to vector<32x128xbf16>
    %cst_30 = arith.constant dense<0.000000e+00> : vector<32x128xf32>
    %48 = tpu.matmul %46, %47, %cst_30 {dimension_numbers = #tpu.dot_dimension_numbers<[1], [0], [0], [1], [0, 0, 1, 1], [], []>} : vector<32x32xbf16>, vector<32x128xbf16>, vector<32x128xf32> -> vector<32x128xf32>
    %49 = arith.addf %44, %48 : vector<32x128xf32>
    %c127_i32 = arith.constant 127 : i32
    %50 = tpu.dynamic_rotate %7 by %c127_i32 dim 1 : vector<32x128xf32>, i32 -> vector<32x128xf32>
    %c5 = arith.constant 5 : index
    %c0_31 = arith.constant 0 : index
    %51 = vector.load %arg2[%c5, %c0_31] : memref<9x128xf32, #tpu.memory_space<vmem>>, vector<1x128xf32>
    %52 = vector.broadcast %51 : vector<1x128xf32> to vector<32x128xf32>
    %53 = arith.mulf %50, %52 : vector<32x128xf32>
    %c5_32 = arith.constant 5 : index
    %c0_33 = arith.constant 0 : index
    %c0_34 = arith.constant 0 : index
    %54 = vector.load %arg5[%c5_32, %c0_33, %c0_34] : memref<9x32x32xbf16, #tpu.memory_space<vmem>>, vector<1x32x32xbf16>
    %55 = vector.shape_cast %54 : vector<1x32x32xbf16> to vector<32x32xbf16>
    %56 = arith.truncf %53 : vector<32x128xf32> to vector<32x128xbf16>
    %cst_35 = arith.constant dense<0.000000e+00> : vector<32x128xf32>
    %57 = tpu.matmul %55, %56, %cst_35 {dimension_numbers = #tpu.dot_dimension_numbers<[1], [0], [0], [1], [0, 0, 1, 1], [], []>} : vector<32x32xbf16>, vector<32x128xbf16>, vector<32x128xf32> -> vector<32x128xf32>
    %58 = arith.addf %49, %57 : vector<32x128xf32>
    %c121_i32 = arith.constant 121 : i32
    %59 = tpu.dynamic_rotate %7 by %c121_i32 dim 1 : vector<32x128xf32>, i32 -> vector<32x128xf32>
    %c6 = arith.constant 6 : index
    %c0_36 = arith.constant 0 : index
    %60 = vector.load %arg2[%c6, %c0_36] : memref<9x128xf32, #tpu.memory_space<vmem>>, vector<1x128xf32>
    %61 = vector.broadcast %60 : vector<1x128xf32> to vector<32x128xf32>
    %62 = arith.mulf %59, %61 : vector<32x128xf32>
    %c6_37 = arith.constant 6 : index
    %c0_38 = arith.constant 0 : index
    %c0_39 = arith.constant 0 : index
    %63 = vector.load %arg5[%c6_37, %c0_38, %c0_39] : memref<9x32x32xbf16, #tpu.memory_space<vmem>>, vector<1x32x32xbf16>
    %64 = vector.shape_cast %63 : vector<1x32x32xbf16> to vector<32x32xbf16>
    %65 = arith.truncf %62 : vector<32x128xf32> to vector<32x128xbf16>
    %cst_40 = arith.constant dense<0.000000e+00> : vector<32x128xf32>
    %66 = tpu.matmul %64, %65, %cst_40 {dimension_numbers = #tpu.dot_dimension_numbers<[1], [0], [0], [1], [0, 0, 1, 1], [], []>} : vector<32x32xbf16>, vector<32x128xbf16>, vector<32x128xf32> -> vector<32x128xf32>
    %67 = arith.addf %58, %66 : vector<32x128xf32>
    %c120_i32 = arith.constant 120 : i32
    %68 = tpu.dynamic_rotate %7 by %c120_i32 dim 1 : vector<32x128xf32>, i32 -> vector<32x128xf32>
    %c7 = arith.constant 7 : index
    %c0_41 = arith.constant 0 : index
    %69 = vector.load %arg2[%c7, %c0_41] : memref<9x128xf32, #tpu.memory_space<vmem>>, vector<1x128xf32>
    %70 = vector.broadcast %69 : vector<1x128xf32> to vector<32x128xf32>
    %71 = arith.mulf %68, %70 : vector<32x128xf32>
    %c7_42 = arith.constant 7 : index
    %c0_43 = arith.constant 0 : index
    %c0_44 = arith.constant 0 : index
    %72 = vector.load %arg5[%c7_42, %c0_43, %c0_44] : memref<9x32x32xbf16, #tpu.memory_space<vmem>>, vector<1x32x32xbf16>
    %73 = vector.shape_cast %72 : vector<1x32x32xbf16> to vector<32x32xbf16>
    %74 = arith.truncf %71 : vector<32x128xf32> to vector<32x128xbf16>
    %cst_45 = arith.constant dense<0.000000e+00> : vector<32x128xf32>
    %75 = tpu.matmul %73, %74, %cst_45 {dimension_numbers = #tpu.dot_dimension_numbers<[1], [0], [0], [1], [0, 0, 1, 1], [], []>} : vector<32x32xbf16>, vector<32x128xbf16>, vector<32x128xf32> -> vector<32x128xf32>
    %76 = arith.addf %67, %75 : vector<32x128xf32>
    %c119_i32 = arith.constant 119 : i32
    %77 = tpu.dynamic_rotate %7 by %c119_i32 dim 1 : vector<32x128xf32>, i32 -> vector<32x128xf32>
    %c8 = arith.constant 8 : index
    %c0_46 = arith.constant 0 : index
    %78 = vector.load %arg2[%c8, %c0_46] : memref<9x128xf32, #tpu.memory_space<vmem>>, vector<1x128xf32>
    %79 = vector.broadcast %78 : vector<1x128xf32> to vector<32x128xf32>
    %80 = arith.mulf %77, %79 : vector<32x128xf32>
    %c8_47 = arith.constant 8 : index
    %c0_48 = arith.constant 0 : index
    %c0_49 = arith.constant 0 : index
    %81 = vector.load %arg5[%c8_47, %c0_48, %c0_49] : memref<9x32x32xbf16, #tpu.memory_space<vmem>>, vector<1x32x32xbf16>
    %82 = vector.shape_cast %81 : vector<1x32x32xbf16> to vector<32x32xbf16>
    %83 = arith.truncf %80 : vector<32x128xf32> to vector<32x128xbf16>
    %cst_50 = arith.constant dense<0.000000e+00> : vector<32x128xf32>
    %84 = tpu.matmul %82, %83, %cst_50 {dimension_numbers = #tpu.dot_dimension_numbers<[1], [0], [0], [1], [0, 0, 1, 1], [], []>} : vector<32x32xbf16>, vector<32x128xbf16>, vector<32x128xf32> -> vector<32x128xf32>
    %85 = arith.addf %76, %84 : vector<32x128xf32>
    %c0_51 = arith.constant 0 : index
    %c0_52 = arith.constant 0 : index
    %86 = vector.load %arg6[%c0_51, %c0_52] : memref<32x1xf32, #tpu.memory_space<vmem>>, vector<32x1xf32>
    %87 = vector.broadcast %86 : vector<32x1xf32> to vector<32x128xf32>
    %88 = arith.addf %85, %87 : vector<32x128xf32>
    %c0_53 = arith.constant 0 : index
    %c0_54 = arith.constant 0 : index
    %89 = vector.load %arg1[%c0_53, %c0_54] : memref<32x128xf32, #tpu.memory_space<vmem>>, vector<32x128xf32>
    %90 = arith.addf %88, %89 : vector<32x128xf32>
    %cst_55 = arith.constant 0.000000e+00 : f32
    %91 = vector.broadcast %cst_55 : f32 to vector<32x128xf32>
    %92 = arith.maximumf %90, %91 : vector<32x128xf32>
    %cst_56 = arith.constant 0.000000e+00 : f32
    %93 = vector.broadcast %cst_56 : f32 to vector<32x128xf32>
    %c9_i32_57 = arith.constant 9 : i32
    %94 = tpu.dynamic_rotate %92 by %c9_i32_57 dim 1 : vector<32x128xf32>, i32 -> vector<32x128xf32>
    %c0_58 = arith.constant 0 : index
    %c0_59 = arith.constant 0 : index
    %95 = vector.load %arg2[%c0_58, %c0_59] : memref<9x128xf32, #tpu.memory_space<vmem>>, vector<1x128xf32>
    %96 = vector.broadcast %95 : vector<1x128xf32> to vector<32x128xf32>
    %97 = arith.mulf %94, %96 : vector<32x128xf32>
    %c0_60 = arith.constant 0 : index
    %c0_61 = arith.constant 0 : index
    %c0_62 = arith.constant 0 : index
    %98 = vector.load %arg7[%c0_60, %c0_61, %c0_62] : memref<9x32x32xbf16, #tpu.memory_space<vmem>>, vector<1x32x32xbf16>
    %99 = vector.shape_cast %98 : vector<1x32x32xbf16> to vector<32x32xbf16>
    %100 = arith.truncf %97 : vector<32x128xf32> to vector<32x128xbf16>
    %cst_63 = arith.constant dense<0.000000e+00> : vector<32x128xf32>
    %101 = tpu.matmul %99, %100, %cst_63 {dimension_numbers = #tpu.dot_dimension_numbers<[1], [0], [0], [1], [0, 0, 1, 1], [], []>} : vector<32x32xbf16>, vector<32x128xbf16>, vector<32x128xf32> -> vector<32x128xf32>
    %102 = arith.addf %93, %101 : vector<32x128xf32>
    %c8_i32_64 = arith.constant 8 : i32
    %103 = tpu.dynamic_rotate %92 by %c8_i32_64 dim 1 : vector<32x128xf32>, i32 -> vector<32x128xf32>
    %c1_65 = arith.constant 1 : index
    %c0_66 = arith.constant 0 : index
    %104 = vector.load %arg2[%c1_65, %c0_66] : memref<9x128xf32, #tpu.memory_space<vmem>>, vector<1x128xf32>
    %105 = vector.broadcast %104 : vector<1x128xf32> to vector<32x128xf32>
    %106 = arith.mulf %103, %105 : vector<32x128xf32>
    %c1_67 = arith.constant 1 : index
    %c0_68 = arith.constant 0 : index
    %c0_69 = arith.constant 0 : index
    %107 = vector.load %arg7[%c1_67, %c0_68, %c0_69] : memref<9x32x32xbf16, #tpu.memory_space<vmem>>, vector<1x32x32xbf16>
    %108 = vector.shape_cast %107 : vector<1x32x32xbf16> to vector<32x32xbf16>
    %109 = arith.truncf %106 : vector<32x128xf32> to vector<32x128xbf16>
    %cst_70 = arith.constant dense<0.000000e+00> : vector<32x128xf32>
    %110 = tpu.matmul %108, %109, %cst_70 {dimension_numbers = #tpu.dot_dimension_numbers<[1], [0], [0], [1], [0, 0, 1, 1], [], []>} : vector<32x32xbf16>, vector<32x128xbf16>, vector<32x128xf32> -> vector<32x128xf32>
    %111 = arith.addf %102, %110 : vector<32x128xf32>
    %c7_i32_71 = arith.constant 7 : i32
    %112 = tpu.dynamic_rotate %92 by %c7_i32_71 dim 1 : vector<32x128xf32>, i32 -> vector<32x128xf32>
    %c2_72 = arith.constant 2 : index
    %c0_73 = arith.constant 0 : index
    %113 = vector.load %arg2[%c2_72, %c0_73] : memref<9x128xf32, #tpu.memory_space<vmem>>, vector<1x128xf32>
    %114 = vector.broadcast %113 : vector<1x128xf32> to vector<32x128xf32>
    %115 = arith.mulf %112, %114 : vector<32x128xf32>
    %c2_74 = arith.constant 2 : index
    %c0_75 = arith.constant 0 : index
    %c0_76 = arith.constant 0 : index
    %116 = vector.load %arg7[%c2_74, %c0_75, %c0_76] : memref<9x32x32xbf16, #tpu.memory_space<vmem>>, vector<1x32x32xbf16>
    %117 = vector.shape_cast %116 : vector<1x32x32xbf16> to vector<32x32xbf16>
    %118 = arith.truncf %115 : vector<32x128xf32> to vector<32x128xbf16>
    %cst_77 = arith.constant dense<0.000000e+00> : vector<32x128xf32>
    %119 = tpu.matmul %117, %118, %cst_77 {dimension_numbers = #tpu.dot_dimension_numbers<[1], [0], [0], [1], [0, 0, 1, 1], [], []>} : vector<32x32xbf16>, vector<32x128xbf16>, vector<32x128xf32> -> vector<32x128xf32>
    %120 = arith.addf %111, %119 : vector<32x128xf32>
    %c1_i32_78 = arith.constant 1 : i32
    %121 = tpu.dynamic_rotate %92 by %c1_i32_78 dim 1 : vector<32x128xf32>, i32 -> vector<32x128xf32>
    %c3_79 = arith.constant 3 : index
    %c0_80 = arith.constant 0 : index
    %122 = vector.load %arg2[%c3_79, %c0_80] : memref<9x128xf32, #tpu.memory_space<vmem>>, vector<1x128xf32>
    %123 = vector.broadcast %122 : vector<1x128xf32> to vector<32x128xf32>
    %124 = arith.mulf %121, %123 : vector<32x128xf32>
    %c3_81 = arith.constant 3 : index
    %c0_82 = arith.constant 0 : index
    %c0_83 = arith.constant 0 : index
    %125 = vector.load %arg7[%c3_81, %c0_82, %c0_83] : memref<9x32x32xbf16, #tpu.memory_space<vmem>>, vector<1x32x32xbf16>
    %126 = vector.shape_cast %125 : vector<1x32x32xbf16> to vector<32x32xbf16>
    %127 = arith.truncf %124 : vector<32x128xf32> to vector<32x128xbf16>
    %cst_84 = arith.constant dense<0.000000e+00> : vector<32x128xf32>
    %128 = tpu.matmul %126, %127, %cst_84 {dimension_numbers = #tpu.dot_dimension_numbers<[1], [0], [0], [1], [0, 0, 1, 1], [], []>} : vector<32x32xbf16>, vector<32x128xbf16>, vector<32x128xf32> -> vector<32x128xf32>
    %129 = arith.addf %120, %128 : vector<32x128xf32>
    %c4_85 = arith.constant 4 : index
    %c0_86 = arith.constant 0 : index
    %c0_87 = arith.constant 0 : index
    %130 = vector.load %arg7[%c4_85, %c0_86, %c0_87] : memref<9x32x32xbf16, #tpu.memory_space<vmem>>, vector<1x32x32xbf16>
    %131 = vector.shape_cast %130 : vector<1x32x32xbf16> to vector<32x32xbf16>
    %132 = arith.truncf %92 : vector<32x128xf32> to vector<32x128xbf16>
    %cst_88 = arith.constant dense<0.000000e+00> : vector<32x128xf32>
    %133 = tpu.matmul %131, %132, %cst_88 {dimension_numbers = #tpu.dot_dimension_numbers<[1], [0], [0], [1], [0, 0, 1, 1], [], []>} : vector<32x32xbf16>, vector<32x128xbf16>, vector<32x128xf32> -> vector<32x128xf32>
    %134 = arith.addf %129, %133 : vector<32x128xf32>
    %c127_i32_89 = arith.constant 127 : i32
    %135 = tpu.dynamic_rotate %92 by %c127_i32_89 dim 1 : vector<32x128xf32>, i32 -> vector<32x128xf32>
    %c5_90 = arith.constant 5 : index
    %c0_91 = arith.constant 0 : index
    %136 = vector.load %arg2[%c5_90, %c0_91] : memref<9x128xf32, #tpu.memory_space<vmem>>, vector<1x128xf32>
    %137 = vector.broadcast %136 : vector<1x128xf32> to vector<32x128xf32>
    %138 = arith.mulf %135, %137 : vector<32x128xf32>
    %c5_92 = arith.constant 5 : index
    %c0_93 = arith.constant 0 : index
    %c0_94 = arith.constant 0 : index
    %139 = vector.load %arg7[%c5_92, %c0_93, %c0_94] : memref<9x32x32xbf16, #tpu.memory_space<vmem>>, vector<1x32x32xbf16>
    %140 = vector.shape_cast %139 : vector<1x32x32xbf16> to vector<32x32xbf16>
    %141 = arith.truncf %138 : vector<32x128xf32> to vector<32x128xbf16>
    %cst_95 = arith.constant dense<0.000000e+00> : vector<32x128xf32>
    %142 = tpu.matmul %140, %141, %cst_95 {dimension_numbers = #tpu.dot_dimension_numbers<[1], [0], [0], [1], [0, 0, 1, 1], [], []>} : vector<32x32xbf16>, vector<32x128xbf16>, vector<32x128xf32> -> vector<32x128xf32>
    %143 = arith.addf %134, %142 : vector<32x128xf32>
    %c121_i32_96 = arith.constant 121 : i32
    %144 = tpu.dynamic_rotate %92 by %c121_i32_96 dim 1 : vector<32x128xf32>, i32 -> vector<32x128xf32>
    %c6_97 = arith.constant 6 : index
    %c0_98 = arith.constant 0 : index
    %145 = vector.load %arg2[%c6_97, %c0_98] : memref<9x128xf32, #tpu.memory_space<vmem>>, vector<1x128xf32>
    %146 = vector.broadcast %145 : vector<1x128xf32> to vector<32x128xf32>
    %147 = arith.mulf %144, %146 : vector<32x128xf32>
    %c6_99 = arith.constant 6 : index
    %c0_100 = arith.constant 0 : index
    %c0_101 = arith.constant 0 : index
    %148 = vector.load %arg7[%c6_99, %c0_100, %c0_101] : memref<9x32x32xbf16, #tpu.memory_space<vmem>>, vector<1x32x32xbf16>
    %149 = vector.shape_cast %148 : vector<1x32x32xbf16> to vector<32x32xbf16>
    %150 = arith.truncf %147 : vector<32x128xf32> to vector<32x128xbf16>
    %cst_102 = arith.constant dense<0.000000e+00> : vector<32x128xf32>
    %151 = tpu.matmul %149, %150, %cst_102 {dimension_numbers = #tpu.dot_dimension_numbers<[1], [0], [0], [1], [0, 0, 1, 1], [], []>} : vector<32x32xbf16>, vector<32x128xbf16>, vector<32x128xf32> -> vector<32x128xf32>
    %152 = arith.addf %143, %151 : vector<32x128xf32>
    %c120_i32_103 = arith.constant 120 : i32
    %153 = tpu.dynamic_rotate %92 by %c120_i32_103 dim 1 : vector<32x128xf32>, i32 -> vector<32x128xf32>
    %c7_104 = arith.constant 7 : index
    %c0_105 = arith.constant 0 : index
    %154 = vector.load %arg2[%c7_104, %c0_105] : memref<9x128xf32, #tpu.memory_space<vmem>>, vector<1x128xf32>
    %155 = vector.broadcast %154 : vector<1x128xf32> to vector<32x128xf32>
    %156 = arith.mulf %153, %155 : vector<32x128xf32>
    %c7_106 = arith.constant 7 : index
    %c0_107 = arith.constant 0 : index
    %c0_108 = arith.constant 0 : index
    %157 = vector.load %arg7[%c7_106, %c0_107, %c0_108] : memref<9x32x32xbf16, #tpu.memory_space<vmem>>, vector<1x32x32xbf16>
    %158 = vector.shape_cast %157 : vector<1x32x32xbf16> to vector<32x32xbf16>
    %159 = arith.truncf %156 : vector<32x128xf32> to vector<32x128xbf16>
    %cst_109 = arith.constant dense<0.000000e+00> : vector<32x128xf32>
    %160 = tpu.matmul %158, %159, %cst_109 {dimension_numbers = #tpu.dot_dimension_numbers<[1], [0], [0], [1], [0, 0, 1, 1], [], []>} : vector<32x32xbf16>, vector<32x128xbf16>, vector<32x128xf32> -> vector<32x128xf32>
    %161 = arith.addf %152, %160 : vector<32x128xf32>
    %c119_i32_110 = arith.constant 119 : i32
    %162 = tpu.dynamic_rotate %92 by %c119_i32_110 dim 1 : vector<32x128xf32>, i32 -> vector<32x128xf32>
    %c8_111 = arith.constant 8 : index
    %c0_112 = arith.constant 0 : index
    %163 = vector.load %arg2[%c8_111, %c0_112] : memref<9x128xf32, #tpu.memory_space<vmem>>, vector<1x128xf32>
    %164 = vector.broadcast %163 : vector<1x128xf32> to vector<32x128xf32>
    %165 = arith.mulf %162, %164 : vector<32x128xf32>
    %c8_113 = arith.constant 8 : index
    %c0_114 = arith.constant 0 : index
    %c0_115 = arith.constant 0 : index
    %166 = vector.load %arg7[%c8_113, %c0_114, %c0_115] : memref<9x32x32xbf16, #tpu.memory_space<vmem>>, vector<1x32x32xbf16>
    %167 = vector.shape_cast %166 : vector<1x32x32xbf16> to vector<32x32xbf16>
    %168 = arith.truncf %165 : vector<32x128xf32> to vector<32x128xbf16>
    %cst_116 = arith.constant dense<0.000000e+00> : vector<32x128xf32>
    %169 = tpu.matmul %167, %168, %cst_116 {dimension_numbers = #tpu.dot_dimension_numbers<[1], [0], [0], [1], [0, 0, 1, 1], [], []>} : vector<32x32xbf16>, vector<32x128xbf16>, vector<32x128xf32> -> vector<32x128xf32>
    %170 = arith.addf %161, %169 : vector<32x128xf32>
    %c0_117 = arith.constant 0 : index
    %c0_118 = arith.constant 0 : index
    %171 = vector.load %arg8[%c0_117, %c0_118] : memref<32x1xf32, #tpu.memory_space<vmem>>, vector<32x1xf32>
    %172 = vector.broadcast %171 : vector<32x1xf32> to vector<32x128xf32>
    %173 = arith.addf %170, %172 : vector<32x128xf32>
    %cst_119 = arith.constant 0.000000e+00 : f32
    %174 = vector.broadcast %cst_119 : f32 to vector<32x128xf32>
    %175 = arith.maximumf %173, %174 : vector<32x128xf32>
    %cst_120 = arith.constant 0.000000e+00 : f32
    %176 = vector.broadcast %cst_120 : f32 to vector<32x128xf32>
    %c9_i32_121 = arith.constant 9 : i32
    %177 = tpu.dynamic_rotate %175 by %c9_i32_121 dim 1 : vector<32x128xf32>, i32 -> vector<32x128xf32>
    %c0_122 = arith.constant 0 : index
    %c0_123 = arith.constant 0 : index
    %178 = vector.load %arg2[%c0_122, %c0_123] : memref<9x128xf32, #tpu.memory_space<vmem>>, vector<1x128xf32>
    %179 = vector.broadcast %178 : vector<1x128xf32> to vector<32x128xf32>
    %180 = arith.mulf %177, %179 : vector<32x128xf32>
    %c0_124 = arith.constant 0 : index
    %c0_125 = arith.constant 0 : index
    %c0_126 = arith.constant 0 : index
    %181 = vector.load %arg9[%c0_124, %c0_125, %c0_126] : memref<9x32x32xbf16, #tpu.memory_space<vmem>>, vector<1x32x32xbf16>
    %182 = vector.shape_cast %181 : vector<1x32x32xbf16> to vector<32x32xbf16>
    %183 = arith.truncf %180 : vector<32x128xf32> to vector<32x128xbf16>
    %cst_127 = arith.constant dense<0.000000e+00> : vector<32x128xf32>
    %184 = tpu.matmul %182, %183, %cst_127 {dimension_numbers = #tpu.dot_dimension_numbers<[1], [0], [0], [1], [0, 0, 1, 1], [], []>} : vector<32x32xbf16>, vector<32x128xbf16>, vector<32x128xf32> -> vector<32x128xf32>
    %185 = arith.addf %176, %184 : vector<32x128xf32>
    %c8_i32_128 = arith.constant 8 : i32
    %186 = tpu.dynamic_rotate %175 by %c8_i32_128 dim 1 : vector<32x128xf32>, i32 -> vector<32x128xf32>
    %c1_129 = arith.constant 1 : index
    %c0_130 = arith.constant 0 : index
    %187 = vector.load %arg2[%c1_129, %c0_130] : memref<9x128xf32, #tpu.memory_space<vmem>>, vector<1x128xf32>
    %188 = vector.broadcast %187 : vector<1x128xf32> to vector<32x128xf32>
    %189 = arith.mulf %186, %188 : vector<32x128xf32>
    %c1_131 = arith.constant 1 : index
    %c0_132 = arith.constant 0 : index
    %c0_133 = arith.constant 0 : index
    %190 = vector.load %arg9[%c1_131, %c0_132, %c0_133] : memref<9x32x32xbf16, #tpu.memory_space<vmem>>, vector<1x32x32xbf16>
    %191 = vector.shape_cast %190 : vector<1x32x32xbf16> to vector<32x32xbf16>
    %192 = arith.truncf %189 : vector<32x128xf32> to vector<32x128xbf16>
    %cst_134 = arith.constant dense<0.000000e+00> : vector<32x128xf32>
    %193 = tpu.matmul %191, %192, %cst_134 {dimension_numbers = #tpu.dot_dimension_numbers<[1], [0], [0], [1], [0, 0, 1, 1], [], []>} : vector<32x32xbf16>, vector<32x128xbf16>, vector<32x128xf32> -> vector<32x128xf32>
    %194 = arith.addf %185, %193 : vector<32x128xf32>
    %c7_i32_135 = arith.constant 7 : i32
    %195 = tpu.dynamic_rotate %175 by %c7_i32_135 dim 1 : vector<32x128xf32>, i32 -> vector<32x128xf32>
    %c2_136 = arith.constant 2 : index
    %c0_137 = arith.constant 0 : index
    %196 = vector.load %arg2[%c2_136, %c0_137] : memref<9x128xf32, #tpu.memory_space<vmem>>, vector<1x128xf32>
    %197 = vector.broadcast %196 : vector<1x128xf32> to vector<32x128xf32>
    %198 = arith.mulf %195, %197 : vector<32x128xf32>
    %c2_138 = arith.constant 2 : index
    %c0_139 = arith.constant 0 : index
    %c0_140 = arith.constant 0 : index
    %199 = vector.load %arg9[%c2_138, %c0_139, %c0_140] : memref<9x32x32xbf16, #tpu.memory_space<vmem>>, vector<1x32x32xbf16>
    %200 = vector.shape_cast %199 : vector<1x32x32xbf16> to vector<32x32xbf16>
    %201 = arith.truncf %198 : vector<32x128xf32> to vector<32x128xbf16>
    %cst_141 = arith.constant dense<0.000000e+00> : vector<32x128xf32>
    %202 = tpu.matmul %200, %201, %cst_141 {dimension_numbers = #tpu.dot_dimension_numbers<[1], [0], [0], [1], [0, 0, 1, 1], [], []>} : vector<32x32xbf16>, vector<32x128xbf16>, vector<32x128xf32> -> vector<32x128xf32>
    %203 = arith.addf %194, %202 : vector<32x128xf32>
    %c1_i32_142 = arith.constant 1 : i32
    %204 = tpu.dynamic_rotate %175 by %c1_i32_142 dim 1 : vector<32x128xf32>, i32 -> vector<32x128xf32>
    %c3_143 = arith.constant 3 : index
    %c0_144 = arith.constant 0 : index
    %205 = vector.load %arg2[%c3_143, %c0_144] : memref<9x128xf32, #tpu.memory_space<vmem>>, vector<1x128xf32>
    %206 = vector.broadcast %205 : vector<1x128xf32> to vector<32x128xf32>
    %207 = arith.mulf %204, %206 : vector<32x128xf32>
    %c3_145 = arith.constant 3 : index
    %c0_146 = arith.constant 0 : index
    %c0_147 = arith.constant 0 : index
    %208 = vector.load %arg9[%c3_145, %c0_146, %c0_147] : memref<9x32x32xbf16, #tpu.memory_space<vmem>>, vector<1x32x32xbf16>
    %209 = vector.shape_cast %208 : vector<1x32x32xbf16> to vector<32x32xbf16>
    %210 = arith.truncf %207 : vector<32x128xf32> to vector<32x128xbf16>
    %cst_148 = arith.constant dense<0.000000e+00> : vector<32x128xf32>
    %211 = tpu.matmul %209, %210, %cst_148 {dimension_numbers = #tpu.dot_dimension_numbers<[1], [0], [0], [1], [0, 0, 1, 1], [], []>} : vector<32x32xbf16>, vector<32x128xbf16>, vector<32x128xf32> -> vector<32x128xf32>
    %212 = arith.addf %203, %211 : vector<32x128xf32>
    %c4_149 = arith.constant 4 : index
    %c0_150 = arith.constant 0 : index
    %c0_151 = arith.constant 0 : index
    %213 = vector.load %arg9[%c4_149, %c0_150, %c0_151] : memref<9x32x32xbf16, #tpu.memory_space<vmem>>, vector<1x32x32xbf16>
    %214 = vector.shape_cast %213 : vector<1x32x32xbf16> to vector<32x32xbf16>
    %215 = arith.truncf %175 : vector<32x128xf32> to vector<32x128xbf16>
    %cst_152 = arith.constant dense<0.000000e+00> : vector<32x128xf32>
    %216 = tpu.matmul %214, %215, %cst_152 {dimension_numbers = #tpu.dot_dimension_numbers<[1], [0], [0], [1], [0, 0, 1, 1], [], []>} : vector<32x32xbf16>, vector<32x128xbf16>, vector<32x128xf32> -> vector<32x128xf32>
    %217 = arith.addf %212, %216 : vector<32x128xf32>
    %c127_i32_153 = arith.constant 127 : i32
    %218 = tpu.dynamic_rotate %175 by %c127_i32_153 dim 1 : vector<32x128xf32>, i32 -> vector<32x128xf32>
    %c5_154 = arith.constant 5 : index
    %c0_155 = arith.constant 0 : index
    %219 = vector.load %arg2[%c5_154, %c0_155] : memref<9x128xf32, #tpu.memory_space<vmem>>, vector<1x128xf32>
    %220 = vector.broadcast %219 : vector<1x128xf32> to vector<32x128xf32>
    %221 = arith.mulf %218, %220 : vector<32x128xf32>
    %c5_156 = arith.constant 5 : index
    %c0_157 = arith.constant 0 : index
    %c0_158 = arith.constant 0 : index
    %222 = vector.load %arg9[%c5_156, %c0_157, %c0_158] : memref<9x32x32xbf16, #tpu.memory_space<vmem>>, vector<1x32x32xbf16>
    %223 = vector.shape_cast %222 : vector<1x32x32xbf16> to vector<32x32xbf16>
    %224 = arith.truncf %221 : vector<32x128xf32> to vector<32x128xbf16>
    %cst_159 = arith.constant dense<0.000000e+00> : vector<32x128xf32>
    %225 = tpu.matmul %223, %224, %cst_159 {dimension_numbers = #tpu.dot_dimension_numbers<[1], [0], [0], [1], [0, 0, 1, 1], [], []>} : vector<32x32xbf16>, vector<32x128xbf16>, vector<32x128xf32> -> vector<32x128xf32>
    %226 = arith.addf %217, %225 : vector<32x128xf32>
    %c121_i32_160 = arith.constant 121 : i32
    %227 = tpu.dynamic_rotate %175 by %c121_i32_160 dim 1 : vector<32x128xf32>, i32 -> vector<32x128xf32>
    %c6_161 = arith.constant 6 : index
    %c0_162 = arith.constant 0 : index
    %228 = vector.load %arg2[%c6_161, %c0_162] : memref<9x128xf32, #tpu.memory_space<vmem>>, vector<1x128xf32>
    %229 = vector.broadcast %228 : vector<1x128xf32> to vector<32x128xf32>
    %230 = arith.mulf %227, %229 : vector<32x128xf32>
    %c6_163 = arith.constant 6 : index
    %c0_164 = arith.constant 0 : index
    %c0_165 = arith.constant 0 : index
    %231 = vector.load %arg9[%c6_163, %c0_164, %c0_165] : memref<9x32x32xbf16, #tpu.memory_space<vmem>>, vector<1x32x32xbf16>
    %232 = vector.shape_cast %231 : vector<1x32x32xbf16> to vector<32x32xbf16>
    %233 = arith.truncf %230 : vector<32x128xf32> to vector<32x128xbf16>
    %cst_166 = arith.constant dense<0.000000e+00> : vector<32x128xf32>
    %234 = tpu.matmul %232, %233, %cst_166 {dimension_numbers = #tpu.dot_dimension_numbers<[1], [0], [0], [1], [0, 0, 1, 1], [], []>} : vector<32x32xbf16>, vector<32x128xbf16>, vector<32x128xf32> -> vector<32x128xf32>
    %235 = arith.addf %226, %234 : vector<32x128xf32>
    %c120_i32_167 = arith.constant 120 : i32
    %236 = tpu.dynamic_rotate %175 by %c120_i32_167 dim 1 : vector<32x128xf32>, i32 -> vector<32x128xf32>
    %c7_168 = arith.constant 7 : index
    %c0_169 = arith.constant 0 : index
    %237 = vector.load %arg2[%c7_168, %c0_169] : memref<9x128xf32, #tpu.memory_space<vmem>>, vector<1x128xf32>
    %238 = vector.broadcast %237 : vector<1x128xf32> to vector<32x128xf32>
    %239 = arith.mulf %236, %238 : vector<32x128xf32>
    %c7_170 = arith.constant 7 : index
    %c0_171 = arith.constant 0 : index
    %c0_172 = arith.constant 0 : index
    %240 = vector.load %arg9[%c7_170, %c0_171, %c0_172] : memref<9x32x32xbf16, #tpu.memory_space<vmem>>, vector<1x32x32xbf16>
    %241 = vector.shape_cast %240 : vector<1x32x32xbf16> to vector<32x32xbf16>
    %242 = arith.truncf %239 : vector<32x128xf32> to vector<32x128xbf16>
    %cst_173 = arith.constant dense<0.000000e+00> : vector<32x128xf32>
    %243 = tpu.matmul %241, %242, %cst_173 {dimension_numbers = #tpu.dot_dimension_numbers<[1], [0], [0], [1], [0, 0, 1, 1], [], []>} : vector<32x32xbf16>, vector<32x128xbf16>, vector<32x128xf32> -> vector<32x128xf32>
    %244 = arith.addf %235, %243 : vector<32x128xf32>
    %c119_i32_174 = arith.constant 119 : i32
    %245 = tpu.dynamic_rotate %175 by %c119_i32_174 dim 1 : vector<32x128xf32>, i32 -> vector<32x128xf32>
    %c8_175 = arith.constant 8 : index
    %c0_176 = arith.constant 0 : index
    %246 = vector.load %arg2[%c8_175, %c0_176] : memref<9x128xf32, #tpu.memory_space<vmem>>, vector<1x128xf32>
    %247 = vector.broadcast %246 : vector<1x128xf32> to vector<32x128xf32>
    %248 = arith.mulf %245, %247 : vector<32x128xf32>
    %c8_177 = arith.constant 8 : index
    %c0_178 = arith.constant 0 : index
    %c0_179 = arith.constant 0 : index
    %249 = vector.load %arg9[%c8_177, %c0_178, %c0_179] : memref<9x32x32xbf16, #tpu.memory_space<vmem>>, vector<1x32x32xbf16>
    %250 = vector.shape_cast %249 : vector<1x32x32xbf16> to vector<32x32xbf16>
    %251 = arith.truncf %248 : vector<32x128xf32> to vector<32x128xbf16>
    %cst_180 = arith.constant dense<0.000000e+00> : vector<32x128xf32>
    %252 = tpu.matmul %250, %251, %cst_180 {dimension_numbers = #tpu.dot_dimension_numbers<[1], [0], [0], [1], [0, 0, 1, 1], [], []>} : vector<32x32xbf16>, vector<32x128xbf16>, vector<32x128xf32> -> vector<32x128xf32>
    %253 = arith.addf %244, %252 : vector<32x128xf32>
    %c0_181 = arith.constant 0 : index
    %c0_182 = arith.constant 0 : index
    %254 = vector.load %arg10[%c0_181, %c0_182] : memref<32x1xf32, #tpu.memory_space<vmem>>, vector<32x1xf32>
    %255 = vector.broadcast %254 : vector<32x1xf32> to vector<32x128xf32>
    %256 = arith.addf %253, %255 : vector<32x128xf32>
    %257 = arith.addf %256, %92 : vector<32x128xf32>
    %c0_183 = arith.constant 0 : index
    %c0_184 = arith.constant 0 : index
    %258 = vector.load %arg11[%c0_183, %c0_184] : memref<32x128xf32, #tpu.memory_space<vmem>>, vector<32x128xf32>
    tpu.vector_store %arg11[%c0_183, %c0_184], %257 {strides = array<i32>} : memref<32x128xf32, #tpu.memory_space<vmem>>, vector<32x128xf32>,
    return
  }
}

module attributes {stable_mosaic.version = 11 : i64} {
  func.func @_down_layer_kernel(%arg0: memref<288x32xbf16, #tpu.memory_space<vmem>>, %arg1: memref<64x32xf32, #tpu.memory_space<vmem>>, %arg2: memref<9x32xf32, #tpu.memory_space<vmem>>, %arg3: memref<64x288xbf16, #tpu.memory_space<vmem>>, %arg4: memref<64x1xf32, #tpu.memory_space<vmem>>, %arg5: memref<9x64x64xbf16, #tpu.memory_space<vmem>>, %arg6: memref<64x1xf32, #tpu.memory_space<vmem>>, %arg7: memref<9x64x64xbf16, #tpu.memory_space<vmem>>, %arg8: memref<64x1xf32, #tpu.memory_space<vmem>>, %arg9: memref<9x64x64xbf16, #tpu.memory_space<vmem>>, %arg10: memref<64x1xf32, #tpu.memory_space<vmem>>, %arg11: memref<64x32xf32, #tpu.memory_space<vmem>>) attributes {dimension_semantics = [], scalar_prefetch = 0 : i64, scratch_operands = 0 : i64, tpu.core_type = #tpu.core_type<tc>} {
    %c0 = arith.constant 0 : index
    %c0_0 = arith.constant 0 : index
    %0 = vector.load %arg3[%c0, %c0_0] : memref<64x288xbf16, #tpu.memory_space<vmem>>, vector<64x288xbf16>
    %c0_1 = arith.constant 0 : index
    %c0_2 = arith.constant 0 : index
    %1 = vector.load %arg0[%c0_1, %c0_2] : memref<288x32xbf16, #tpu.memory_space<vmem>>, vector<288x32xbf16>
    %cst = arith.constant dense<0.000000e+00> : vector<64x32xf32>
    %2 = tpu.matmul %0, %1, %cst {dimension_numbers = #tpu.dot_dimension_numbers<[1], [0], [0], [1], [0, 0, 1, 1], [], []>} : vector<64x288xbf16>, vector<288x32xbf16>, vector<64x32xf32> -> vector<64x32xf32>
    %c0_3 = arith.constant 0 : index
    %c0_4 = arith.constant 0 : index
    %3 = vector.load %arg4[%c0_3, %c0_4] : memref<64x1xf32, #tpu.memory_space<vmem>>, vector<64x1xf32>
    %4 = vector.broadcast %3 : vector<64x1xf32> to vector<64x32xf32>
    %5 = arith.addf %2, %4 : vector<64x32xf32>
    %cst_5 = arith.constant 0.000000e+00 : f32
    %6 = vector.broadcast %cst_5 : f32 to vector<64x32xf32>
    %7 = arith.maximumf %5, %6 : vector<64x32xf32>
    %cst_6 = arith.constant 0.000000e+00 : f32
    %8 = vector.broadcast %cst_6 : f32 to vector<64x32xf32>
    %c5_i32 = arith.constant 5 : i32
    %9 = tpu.dynamic_rotate %7 by %c5_i32 dim 1 : vector<64x32xf32>, i32 -> vector<64x32xf32>
    %c0_7 = arith.constant 0 : index
    %c0_8 = arith.constant 0 : index
    %10 = vector.load %arg2[%c0_7, %c0_8] : memref<9x32xf32, #tpu.memory_space<vmem>>, vector<1x32xf32>
    %11 = vector.broadcast %10 : vector<1x32xf32> to vector<64x32xf32>
    %12 = arith.mulf %9, %11 : vector<64x32xf32>
    %c0_9 = arith.constant 0 : index
    %c0_10 = arith.constant 0 : index
    %c0_11 = arith.constant 0 : index
    %13 = vector.load %arg5[%c0_9, %c0_10, %c0_11] : memref<9x64x64xbf16, #tpu.memory_space<vmem>>, vector<1x64x64xbf16>
    %14 = vector.shape_cast %13 : vector<1x64x64xbf16> to vector<64x64xbf16>
    %15 = arith.truncf %12 : vector<64x32xf32> to vector<64x32xbf16>
    %cst_12 = arith.constant dense<0.000000e+00> : vector<64x32xf32>
    %16 = tpu.matmul %14, %15, %cst_12 {dimension_numbers = #tpu.dot_dimension_numbers<[1], [0], [0], [1], [0, 0, 1, 1], [], []>} : vector<64x64xbf16>, vector<64x32xbf16>, vector<64x32xf32> -> vector<64x32xf32>
    %17 = arith.addf %8, %16 : vector<64x32xf32>
    %c4_i32 = arith.constant 4 : i32
    %18 = tpu.dynamic_rotate %7 by %c4_i32 dim 1 : vector<64x32xf32>, i32 -> vector<64x32xf32>
    %c1 = arith.constant 1 : index
    %c0_13 = arith.constant 0 : index
    %19 = vector.load %arg2[%c1, %c0_13] : memref<9x32xf32, #tpu.memory_space<vmem>>, vector<1x32xf32>
    %20 = vector.broadcast %19 : vector<1x32xf32> to vector<64x32xf32>
    %21 = arith.mulf %18, %20 : vector<64x32xf32>
    %c1_14 = arith.constant 1 : index
    %c0_15 = arith.constant 0 : index
    %c0_16 = arith.constant 0 : index
    %22 = vector.load %arg5[%c1_14, %c0_15, %c0_16] : memref<9x64x64xbf16, #tpu.memory_space<vmem>>, vector<1x64x64xbf16>
    %23 = vector.shape_cast %22 : vector<1x64x64xbf16> to vector<64x64xbf16>
    %24 = arith.truncf %21 : vector<64x32xf32> to vector<64x32xbf16>
    %cst_17 = arith.constant dense<0.000000e+00> : vector<64x32xf32>
    %25 = tpu.matmul %23, %24, %cst_17 {dimension_numbers = #tpu.dot_dimension_numbers<[1], [0], [0], [1], [0, 0, 1, 1], [], []>} : vector<64x64xbf16>, vector<64x32xbf16>, vector<64x32xf32> -> vector<64x32xf32>
    %26 = arith.addf %17, %25 : vector<64x32xf32>
    %c3_i32 = arith.constant 3 : i32
    %27 = tpu.dynamic_rotate %7 by %c3_i32 dim 1 : vector<64x32xf32>, i32 -> vector<64x32xf32>
    %c2 = arith.constant 2 : index
    %c0_18 = arith.constant 0 : index
    %28 = vector.load %arg2[%c2, %c0_18] : memref<9x32xf32, #tpu.memory_space<vmem>>, vector<1x32xf32>
    %29 = vector.broadcast %28 : vector<1x32xf32> to vector<64x32xf32>
    %30 = arith.mulf %27, %29 : vector<64x32xf32>
    %c2_19 = arith.constant 2 : index
    %c0_20 = arith.constant 0 : index
    %c0_21 = arith.constant 0 : index
    %31 = vector.load %arg5[%c2_19, %c0_20, %c0_21] : memref<9x64x64xbf16, #tpu.memory_space<vmem>>, vector<1x64x64xbf16>
    %32 = vector.shape_cast %31 : vector<1x64x64xbf16> to vector<64x64xbf16>
    %33 = arith.truncf %30 : vector<64x32xf32> to vector<64x32xbf16>
    %cst_22 = arith.constant dense<0.000000e+00> : vector<64x32xf32>
    %34 = tpu.matmul %32, %33, %cst_22 {dimension_numbers = #tpu.dot_dimension_numbers<[1], [0], [0], [1], [0, 0, 1, 1], [], []>} : vector<64x64xbf16>, vector<64x32xbf16>, vector<64x32xf32> -> vector<64x32xf32>
    %35 = arith.addf %26, %34 : vector<64x32xf32>
    %c1_i32 = arith.constant 1 : i32
    %36 = tpu.dynamic_rotate %7 by %c1_i32 dim 1 : vector<64x32xf32>, i32 -> vector<64x32xf32>
    %c3 = arith.constant 3 : index
    %c0_23 = arith.constant 0 : index
    %37 = vector.load %arg2[%c3, %c0_23] : memref<9x32xf32, #tpu.memory_space<vmem>>, vector<1x32xf32>
    %38 = vector.broadcast %37 : vector<1x32xf32> to vector<64x32xf32>
    %39 = arith.mulf %36, %38 : vector<64x32xf32>
    %c3_24 = arith.constant 3 : index
    %c0_25 = arith.constant 0 : index
    %c0_26 = arith.constant 0 : index
    %40 = vector.load %arg5[%c3_24, %c0_25, %c0_26] : memref<9x64x64xbf16, #tpu.memory_space<vmem>>, vector<1x64x64xbf16>
    %41 = vector.shape_cast %40 : vector<1x64x64xbf16> to vector<64x64xbf16>
    %42 = arith.truncf %39 : vector<64x32xf32> to vector<64x32xbf16>
    %cst_27 = arith.constant dense<0.000000e+00> : vector<64x32xf32>
    %43 = tpu.matmul %41, %42, %cst_27 {dimension_numbers = #tpu.dot_dimension_numbers<[1], [0], [0], [1], [0, 0, 1, 1], [], []>} : vector<64x64xbf16>, vector<64x32xbf16>, vector<64x32xf32> -> vector<64x32xf32>
    %44 = arith.addf %35, %43 : vector<64x32xf32>
    %c4 = arith.constant 4 : index
    %c0_28 = arith.constant 0 : index
    %c0_29 = arith.constant 0 : index
    %45 = vector.load %arg5[%c4, %c0_28, %c0_29] : memref<9x64x64xbf16, #tpu.memory_space<vmem>>, vector<1x64x64xbf16>
    %46 = vector.shape_cast %45 : vector<1x64x64xbf16> to vector<64x64xbf16>
    %47 = arith.truncf %7 : vector<64x32xf32> to vector<64x32xbf16>
    %cst_30 = arith.constant dense<0.000000e+00> : vector<64x32xf32>
    %48 = tpu.matmul %46, %47, %cst_30 {dimension_numbers = #tpu.dot_dimension_numbers<[1], [0], [0], [1], [0, 0, 1, 1], [], []>} : vector<64x64xbf16>, vector<64x32xbf16>, vector<64x32xf32> -> vector<64x32xf32>
    %49 = arith.addf %44, %48 : vector<64x32xf32>
    %c31_i32 = arith.constant 31 : i32
    %50 = tpu.dynamic_rotate %7 by %c31_i32 dim 1 : vector<64x32xf32>, i32 -> vector<64x32xf32>
    %c5 = arith.constant 5 : index
    %c0_31 = arith.constant 0 : index
    %51 = vector.load %arg2[%c5, %c0_31] : memref<9x32xf32, #tpu.memory_space<vmem>>, vector<1x32xf32>
    %52 = vector.broadcast %51 : vector<1x32xf32> to vector<64x32xf32>
    %53 = arith.mulf %50, %52 : vector<64x32xf32>
    %c5_32 = arith.constant 5 : index
    %c0_33 = arith.constant 0 : index
    %c0_34 = arith.constant 0 : index
    %54 = vector.load %arg5[%c5_32, %c0_33, %c0_34] : memref<9x64x64xbf16, #tpu.memory_space<vmem>>, vector<1x64x64xbf16>
    %55 = vector.shape_cast %54 : vector<1x64x64xbf16> to vector<64x64xbf16>
    %56 = arith.truncf %53 : vector<64x32xf32> to vector<64x32xbf16>
    %cst_35 = arith.constant dense<0.000000e+00> : vector<64x32xf32>
    %57 = tpu.matmul %55, %56, %cst_35 {dimension_numbers = #tpu.dot_dimension_numbers<[1], [0], [0], [1], [0, 0, 1, 1], [], []>} : vector<64x64xbf16>, vector<64x32xbf16>, vector<64x32xf32> -> vector<64x32xf32>
    %58 = arith.addf %49, %57 : vector<64x32xf32>
    %c29_i32 = arith.constant 29 : i32
    %59 = tpu.dynamic_rotate %7 by %c29_i32 dim 1 : vector<64x32xf32>, i32 -> vector<64x32xf32>
    %c6 = arith.constant 6 : index
    %c0_36 = arith.constant 0 : index
    %60 = vector.load %arg2[%c6, %c0_36] : memref<9x32xf32, #tpu.memory_space<vmem>>, vector<1x32xf32>
    %61 = vector.broadcast %60 : vector<1x32xf32> to vector<64x32xf32>
    %62 = arith.mulf %59, %61 : vector<64x32xf32>
    %c6_37 = arith.constant 6 : index
    %c0_38 = arith.constant 0 : index
    %c0_39 = arith.constant 0 : index
    %63 = vector.load %arg5[%c6_37, %c0_38, %c0_39] : memref<9x64x64xbf16, #tpu.memory_space<vmem>>, vector<1x64x64xbf16>
    %64 = vector.shape_cast %63 : vector<1x64x64xbf16> to vector<64x64xbf16>
    %65 = arith.truncf %62 : vector<64x32xf32> to vector<64x32xbf16>
    %cst_40 = arith.constant dense<0.000000e+00> : vector<64x32xf32>
    %66 = tpu.matmul %64, %65, %cst_40 {dimension_numbers = #tpu.dot_dimension_numbers<[1], [0], [0], [1], [0, 0, 1, 1], [], []>} : vector<64x64xbf16>, vector<64x32xbf16>, vector<64x32xf32> -> vector<64x32xf32>
    %67 = arith.addf %58, %66 : vector<64x32xf32>
    %c28_i32 = arith.constant 28 : i32
    %68 = tpu.dynamic_rotate %7 by %c28_i32 dim 1 : vector<64x32xf32>, i32 -> vector<64x32xf32>
    %c7 = arith.constant 7 : index
    %c0_41 = arith.constant 0 : index
    %69 = vector.load %arg2[%c7, %c0_41] : memref<9x32xf32, #tpu.memory_space<vmem>>, vector<1x32xf32>
    %70 = vector.broadcast %69 : vector<1x32xf32> to vector<64x32xf32>
    %71 = arith.mulf %68, %70 : vector<64x32xf32>
    %c7_42 = arith.constant 7 : index
    %c0_43 = arith.constant 0 : index
    %c0_44 = arith.constant 0 : index
    %72 = vector.load %arg5[%c7_42, %c0_43, %c0_44] : memref<9x64x64xbf16, #tpu.memory_space<vmem>>, vector<1x64x64xbf16>
    %73 = vector.shape_cast %72 : vector<1x64x64xbf16> to vector<64x64xbf16>
    %74 = arith.truncf %71 : vector<64x32xf32> to vector<64x32xbf16>
    %cst_45 = arith.constant dense<0.000000e+00> : vector<64x32xf32>
    %75 = tpu.matmul %73, %74, %cst_45 {dimension_numbers = #tpu.dot_dimension_numbers<[1], [0], [0], [1], [0, 0, 1, 1], [], []>} : vector<64x64xbf16>, vector<64x32xbf16>, vector<64x32xf32> -> vector<64x32xf32>
    %76 = arith.addf %67, %75 : vector<64x32xf32>
    %c27_i32 = arith.constant 27 : i32
    %77 = tpu.dynamic_rotate %7 by %c27_i32 dim 1 : vector<64x32xf32>, i32 -> vector<64x32xf32>
    %c8 = arith.constant 8 : index
    %c0_46 = arith.constant 0 : index
    %78 = vector.load %arg2[%c8, %c0_46] : memref<9x32xf32, #tpu.memory_space<vmem>>, vector<1x32xf32>
    %79 = vector.broadcast %78 : vector<1x32xf32> to vector<64x32xf32>
    %80 = arith.mulf %77, %79 : vector<64x32xf32>
    %c8_47 = arith.constant 8 : index
    %c0_48 = arith.constant 0 : index
    %c0_49 = arith.constant 0 : index
    %81 = vector.load %arg5[%c8_47, %c0_48, %c0_49] : memref<9x64x64xbf16, #tpu.memory_space<vmem>>, vector<1x64x64xbf16>
    %82 = vector.shape_cast %81 : vector<1x64x64xbf16> to vector<64x64xbf16>
    %83 = arith.truncf %80 : vector<64x32xf32> to vector<64x32xbf16>
    %cst_50 = arith.constant dense<0.000000e+00> : vector<64x32xf32>
    %84 = tpu.matmul %82, %83, %cst_50 {dimension_numbers = #tpu.dot_dimension_numbers<[1], [0], [0], [1], [0, 0, 1, 1], [], []>} : vector<64x64xbf16>, vector<64x32xbf16>, vector<64x32xf32> -> vector<64x32xf32>
    %85 = arith.addf %76, %84 : vector<64x32xf32>
    %c0_51 = arith.constant 0 : index
    %c0_52 = arith.constant 0 : index
    %86 = vector.load %arg6[%c0_51, %c0_52] : memref<64x1xf32, #tpu.memory_space<vmem>>, vector<64x1xf32>
    %87 = vector.broadcast %86 : vector<64x1xf32> to vector<64x32xf32>
    %88 = arith.addf %85, %87 : vector<64x32xf32>
    %c0_53 = arith.constant 0 : index
    %c0_54 = arith.constant 0 : index
    %89 = vector.load %arg1[%c0_53, %c0_54] : memref<64x32xf32, #tpu.memory_space<vmem>>, vector<64x32xf32>
    %90 = arith.addf %88, %89 : vector<64x32xf32>
    %cst_55 = arith.constant 0.000000e+00 : f32
    %91 = vector.broadcast %cst_55 : f32 to vector<64x32xf32>
    %92 = arith.maximumf %90, %91 : vector<64x32xf32>
    %cst_56 = arith.constant 0.000000e+00 : f32
    %93 = vector.broadcast %cst_56 : f32 to vector<64x32xf32>
    %c5_i32_57 = arith.constant 5 : i32
    %94 = tpu.dynamic_rotate %92 by %c5_i32_57 dim 1 : vector<64x32xf32>, i32 -> vector<64x32xf32>
    %c0_58 = arith.constant 0 : index
    %c0_59 = arith.constant 0 : index
    %95 = vector.load %arg2[%c0_58, %c0_59] : memref<9x32xf32, #tpu.memory_space<vmem>>, vector<1x32xf32>
    %96 = vector.broadcast %95 : vector<1x32xf32> to vector<64x32xf32>
    %97 = arith.mulf %94, %96 : vector<64x32xf32>
    %c0_60 = arith.constant 0 : index
    %c0_61 = arith.constant 0 : index
    %c0_62 = arith.constant 0 : index
    %98 = vector.load %arg7[%c0_60, %c0_61, %c0_62] : memref<9x64x64xbf16, #tpu.memory_space<vmem>>, vector<1x64x64xbf16>
    %99 = vector.shape_cast %98 : vector<1x64x64xbf16> to vector<64x64xbf16>
    %100 = arith.truncf %97 : vector<64x32xf32> to vector<64x32xbf16>
    %cst_63 = arith.constant dense<0.000000e+00> : vector<64x32xf32>
    %101 = tpu.matmul %99, %100, %cst_63 {dimension_numbers = #tpu.dot_dimension_numbers<[1], [0], [0], [1], [0, 0, 1, 1], [], []>} : vector<64x64xbf16>, vector<64x32xbf16>, vector<64x32xf32> -> vector<64x32xf32>
    %102 = arith.addf %93, %101 : vector<64x32xf32>
    %c4_i32_64 = arith.constant 4 : i32
    %103 = tpu.dynamic_rotate %92 by %c4_i32_64 dim 1 : vector<64x32xf32>, i32 -> vector<64x32xf32>
    %c1_65 = arith.constant 1 : index
    %c0_66 = arith.constant 0 : index
    %104 = vector.load %arg2[%c1_65, %c0_66] : memref<9x32xf32, #tpu.memory_space<vmem>>, vector<1x32xf32>
    %105 = vector.broadcast %104 : vector<1x32xf32> to vector<64x32xf32>
    %106 = arith.mulf %103, %105 : vector<64x32xf32>
    %c1_67 = arith.constant 1 : index
    %c0_68 = arith.constant 0 : index
    %c0_69 = arith.constant 0 : index
    %107 = vector.load %arg7[%c1_67, %c0_68, %c0_69] : memref<9x64x64xbf16, #tpu.memory_space<vmem>>, vector<1x64x64xbf16>
    %108 = vector.shape_cast %107 : vector<1x64x64xbf16> to vector<64x64xbf16>
    %109 = arith.truncf %106 : vector<64x32xf32> to vector<64x32xbf16>
    %cst_70 = arith.constant dense<0.000000e+00> : vector<64x32xf32>
    %110 = tpu.matmul %108, %109, %cst_70 {dimension_numbers = #tpu.dot_dimension_numbers<[1], [0], [0], [1], [0, 0, 1, 1], [], []>} : vector<64x64xbf16>, vector<64x32xbf16>, vector<64x32xf32> -> vector<64x32xf32>
    %111 = arith.addf %102, %110 : vector<64x32xf32>
    %c3_i32_71 = arith.constant 3 : i32
    %112 = tpu.dynamic_rotate %92 by %c3_i32_71 dim 1 : vector<64x32xf32>, i32 -> vector<64x32xf32>
    %c2_72 = arith.constant 2 : index
    %c0_73 = arith.constant 0 : index
    %113 = vector.load %arg2[%c2_72, %c0_73] : memref<9x32xf32, #tpu.memory_space<vmem>>, vector<1x32xf32>
    %114 = vector.broadcast %113 : vector<1x32xf32> to vector<64x32xf32>
    %115 = arith.mulf %112, %114 : vector<64x32xf32>
    %c2_74 = arith.constant 2 : index
    %c0_75 = arith.constant 0 : index
    %c0_76 = arith.constant 0 : index
    %116 = vector.load %arg7[%c2_74, %c0_75, %c0_76] : memref<9x64x64xbf16, #tpu.memory_space<vmem>>, vector<1x64x64xbf16>
    %117 = vector.shape_cast %116 : vector<1x64x64xbf16> to vector<64x64xbf16>
    %118 = arith.truncf %115 : vector<64x32xf32> to vector<64x32xbf16>
    %cst_77 = arith.constant dense<0.000000e+00> : vector<64x32xf32>
    %119 = tpu.matmul %117, %118, %cst_77 {dimension_numbers = #tpu.dot_dimension_numbers<[1], [0], [0], [1], [0, 0, 1, 1], [], []>} : vector<64x64xbf16>, vector<64x32xbf16>, vector<64x32xf32> -> vector<64x32xf32>
    %120 = arith.addf %111, %119 : vector<64x32xf32>
    %c1_i32_78 = arith.constant 1 : i32
    %121 = tpu.dynamic_rotate %92 by %c1_i32_78 dim 1 : vector<64x32xf32>, i32 -> vector<64x32xf32>
    %c3_79 = arith.constant 3 : index
    %c0_80 = arith.constant 0 : index
    %122 = vector.load %arg2[%c3_79, %c0_80] : memref<9x32xf32, #tpu.memory_space<vmem>>, vector<1x32xf32>
    %123 = vector.broadcast %122 : vector<1x32xf32> to vector<64x32xf32>
    %124 = arith.mulf %121, %123 : vector<64x32xf32>
    %c3_81 = arith.constant 3 : index
    %c0_82 = arith.constant 0 : index
    %c0_83 = arith.constant 0 : index
    %125 = vector.load %arg7[%c3_81, %c0_82, %c0_83] : memref<9x64x64xbf16, #tpu.memory_space<vmem>>, vector<1x64x64xbf16>
    %126 = vector.shape_cast %125 : vector<1x64x64xbf16> to vector<64x64xbf16>
    %127 = arith.truncf %124 : vector<64x32xf32> to vector<64x32xbf16>
    %cst_84 = arith.constant dense<0.000000e+00> : vector<64x32xf32>
    %128 = tpu.matmul %126, %127, %cst_84 {dimension_numbers = #tpu.dot_dimension_numbers<[1], [0], [0], [1], [0, 0, 1, 1], [], []>} : vector<64x64xbf16>, vector<64x32xbf16>, vector<64x32xf32> -> vector<64x32xf32>
    %129 = arith.addf %120, %128 : vector<64x32xf32>
    %c4_85 = arith.constant 4 : index
    %c0_86 = arith.constant 0 : index
    %c0_87 = arith.constant 0 : index
    %130 = vector.load %arg7[%c4_85, %c0_86, %c0_87] : memref<9x64x64xbf16, #tpu.memory_space<vmem>>, vector<1x64x64xbf16>
    %131 = vector.shape_cast %130 : vector<1x64x64xbf16> to vector<64x64xbf16>
    %132 = arith.truncf %92 : vector<64x32xf32> to vector<64x32xbf16>
    %cst_88 = arith.constant dense<0.000000e+00> : vector<64x32xf32>
    %133 = tpu.matmul %131, %132, %cst_88 {dimension_numbers = #tpu.dot_dimension_numbers<[1], [0], [0], [1], [0, 0, 1, 1], [], []>} : vector<64x64xbf16>, vector<64x32xbf16>, vector<64x32xf32> -> vector<64x32xf32>
    %134 = arith.addf %129, %133 : vector<64x32xf32>
    %c31_i32_89 = arith.constant 31 : i32
    %135 = tpu.dynamic_rotate %92 by %c31_i32_89 dim 1 : vector<64x32xf32>, i32 -> vector<64x32xf32>
    %c5_90 = arith.constant 5 : index
    %c0_91 = arith.constant 0 : index
    %136 = vector.load %arg2[%c5_90, %c0_91] : memref<9x32xf32, #tpu.memory_space<vmem>>, vector<1x32xf32>
    %137 = vector.broadcast %136 : vector<1x32xf32> to vector<64x32xf32>
    %138 = arith.mulf %135, %137 : vector<64x32xf32>
    %c5_92 = arith.constant 5 : index
    %c0_93 = arith.constant 0 : index
    %c0_94 = arith.constant 0 : index
    %139 = vector.load %arg7[%c5_92, %c0_93, %c0_94] : memref<9x64x64xbf16, #tpu.memory_space<vmem>>, vector<1x64x64xbf16>
    %140 = vector.shape_cast %139 : vector<1x64x64xbf16> to vector<64x64xbf16>
    %141 = arith.truncf %138 : vector<64x32xf32> to vector<64x32xbf16>
    %cst_95 = arith.constant dense<0.000000e+00> : vector<64x32xf32>
    %142 = tpu.matmul %140, %141, %cst_95 {dimension_numbers = #tpu.dot_dimension_numbers<[1], [0], [0], [1], [0, 0, 1, 1], [], []>} : vector<64x64xbf16>, vector<64x32xbf16>, vector<64x32xf32> -> vector<64x32xf32>
    %143 = arith.addf %134, %142 : vector<64x32xf32>
    %c29_i32_96 = arith.constant 29 : i32
    %144 = tpu.dynamic_rotate %92 by %c29_i32_96 dim 1 : vector<64x32xf32>, i32 -> vector<64x32xf32>
    %c6_97 = arith.constant 6 : index
    %c0_98 = arith.constant 0 : index
    %145 = vector.load %arg2[%c6_97, %c0_98] : memref<9x32xf32, #tpu.memory_space<vmem>>, vector<1x32xf32>
    %146 = vector.broadcast %145 : vector<1x32xf32> to vector<64x32xf32>
    %147 = arith.mulf %144, %146 : vector<64x32xf32>
    %c6_99 = arith.constant 6 : index
    %c0_100 = arith.constant 0 : index
    %c0_101 = arith.constant 0 : index
    %148 = vector.load %arg7[%c6_99, %c0_100, %c0_101] : memref<9x64x64xbf16, #tpu.memory_space<vmem>>, vector<1x64x64xbf16>
    %149 = vector.shape_cast %148 : vector<1x64x64xbf16> to vector<64x64xbf16>
    %150 = arith.truncf %147 : vector<64x32xf32> to vector<64x32xbf16>
    %cst_102 = arith.constant dense<0.000000e+00> : vector<64x32xf32>
    %151 = tpu.matmul %149, %150, %cst_102 {dimension_numbers = #tpu.dot_dimension_numbers<[1], [0], [0], [1], [0, 0, 1, 1], [], []>} : vector<64x64xbf16>, vector<64x32xbf16>, vector<64x32xf32> -> vector<64x32xf32>
    %152 = arith.addf %143, %151 : vector<64x32xf32>
    %c28_i32_103 = arith.constant 28 : i32
    %153 = tpu.dynamic_rotate %92 by %c28_i32_103 dim 1 : vector<64x32xf32>, i32 -> vector<64x32xf32>
    %c7_104 = arith.constant 7 : index
    %c0_105 = arith.constant 0 : index
    %154 = vector.load %arg2[%c7_104, %c0_105] : memref<9x32xf32, #tpu.memory_space<vmem>>, vector<1x32xf32>
    %155 = vector.broadcast %154 : vector<1x32xf32> to vector<64x32xf32>
    %156 = arith.mulf %153, %155 : vector<64x32xf32>
    %c7_106 = arith.constant 7 : index
    %c0_107 = arith.constant 0 : index
    %c0_108 = arith.constant 0 : index
    %157 = vector.load %arg7[%c7_106, %c0_107, %c0_108] : memref<9x64x64xbf16, #tpu.memory_space<vmem>>, vector<1x64x64xbf16>
    %158 = vector.shape_cast %157 : vector<1x64x64xbf16> to vector<64x64xbf16>
    %159 = arith.truncf %156 : vector<64x32xf32> to vector<64x32xbf16>
    %cst_109 = arith.constant dense<0.000000e+00> : vector<64x32xf32>
    %160 = tpu.matmul %158, %159, %cst_109 {dimension_numbers = #tpu.dot_dimension_numbers<[1], [0], [0], [1], [0, 0, 1, 1], [], []>} : vector<64x64xbf16>, vector<64x32xbf16>, vector<64x32xf32> -> vector<64x32xf32>
    %161 = arith.addf %152, %160 : vector<64x32xf32>
    %c27_i32_110 = arith.constant 27 : i32
    %162 = tpu.dynamic_rotate %92 by %c27_i32_110 dim 1 : vector<64x32xf32>, i32 -> vector<64x32xf32>
    %c8_111 = arith.constant 8 : index
    %c0_112 = arith.constant 0 : index
    %163 = vector.load %arg2[%c8_111, %c0_112] : memref<9x32xf32, #tpu.memory_space<vmem>>, vector<1x32xf32>
    %164 = vector.broadcast %163 : vector<1x32xf32> to vector<64x32xf32>
    %165 = arith.mulf %162, %164 : vector<64x32xf32>
    %c8_113 = arith.constant 8 : index
    %c0_114 = arith.constant 0 : index
    %c0_115 = arith.constant 0 : index
    %166 = vector.load %arg7[%c8_113, %c0_114, %c0_115] : memref<9x64x64xbf16, #tpu.memory_space<vmem>>, vector<1x64x64xbf16>
    %167 = vector.shape_cast %166 : vector<1x64x64xbf16> to vector<64x64xbf16>
    %168 = arith.truncf %165 : vector<64x32xf32> to vector<64x32xbf16>
    %cst_116 = arith.constant dense<0.000000e+00> : vector<64x32xf32>
    %169 = tpu.matmul %167, %168, %cst_116 {dimension_numbers = #tpu.dot_dimension_numbers<[1], [0], [0], [1], [0, 0, 1, 1], [], []>} : vector<64x64xbf16>, vector<64x32xbf16>, vector<64x32xf32> -> vector<64x32xf32>
    %170 = arith.addf %161, %169 : vector<64x32xf32>
    %c0_117 = arith.constant 0 : index
    %c0_118 = arith.constant 0 : index
    %171 = vector.load %arg8[%c0_117, %c0_118] : memref<64x1xf32, #tpu.memory_space<vmem>>, vector<64x1xf32>
    %172 = vector.broadcast %171 : vector<64x1xf32> to vector<64x32xf32>
    %173 = arith.addf %170, %172 : vector<64x32xf32>
    %cst_119 = arith.constant 0.000000e+00 : f32
    %174 = vector.broadcast %cst_119 : f32 to vector<64x32xf32>
    %175 = arith.maximumf %173, %174 : vector<64x32xf32>
    %cst_120 = arith.constant 0.000000e+00 : f32
    %176 = vector.broadcast %cst_120 : f32 to vector<64x32xf32>
    %c5_i32_121 = arith.constant 5 : i32
    %177 = tpu.dynamic_rotate %175 by %c5_i32_121 dim 1 : vector<64x32xf32>, i32 -> vector<64x32xf32>
    %c0_122 = arith.constant 0 : index
    %c0_123 = arith.constant 0 : index
    %178 = vector.load %arg2[%c0_122, %c0_123] : memref<9x32xf32, #tpu.memory_space<vmem>>, vector<1x32xf32>
    %179 = vector.broadcast %178 : vector<1x32xf32> to vector<64x32xf32>
    %180 = arith.mulf %177, %179 : vector<64x32xf32>
    %c0_124 = arith.constant 0 : index
    %c0_125 = arith.constant 0 : index
    %c0_126 = arith.constant 0 : index
    %181 = vector.load %arg9[%c0_124, %c0_125, %c0_126] : memref<9x64x64xbf16, #tpu.memory_space<vmem>>, vector<1x64x64xbf16>
    %182 = vector.shape_cast %181 : vector<1x64x64xbf16> to vector<64x64xbf16>
    %183 = arith.truncf %180 : vector<64x32xf32> to vector<64x32xbf16>
    %cst_127 = arith.constant dense<0.000000e+00> : vector<64x32xf32>
    %184 = tpu.matmul %182, %183, %cst_127 {dimension_numbers = #tpu.dot_dimension_numbers<[1], [0], [0], [1], [0, 0, 1, 1], [], []>} : vector<64x64xbf16>, vector<64x32xbf16>, vector<64x32xf32> -> vector<64x32xf32>
    %185 = arith.addf %176, %184 : vector<64x32xf32>
    %c4_i32_128 = arith.constant 4 : i32
    %186 = tpu.dynamic_rotate %175 by %c4_i32_128 dim 1 : vector<64x32xf32>, i32 -> vector<64x32xf32>
    %c1_129 = arith.constant 1 : index
    %c0_130 = arith.constant 0 : index
    %187 = vector.load %arg2[%c1_129, %c0_130] : memref<9x32xf32, #tpu.memory_space<vmem>>, vector<1x32xf32>
    %188 = vector.broadcast %187 : vector<1x32xf32> to vector<64x32xf32>
    %189 = arith.mulf %186, %188 : vector<64x32xf32>
    %c1_131 = arith.constant 1 : index
    %c0_132 = arith.constant 0 : index
    %c0_133 = arith.constant 0 : index
    %190 = vector.load %arg9[%c1_131, %c0_132, %c0_133] : memref<9x64x64xbf16, #tpu.memory_space<vmem>>, vector<1x64x64xbf16>
    %191 = vector.shape_cast %190 : vector<1x64x64xbf16> to vector<64x64xbf16>
    %192 = arith.truncf %189 : vector<64x32xf32> to vector<64x32xbf16>
    %cst_134 = arith.constant dense<0.000000e+00> : vector<64x32xf32>
    %193 = tpu.matmul %191, %192, %cst_134 {dimension_numbers = #tpu.dot_dimension_numbers<[1], [0], [0], [1], [0, 0, 1, 1], [], []>} : vector<64x64xbf16>, vector<64x32xbf16>, vector<64x32xf32> -> vector<64x32xf32>
    %194 = arith.addf %185, %193 : vector<64x32xf32>
    %c3_i32_135 = arith.constant 3 : i32
    %195 = tpu.dynamic_rotate %175 by %c3_i32_135 dim 1 : vector<64x32xf32>, i32 -> vector<64x32xf32>
    %c2_136 = arith.constant 2 : index
    %c0_137 = arith.constant 0 : index
    %196 = vector.load %arg2[%c2_136, %c0_137] : memref<9x32xf32, #tpu.memory_space<vmem>>, vector<1x32xf32>
    %197 = vector.broadcast %196 : vector<1x32xf32> to vector<64x32xf32>
    %198 = arith.mulf %195, %197 : vector<64x32xf32>
    %c2_138 = arith.constant 2 : index
    %c0_139 = arith.constant 0 : index
    %c0_140 = arith.constant 0 : index
    %199 = vector.load %arg9[%c2_138, %c0_139, %c0_140] : memref<9x64x64xbf16, #tpu.memory_space<vmem>>, vector<1x64x64xbf16>
    %200 = vector.shape_cast %199 : vector<1x64x64xbf16> to vector<64x64xbf16>
    %201 = arith.truncf %198 : vector<64x32xf32> to vector<64x32xbf16>
    %cst_141 = arith.constant dense<0.000000e+00> : vector<64x32xf32>
    %202 = tpu.matmul %200, %201, %cst_141 {dimension_numbers = #tpu.dot_dimension_numbers<[1], [0], [0], [1], [0, 0, 1, 1], [], []>} : vector<64x64xbf16>, vector<64x32xbf16>, vector<64x32xf32> -> vector<64x32xf32>
    %203 = arith.addf %194, %202 : vector<64x32xf32>
    %c1_i32_142 = arith.constant 1 : i32
    %204 = tpu.dynamic_rotate %175 by %c1_i32_142 dim 1 : vector<64x32xf32>, i32 -> vector<64x32xf32>
    %c3_143 = arith.constant 3 : index
    %c0_144 = arith.constant 0 : index
    %205 = vector.load %arg2[%c3_143, %c0_144] : memref<9x32xf32, #tpu.memory_space<vmem>>, vector<1x32xf32>
    %206 = vector.broadcast %205 : vector<1x32xf32> to vector<64x32xf32>
    %207 = arith.mulf %204, %206 : vector<64x32xf32>
    %c3_145 = arith.constant 3 : index
    %c0_146 = arith.constant 0 : index
    %c0_147 = arith.constant 0 : index
    %208 = vector.load %arg9[%c3_145, %c0_146, %c0_147] : memref<9x64x64xbf16, #tpu.memory_space<vmem>>, vector<1x64x64xbf16>
    %209 = vector.shape_cast %208 : vector<1x64x64xbf16> to vector<64x64xbf16>
    %210 = arith.truncf %207 : vector<64x32xf32> to vector<64x32xbf16>
    %cst_148 = arith.constant dense<0.000000e+00> : vector<64x32xf32>
    %211 = tpu.matmul %209, %210, %cst_148 {dimension_numbers = #tpu.dot_dimension_numbers<[1], [0], [0], [1], [0, 0, 1, 1], [], []>} : vector<64x64xbf16>, vector<64x32xbf16>, vector<64x32xf32> -> vector<64x32xf32>
    %212 = arith.addf %203, %211 : vector<64x32xf32>
    %c4_149 = arith.constant 4 : index
    %c0_150 = arith.constant 0 : index
    %c0_151 = arith.constant 0 : index
    %213 = vector.load %arg9[%c4_149, %c0_150, %c0_151] : memref<9x64x64xbf16, #tpu.memory_space<vmem>>, vector<1x64x64xbf16>
    %214 = vector.shape_cast %213 : vector<1x64x64xbf16> to vector<64x64xbf16>
    %215 = arith.truncf %175 : vector<64x32xf32> to vector<64x32xbf16>
    %cst_152 = arith.constant dense<0.000000e+00> : vector<64x32xf32>
    %216 = tpu.matmul %214, %215, %cst_152 {dimension_numbers = #tpu.dot_dimension_numbers<[1], [0], [0], [1], [0, 0, 1, 1], [], []>} : vector<64x64xbf16>, vector<64x32xbf16>, vector<64x32xf32> -> vector<64x32xf32>
    %217 = arith.addf %212, %216 : vector<64x32xf32>
    %c31_i32_153 = arith.constant 31 : i32
    %218 = tpu.dynamic_rotate %175 by %c31_i32_153 dim 1 : vector<64x32xf32>, i32 -> vector<64x32xf32>
    %c5_154 = arith.constant 5 : index
    %c0_155 = arith.constant 0 : index
    %219 = vector.load %arg2[%c5_154, %c0_155] : memref<9x32xf32, #tpu.memory_space<vmem>>, vector<1x32xf32>
    %220 = vector.broadcast %219 : vector<1x32xf32> to vector<64x32xf32>
    %221 = arith.mulf %218, %220 : vector<64x32xf32>
    %c5_156 = arith.constant 5 : index
    %c0_157 = arith.constant 0 : index
    %c0_158 = arith.constant 0 : index
    %222 = vector.load %arg9[%c5_156, %c0_157, %c0_158] : memref<9x64x64xbf16, #tpu.memory_space<vmem>>, vector<1x64x64xbf16>
    %223 = vector.shape_cast %222 : vector<1x64x64xbf16> to vector<64x64xbf16>
    %224 = arith.truncf %221 : vector<64x32xf32> to vector<64x32xbf16>
    %cst_159 = arith.constant dense<0.000000e+00> : vector<64x32xf32>
    %225 = tpu.matmul %223, %224, %cst_159 {dimension_numbers = #tpu.dot_dimension_numbers<[1], [0], [0], [1], [0, 0, 1, 1], [], []>} : vector<64x64xbf16>, vector<64x32xbf16>, vector<64x32xf32> -> vector<64x32xf32>
    %226 = arith.addf %217, %225 : vector<64x32xf32>
    %c29_i32_160 = arith.constant 29 : i32
    %227 = tpu.dynamic_rotate %175 by %c29_i32_160 dim 1 : vector<64x32xf32>, i32 -> vector<64x32xf32>
    %c6_161 = arith.constant 6 : index
    %c0_162 = arith.constant 0 : index
    %228 = vector.load %arg2[%c6_161, %c0_162] : memref<9x32xf32, #tpu.memory_space<vmem>>, vector<1x32xf32>
    %229 = vector.broadcast %228 : vector<1x32xf32> to vector<64x32xf32>
    %230 = arith.mulf %227, %229 : vector<64x32xf32>
    %c6_163 = arith.constant 6 : index
    %c0_164 = arith.constant 0 : index
    %c0_165 = arith.constant 0 : index
    %231 = vector.load %arg9[%c6_163, %c0_164, %c0_165] : memref<9x64x64xbf16, #tpu.memory_space<vmem>>, vector<1x64x64xbf16>
    %232 = vector.shape_cast %231 : vector<1x64x64xbf16> to vector<64x64xbf16>
    %233 = arith.truncf %230 : vector<64x32xf32> to vector<64x32xbf16>
    %cst_166 = arith.constant dense<0.000000e+00> : vector<64x32xf32>
    %234 = tpu.matmul %232, %233, %cst_166 {dimension_numbers = #tpu.dot_dimension_numbers<[1], [0], [0], [1], [0, 0, 1, 1], [], []>} : vector<64x64xbf16>, vector<64x32xbf16>, vector<64x32xf32> -> vector<64x32xf32>
    %235 = arith.addf %226, %234 : vector<64x32xf32>
    %c28_i32_167 = arith.constant 28 : i32
    %236 = tpu.dynamic_rotate %175 by %c28_i32_167 dim 1 : vector<64x32xf32>, i32 -> vector<64x32xf32>
    %c7_168 = arith.constant 7 : index
    %c0_169 = arith.constant 0 : index
    %237 = vector.load %arg2[%c7_168, %c0_169] : memref<9x32xf32, #tpu.memory_space<vmem>>, vector<1x32xf32>
    %238 = vector.broadcast %237 : vector<1x32xf32> to vector<64x32xf32>
    %239 = arith.mulf %236, %238 : vector<64x32xf32>
    %c7_170 = arith.constant 7 : index
    %c0_171 = arith.constant 0 : index
    %c0_172 = arith.constant 0 : index
    %240 = vector.load %arg9[%c7_170, %c0_171, %c0_172] : memref<9x64x64xbf16, #tpu.memory_space<vmem>>, vector<1x64x64xbf16>
    %241 = vector.shape_cast %240 : vector<1x64x64xbf16> to vector<64x64xbf16>
    %242 = arith.truncf %239 : vector<64x32xf32> to vector<64x32xbf16>
    %cst_173 = arith.constant dense<0.000000e+00> : vector<64x32xf32>
    %243 = tpu.matmul %241, %242, %cst_173 {dimension_numbers = #tpu.dot_dimension_numbers<[1], [0], [0], [1], [0, 0, 1, 1], [], []>} : vector<64x64xbf16>, vector<64x32xbf16>, vector<64x32xf32> -> vector<64x32xf32>
    %244 = arith.addf %235, %243 : vector<64x32xf32>
    %c27_i32_174 = arith.constant 27 : i32
    %245 = tpu.dynamic_rotate %175 by %c27_i32_174 dim 1 : vector<64x32xf32>, i32 -> vector<64x32xf32>
    %c8_175 = arith.constant 8 : index
    %c0_176 = arith.constant 0 : index
    %246 = vector.load %arg2[%c8_175, %c0_176] : memref<9x32xf32, #tpu.memory_space<vmem>>, vector<1x32xf32>
    %247 = vector.broadcast %246 : vector<1x32xf32> to vector<64x32xf32>
    %248 = arith.mulf %245, %247 : vector<64x32xf32>
    %c8_177 = arith.constant 8 : index
    %c0_178 = arith.constant 0 : index
    %c0_179 = arith.constant 0 : index
    %249 = vector.load %arg9[%c8_177, %c0_178, %c0_179] : memref<9x64x64xbf16, #tpu.memory_space<vmem>>, vector<1x64x64xbf16>
    %250 = vector.shape_cast %249 : vector<1x64x64xbf16> to vector<64x64xbf16>
    %251 = arith.truncf %248 : vector<64x32xf32> to vector<64x32xbf16>
    %cst_180 = arith.constant dense<0.000000e+00> : vector<64x32xf32>
    %252 = tpu.matmul %250, %251, %cst_180 {dimension_numbers = #tpu.dot_dimension_numbers<[1], [0], [0], [1], [0, 0, 1, 1], [], []>} : vector<64x64xbf16>, vector<64x32xbf16>, vector<64x32xf32> -> vector<64x32xf32>
    %253 = arith.addf %244, %252 : vector<64x32xf32>
    %c0_181 = arith.constant 0 : index
    %c0_182 = arith.constant 0 : index
    %254 = vector.load %arg10[%c0_181, %c0_182] : memref<64x1xf32, #tpu.memory_space<vmem>>, vector<64x1xf32>
    %255 = vector.broadcast %254 : vector<64x1xf32> to vector<64x32xf32>
    %256 = arith.addf %253, %255 : vector<64x32xf32>
    %257 = arith.addf %256, %92 : vector<64x32xf32>
    %c0_183 = arith.constant 0 : index
    %c0_184 = arith.constant 0 : index
    %258 = vector.load %arg11[%c0_183, %c0_184] : memref<64x32xf32, #tpu.memory_space<vmem>>, vector<64x32xf32>
    tpu.vector_store %arg11[%c0_183, %c0_184], %257 {strides = array<i32>} : memref<64x32xf32, #tpu.memory_space<vmem>>, vector<64x32xf32>,
    return
  }
}

</mosaic_0001>

<bundles_post_ra>
// kernel: podnet_resnet_cifar_forward.4
= control target key start
LH: loop header
LB: loop body
LE: loop exit
PB: predicated region body
PF: predicated region fallthrough
CT: control target
= control target key end

     0   :  { %v3416_v0 = vmov 0   ;;  %vm157_vm0 = vcmask 130048   ;;  %vm274_vm1 = vcmask 261120   ;;  %s3419_s14 = smov 127   ;;  %s3420_s15 = smov 121   ;;  %s4104_s0 = inlined_call_operand.vmem [shape: bf16[144,128], index: 0, kind: input, shape index: {}]   ;;  %s4105_s3 = inlined_call_operand.vmem [shape: bf16[32,144], index: 3, kind: input, shape index: {}]   ;;  %s4106_s4 = inlined_call_operand.vmem [shape: f32[32,1], index: 4, kind: input, shape index: {}]   ;;  %s4107_s5 = inlined_call_operand.vmem [shape: bf16[9,32,32], index: 5, kind: input, shape index: {}]   ;;  %s4108_s6 = inlined_call_operand.vmem [shape: f32[32,1], index: 6, kind: input, shape index: {}]   ;;  %s4109_s2 = inlined_call_operand.vmem [shape: f32[9,128], index: 2, kind: input, shape index: {}]   ;;  %s4110_s1 = inlined_call_operand.vmem [shape: f32[32,128], index: 1, kind: input, shape index: {}]   ;;  %s4111_s7 = inlined_call_operand.vmem [shape: bf16[9,32,32], index: 7, kind: input, shape index: {}]   ;;  %s4112_s8 = inlined_call_operand.vmem [shape: f32[32,1], index: 8, kind: input, shape index: {}]   ;;  %s4113_s9 = inlined_call_operand.vmem [shape: bf16[9,32,32], index: 9, kind: input, shape index: {}]   ;;  %s4114_s10 = inlined_call_operand.vmem [shape: f32[32,1], index: 10, kind: input, shape index: {}]   ;;  %s4115_s11 = inlined_call_operand.vmem [shape: f32[32,128], index: 11, kind: output, shape index: {}]  }
   0x1   :  { %164 = vmatprep.subr.bf16.mxu0 %v3416_v0  ;;  %v3341_v1 = vld [vmem:[%s4104_s0] sm:$0xff]   ;;  %3339 = vset.pattern.permute.xlu0 %v3416_v0  ;;  %v3342_v2 = vld [vmem:[%s4104_s0 + $0x8] sm:$0xff]   ;;  %v3343_v3 = vld [vmem:[%s4104_s0 + $0x10] sm:$0xff]   ;;  %s3421_s16 = smov 8   ;;  %s3422_s17 = smov 120  }
   0x2   :  { %3340 = vset.pattern.permute.xlu1 %v3416_v0  ;;  %165 = vmatpush1.bf16.msra.mxu0 %v3341_v1  ;;  %v3344_v4 = vld [vmem:[%s4104_s0 + $0x18] sm:$0xff]   ;;  %v3352_v5 = vld [vmem:[%s4105_s3 + $0x4] ss:$8 sps:$4 sm:$0xff]   ;;  %v63_v7 = vld [vmem:[%s4106_s4 + $0x10] sm:$0xff]  ;;  %s3423_s20 = smov 9   ;;  %s3424_s21 = smov 119  }
   0x3   :  { %166 = vmatprep.subr.bf16.mxu0 %v3416_v0  ;;  %v61_v6 = vld [vmem:[%s4106_s4] sm:$0xff]  ;;  %2696 = vmatprep.mubr.msk.bf16.mxu0 %vm157_vm0, %v3352_v5  ;;  %v62_v8 = vld [vmem:[%s4106_s4 + $0x8] sm:$0xff]  ;;  %v64_v10 = vld [vmem:[%s4106_s4 + $0x18] sm:$0xff] }
   0x4   :  { %67 = vperm.xlu0 %3339, %v61_v6   ;;  %77 = vperm.xlu1 %3340, %v63_v7   ;;  %v3345_v9 = vld [vmem:[%s4104_s0 + $0x20] sm:$0xff]   ;;  %v3346_v11 = vld [vmem:[%s4104_s0 + $0x28] sm:$0xff]   ;;  %v3347_v12 = vld [vmem:[%s4104_s0 + $0x30] sm:$0xff]  }
   0x5   :  { %v3348_v13 = vld [vmem:[%s4104_s0 + $0x38] sm:$0xff]   ;;  %v3349_v14 = vld [vmem:[%s4104_s0 + $0x40] sm:$0xff]   ;;  %s3417_s0 = smov 7   ;;  %v3364_v41 = vld [vmem:[%s4107_s5 + $0x10] sm:$0xff]  }
   0x6   :  { %167 = vmatpush1.bf16.msra.mxu0 %v3342_v2  ;;  %v3350_v15 = vld [vmem:[%s4105_s3] ss:$8 sps:$4 sm:$0xff]   ;;  %v3353_v16 = vld [vmem:[%s4105_s3 + $0x14] ss:$8 sps:$4 sm:$0xff]   ;;  %v3355_v17 = vld [vmem:[%s4105_s3 + $0x10] ss:$8 sps:$4 sm:$0xff]  }
   0x7   :  { %168 = vmatprep.subr.bf16.mxu0 %v3416_v0  ;;  %v3356_v29 = vld [vmem:[%s4107_s5 + $0x20] sm:$0xff]   ;;  %s3418_s3 = smov 1   ;;  %v1030_v43 = vld [vmem:[%s4108_s6 + $0x8] sm:$0xff]  ;;  %v1031_v44 = vld [vmem:[%s4108_s6 + $0x10] sm:$0xff] }
   0x8   :  { %72 = vperm.xlu0 %3339, %v62_v8   ;;  %82 = vperm.xlu1 %3340, %v64_v10   ;;  %v1029_v42 = vld [vmem:[%s4108_s6] sm:$0xff]  ;;  %v1032_v45 = vld [vmem:[%s4108_s6 + $0x18] sm:$0xff]  ;;  %v3357_v62 = vld [vmem:[%s4107_s5 + $0x28] sm:$0xff]  }
   0x9   :  { %3038 = vmatprep.mubr.msk.bf16.mxu1 %vm274_vm1, %v3356_v29  ;;  %v3597_v46 = vld [vmem:[%s4109_s2 + $0x2] ss:$0 sm:$0xff]  ;;  %v3606_v56 = vld [vmem:[%s4109_s2 + $0x3] ss:$0 sm:$0xff]  ;;  %v3359_v10 = vld [vmem:[%s4107_s5 + $0x38] sm:$0xff]  }
   0xa   :  { %169 = vmatpush1.bf16.msra.mxu0 %v3343_v3  ;;  %v3362_v29 = vld [vmem:[%s4107_s5 + $0x50] sm:$0xff]  }
   0xb   :  { %170 = vmatprep.subr.bf16.mxu0 %v3416_v0 }
   0xe   :  { %171 = vmatpush1.bf16.msra.mxu0 %v3344_v4 }
   0xf   :  { %172 = vmatprep.subr.bf16.mxu0 %v3416_v0 }
  0x12   :  { %173 = vmatpush1.bf16.msra.mxu0 %v3345_v9 }
  0x13   :  { %174 = vmatprep.subr.bf16.mxu0 %v3416_v0 }
  0x16   :  { %175 = vmatpush1.bf16.msra.mxu0 %v3346_v11 }
  0x17   :  { %176 = vmatprep.subr.bf16.mxu0 %v3416_v0 }
  0x1a   :  { %177 = vmatpush1.bf16.msra.mxu0 %v3347_v12  ;;  %v3360_v12 = vld [vmem:[%s4107_s5 + $0x40] sm:$0xff]  }
  0x1b   :  { %178 = vmatprep.subr.bf16.mxu0 %v3416_v0 }
  0x1e   :  { %179 = vmatpush1.bf16.msra.mxu0 %v3348_v13  ;;  %v3630_v13 = vld [vmem:[%s4109_s2 + $0x5] ss:$0 sm:$0xff] }
  0x1f   :  { %180 = vmatprep.subr.bf16.mxu0 %v3416_v0  ;;  %v3358_v0 = vld [vmem:[%s4107_s5 + $0x30] sm:$0xff]  }
  0x22   :  { %181 = vmatpush1.bf16.msra.mxu0 %v3349_v14 }
  0x25   :  { %197 = vmatmul.mubr.bf16.vlgmr.msra.gmra.mrb[0].mxu0 %v3350_v15 }
  0x26   :  { %2697 = vmatprep.mubr.msk.bf16.mxu0 %vm157_vm0, %v3353_v16 }
  0x2d   :  { %205 = vmatmul.mubr.bf16.gmra.mrb[4].mxu0 %v3355_v17 }
  0x2e   :  { %3022 = vmatprep.mubr.msk.bf16.mxu0 %vm274_vm1, %v3364_v41 }
  0x83   :  { %v68_v18 = vpop.permute.xlu0 %67  ;;  %v78_v27 = vpop.permute.xlu1 %77 }
  0x87   :  { %v73_v20 = vpop.permute.xlu0 %72  ;;  %v83_v34 = vpop.permute.xlu1 %82 }
  0xf8   :  { %v198_v19 = vpop.f32.mrb[0].mxu0 }
  0xf9   :  { %v199_v21 = vadd.f32 %v198_v19, %v68_v18  ;;  %v200_v22 = vpop.f32.mrb[1].mxu0  ;;  %v3641_v18 = vld [vmem:[%s4109_s2 + $0x1] ss:$0 sm:$0xff] }
  0xfa   :  { %v201_v23 = vpop.f32.mrb[2].mxu0 }
  0xfb   :  { %v213_v24 = vmax.f32 %v199_v21, 0.0  ;;  %v202_v25 = vadd.f32 %v201_v23, %v73_v20  ;;  %v203_v26 = vpop.f32.mrb[3].mxu0 }
  0xfd   :  { %v214_v28 = vmax.f32 %v202_v25, 0.0  ;;  %395 = vrot.lane.b32.xlu0 %v213_v24, %s3417_s0 }
  0xff   :  { %397 = vrot.lane.b32.xlu1 %v214_v28, %s3417_s0  ;;  %v3543_v30 = vpack.c.bf16 %v214_v28, %v213_v24 }
 0x100   :  { %v206_v31 = vpop.f32.mrb[4].mxu0 }
 0x101   :  { %v207_v32 = vadd.f32 %v206_v31, %v78_v27  ;;  %v208_v33 = vpop.f32.mrb[5].mxu0  ;;  %v3361_v27 = vld [vmem:[%s4107_s5 + $0x48] sm:$0xff]   ;;  %v3657_v31 = vld [vmem:[%s4109_s2 + $0x6] ss:$0 sm:$0xff] }
 0x102   :  { %v209_v35 = vpop.f32.mrb[6].mxu0 }
 0x103   :  { %v215_v36 = vmax.f32 %v207_v32, 0.0  ;;  %v210_v37 = vadd.f32 %v209_v35, %v83_v34  ;;  %v211_v38 = vpop.f32.mrb[7].mxu0 }
 0x105   :  { %v216_v39 = vmax.f32 %v210_v37, 0.0  ;;  %399 = vrot.lane.b32.xlu0 %v215_v36, %s3417_s0 }
 0x107   :  { %401 = vrot.lane.b32.xlu1 %v216_v39, %s3417_s0  ;;  %v3548_v40 = vpack.c.bf16 %v216_v39, %v215_v36 }
 0x109   :  { %488 = vrot.lane.b32.xlu0 %v213_v24, %s3418_s3 }
 0x10b   :  { %490 = vrot.lane.b32.xlu1 %v214_v28, %s3418_s3 }
 0x10d   :  { %492 = vrot.lane.b32.xlu0 %v215_v36, %s3418_s3 }
 0x10f   :  { %494 = vrot.lane.b32.xlu1 %v216_v39, %s3418_s3 }
 0x111   :  { %657 = vrot.lane.b32.xlu0 %v213_v24, %s3419_s14 }
 0x113   :  { %659 = vrot.lane.b32.xlu1 %v214_v28, %s3419_s14 }
 0x115   :  { %661 = vrot.lane.b32.xlu0 %v215_v36, %s3419_s14 }
 0x117   :  { %752 = vrot.lane.b32.xlu1 %v214_v28, %s3420_s15 }
 0x119   :  { %750 = vrot.lane.b32.xlu0 %v213_v24, %s3420_s15 }
 0x11b   :  { %663 = vrot.lane.b32.xlu1 %v216_v39, %s3419_s14 }
 0x11d   :  { %754 = vrot.lane.b32.xlu0 %v215_v36, %s3420_s15 }
 0x11f   :  { %242 = vrot.lane.b32.xlu1 %v214_v28, %s3421_s16 }
 0x121   :  { %240 = vrot.lane.b32.xlu0 %v213_v24, %s3421_s16 }
 0x123   :  { %845 = vrot.lane.b32.xlu1 %v214_v28, %s3422_s17 }
 0x125   :  { %843 = vrot.lane.b32.xlu0 %v213_v24, %s3422_s17 }
 0x127   :  { %756 = vrot.lane.b32.xlu1 %v216_v39, %s3420_s15 }
 0x129   :  { %244 = vrot.lane.b32.xlu0 %v215_v36, %s3421_s16 }
 0x12b   :  { %219 = vrot.lane.b32.xlu1 %v214_v28, %s3423_s20 }
 0x12d   :  { %847 = vrot.lane.b32.xlu0 %v215_v36, %s3422_s17 }
 0x12f   :  { %246 = vrot.lane.b32.xlu1 %v216_v39, %s3421_s16 }
 0x131   :  { %217 = vrot.lane.b32.xlu0 %v213_v24, %s3423_s20 }
 0x133   :  { %849 = vrot.lane.b32.xlu1 %v216_v39, %s3422_s17 }
 0x135   :  { %936 = vrot.lane.b32.xlu0 %v213_v24, %s3424_s21 }
 0x137   :  { %938 = vrot.lane.b32.xlu1 %v214_v28, %s3424_s21 }
 0x139   :  { %221 = vrot.lane.b32.xlu0 %v215_v36, %s3423_s20 }
 0x13b   :  { %223 = vrot.lane.b32.xlu1 %v216_v39, %s3423_s20 }
 0x13d   :  { %940 = vrot.lane.b32.xlu0 %v215_v36, %s3424_s21 }
 0x13f   :  { %942 = vrot.lane.b32.xlu1 %v216_v39, %s3424_s21 }
 0x141   :  { %1035 = vperm.xlu0 %3339, %v1029_v42  }
 0x143   :  { %1040 = vperm.xlu1 %3340, %v1030_v43  }
 0x145   :  { %1045 = vperm.xlu0 %3339, %v1031_v44  }
 0x147   :  { %1050 = vperm.xlu1 %3340, %v1032_v45   ;;  %v3363_v45 = vld [vmem:[%s4107_s5 + $0x58] sm:$0xff]  }
 0x16f   :  { %v396_v47 = vpop.permute.xlu0 %395 }
 0x170   :  { %v408_v49 = vmul.f32 %v3597_v46, %v396_v47 }
 0x171   :  { %v398_v48 = vpop.permute.xlu1 %397 }
 0x172   :  { %v409_v50 = vmul.f32 %v3597_v46, %v398_v48 }
 0x174   :  { %v417_v51 = vpack.c.bf16 %v409_v50, %v408_v49 }
 0x176   :  { %3034 = vmatprep.subr.bf16.mxu1 %v417_v51 }
 0x177   :  { %3035 = vmatpush3.bf16.msra.mxu1 %v417_v51  ;;  %v400_v52 = vpop.permute.xlu0 %399 }
 0x178   :  { %v410_v54 = vmul.f32 %v3597_v46, %v400_v52  ;;  %v3680_v52 = vld [vmem:[%s4109_s2 + $0x7] ss:$0 sm:$0xff] }
 0x179   :  { %v402_v53 = vpop.permute.xlu1 %401 }
 0x17a   :  { %v411_v55 = vmul.f32 %v3597_v46, %v402_v53 }
 0x17b   :  { %v489_v57 = vpop.permute.xlu0 %488 }
 0x17c   :  { %v418_v58 = vpack.c.bf16 %v411_v55, %v410_v54  ;;  %v501_v60 = vmul.f32 %v3606_v56, %v489_v57  ;;  %v3366_v54 = vld [vmem:[%s4107_s5 + $0x60] sm:$0xff]  }
 0x17d   :  { %v491_v59 = vpop.permute.xlu1 %490 }
 0x17e   :  { %v502_v61 = vmul.f32 %v3606_v56, %v491_v59  ;;  %3036 = vmatprep.subr.bf16.mxu1 %v418_v58  ;;  %v3365_v59 = vld [vmem:[%s4107_s5 + $0x18] sm:$0xff]  }
 0x17f   :  { %3037 = vmatpush3.bf16.msra.mxu1 %v418_v58  ;;  %v493_v63 = vpop.permute.xlu0 %492 }
 0x180   :  { %v510_v1 = vpack.c.bf16 %v502_v61, %v501_v60  ;;  %v503_v3 = vmul.f32 %v3606_v56, %v493_v63 }
 0x181   :  { %v495_v2 = vpop.permute.xlu1 %494 }
 0x182   :  { %v504_v4 = vmul.f32 %v3606_v56, %v495_v2  ;;  %3039 = vmatmul.mubr.msk.bf16.vlgmr.msra.gmra.mrb[0].mxu1 %vm274_vm1, %v3357_v62  ;;  %3042 = vmatprep.subr.bf16.mxu1 %v510_v1  ;;  %v3368_v62 = vld [vmem:[%s4107_s5] sm:$0xff]  }
 0x183   :  { %3043 = vmatpush3.bf16.msra.mxu1 %v510_v1  ;;  %v658_v5 = vpop.permute.xlu0 %657  ;;  %3046 = vmatprep.mubr.msk.bf16.mxu1 %vm274_vm1, %v3358_v0 }
 0x184   :  { %v511_v6 = vpack.c.bf16 %v504_v4, %v503_v3  ;;  %v670_v17 = vmul.f32 %v3630_v13, %v658_v5 }
 0x185   :  { %v660_v7 = vpop.permute.xlu1 %659 }
 0x186   :  { %3044 = vmatprep.subr.bf16.mxu1 %v511_v6  ;;  %v671_v15 = vmul.f32 %v3630_v13, %v660_v7 }
 0x187   :  { %3045 = vmatpush3.bf16.msra.mxu1 %v511_v6  ;;  %v662_v8 = vpop.permute.xlu0 %661  ;;  %v3367_v6 = vld [vmem:[%s4107_s5 + $0x68] sm:$0xff]  }
 0x188   :  { %3050 = vmatprep.subr.bf16.mxu1 %v3543_v30  ;;  %v679_v20 = vpack.c.bf16 %v671_v15, %v670_v17 }
 0x189   :  { %v753_v9 = vpop.permute.xlu1 %752 }
 0x18a   :  { %v764_v36 = vmul.f32 %v3657_v31, %v753_v9  ;;  %v3370_v9 = vld [vmem:[%s4107_s5 + $0x70] sm:$0xff]  }
 0x18b   :  { %v751_v11 = vpop.permute.xlu0 %750 }
 0x18c   :  { %v763_v33 = vmul.f32 %v3657_v31, %v751_v11 }
 0x18d   :  { %v664_v14 = vpop.permute.xlu1 %663 }
 0x18e   :  { %3047 = vmatmul.mubr.msk.bf16.vlgmr.msra.gmra.mrb[0].mxu1 %vm274_vm1, %v3359_v10  ;;  %v673_v25 = vmul.f32 %v3630_v13, %v664_v14  ;;  %v772_v38 = vpack.c.bf16 %v764_v36, %v763_v33  ;;  %v3710_v10 = vld [vmem:[%s4109_s2 + $0x8] ss:$0 sm:$0xff] }
 0x18f   :  { %3051 = vmatpush3.bf16.msra.mxu1 %v3543_v30  ;;  %v755_v16 = vpop.permute.xlu0 %754  ;;  %3054 = vmatprep.mubr.msk.bf16.mxu1 %vm274_vm1, %v3360_v12  ;;  %v672_v30 = vmul.f32 %v3630_v13, %v662_v8  ;;  %v3369_v14 = vld [vmem:[%s4107_s5 + $0x8] sm:$0xff]  }
 0x190   :  { %3052 = vmatprep.subr.bf16.mxu1 %v3548_v40  ;;  %v765_v48 = vmul.f32 %v3657_v31, %v755_v16 }
 0x191   :  { %v243_v19 = vpop.permute.xlu1 %242  ;;  %v680_v34 = vpack.c.bf16 %v673_v25, %v672_v30  ;;  %v3373_v25 = vld [vmem:[%s4107_s5 + $0x88] sm:$0xff]  }
 0x192   :  { %v254_v22 = vmul.f32 %v3641_v18, %v243_v19 }
 0x193   :  { %3053 = vmatpush3.bf16.msra.mxu1 %v3548_v40  ;;  %v241_v21 = vpop.permute.xlu0 %240  ;;  %v3666_v40 = vld [vmem:[%s4109_s2] ss:$0 sm:$0xff] }
 0x194   :  { %v253_v23 = vmul.f32 %v3641_v18, %v241_v21  ;;  %3058 = vmatprep.subr.bf16.mxu1 %v679_v20  ;;  %v3371_v21 = vld [vmem:[%s4107_s5 + $0x78] sm:$0xff]  }
 0x195   :  { %v846_v24 = vpop.permute.xlu1 %845 }
 0x196   :  { %v262_v26 = vpack.c.bf16 %v254_v22, %v253_v23  ;;  %v857_v61 = vmul.f32 %v3680_v52, %v846_v24  ;;  %v3372_v22 = vld [vmem:[%s4107_s5 + $0x80] sm:$0xff]  }
 0x197   :  { %v844_v28 = vpop.permute.xlu0 %843 }
 0x198   :  { %3018 = vmatprep.subr.bf16.mxu0 %v262_v26  ;;  %v856_v55 = vmul.f32 %v3680_v52, %v844_v28 }
 0x199   :  { %v757_v32 = vpop.permute.xlu1 %756  ;;  %3019 = vmatpush3.bf16.msra.mxu0 %v262_v26 }
 0x19a   :  { %3055 = vmatmul.mubr.msk.bf16.vlgmr.msra.gmra.mrb[0].mxu1 %vm274_vm1, %v3361_v27  ;;  %v766_v42 = vmul.f32 %v3657_v31, %v757_v32  ;;  %v865_v0 = vpack.c.bf16 %v857_v61, %v856_v55  ;;  %v3374_v61 = vld [vmem:[%s4111_s7 + $0x10] sm:$0xff]  }
 0x19b   :  { %3059 = vmatpush3.bf16.msra.mxu1 %v679_v20  ;;  %v245_v35 = vpop.permute.xlu0 %244  ;;  %3062 = vmatprep.mubr.msk.bf16.mxu1 %vm274_vm1, %v3362_v29 }
 0x19c   :  { %3060 = vmatprep.subr.bf16.mxu1 %v680_v34  ;;  %v255_v43 = vmul.f32 %v3641_v18, %v245_v35  ;;  %v773_v57 = vpack.c.bf16 %v766_v42, %v765_v48  ;;  %v1057_v42 = vld [vmem:[%s4110_s1] sm:$0xff]  ;;  %v1060_v48 = vld [vmem:[%s4110_s1 + $0x18] sm:$0xff] }
 0x19d   :  { %v220_v37 = vpop.permute.xlu1 %219 }
 0x19e   :  { %v231_v49 = vmul.f32 %v3666_v40, %v220_v37  ;;  %v1059_v37 = vld [vmem:[%s4110_s1 + $0x10] sm:$0xff] }
 0x19f   :  { %3061 = vmatpush3.bf16.msra.mxu1 %v680_v34  ;;  %v848_v39 = vpop.permute.xlu0 %847 }
 0x1a0   :  { %3066 = vmatprep.subr.bf16.mxu1 %v772_v38  ;;  %v858_v7 = vmul.f32 %v3680_v52, %v848_v39 }
 0x1a1   :  { %v247_v41 = vpop.permute.xlu1 %246 }
 0x1a2   :  { %v256_v44 = vmul.f32 %v3641_v18, %v247_v41 }
 0x1a3   :  { %v218_v47 = vpop.permute.xlu0 %217 }
 0x1a4   :  { %v263_v50 = vpack.c.bf16 %v256_v44, %v255_v43  ;;  %v230_v51 = vmul.f32 %v3666_v40, %v218_v47 }
 0x1a5   :  { %v850_v53 = vpop.permute.xlu1 %849 }
 0x1a6   :  { %v238_v58 = vpack.c.bf16 %v231_v49, %v230_v51  ;;  %3020 = vmatprep.subr.bf16.mxu0 %v263_v50  ;;  %3063 = vmatmul.mubr.msk.bf16.vlgmr.msra.gmra.mrb[0].mxu1 %vm274_vm1, %v3363_v45  ;;  %v859_v3 = vmul.f32 %v3680_v52, %v850_v53  ;;  %v1058_v53 = vld [vmem:[%s4110_s1 + $0x8] sm:$0xff] }
 0x1a7   :  { %3067 = vmatpush3.bf16.msra.mxu1 %v772_v38  ;;  %3021 = vmatpush3.bf16.msra.mxu0 %v263_v50  ;;  %v937_v60 = vpop.permute.xlu0 %936 }
 0x1a8   :  { %3068 = vmatprep.subr.bf16.mxu1 %v773_v57  ;;  %3026 = vmatprep.subr.bf16.mxu0 %v238_v58  ;;  %v866_v11 = vpack.c.bf16 %v859_v3, %v858_v7  ;;  %v949_v15 = vmul.f32 %v3710_v10, %v937_v60  ;;  %v1843_v3 = vld [vmem:[%s4112_s8 + $0x18] sm:$0xff] }
 0x1a9   :  { %v939_v63 = vpop.permute.xlu1 %938  ;;  %3070 = vmatprep.mubr.msk.bf16.mxu1 %vm274_vm1, %v3366_v54 }
 0x1aa   :  { %3023 = vmatmul.mubr.msk.bf16.vlgmr.msra.gmra.mrb[8].mxu0 %vm274_vm1, %v3365_v59  ;;  %v950_v12 = vmul.f32 %v3710_v10, %v939_v63 }
 0x1ab   :  { %3069 = vmatpush3.bf16.msra.mxu1 %v773_v57  ;;  %3027 = vmatpush3.bf16.msra.mxu0 %v238_v58  ;;  %v222_v1 = vpop.permute.xlu0 %221 }
 0x1ac   :  { %3074 = vmatprep.subr.bf16.mxu1 %v865_v0  ;;  %3030 = vmatprep.mubr.msk.bf16.mxu0 %vm274_vm1, %v3368_v62  ;;  %v232_v4 = vmul.f32 %v3666_v40, %v222_v1  ;;  %v958_v16 = vpack.c.bf16 %v950_v12, %v949_v15  ;;  %v1841_v1 = vld [vmem:[%s4112_s8 + $0x8] sm:$0xff] }
 0x1ad   :  { %v224_v2 = vpop.permute.xlu1 %223 }
 0x1ae   :  { %v233_v5 = vmul.f32 %v3666_v40, %v224_v2  ;;  %v1842_v2 = vld [vmem:[%s4112_s8 + $0x10] sm:$0xff] }
 0x1af   :  { %v941_v19 = vpop.permute.xlu0 %940 }
 0x1b0   :  { %v239_v8 = vpack.c.bf16 %v233_v5, %v232_v4  ;;  %v951_v23 = vmul.f32 %v3710_v10, %v941_v19 }
 0x1b1   :  { %v943_v17 = vpop.permute.xlu1 %942 }
 0x1b2   :  { %3028 = vmatprep.subr.bf16.mxu0 %v239_v8  ;;  %3071 = vmatmul.mubr.msk.bf16.vlgmr.msra.gmra.mrb[0].mxu1 %vm274_vm1, %v3367_v6  ;;  %v952_v20 = vmul.f32 %v3710_v10, %v943_v17 }
 0x1b3   :  { %3075 = vmatpush3.bf16.msra.mxu1 %v865_v0  ;;  %3029 = vmatpush3.bf16.msra.mxu0 %v239_v8  ;;  %v1840_v0 = vld [vmem:[%s4112_s8] sm:$0xff] }
 0x1b4   :  { %3076 = vmatprep.subr.bf16.mxu1 %v866_v11  ;;  %3078 = vmatprep.mubr.msk.bf16.mxu1 %vm274_vm1, %v3370_v9  ;;  %v959_v24 = vpack.c.bf16 %v952_v20, %v951_v23  ;;  %v3376_v23 = vld [vmem:[%s4111_s7] sm:$0xff]  }
 0x1b6   :  { %3031 = vmatmul.mubr.msk.bf16.vlgmr.msra.gmra.mrb[8].mxu0 %vm274_vm1, %v3369_v14 }
 0x1b7   :  { %3077 = vmatpush3.bf16.msra.mxu1 %v866_v11  ;;  %3094 = vmatprep.mubr.msk.bf16.mxu0 %vm274_vm1, %v3374_v61 }
 0x1b8   :  { %3082 = vmatprep.subr.bf16.mxu1 %v958_v16 }
 0x1be   :  { %3079 = vmatmul.mubr.msk.bf16.vlgmr.msra.gmra.mrb[0].mxu1 %vm274_vm1, %v3371_v21  ;;  %v3375_v21 = vld [vmem:[%s4111_s7 + $0x18] sm:$0xff]  }
 0x1bf   :  { %3083 = vmatpush3.bf16.msra.mxu1 %v958_v16  ;;  %3086 = vmatprep.mubr.msk.bf16.mxu1 %vm274_vm1, %v3372_v22 }
 0x1c0   :  { %3084 = vmatprep.subr.bf16.mxu1 %v959_v24  ;;  %v1036_v30 = vpop.permute.xlu0 %1035 }
 0x1c2   :  { %v1041_v32 = vpop.permute.xlu1 %1040 }
 0x1c3   :  { %3085 = vmatpush3.bf16.msra.mxu1 %v959_v24 }
 0x1c4   :  { %v1046_v36 = vpop.permute.xlu0 %1045 }
 0x1c6   :  { %v1051_v45 = vpop.permute.xlu1 %1050 }
 0x1ca   :  { %3087 = vmatmul.mubr.msk.bf16.vlgmr.msra.gmra.mrb[0].mxu1 %vm274_vm1, %v3373_v25 }
 0x289   :  { %v3032_v26 = vpop.f32.mrb[8].mxu0 }
 0x28a   :  { %v380_v27 = vpop.f32.mrb[9].mxu0 }
 0x28b   :  { %v3033_v28 = vpop.f32.mrb[10].mxu0 }
 0x28c   :  { %v383_v29 = vpop.f32.mrb[11].mxu0 }
 0x29d   :  { %v3088_v33 = vpop.f32.mrb[0].mxu1 }
 0x29e   :  { %v3234_v34 = vadd.f32 %v3088_v33, %v3032_v26  ;;  %v1010_v35 = vpop.f32.mrb[1].mxu1 }
 0x29f   :  { %v3235_v38 = vadd.f32 %v1010_v35, %v380_v27  ;;  %v3089_v39 = vpop.f32.mrb[2].mxu1 }
 0x2a0   :  { %v1055_v41 = vadd.f32 %v3234_v34, %v1046_v36  ;;  %v3236_v43 = vadd.f32 %v3089_v39, %v3033_v28  ;;  %v1013_v44 = vpop.f32.mrb[3].mxu1  ;;  %v3377_v39 = vld [vmem:[%s4111_s7 + $0x8] sm:$0xff]  }
 0x2a1   :  { %v1053_v47 = vadd.f32 %v3235_v38, %v1036_v30  ;;  %v3237_v49 = vadd.f32 %v1013_v44, %v383_v29 }
 0x2a2   :  { %v1063_v50 = vadd.f32 %v1059_v37, %v1055_v41  ;;  %v1056_v51 = vadd.f32 %v3236_v43, %v1051_v45 }
 0x2a3   :  { %v1061_v54 = vadd.f32 %v1057_v42, %v1053_v47  ;;  %v1054_v55 = vadd.f32 %v3237_v49, %v1041_v32  ;;  %v3378_v42 = vld [vmem:[%s4111_s7 + $0x20] sm:$0xff]  }
 0x2a4   :  { %v1064_v57 = vadd.f32 %v1060_v48, %v1056_v51  ;;  %v3748_v60 = vmax.f32 %v1063_v50, 0.0  ;;  %v3379_v51 = vld [vmem:[%s4111_s7 + $0x28] sm:$0xff]  }
 0x2a5   :  { %v3746_v58 = vmax.f32 %v1061_v54, 0.0  ;;  %v1062_v59 = vadd.f32 %v1058_v53, %v1054_v55  ;;  %v3380_v53 = vld [vmem:[%s4111_s7 + $0x30] sm:$0xff]  }
 0x2a6   :  { %v3753_v62 = vmax.f32 %v1064_v57, 0.0 }
 0x2a7   :  { %v3755_v63 = vmax.f32 %v1062_v59, 0.0  ;;  %1087 = vrot.lane.b32.xlu0 %v3746_v58, %s3421_s16  ;;  %v3381_v59 = vld [vmem:[%s4111_s7 + $0x38] sm:$0xff]  }
 0x2a9   :  { %1089 = vrot.lane.b32.xlu1 %v3755_v63, %s3421_s16  ;;  %v1417_v57 = vpack.c.bf16 %v3755_v63, %v3746_v58 }
 0x2ab   :  { %1091 = vrot.lane.b32.xlu0 %v3748_v60, %s3421_s16 }
 0x2ad   :  { %1093 = vrot.lane.b32.xlu1 %v3753_v62, %s3421_s16 }
 0x2af   :  { %1069 = vrot.lane.b32.xlu0 %v3746_v58, %s3423_s20 }
 0x2b1   :  { %1071 = vrot.lane.b32.xlu1 %v3755_v63, %s3423_s20 }
 0x2b3   :  { %1073 = vrot.lane.b32.xlu0 %v3748_v60, %s3423_s20 }
 0x2b5   :  { %1075 = vrot.lane.b32.xlu1 %v3753_v62, %s3423_s20 }
 0x2b7   :  { %1236 = vrot.lane.b32.xlu0 %v3746_v58, %s3417_s0 }
 0x2b9   :  { %1238 = vrot.lane.b32.xlu1 %v3755_v63, %s3417_s0 }
 0x2bb   :  { %1240 = vrot.lane.b32.xlu0 %v3748_v60, %s3417_s0 }
 0x2bd   :  { %1242 = vrot.lane.b32.xlu1 %v3753_v62, %s3417_s0 }
 0x2bf   :  { %1324 = vrot.lane.b32.xlu0 %v3746_v58, %s3418_s3 }
 0x2c1   :  { %1326 = vrot.lane.b32.xlu1 %v3755_v63, %s3418_s3 }
 0x2c3   :  { %1328 = vrot.lane.b32.xlu0 %v3748_v60, %s3418_s3 }
 0x2c5   :  { %1330 = vrot.lane.b32.xlu1 %v3753_v62, %s3418_s3 }
 0x2c7   :  { %1488 = vrot.lane.b32.xlu0 %v3746_v58, %s3419_s14 }
 0x2c9   :  { %1490 = vrot.lane.b32.xlu1 %v3755_v63, %s3419_s14 }
 0x2cb   :  { %1492 = vrot.lane.b32.xlu0 %v3748_v60, %s3419_s14 }
 0x2cd   :  { %1494 = vrot.lane.b32.xlu1 %v3753_v62, %s3419_s14 }
 0x2cf   :  { %1576 = vrot.lane.b32.xlu0 %v3746_v58, %s3420_s15 }
 0x2d1   :  { %1578 = vrot.lane.b32.xlu1 %v3755_v63, %s3420_s15 }
 0x2d3   :  { %1580 = vrot.lane.b32.xlu0 %v3748_v60, %s3420_s15 }
 0x2d5   :  { %1582 = vrot.lane.b32.xlu1 %v3753_v62, %s3420_s15 }
 0x2d7   :  { %1664 = vrot.lane.b32.xlu0 %v3746_v58, %s3422_s17 }
 0x2d9   :  { %1666 = vrot.lane.b32.xlu1 %v3755_v63, %s3422_s17 }
 0x2db   :  { %1668 = vrot.lane.b32.xlu0 %v3748_v60, %s3422_s17 }
 0x2dd   :  { %1670 = vrot.lane.b32.xlu1 %v3753_v62, %s3422_s17 }
 0x2df   :  { %1752 = vrot.lane.b32.xlu0 %v3746_v58, %s3424_s21 }
 0x2e1   :  { %1754 = vrot.lane.b32.xlu1 %v3755_v63, %s3424_s21 }
 0x2e3   :  { %1756 = vrot.lane.b32.xlu0 %v3748_v60, %s3424_s21 }
 0x2e5   :  { %1758 = vrot.lane.b32.xlu1 %v3753_v62, %s3424_s21 }
 0x2e7   :  { %1846 = vperm.xlu0 %3339, %v1840_v0  }
 0x2e9   :  { %1851 = vperm.xlu1 %3340, %v1841_v1  }
 0x2eb   :  { %1856 = vperm.xlu0 %3339, %v1842_v2   ;;  %v1418_v2 = vpack.c.bf16 %v3753_v62, %v3748_v60 }
 0x2ed   :  { %1861 = vperm.xlu1 %3340, %v1843_v3  }
 0x319   :  { %v1088_v4 = vpop.permute.xlu0 %1087 }
 0x31a   :  { %v1095_v6 = vmul.f32 %v3641_v18, %v1088_v4 }
 0x31b   :  { %v1090_v5 = vpop.permute.xlu1 %1089 }
 0x31c   :  { %v1096_v7 = vmul.f32 %v3641_v18, %v1090_v5 }
 0x31d   :  { %v1092_v8 = vpop.permute.xlu0 %1091 }
 0x31e   :  { %v1104_v9 = vpack.c.bf16 %v1096_v7, %v1095_v6  ;;  %v1097_v12 = vmul.f32 %v3641_v18, %v1092_v8  ;;  %v3383_v8 = vld [vmem:[%s4111_s7 + $0x48] sm:$0xff]  }
 0x31f   :  { %v1094_v11 = vpop.permute.xlu1 %1093 }
 0x320   :  { %v1098_v14 = vmul.f32 %v3641_v18, %v1094_v11  ;;  %3090 = vmatprep.subr.bf16.mxu0 %v1104_v9  ;;  %v3384_v11 = vld [vmem:[%s4111_s7 + $0x50] sm:$0xff]  }
 0x321   :  { %v1070_v15 = vpop.permute.xlu0 %1069  ;;  %3091 = vmatpush3.bf16.msra.mxu0 %v1104_v9 }
 0x322   :  { %v1105_v16 = vpack.c.bf16 %v1098_v14, %v1097_v12  ;;  %v1077_v19 = vmul.f32 %v3666_v40, %v1070_v15 }
 0x323   :  { %v1072_v17 = vpop.permute.xlu1 %1071 }
 0x324   :  { %v1078_v20 = vmul.f32 %v3666_v40, %v1072_v17  ;;  %3092 = vmatprep.subr.bf16.mxu0 %v1105_v16 }
 0x325   :  { %v1074_v22 = vpop.permute.xlu0 %1073  ;;  %3093 = vmatpush3.bf16.msra.mxu0 %v1105_v16 }
 0x326   :  { %v1085_v24 = vpack.c.bf16 %v1078_v20, %v1077_v19  ;;  %v1079_v26 = vmul.f32 %v3666_v40, %v1074_v22 }
 0x327   :  { %v1076_v25 = vpop.permute.xlu1 %1075 }
 0x328   :  { %v1080_v27 = vmul.f32 %v3666_v40, %v1076_v25  ;;  %3095 = vmatmul.mubr.msk.bf16.vlgmr.msra.gmra.mrb[12].mxu0 %vm274_vm1, %v3375_v21  ;;  %3098 = vmatprep.subr.bf16.mxu0 %v1085_v24 }
 0x329   :  { %v1237_v28 = vpop.permute.xlu0 %1236  ;;  %3099 = vmatpush3.bf16.msra.mxu0 %v1085_v24  ;;  %3102 = vmatprep.mubr.msk.bf16.mxu0 %vm274_vm1, %v3376_v23  ;;  %v3386_v24 = vld [vmem:[%s4111_s7 + $0x60] sm:$0xff]  }
 0x32a   :  { %v1086_v29 = vpack.c.bf16 %v1080_v27, %v1079_v26  ;;  %v1244_v32 = vmul.f32 %v3597_v46, %v1237_v28 }
 0x32b   :  { %v1239_v30 = vpop.permute.xlu1 %1238 }
 0x32c   :  { %v1245_v33 = vmul.f32 %v3597_v46, %v1239_v30  ;;  %3100 = vmatprep.subr.bf16.mxu0 %v1086_v29 }
 0x32d   :  { %v1241_v34 = vpop.permute.xlu0 %1240  ;;  %3101 = vmatpush3.bf16.msra.mxu0 %v1086_v29 }
 0x32e   :  { %v1253_v35 = vpack.c.bf16 %v1245_v33, %v1244_v32  ;;  %v1246_v37 = vmul.f32 %v3597_v46, %v1241_v34 }
 0x32f   :  { %v1243_v36 = vpop.permute.xlu1 %1242 }
 0x330   :  { %v1247_v38 = vmul.f32 %v3597_v46, %v1243_v36  ;;  %3106 = vmatprep.subr.bf16.mxu0 %v1253_v35  ;;  %v3388_v36 = vld [vmem:[%s4111_s7 + $0x70] sm:$0xff]  }
 0x331   :  { %v1325_v41 = vpop.permute.xlu0 %1324 }
 0x332   :  { %v1254_v43 = vpack.c.bf16 %v1247_v38, %v1246_v37  ;;  %v1332_v45 = vmul.f32 %v3606_v56, %v1325_v41 }
 0x333   :  { %v1327_v44 = vpop.permute.xlu1 %1326 }
 0x334   :  { %v1333_v47 = vmul.f32 %v3606_v56, %v1327_v44  ;;  %3103 = vmatmul.mubr.msk.bf16.vlgmr.msra.gmra.mrb[12].mxu0 %vm274_vm1, %v3377_v39 }
 0x335   :  { %3107 = vmatpush3.bf16.msra.mxu0 %v1253_v35  ;;  %3110 = vmatprep.mubr.msk.bf16.mxu0 %vm274_vm1, %v3378_v42  ;;  %v1329_v49 = vpop.permute.xlu0 %1328 }
 0x336   :  { %v1341_v46 = vpack.c.bf16 %v1333_v47, %v1332_v45  ;;  %3108 = vmatprep.subr.bf16.mxu0 %v1254_v43  ;;  %v1334_v54 = vmul.f32 %v3606_v56, %v1329_v49 }
 0x337   :  { %v1331_v48 = vpop.permute.xlu1 %1330 }
 0x338   :  { %v1335_v50 = vmul.f32 %v3606_v56, %v1331_v48  ;;  %v3382_v56 = vld [vmem:[%s4111_s7 + $0x40] sm:$0xff]  }
 0x339   :  { %3109 = vmatpush3.bf16.msra.mxu0 %v1254_v43  ;;  %v1489_v0 = vpop.permute.xlu0 %1488 }
 0x33a   :  { %3114 = vmatprep.subr.bf16.mxu0 %v1341_v46  ;;  %v1342_v55 = vpack.c.bf16 %v1335_v50, %v1334_v54  ;;  %v1496_v3 = vmul.f32 %v3630_v13, %v1489_v0  ;;  %v3391_v50 = vld [vmem:[%s4111_s7 + $0x88] sm:$0xff]  }
 0x33b   :  { %v1491_v61 = vpop.permute.xlu1 %1490 }
 0x33c   :  { %v1497_v1 = vmul.f32 %v3630_v13, %v1491_v61 }
 0x33d   :  { %v1493_v6 = vpop.permute.xlu0 %1492 }
 0x33e   :  { %v1505_v5 = vpack.c.bf16 %v1497_v1, %v1496_v3  ;;  %v1498_v12 = vmul.f32 %v3630_v13, %v1493_v6  ;;  %v3392_v6 = vld [vmem:[%s4113_s9 + $0x10] sm:$0xff]  }
 0x33f   :  { %v1495_v4 = vpop.permute.xlu1 %1494  ;;  %3166 = vmatprep.mubr.msk.bf16.mxu1 %vm274_vm1, %v3392_v6  ;;  %v3412_v6 = vld [vmem:[%s4109_s2 + $0x5] ss:$0 sm:$0xff] }
 0x340   :  { %3111 = vmatmul.mubr.msk.bf16.vlgmr.msra.gmra.mrb[12].mxu0 %vm274_vm1, %v3379_v51  ;;  %v1499_v7 = vmul.f32 %v3630_v13, %v1495_v4  ;;  %v3385_v13 = vld [vmem:[%s4111_s7 + $0x58] sm:$0xff]  }
 0x341   :  { %3115 = vmatpush3.bf16.msra.mxu0 %v1341_v46  ;;  %3118 = vmatprep.mubr.msk.bf16.mxu0 %vm274_vm1, %v3380_v53  ;;  %v1577_v14 = vpop.permute.xlu0 %1576  ;;  %v3390_v46 = vld [vmem:[%s4111_s7 + $0x80] sm:$0xff]  }
 0x342   :  { %3116 = vmatprep.subr.bf16.mxu0 %v1342_v55  ;;  %v1506_v15 = vpack.c.bf16 %v1499_v7, %v1498_v12  ;;  %v1584_v17 = vmul.f32 %v3657_v31, %v1577_v14  ;;  %v2644_v12 = vld [vmem:[%s4114_s10 + $0x8] sm:$0xff]  ;;  %v2645_v14 = vld [vmem:[%s4114_s10 + $0x10] sm:$0xff] }
 0x343   :  { %v1579_v9 = vpop.permute.xlu1 %1578 }
 0x344   :  { %v1585_v16 = vmul.f32 %v3657_v31, %v1579_v9 }
 0x345   :  { %3117 = vmatpush3.bf16.msra.mxu0 %v1342_v55  ;;  %v1581_v21 = vpop.permute.xlu0 %1580 }
 0x346   :  { %3122 = vmatprep.subr.bf16.mxu0 %v1417_v57  ;;  %v1593_v20 = vpack.c.bf16 %v1585_v16, %v1584_v17  ;;  %v1586_v25 = vmul.f32 %v3657_v31, %v1581_v21 }
 0x347   :  { %v1583_v19 = vpop.permute.xlu1 %1582 }
 0x348   :  { %v1587_v22 = vmul.f32 %v3657_v31, %v1583_v19  ;;  %v3387_v31 = vld [vmem:[%s4111_s7 + $0x68] sm:$0xff]  }
 0x349   :  { %v1665_v26 = vpop.permute.xlu0 %1664 }
 0x34a   :  { %v1594_v27 = vpack.c.bf16 %v1587_v22, %v1586_v25  ;;  %v1672_v29 = vmul.f32 %v3680_v52, %v1665_v26 }
 0x34b   :  { %v1667_v23 = vpop.permute.xlu1 %1666 }
 0x34c   :  { %3119 = vmatmul.mubr.msk.bf16.vlgmr.msra.gmra.mrb[12].mxu0 %vm274_vm1, %v3381_v59  ;;  %v1673_v28 = vmul.f32 %v3680_v52, %v1667_v23 }
 0x34d   :  { %3123 = vmatpush3.bf16.msra.mxu0 %v1417_v57  ;;  %3126 = vmatprep.mubr.msk.bf16.mxu0 %vm274_vm1, %v3382_v56  ;;  %v1669_v33 = vpop.permute.xlu0 %1668 }
 0x34e   :  { %3124 = vmatprep.subr.bf16.mxu0 %v1418_v2  ;;  %v1681_v32 = vpack.c.bf16 %v1673_v28, %v1672_v29  ;;  %v1674_v37 = vmul.f32 %v3680_v52, %v1669_v33 }
 0x34f   :  { %v1671_v30 = vpop.permute.xlu1 %1670 }
 0x350   :  { %v1675_v34 = vmul.f32 %v3680_v52, %v1671_v30  ;;  %v3389_v52 = vld [vmem:[%s4111_s7 + $0x78] sm:$0xff]  }
 0x351   :  { %3125 = vmatpush3.bf16.msra.mxu0 %v1418_v2  ;;  %v1753_v38 = vpop.permute.xlu0 %1752  ;;  %v3393_v30 = vld [vmem:[%s4113_s9 + $0x18] sm:$0xff]  }
 0x352   :  { %3130 = vmatprep.subr.bf16.mxu0 %v1505_v5  ;;  %v1682_v39 = vpack.c.bf16 %v1675_v34, %v1674_v37  ;;  %v1760_v42 = vmul.f32 %v3710_v10, %v1753_v38 }
 0x353   :  { %v1755_v35 = vpop.permute.xlu1 %1754 }
 0x354   :  { %v1761_v41 = vmul.f32 %v3710_v10, %v1755_v35 }
 0x355   :  { %v1757_v45 = vpop.permute.xlu0 %1756 }
 0x356   :  { %v1769_v43 = vpack.c.bf16 %v1761_v41, %v1760_v42  ;;  %v1762_v48 = vmul.f32 %v3710_v10, %v1757_v45 }
 0x357   :  { %v1759_v44 = vpop.permute.xlu1 %1758 }
 0x358   :  { %3127 = vmatmul.mubr.msk.bf16.vlgmr.msra.gmra.mrb[12].mxu0 %vm274_vm1, %v3383_v8  ;;  %v1763_v47 = vmul.f32 %v3710_v10, %v1759_v44 }
 0x359   :  { %3131 = vmatpush3.bf16.msra.mxu0 %v1505_v5  ;;  %3134 = vmatprep.mubr.msk.bf16.mxu0 %vm274_vm1, %v3384_v11  ;;  %v2643_v11 = vld [vmem:[%s4114_s10] sm:$0xff] }
 0x35a   :  { %3132 = vmatprep.subr.bf16.mxu0 %v1506_v15  ;;  %v1770_v49 = vpack.c.bf16 %v1763_v47, %v1762_v48  ;;  %v3396_v48 = vld [vmem:[%s4113_s9 + $0x20] sm:$0xff]  }
 0x35d   :  { %3133 = vmatpush3.bf16.msra.mxu0 %v1506_v15  ;;  %v2646_v15 = vld [vmem:[%s4114_s10 + $0x18] sm:$0xff] }
 0x35e   :  { %3138 = vmatprep.subr.bf16.mxu0 %v1593_v20 }
 0x364   :  { %3135 = vmatmul.mubr.msk.bf16.vlgmr.msra.gmra.mrb[12].mxu0 %vm274_vm1, %v3385_v13 }
 0x365   :  { %3139 = vmatpush3.bf16.msra.mxu0 %v1593_v20  ;;  %3142 = vmatprep.mubr.msk.bf16.mxu0 %vm274_vm1, %v3386_v24 }
 0x366   :  { %3140 = vmatprep.subr.bf16.mxu0 %v1594_v27  ;;  %v1847_v51 = vpop.permute.xlu0 %1846 }
 0x368   :  { %v1852_v53 = vpop.permute.xlu1 %1851 }
 0x369   :  { %3141 = vmatpush3.bf16.msra.mxu0 %v1594_v27 }
 0x36a   :  { %3146 = vmatprep.subr.bf16.mxu0 %v1681_v32  ;;  %v1857_v54 = vpop.permute.xlu0 %1856 }
 0x36c   :  { %v1862_v59 = vpop.permute.xlu1 %1861 }
 0x370   :  { %3143 = vmatmul.mubr.msk.bf16.vlgmr.msra.gmra.mrb[12].mxu0 %vm274_vm1, %v3387_v31 }
 0x371   :  { %3147 = vmatpush3.bf16.msra.mxu0 %v1681_v32  ;;  %3150 = vmatprep.mubr.msk.bf16.mxu0 %vm274_vm1, %v3388_v36 }
 0x372   :  { %3148 = vmatprep.subr.bf16.mxu0 %v1682_v39 }
 0x375   :  { %3149 = vmatpush3.bf16.msra.mxu0 %v1682_v39  ;;  %v3410_v39 = vld [vmem:[%s4109_s2 + $0x2] ss:$0 sm:$0xff] }
 0x376   :  { %3154 = vmatprep.subr.bf16.mxu0 %v1769_v43 }
 0x37c   :  { %3151 = vmatmul.mubr.msk.bf16.vlgmr.msra.gmra.mrb[12].mxu0 %vm274_vm1, %v3389_v52  ;;  %v3395_v52 = vld [vmem:[%s4113_s9 + $0x8] sm:$0xff]  }
 0x37d   :  { %3155 = vmatpush3.bf16.msra.mxu0 %v1769_v43  ;;  %3158 = vmatprep.mubr.msk.bf16.mxu0 %vm274_vm1, %v3390_v46 }
 0x37e   :  { %3156 = vmatprep.subr.bf16.mxu0 %v1770_v49 }
 0x381   :  { %3157 = vmatpush3.bf16.msra.mxu0 %v1770_v49 }
 0x388   :  { %3159 = vmatmul.mubr.msk.bf16.vlgmr.msra.gmra.mrb[12].mxu0 %vm274_vm1, %v3391_v50 }
 0x45b   :  { %v3160_v55 = vpop.f32.mrb[12].mxu0 }
 0x45c   :  { %v1866_v57 = vadd.f32 %v3160_v55, %v1857_v54  ;;  %v1821_v10 = vpop.f32.mrb[13].mxu0 }
 0x45d   :  { %v1864_v61 = vadd.f32 %v1847_v51, %v1821_v10  ;;  %v3161_v56 = vpop.f32.mrb[14].mxu0  ;;  %v3411_v51 = vld [vmem:[%s4109_s2 + $0x3] ss:$0 sm:$0xff] }
 0x45e   :  { %v1867_v0 = vadd.f32 %v3161_v56, %v1862_v59  ;;  %v1824_v1 = vpop.f32.mrb[15].mxu0  ;;  %v1870_v2 = vmax.f32 %v1866_v57, 0.0  ;;  %v3398_v56 = vld [vmem:[%s4113_s9 + $0x30] sm:$0xff]  }
 0x45f   :  { %v1868_v3 = vmax.f32 %v1864_v61, 0.0  ;;  %v1865_v4 = vadd.f32 %v1852_v53, %v1824_v1  ;;  %v3397_v61 = vld [vmem:[%s4113_s9 + $0x28] sm:$0xff]  }
 0x460   :  { %v1871_v5 = vmax.f32 %v1867_v0, 0.0 }
 0x461   :  { %v1869_v7 = vmax.f32 %v1865_v4, 0.0  ;;  %1890 = vrot.lane.b32.xlu0 %v1868_v3, %s3421_s16  ;;  %v3400_v4 = vld [vmem:[%s4113_s9 + $0x40] sm:$0xff]  }
 0x462   :  { %v3943_v8 = vpack.c.bf16 %v1871_v5, %v1870_v2 }
 0x463   :  { %1892 = vrot.lane.b32.xlu1 %v1869_v7, %s3421_s16  ;;  %v3946_v9 = vpack.c.bf16 %v1869_v7, %v1868_v3 }
 0x465   :  { %1894 = vrot.lane.b32.xlu0 %v1870_v2, %s3421_s16 }
 0x467   :  { %1896 = vrot.lane.b32.xlu1 %v1871_v5, %s3421_s16 }
 0x469   :  { %1872 = vrot.lane.b32.xlu0 %v1868_v3, %s3423_s20 }
 0x46b   :  { %1874 = vrot.lane.b32.xlu1 %v1869_v7, %s3423_s20 }
 0x46d   :  { %1876 = vrot.lane.b32.xlu0 %v1870_v2, %s3423_s20 }
 0x46f   :  { %1878 = vrot.lane.b32.xlu1 %v1871_v5, %s3423_s20 }
 0x471   :  { %2039 = vrot.lane.b32.xlu0 %v1868_v3, %s3417_s0 }
 0x473   :  { %2041 = vrot.lane.b32.xlu1 %v1869_v7, %s3417_s0 }
 0x475   :  { %2043 = vrot.lane.b32.xlu0 %v1870_v2, %s3417_s0 }
 0x477   :  { %2045 = vrot.lane.b32.xlu1 %v1871_v5, %s3417_s0 }
 0x479   :  { %2127 = vrot.lane.b32.xlu0 %v1868_v3, %s3418_s3 }
 0x47b   :  { %2129 = vrot.lane.b32.xlu1 %v1869_v7, %s3418_s3 }
 0x47d   :  { %2131 = vrot.lane.b32.xlu0 %v1870_v2, %s3418_s3 }
 0x47f   :  { %2133 = vrot.lane.b32.xlu1 %v1871_v5, %s3418_s3 }
 0x481   :  { %2291 = vrot.lane.b32.xlu0 %v1868_v3, %s3419_s14 }
 0x483   :  { %2293 = vrot.lane.b32.xlu1 %v1869_v7, %s3419_s14 }
 0x485   :  { %2295 = vrot.lane.b32.xlu0 %v1870_v2, %s3419_s14 }
 0x487   :  { %2297 = vrot.lane.b32.xlu1 %v1871_v5, %s3419_s14 }
 0x489   :  { %2379 = vrot.lane.b32.xlu0 %v1868_v3, %s3420_s15 }
 0x48b   :  { %2381 = vrot.lane.b32.xlu1 %v1869_v7, %s3420_s15 }
 0x48d   :  { %2383 = vrot.lane.b32.xlu0 %v1870_v2, %s3420_s15 }
 0x48f   :  { %2385 = vrot.lane.b32.xlu1 %v1871_v5, %s3420_s15 }
 0x491   :  { %2467 = vrot.lane.b32.xlu0 %v1868_v3, %s3422_s17 }
 0x493   :  { %2469 = vrot.lane.b32.xlu1 %v1869_v7, %s3422_s17 }
 0x495   :  { %2471 = vrot.lane.b32.xlu0 %v1870_v2, %s3422_s17 }
 0x497   :  { %2473 = vrot.lane.b32.xlu1 %v1871_v5, %s3422_s17 }
 0x499   :  { %2555 = vrot.lane.b32.xlu0 %v1868_v3, %s3424_s21 }
 0x49b   :  { %2557 = vrot.lane.b32.xlu1 %v1869_v7, %s3424_s21 }
 0x49d   :  { %2559 = vrot.lane.b32.xlu0 %v1870_v2, %s3424_s21  ;;  %v3399_v2 = vld [vmem:[%s4113_s9 + $0x38] sm:$0xff]  }
 0x49f   :  { %2561 = vrot.lane.b32.xlu1 %v1871_v5, %s3424_s21 }
 0x4a1   :  { %2649 = vperm.xlu0 %3339, %v2643_v11  }
 0x4a3   :  { %2654 = vperm.xlu1 %3340, %v2644_v12  }
 0x4a5   :  { %2659 = vperm.xlu0 %3339, %v2645_v14  }
 0x4a7   :  { %2664 = vperm.xlu1 %3340, %v2646_v15  }
 0x4d3   :  { %v1891_v16 = vpop.permute.xlu0 %1890 }
 0x4d4   :  { %v1898_v19 = vmul.f32 %v3641_v18, %v1891_v16 }
 0x4d5   :  { %v1893_v17 = vpop.permute.xlu1 %1892 }
 0x4d6   :  { %v1899_v20 = vmul.f32 %v3641_v18, %v1893_v17  ;;  %v3401_v17 = vld [vmem:[%s4113_s9 + $0x48] sm:$0xff]  }
 0x4d7   :  { %v1895_v21 = vpop.permute.xlu0 %1894 }
 0x4d8   :  { %v1907_v22 = vpack.c.bf16 %v1899_v20, %v1898_v19  ;;  %v1900_v23 = vmul.f32 %v3641_v18, %v1895_v21 }
 0x4d9   :  { %v1897_v13 = vpop.permute.xlu1 %1896 }
 0x4da   :  { %v1901_v24 = vmul.f32 %v3641_v18, %v1897_v13  ;;  %3162 = vmatprep.subr.bf16.mxu1 %v1907_v22  ;;  %v3394_v18 = vld [vmem:[%s4113_s9] sm:$0xff]  }
 0x4db   :  { %v1873_v25 = vpop.permute.xlu0 %1872  ;;  %3163 = vmatpush3.bf16.msra.mxu1 %v1907_v22  ;;  %v3413_v13 = vld [vmem:[%s4109_s2 + $0x6] ss:$0 sm:$0xff] }
 0x4dc   :  { %v1908_v26 = vpack.c.bf16 %v1901_v24, %v1900_v23  ;;  %v1880_v28 = vmul.f32 %v3666_v40, %v1873_v25 }
 0x4dd   :  { %v1875_v27 = vpop.permute.xlu1 %1874 }
 0x4de   :  { %v1881_v29 = vmul.f32 %v3666_v40, %v1875_v27  ;;  %3164 = vmatprep.subr.bf16.mxu1 %v1908_v26 }
 0x4df   :  { %v1877_v32 = vpop.permute.xlu0 %1876  ;;  %3165 = vmatpush3.bf16.msra.mxu1 %v1908_v26 }
 0x4e0   :  { %v1888_v33 = vpack.c.bf16 %v1881_v29, %v1880_v28  ;;  %v1882_v31 = vmul.f32 %v3666_v40, %v1877_v32  ;;  %v3403_v28 = vld [vmem:[%s4113_s9 + $0x58] sm:$0xff]  }
 0x4e1   :  { %v1879_v34 = vpop.permute.xlu1 %1878 }
 0x4e2   :  { %v1883_v35 = vmul.f32 %v3666_v40, %v1879_v34  ;;  %3167 = vmatmul.mubr.msk.bf16.vlgmr.msra.gmra.mrb[4].mxu1 %vm274_vm1, %v3393_v30  ;;  %3170 = vmatprep.subr.bf16.mxu1 %v1888_v33  ;;  %v3404_v30 = vld [vmem:[%s4113_s9 + $0x60] sm:$0xff]  }
 0x4e3   :  { %v2040_v36 = vpop.permute.xlu0 %2039  ;;  %3171 = vmatpush3.bf16.msra.mxu1 %v1888_v33  ;;  %3174 = vmatprep.mubr.msk.bf16.mxu1 %vm274_vm1, %v3394_v18  ;;  %v3414_v34 = vld [vmem:[%s4109_s2 + $0x7] ss:$0 sm:$0xff] }
 0x4e4   :  { %v1889_v37 = vpack.c.bf16 %v1883_v35, %v1882_v31  ;;  %v2047_v41 = vmul.f32 %v3410_v39, %v2040_v36 }
 0x4e5   :  { %v2042_v38 = vpop.permute.xlu1 %2041 }
 0x4e6   :  { %v2048_v42 = vmul.f32 %v3410_v39, %v2042_v38  ;;  %3172 = vmatprep.subr.bf16.mxu1 %v1889_v37 }
 0x4e7   :  { %v2044_v43 = vpop.permute.xlu0 %2043  ;;  %3173 = vmatpush3.bf16.msra.mxu1 %v1889_v37 }
 0x4e8   :  { %v2056_v44 = vpack.c.bf16 %v2048_v42, %v2047_v41  ;;  %v2049_v45 = vmul.f32 %v3410_v39, %v2044_v43  ;;  %v3405_v41 = vld [vmem:[%s4113_s9 + $0x68] sm:$0xff]   ;;  %v3406_v43 = vld [vmem:[%s4113_s9 + $0x70] sm:$0xff]  }
 0x4e9   :  { %v2046_v40 = vpop.permute.xlu1 %2045 }
 0x4ea   :  { %v2050_v47 = vmul.f32 %v3410_v39, %v2046_v40  ;;  %3178 = vmatprep.subr.bf16.mxu1 %v2056_v44 }
 0x4eb   :  { %v2128_v46 = vpop.permute.xlu0 %2127 }
 0x4ec   :  { %v2057_v49 = vpack.c.bf16 %v2050_v47, %v2049_v45  ;;  %v2135_v53 = vmul.f32 %v3411_v51, %v2128_v46  ;;  %v3415_v47 = vld [vmem:[%s4109_s2 + $0x8] ss:$0 sm:$0xff] }
 0x4ed   :  { %v2130_v50 = vpop.permute.xlu1 %2129 }
 0x4ee   :  { %v2136_v54 = vmul.f32 %v3411_v51, %v2130_v50  ;;  %3175 = vmatmul.mubr.msk.bf16.vlgmr.msra.gmra.mrb[4].mxu1 %vm274_vm1, %v3395_v52 }
 0x4ef   :  { %3179 = vmatpush3.bf16.msra.mxu1 %v2056_v44  ;;  %3182 = vmatprep.mubr.msk.bf16.mxu1 %vm274_vm1, %v3396_v48  ;;  %v2132_v10 = vpop.permute.xlu0 %2131 }
 0x4f0   :  { %v2144_v55 = vpack.c.bf16 %v2136_v54, %v2135_v53  ;;  %3180 = vmatprep.subr.bf16.mxu1 %v2057_v49  ;;  %v2137_v0 = vmul.f32 %v3411_v51, %v2132_v10  ;;  %v3407_v53 = vld [vmem:[%s4113_s9 + $0x78] sm:$0xff]   ;;  %v3408_v54 = vld [vmem:[%s4113_s9 + $0x80] sm:$0xff]   ;;  %v3409_v10 = vld [vmem:[%s4113_s9 + $0x88] sm:$0xff]  }
 0x4f1   :  { %v2134_v57 = vpop.permute.xlu1 %2133 }
 0x4f2   :  { %v2138_v59 = vmul.f32 %v3411_v51, %v2134_v57 }
 0x4f3   :  { %3181 = vmatpush3.bf16.msra.mxu1 %v2057_v49  ;;  %v2292_v5 = vpop.permute.xlu0 %2291 }
 0x4f4   :  { %3186 = vmatprep.subr.bf16.mxu1 %v2144_v55  ;;  %v2145_v1 = vpack.c.bf16 %v2138_v59, %v2137_v0  ;;  %v2299_v11 = vmul.f32 %v3412_v6, %v2292_v5 }
 0x4f5   :  { %v2294_v3 = vpop.permute.xlu1 %2293 }
 0x4f6   :  { %v2300_v7 = vmul.f32 %v3412_v6, %v2294_v3 }
 0x4f7   :  { %v2296_v15 = vpop.permute.xlu0 %2295 }
 0x4f8   :  { %v2308_v14 = vpack.c.bf16 %v2300_v7, %v2299_v11  ;;  %v2301_v20 = vmul.f32 %v3412_v6, %v2296_v15 }
 0x4f9   :  { %v2298_v12 = vpop.permute.xlu1 %2297 }
 0x4fa   :  { %3183 = vmatmul.mubr.msk.bf16.vlgmr.msra.gmra.mrb[4].mxu1 %vm274_vm1, %v3397_v61  ;;  %v2302_v16 = vmul.f32 %v3412_v6, %v2298_v12 }
 0x4fb   :  { %3187 = vmatpush3.bf16.msra.mxu1 %v2144_v55  ;;  %3190 = vmatprep.mubr.msk.bf16.mxu1 %vm274_vm1, %v3398_v56  ;;  %v2380_v21 = vpop.permute.xlu0 %2379 }
 0x4fc   :  { %3188 = vmatprep.subr.bf16.mxu1 %v2145_v1  ;;  %v2309_v22 = vpack.c.bf16 %v2302_v16, %v2301_v20 }
 0x4fd   :  { %v2382_v19 = vpop.permute.xlu1 %2381 }
 0x4fe   :  { %v2388_v23 = vmul.f32 %v3413_v13, %v2382_v19 }
 0x4ff   :  { %3189 = vmatpush3.bf16.msra.mxu1 %v2145_v1  ;;  %v2384_v26 = vpop.permute.xlu0 %2383 }
 0x500   :  { %3194 = vmatprep.subr.bf16.mxu1 %v3946_v9  ;;  %v2389_v32 = vmul.f32 %v3413_v13, %v2384_v26 }
 0x501   :  { %v2386_v24 = vpop.permute.xlu1 %2385 }
 0x502   :  { %v2390_v27 = vmul.f32 %v3413_v13, %v2386_v24 }
 0x503   :  { %v2468_v18 = vpop.permute.xlu0 %2467 }
 0x504   :  { %v2397_v33 = vpack.c.bf16 %v2390_v27, %v2389_v32  ;;  %v2475_v35 = vmul.f32 %v3414_v34, %v2468_v18 }
 0x505   :  { %v2470_v29 = vpop.permute.xlu1 %2469 }
 0x506   :  { %3191 = vmatmul.mubr.msk.bf16.vlgmr.msra.gmra.mrb[4].mxu1 %vm274_vm1, %v3399_v2  ;;  %v2476_v31 = vmul.f32 %v3414_v34, %v2470_v29 }
 0x507   :  { %3195 = vmatpush3.bf16.msra.mxu1 %v3946_v9  ;;  %3198 = vmatprep.mubr.msk.bf16.mxu1 %vm274_vm1, %v3400_v4  ;;  %v3402_v9 = vld [vmem:[%s4113_s9 + $0x50] sm:$0xff]   ;;  %v2472_v38 = vpop.permute.xlu0 %2471 }
 0x508   :  { %3196 = vmatprep.subr.bf16.mxu1 %v3943_v8  ;;  %v2484_v37 = vpack.c.bf16 %v2476_v31, %v2475_v35  ;;  %v2477_v44 = vmul.f32 %v3414_v34, %v2472_v38 }
 0x509   :  { %v2474_v36 = vpop.permute.xlu1 %2473 }
 0x50a   :  { %v2478_v39 = vmul.f32 %v3414_v34, %v2474_v36 }
 0x50b   :  { %3197 = vmatpush3.bf16.msra.mxu1 %v3943_v8  ;;  %v2387_v8 = vmul.f32 %v3413_v13, %v2380_v21  ;;  %v2556_v40 = vpop.permute.xlu0 %2555 }
 0x50c   :  { %3202 = vmatprep.subr.bf16.mxu1 %v2308_v14  ;;  %v2485_v45 = vpack.c.bf16 %v2478_v39, %v2477_v44  ;;  %v2563_v46 = vmul.f32 %v3415_v47, %v2556_v40 }
 0x50d   :  { %v2396_v25 = vpack.c.bf16 %v2388_v23, %v2387_v8  ;;  %v2558_v42 = vpop.permute.xlu1 %2557 }
 0x50e   :  { %v2564_v52 = vmul.f32 %v3415_v47, %v2558_v42 }
 0x50f   :  { %v2560_v50 = vpop.permute.xlu0 %2559 }
 0x510   :  { %v2572_v48 = vpack.c.bf16 %v2564_v52, %v2563_v46  ;;  %v2565_v55 = vmul.f32 %v3415_v47, %v2560_v50 }
 0x511   :  { %v2562_v49 = vpop.permute.xlu1 %2561 }
 0x512   :  { %3199 = vmatmul.mubr.msk.bf16.vlgmr.msra.gmra.mrb[4].mxu1 %vm274_vm1, %v3401_v17  ;;  %v2566_v51 = vmul.f32 %v3415_v47, %v2562_v49 }
 0x513   :  { %3203 = vmatpush3.bf16.msra.mxu1 %v2308_v14  ;;  %3206 = vmatprep.mubr.msk.bf16.mxu1 %vm274_vm1, %v3402_v9 }
 0x514   :  { %3204 = vmatprep.subr.bf16.mxu1 %v2309_v22  ;;  %v2573_v57 = vpack.c.bf16 %v2566_v51, %v2565_v55 }
 0x517   :  { %3205 = vmatpush3.bf16.msra.mxu1 %v2309_v22 }
 0x518   :  { %3210 = vmatprep.subr.bf16.mxu1 %v2396_v25 }
 0x51e   :  { %3207 = vmatmul.mubr.msk.bf16.vlgmr.msra.gmra.mrb[4].mxu1 %vm274_vm1, %v3403_v28 }
 0x51f   :  { %3211 = vmatpush3.bf16.msra.mxu1 %v2396_v25  ;;  %3214 = vmatprep.mubr.msk.bf16.mxu1 %vm274_vm1, %v3404_v30 }
 0x520   :  { %3212 = vmatprep.subr.bf16.mxu1 %v2397_v33  ;;  %v2650_v59 = vpop.permute.xlu0 %2649 }
 0x522   :  { %v2655_v61 = vpop.permute.xlu1 %2654 }
 0x523   :  { %3213 = vmatpush3.bf16.msra.mxu1 %v2397_v33 }
 0x524   :  { %3218 = vmatprep.subr.bf16.mxu1 %v2484_v37  ;;  %v2660_v56 = vpop.permute.xlu0 %2659 }
 0x526   :  { %v2665_v3 = vpop.permute.xlu1 %2664 }
 0x52a   :  { %3215 = vmatmul.mubr.msk.bf16.vlgmr.msra.gmra.mrb[4].mxu1 %vm274_vm1, %v3405_v41 }
 0x52b   :  { %3219 = vmatpush3.bf16.msra.mxu1 %v2484_v37  ;;  %3222 = vmatprep.mubr.msk.bf16.mxu1 %vm274_vm1, %v3406_v43 }
 0x52c   :  { %3220 = vmatprep.subr.bf16.mxu1 %v2485_v45 }
 0x52f   :  { %3221 = vmatpush3.bf16.msra.mxu1 %v2485_v45 }
 0x530   :  { %3226 = vmatprep.subr.bf16.mxu1 %v2572_v48 }
 0x536   :  { %3223 = vmatmul.mubr.msk.bf16.vlgmr.msra.gmra.mrb[4].mxu1 %vm274_vm1, %v3407_v53 }
 0x537   :  { %3227 = vmatpush3.bf16.msra.mxu1 %v2572_v48  ;;  %3230 = vmatprep.mubr.msk.bf16.mxu1 %vm274_vm1, %v3408_v54 }
 0x538   :  { %3228 = vmatprep.subr.bf16.mxu1 %v2573_v57 }
 0x53b   :  { %3229 = vmatpush3.bf16.msra.mxu1 %v2573_v57 }
 0x542   :  { %3231 = vmatmul.mubr.msk.bf16.vlgmr.msra.gmra.mrb[4].mxu1 %vm274_vm1, %v3409_v10 }
 0x615   :  { %v3232_v0 = vpop.f32.mrb[4].mxu1 }
 0x616   :  { %v2669_v1 = vadd.f32 %v3232_v0, %v2660_v56  ;;  %v2624_v2 = vpop.f32.mrb[5].mxu1 }
 0x617   :  { %v2667_v4 = vadd.f32 %v2650_v59, %v2624_v2  ;;  %v3233_v5 = vpop.f32.mrb[6].mxu1 }
 0x618   :  { %v2673_v6 = vadd.f32 %v2669_v1, %v3748_v60  ;;  %v2670_v7 = vadd.f32 %v3233_v5, %v2665_v3  ;;  %v2627_v11 = vpop.f32.mrb[7].mxu1 }
 0x619   :  { %v2671_v12 = vadd.f32 %v2667_v4, %v3746_v58  ;;  %v2668_v14 = vadd.f32 %v2655_v61, %v2627_v11 }
 0x61a   :  { %2677 = vst [vmem:[%s4115_s11 + $0x10] sm:$0xff] %v2673_v6  ;;  %v2674_v15 = vadd.f32 %v2670_v7, %v3753_v62 }
 0x61b   :  { %2675 = vst [vmem:[%s4115_s11] sm:$0xff] %v2671_v12  ;;  %v2672_v16 = vadd.f32 %v2668_v14, %v3755_v63 }
 0x61c   :  { %2678 = vst [vmem:[%s4115_s11 + $0x18] sm:$0xff] %v2674_v15 }
 0x61d   :  { %2676 = vst [vmem:[%s4115_s11 + $0x8] sm:$0xff] %v2672_v16 }

// kernel: podnet_resnet_cifar_forward.3
= control target key start
LH: loop header
LB: loop body
LE: loop exit
PB: predicated region body
PF: predicated region fallthrough
CT: control target
= control target key end

     0   :  { %s7090_s25 = smov 16   ;;  %v9463_v4 = vmov 0   ;;  %s7093_s26 = smov 15   ;;  %v58_v7 = vlaneseq  ;;  %vm153_vm1 = vcmask 1040384   ;;  %vm154_vm3 = vcmask 1041408   ;;  %s9450_s0 = inlined_call_operand.vmem [shape: f32[3,512], index: 0, kind: input, shape index: {}]   ;;  %s9451_s2 = inlined_call_operand.vmem [shape: bf16[9,16,3], index: 2, kind: input, shape index: {}]   ;;  %s9452_s3 = inlined_call_operand.vmem [shape: f32[16,1], index: 3, kind: input, shape index: {}]   ;;  %s9453_s1 = inlined_call_operand.vmem [shape: f32[9,512], index: 1, kind: input, shape index: {}]   ;;  %s9454_s4 = inlined_call_operand.vmem [shape: bf16[9,16,16], index: 4, kind: input, shape index: {}]   ;;  %s9455_s5 = inlined_call_operand.vmem [shape: f32[16,1], index: 5, kind: input, shape index: {}]   ;;  %s9456_s6 = inlined_call_operand.vmem [shape: bf16[9,16,16], index: 6, kind: input, shape index: {}]   ;;  %s9457_s7 = inlined_call_operand.vmem [shape: f32[16,1], index: 7, kind: input, shape index: {}]   ;;  %s9458_s8 = inlined_call_operand.vmem [shape: bf16[9,16,16], index: 8, kind: input, shape index: {}]   ;;  %s9459_s9 = inlined_call_operand.vmem [shape: f32[16,1], index: 9, kind: input, shape index: {}]   ;;  %s9460_s10 = inlined_call_operand.vmem [shape: bf16[9,16,16], index: 10, kind: input, shape index: {}]   ;;  %s9461_s11 = inlined_call_operand.vmem [shape: f32[16,1], index: 11, kind: input, shape index: {}]   ;;  %s9462_s12 = inlined_call_operand.vmem [shape: f32[16,512], index: 12, kind: output, shape index: {}]  }
   0x1   :  { %v7168_v0 = vld [vmem:[%s9450_s0 + $0x8] sm:$0x77]  ;;  %v7173_v1 = vld [vmem:[%s9450_s0] sm:$0x77]  ;;  %s7091_s0 = smov 17   ;;  %201 = vmatprep.mubr.bf16.mxu0 %v9463_v4  ;;  %244 = vmatprep.mubr.bf16.mxu1 %v9463_v4  ;;  %s7094_s27 = smov 1  }
   0x2   :  { %101 = vrot.lane.b32.xlu1 %v7168_v0, %s7090_s25  ;;  %97 = vrot.lane.b32.xlu0 %v7173_v1, %s7090_s25  ;;  %v7181_v2 = vcombine.high %v7168_v0, %v7168_v0  ;;  %v7185_v3 = vcombine.high %v7173_v1, %v7173_v1  ;;  %s7095_s28 = smov 127   ;;  %s7096_s29 = smov 113   ;;  %v1448_v5 = vld [vmem:[%s9452_s3] sm:$0xff]  ;;  %v1449_v6 = vld [vmem:[%s9452_s3 + $0x8] sm:$0xff]  ;;  %v68_v8 = vshrl.u32 %v58_v7, 7  ;;  %v7257_v9 = vand.u32 127, %v58_v7 }
   0x3   :  { %7041 = vset.pattern.permute.xlu0 %v9463_v4  ;;  %7042 = vset.pattern.permute.xlu1 %v9463_v4  ;;  %s7097_s30 = smov 112   ;;  %s7098_s13 = smov 111   ;;  %v6489_v14 = vld [vmem:[%s9453_s1 + $0x1] ss:$8 sm:$0xf]  ;;  %v7099_v25 = vmov 65535  }
   0x4   :  { %v7259_v10 = vsub.s32 1, %v68_v8  ;;  %v7261_v11 = vsub.s32 3, %v68_v8  ;;  %v7263_v12 = vsub.s32 0, %v68_v8  ;;  %v7265_v13 = vsub.s32 2, %v68_v8  ;;  %v7045_v55 = vld [vmem:[%s9451_s2 + $0x8] sm:$0xff]  }
   0x5   :  { %vm105_vm0 = vcmp.lt.s32.totalorder %v7257_v9, 16  ;;  %v65_v17 = vld [vmem:[%s9453_s1] ss:$8 sm:$0xf]  ;;  %vm60_vm2 = vcmp.lt.s32.totalorder %v7257_v9, 17  ;;  %v155_v26 = vsel %vm153_vm1, 4294967295, %v7099_v25 }
   0x6   :  { %103 = vrot.lane.b32.xlu1 %v7181_v2, %s7090_s25  ;;  %99 = vrot.lane.b32.xlu0 %v7185_v3, %s7090_s25  ;;  %v7275_v18 = vrot.slane %v6489_v14, %v7261_v11  ;;  %v7278_v19 = vrot.slane %v6489_v14, %v7259_v10  ;;  %v7281_v20 = vrot.slane %v6489_v14, %v7263_v12  ;;  %v7302_v35 = vsel %vm154_vm3, %v155_v26, 0  ;;  %v6498_v46 = vld [vmem:[%s9453_s1 + $0x2] ss:$8 sm:$0xf] }
   0x7   :  { %v7284_v21 = vrot.slane %v6489_v14, %v7265_v13  ;;  %v7288_v24 = vrot.slane %v65_v17, %v7259_v10  ;;  %v7307_v43 = vrot.slane %v65_v17, %v7263_v12  ;;  %v7310_v44 = vrot.slane %v65_v17, %v7265_v13 }
   0x8   :  { %9509 = vst [vmem:[#allocation2_spill] sm:$0xff] %v7278_v19  ;;  %v7313_v45 = vrot.slane %v65_v17, %v7261_v11  ;;  %vm369_vm4 = vcmp.lt.s32.totalorder %v7257_v9, 15  ;;  %v7328_v56 = vrot.slane %v6498_v46, %v7259_v10  ;;  %vm149_vm5 = vcmask 23552  }
   0x9   :  { %v7348_v17 = vrot.slane %v6498_v46, %v7265_v13  ;;  %vm530_vm6 = vcmp.lt.s32.totalorder %v7257_v9, 1  ;;  %vm812_vm7 = vcmp.lt.s32.totalorder %v7257_v9, 127  ;;  %vm973_vm8 = vcmp.lt.s32.totalorder %v7257_v9, 113 }
   0xa   :  { %52 = vrot.lane.b32.xlu1 %v7185_v3, %s7091_s0  ;;  %50 = vrot.lane.b32.xlu0 %v7173_v1, %s7091_s0  ;;  %vm1134_vm9 = vcmp.lt.s32.totalorder %v7257_v9, 112  ;;  %vm1295_vm10 = vcmp.lt.s32.totalorder %v7257_v9, 111  ;;  %vm1558_vm11 = vcmask 130048  }
   0xe   :  { %56 = vrot.lane.b32.xlu1 %v7181_v2, %s7091_s0  ;;  %54 = vrot.lane.b32.xlu0 %v7168_v0, %s7091_s0 }
  0x12   :  { %363 = vrot.lane.b32.xlu1 %v7185_v3, %s7093_s26  ;;  %361 = vrot.lane.b32.xlu0 %v7173_v1, %s7093_s26 }
  0x16   :  { %367 = vrot.lane.b32.xlu1 %v7181_v2, %s7093_s26  ;;  %365 = vrot.lane.b32.xlu0 %v7168_v0, %s7093_s26 }
  0x1a   :  { %524 = vrot.lane.b32.xlu1 %v7185_v3, %s7094_s27  ;;  %522 = vrot.lane.b32.xlu0 %v7173_v1, %s7094_s27 }
  0x1e   :  { %528 = vrot.lane.b32.xlu1 %v7181_v2, %s7094_s27  ;;  %526 = vrot.lane.b32.xlu0 %v7168_v0, %s7094_s27 }
  0x22   :  { %804 = vrot.lane.b32.xlu0 %v7173_v1, %s7095_s28  ;;  %806 = vrot.lane.b32.xlu1 %v7185_v3, %s7095_s28 }
  0x26   :  { %808 = vrot.lane.b32.xlu0 %v7168_v0, %s7095_s28  ;;  %810 = vrot.lane.b32.xlu1 %v7181_v2, %s7095_s28 }
  0x2a   :  { %965 = vrot.lane.b32.xlu0 %v7173_v1, %s7096_s29  ;;  %967 = vrot.lane.b32.xlu1 %v7185_v3, %s7096_s29 }
  0x2e   :  { %969 = vrot.lane.b32.xlu0 %v7168_v0, %s7096_s29  ;;  %971 = vrot.lane.b32.xlu1 %v7181_v2, %s7096_s29 }
  0x32   :  { %1126 = vrot.lane.b32.xlu0 %v7173_v1, %s7097_s30  ;;  %1128 = vrot.lane.b32.xlu1 %v7185_v3, %s7097_s30 }
  0x36   :  { %1130 = vrot.lane.b32.xlu0 %v7168_v0, %s7097_s30  ;;  %1132 = vrot.lane.b32.xlu1 %v7181_v2, %s7097_s30 }
  0x3a   :  { %1287 = vrot.lane.b32.xlu0 %v7173_v1, %s7098_s13  ;;  %1289 = vrot.lane.b32.xlu1 %v7185_v3, %s7098_s13 }
  0x3e   :  { %1291 = vrot.lane.b32.xlu0 %v7168_v0, %s7098_s13  ;;  %1293 = vrot.lane.b32.xlu1 %v7181_v2, %s7098_s13 }
  0x42   :  { %1452 = vperm.xlu0 %7041, %v1448_v5   ;;  %1457 = vperm.xlu1 %7042, %v1449_v6   ;;  %v7341_v5 = vrot.slane %v6498_v46, %v7263_v12 }
  0x74   :  { %v102_v15 = vpop.permute.xlu1 %101  ;;  %v98_v16 = vpop.permute.xlu0 %97 }
  0x78   :  { %v104_v22 = vpop.permute.xlu1 %103  ;;  %v100_v23 = vpop.permute.xlu0 %99 }
  0x79   :  { %v109_v27 = vsel %vm105_vm0, %v104_v22, %v98_v16  ;;  %v107_v28 = vsel %vm105_vm0, %v100_v23, %v102_v15  ;;  %v106_v29 = vsel %vm105_vm0, %v102_v15, %v104_v22  ;;  %v108_v30 = vsel %vm105_vm0, %v98_v16, %v100_v23 }
  0x7a   :  { %v136_v31 = vmul.f32 %v7275_v18, %v106_v29  ;;  %v134_v32 = vmul.f32 %v7278_v19, %v108_v30  ;;  %v133_v33 = vmul.f32 %v7281_v20, %v109_v27  ;;  %v135_v34 = vmul.f32 %v7284_v21, %v107_v28  ;;  %v6504_v28 = vld [vmem:[%s9453_s1 + $0x3] ss:$8 sm:$0xf] }
  0x7b   :  { %v7351_v22 = vrot.slane %v6498_v46, %v7261_v11 }
  0x7c   :  { %v53_v36 = vpop.permute.xlu1 %52  ;;  %v51_v37 = vpop.permute.xlu0 %50  ;;  %v143_v38 = vpack.c.bf16 %v136_v31, %v136_v31  ;;  %v141_v39 = vpack.c.bf16 %v134_v32, %v134_v32  ;;  %v140_v40 = vpack.c.bf16 %v133_v33, %v133_v33  ;;  %v142_v41 = vpack.c.bf16 %v135_v34, %v135_v34 }
  0x7d   :  { %v63_v42 = vsel %vm60_vm2, %v51_v37, %v53_v36 }
  0x7e   :  { %v88_v47 = vmul.f32 %v7288_v24, %v63_v42  ;;  %v167_v48 = vand.u32 %v7302_v35, %v143_v38  ;;  %v161_v49 = vand.u32 %v7302_v35, %v141_v39  ;;  %v158_v50 = vand.u32 %v7302_v35, %v140_v40 }
  0x7f   :  { %v164_v51 = vand.u32 %v7302_v35, %v142_v41 }
  0x80   :  { %v94_v52 = vpack.c.bf16 %v88_v47, %v88_v47  ;;  %212 = vmatprep.subr.bf16.mxu1 %v167_v48  ;;  %v57_v53 = vpop.permute.xlu1 %56  ;;  %169 = vmatprep.subr.bf16.mxu0 %v161_v49  ;;  %v55_v54 = vpop.permute.xlu0 %54  ;;  %v7046_v47 = vld [vmem:[%s9451_s2] sm:$0xff]  }
  0x81   :  { %v64_v57 = vsel %vm60_vm2, %v57_v53, %v51_v37  ;;  %v61_v58 = vsel %vm60_vm2, %v55_v54, %v57_v53  ;;  %v62_v59 = vsel %vm60_vm2, %v53_v36, %v55_v54  ;;  %170 = vmatpush1.bf16.msra.mxu0 %v158_v50  ;;  %213 = vmatpush1.bf16.msra.mxu1 %v164_v51 }
  0x82   :  { %v87_v60 = vmul.f32 %v7307_v43, %v64_v57  ;;  %v89_v61 = vmul.f32 %v7310_v44, %v62_v59  ;;  %v90_v62 = vmul.f32 %v7313_v45, %v61_v58  ;;  %v267_v63 = vand.u32 %v7302_v35, %v94_v52 }
  0x83   :  { %v7370_v36 = vrot.slane %v6504_v28, %v7259_v10  ;;  %v7382_v51 = vrot.slane %v6504_v28, %v7263_v12  ;;  %v7385_v52 = vrot.slane %v6504_v28, %v7265_v13  ;;  %v7388_v53 = vrot.slane %v6504_v28, %v7261_v11 }
  0x84   :  { %v93_v6 = vpack.c.bf16 %v87_v60, %v87_v60  ;;  %v95_v7 = vpack.c.bf16 %v89_v61, %v89_v61  ;;  %v96_v8 = vpack.c.bf16 %v90_v62, %v90_v62  ;;  %6493 = vmatmul.mubr.msk.bf16.vlgmr.msra.gmra.mrb[0].mxu0 %vm149_vm5, %v7045_v55  ;;  %6494 = vmatmul.mubr.msk.bf16.vlgmr.msra.gmra.mrb[0].mxu1 %vm149_vm5, %v7045_v55  ;;  %v364_v14 = vpop.permute.xlu1 %363  ;;  %v362_v15 = vpop.permute.xlu0 %361 }
  0x85   :  { %v372_v16 = vsel %vm369_vm4, %v362_v15, %v364_v14  ;;  %275 = vmatprep.subr.bf16.mxu0 %v267_v63  ;;  %307 = vmatprep.mubr.bf16.mxu0 %v9463_v4 }
  0x86   :  { %v264_v23 = vand.u32 %v7302_v35, %v93_v6  ;;  %v270_v25 = vand.u32 %v7302_v35, %v95_v7  ;;  %v273_v26 = vand.u32 %v7302_v35, %v96_v8  ;;  %v398_v27 = vmul.f32 %v7328_v56, %v372_v16  ;;  %350 = vmatprep.mubr.bf16.mxu1 %v9463_v4 }
  0x88   :  { %318 = vmatprep.subr.bf16.mxu1 %v273_v26  ;;  %v405_v29 = vpack.c.bf16 %v398_v27, %v398_v27  ;;  %v368_v30 = vpop.permute.xlu1 %367  ;;  %276 = vmatpush1.bf16.msra.mxu0 %v264_v23  ;;  %v366_v31 = vpop.permute.xlu0 %365 }
  0x89   :  { %319 = vmatpush1.bf16.msra.mxu1 %v270_v25  ;;  %v373_v32 = vsel %vm369_vm4, %v368_v30, %v362_v15  ;;  %v370_v33 = vsel %vm369_vm4, %v366_v31, %v368_v30  ;;  %v371_v34 = vsel %vm369_vm4, %v364_v14, %v366_v31  ;;  %v689_v30 = vpack.c.bf16 %v7181_v2, %v7181_v2  ;;  %v7047_v31 = vld [vmem:[%s9451_s2 + $0x10] sm:$0xff]  }
  0x8a   :  { %v397_v37 = vmul.f32 %v7341_v5, %v373_v32  ;;  %v399_v38 = vmul.f32 %v7348_v17, %v371_v34  ;;  %v400_v39 = vmul.f32 %v7351_v22, %v370_v33  ;;  %v420_v40 = vand.u32 %v405_v29, %v7302_v35  ;;  %v6515_v32 = vld [vmem:[%s9453_s1 + $0x5] ss:$8 sm:$0xf] }
  0x8b   :  { %v687_v29 = vpack.c.bf16 %v7185_v3, %v7185_v3  ;;  %v7426_v2 = vrot.slane %v6515_v32, %v7261_v11 }
  0x8c   :  { %v404_v41 = vpack.c.bf16 %v397_v37, %v397_v37  ;;  %v406_v42 = vpack.c.bf16 %v399_v38, %v399_v38  ;;  %v407_v46 = vpack.c.bf16 %v400_v39, %v400_v39  ;;  %v525_v48 = vpop.permute.xlu1 %524  ;;  %v523_v49 = vpop.permute.xlu0 %522  ;;  %428 = vmatprep.subr.bf16.mxu0 %v420_v40  ;;  %v7423_v38 = vrot.slane %v6515_v32, %v7259_v10 }
  0x8d   :  { %v533_v50 = vsel %vm530_vm6, %v523_v49, %v525_v48  ;;  %v702_v39 = vand.u32 %v687_v29, %v7302_v35  ;;  %v708_v40 = vand.u32 %v689_v30, %v7302_v35 }
  0x8e   :  { %v417_v54 = vand.u32 %v404_v41, %v7302_v35  ;;  %v423_v55 = vand.u32 %v406_v42, %v7302_v35  ;;  %v426_v57 = vand.u32 %v407_v46, %v7302_v35  ;;  %v559_v58 = vmul.f32 %v7370_v36, %v533_v50 }
  0x8f   :  { %v686_v50 = vpack.c.bf16 %v7173_v1, %v7173_v1  ;;  %v7455_v1 = vrot.slane %v6515_v32, %v7265_v13 }
  0x90   :  { %6496 = vmatmul.mubr.msk.bf16.vlgmr.msra.gmra.mrb[0].mxu0 %vm149_vm5, %v7046_v47  ;;  %6497 = vmatmul.mubr.msk.bf16.vlgmr.msra.gmra.mrb[0].mxu1 %vm149_vm5, %v7046_v47  ;;  %v566_v59 = vpack.c.bf16 %v559_v58, %v559_v58  ;;  %v529_v60 = vpop.permute.xlu1 %528  ;;  %v527_v61 = vpop.permute.xlu0 %526  ;;  %v7048_v58 = vld [vmem:[%s9451_s2 + $0x18] sm:$0xff]  }
  0x91   :  { %471 = vmatprep.subr.bf16.mxu1 %v426_v57  ;;  %v534_v62 = vsel %vm530_vm6, %v529_v60, %v523_v49  ;;  %429 = vmatpush1.bf16.msra.mxu0 %v417_v54  ;;  %v531_v63 = vsel %vm530_vm6, %v527_v61, %v529_v60  ;;  %v532_v6 = vsel %vm530_vm6, %v525_v48, %v527_v61 }
  0x92   :  { %472 = vmatpush1.bf16.msra.mxu1 %v423_v55  ;;  %v558_v7 = vmul.f32 %v7382_v51, %v534_v62  ;;  %v560_v8 = vmul.f32 %v7385_v52, %v532_v6  ;;  %v561_v14 = vmul.f32 %v7388_v53, %v531_v63  ;;  %460 = vmatprep.mubr.bf16.mxu0 %v9463_v4 }
  0x93   :  { %503 = vmatprep.mubr.bf16.mxu1 %v9463_v4  ;;  %v581_v15 = vand.u32 %v566_v59, %v7302_v35  ;;  %v688_v54 = vpack.c.bf16 %v7168_v0, %v7168_v0  ;;  %v6521_v59 = vld [vmem:[%s9453_s1 + $0x6] ss:$8 sm:$0xf]  ;;  %v7452_v60 = vrot.slane %v6515_v32, %v7263_v12  ;;  %v699_v0 = vand.u32 %v686_v50, %v7302_v35 }
  0x94   :  { %v568_v16 = vpack.c.bf16 %v561_v14, %v561_v14  ;;  %v805_v23 = vpop.permute.xlu0 %804  ;;  %v807_v25 = vpop.permute.xlu1 %806  ;;  %v565_v26 = vpack.c.bf16 %v558_v7, %v558_v7  ;;  %v567_v27 = vpack.c.bf16 %v560_v8, %v560_v8 }
  0x95   :  { %589 = vmatprep.subr.bf16.mxu0 %v581_v15  ;;  %v705_v61 = vand.u32 %v688_v54, %v7302_v35  ;;  %v815_v6 = vsel %vm812_vm7, %v805_v23, %v807_v25  ;;  %v7466_v15 = vrot.slane %v6521_v59, %v7259_v10 }
  0x96   :  { %v587_v28 = vand.u32 %v568_v16, %v7302_v35  ;;  %v578_v33 = vand.u32 %v565_v26, %v7302_v35  ;;  %v584_v34 = vand.u32 %v567_v27, %v7302_v35  ;;  %v7469_v16 = vrot.slane %v6521_v59, %v7261_v11 }
  0x97   :  { %v840_v26 = vmul.f32 %v7452_v60, %v815_v6 }
  0x98   :  { %632 = vmatprep.subr.bf16.mxu1 %v587_v28  ;;  %v809_v37 = vpop.permute.xlu0 %808  ;;  %v811_v3 = vpop.permute.xlu1 %810 }
  0x99   :  { %v814_v41 = vsel %vm812_vm7, %v807_v25, %v809_v37  ;;  %v816_v42 = vsel %vm812_vm7, %v811_v3, %v805_v23  ;;  %v813_v7 = vsel %vm812_vm7, %v809_v37, %v811_v3  ;;  %v847_v32 = vpack.c.bf16 %v840_v26, %v840_v26  ;;  %v7049_v3 = vld [vmem:[%s9451_s2 + $0x20] sm:$0xff]  }
  0x9a   :  { %v841_v46 = vmul.f32 %v7423_v38, %v814_v41  ;;  %v843_v47 = vmul.f32 %v7426_v2, %v816_v42  ;;  %v842_v27 = vmul.f32 %v7455_v1, %v813_v7  ;;  %v7493_v42 = vrot.slane %v6521_v59, %v7263_v12 }
  0x9c   :  { %6502 = vmatmul.mubr.msk.bf16.vlgmr.msra.gmra.mrb[0].mxu0 %vm149_vm5, %v7047_v31  ;;  %6503 = vmatmul.mubr.msk.bf16.vlgmr.msra.gmra.mrb[0].mxu1 %vm149_vm5, %v7047_v31  ;;  %v966_v48 = vpop.permute.xlu0 %965  ;;  %v968_v49 = vpop.permute.xlu1 %967  ;;  %v848_v55 = vpack.c.bf16 %v841_v46, %v841_v46  ;;  %v850_v57 = vpack.c.bf16 %v843_v47, %v843_v47  ;;  %v7496_v46 = vrot.slane %v6521_v59, %v7265_v13 }
  0x9d   :  { %633 = vmatpush1.bf16.msra.mxu1 %v584_v34  ;;  %590 = vmatpush1.bf16.msra.mxu0 %v578_v33  ;;  %v849_v33 = vpack.c.bf16 %v842_v27, %v842_v27  ;;  %v976_v54 = vsel %vm973_vm8, %v966_v48, %v968_v49  ;;  %v7050_v27 = vld [vmem:[%s9451_s2 + $0x28] sm:$0xff]  }
  0x9e   :  { %621 = vmatprep.mubr.bf16.mxu0 %v9463_v4  ;;  %664 = vmatprep.mubr.bf16.mxu1 %v9463_v4  ;;  %v863_v8 = vand.u32 %v848_v55, %v7302_v35  ;;  %v869_v14 = vand.u32 %v850_v57, %v7302_v35  ;;  %v1001_v59 = vmul.f32 %v7493_v42, %v976_v54 }
  0x9f   :  { %710 = vmatprep.subr.bf16.mxu0 %v702_v39  ;;  %753 = vmatprep.subr.bf16.mxu1 %v708_v40  ;;  %v6527_v39 = vld [vmem:[%s9453_s1 + $0x7] ss:$8 sm:$0xf]  ;;  %v860_v40 = vand.u32 %v847_v32, %v7302_v35  ;;  %v866_v41 = vand.u32 %v849_v33, %v7302_v35 }
  0xa0   :  { %v970_v62 = vpop.permute.xlu0 %969  ;;  %v972_v63 = vpop.permute.xlu1 %971  ;;  %v7532_v33 = vrot.slane %v6527_v39, %v7263_v12 }
  0xa1   :  { %v975_v23 = vsel %vm973_vm8, %v968_v49, %v970_v62  ;;  %v977_v25 = vsel %vm973_vm8, %v972_v63, %v966_v48  ;;  %v974_v55 = vsel %vm973_vm8, %v970_v62, %v972_v63 }
  0xa2   :  { %v1002_v28 = vmul.f32 %v7466_v15, %v975_v23  ;;  %v1004_v29 = vmul.f32 %v7469_v16, %v977_v25  ;;  %v1003_v62 = vmul.f32 %v7496_v46, %v974_v55 }
  0xa4   :  { %v1127_v30 = vpop.permute.xlu0 %1126  ;;  %v1129_v31 = vpop.permute.xlu1 %1128  ;;  %v1009_v34 = vpack.c.bf16 %v1002_v28, %v1002_v28  ;;  %v1011_v37 = vpack.c.bf16 %v1004_v29, %v1004_v29  ;;  %v1010_v23 = vpack.c.bf16 %v1003_v62, %v1003_v62  ;;  %v6533_v28 = vld [vmem:[%s9453_s1 + $0x20] ss:$8 sm:$0xf] }
  0xa5   :  { %v7051_v62 = vld [vmem:[%s9451_s2 + $0x30] sm:$0xff]  }
  0xa6   :  { %v1024_v57 = vand.u32 %v1009_v34, %v7302_v35  ;;  %v1027_v32 = vand.u32 %v1010_v23, %v7302_v35  ;;  %v7535_v34 = vrot.slane %v6527_v39, %v7265_v13  ;;  %v7570_v23 = vrot.slane %v6533_v28, %v7265_v13 }
  0xa8   :  { %6508 = vmatmul.mubr.msk.bf16.vlgmr.msra.gmra.mrb[0].mxu0 %vm149_vm5, %v7048_v58  ;;  %6509 = vmatmul.mubr.msk.bf16.vlgmr.msra.gmra.mrb[0].mxu1 %vm149_vm5, %v7048_v58  ;;  %v1131_v47 = vpop.permute.xlu0 %1130  ;;  %v1133_v50 = vpop.permute.xlu1 %1132  ;;  %v1030_v58 = vand.u32 %v1011_v37, %v7302_v35  ;;  %9514 = vst [vmem:[#allocation7_spill] sm:$0xff] %v7570_v23 }
  0xa9   :  { %711 = vmatpush1.bf16.msra.mxu0 %v699_v0  ;;  %754 = vmatpush1.bf16.msra.mxu1 %v705_v61  ;;  %v7505_v0 = vrot.slane %v6527_v39, %v7259_v10  ;;  %v7508_v61 = vrot.slane %v6527_v39, %v7261_v11  ;;  %v1136_v48 = vsel %vm1134_vm9, %v1129_v31, %v1131_v47 }
  0xaa   :  { %742 = vmatprep.mubr.bf16.mxu0 %v9463_v4  ;;  %785 = vmatprep.mubr.bf16.mxu1 %v9463_v4  ;;  %v1138_v49 = vsel %vm1134_vm9, %v1133_v50, %v1127_v30 }
  0xab   :  { %871 = vmatprep.subr.bf16.mxu0 %v863_v8  ;;  %914 = vmatprep.subr.bf16.mxu1 %v869_v14  ;;  %9510 = vst [vmem:[#allocation3_spill] sm:$0xff] %v7508_v61  ;;  %v1163_v63 = vmul.f32 %v7505_v0, %v1136_v48  ;;  %v1165_v6 = vmul.f32 %v7508_v61, %v1138_v49 }
  0xac   :  { %v1288_v7 = vpop.permute.xlu0 %1287  ;;  %v1290_v8 = vpop.permute.xlu1 %1289  ;;  %v1008_v14 = vpack.c.bf16 %v1001_v59, %v1001_v59 }
  0xad   :  { %v1170_v25 = vpack.c.bf16 %v1163_v63, %v1163_v63  ;;  %v1172_v26 = vpack.c.bf16 %v1165_v6, %v1165_v6 }
  0xae   :  { %v1021_v29 = vand.u32 %v1008_v14, %v7302_v35  ;;  %v7567_v14 = vrot.slane %v6533_v28, %v7263_v12 }
  0xaf   :  { %v1185_v54 = vand.u32 %v1170_v25, %v7302_v35  ;;  %v1191_v55 = vand.u32 %v1172_v26, %v7302_v35  ;;  %v1298_v25 = vsel %vm1295_vm10, %v1288_v7, %v1290_v8 }
  0xb0   :  { %v1292_v37 = vpop.permute.xlu0 %1291  ;;  %9513 = vst [vmem:[#allocation6_spill] sm:$0xff] %v7567_v14  ;;  %v1323_v12 = vmul.f32 %v7567_v14, %v1298_v25 }
  0xb4   :  { %6513 = vmatmul.mubr.msk.bf16.vlgmr.msra.gmra.mrb[0].mxu0 %vm149_vm5, %v7049_v3  ;;  %6514 = vmatmul.mubr.msk.bf16.vlgmr.msra.gmra.mrb[0].mxu1 %vm149_vm5, %v7049_v3  ;;  %v1294_v3 = vpop.permute.xlu1 %1293 }
  0xb5   :  { %872 = vmatpush1.bf16.msra.mxu0 %v860_v40  ;;  %915 = vmatpush1.bf16.msra.mxu1 %v866_v41  ;;  %v1137_v40 = vsel %vm1134_vm9, %v1127_v30, %v1129_v31  ;;  %v1135_v41 = vsel %vm1134_vm9, %v1131_v47, %v1133_v50  ;;  %v1297_v30 = vsel %vm1295_vm10, %v1290_v8, %v1292_v37 }
  0xb6   :  { %903 = vmatprep.mubr.bf16.mxu0 %v9463_v4  ;;  %946 = vmatprep.mubr.bf16.mxu1 %v9463_v4  ;;  %v1299_v31 = vsel %vm1295_vm10, %v1294_v3, %v1288_v7  ;;  %v1162_v39 = vmul.f32 %v7532_v33, %v1137_v40  ;;  %v1164_v47 = vmul.f32 %v7535_v34, %v1135_v41 }
  0xb7   :  { %1032 = vmatprep.subr.bf16.mxu0 %v1024_v57  ;;  %1075 = vmatprep.subr.bf16.mxu1 %v1030_v58  ;;  %v7544_v57 = vrot.slane %v6533_v28, %v7259_v10  ;;  %v7547_v58 = vrot.slane %v6533_v28, %v7261_v11  ;;  %v1296_v26 = vsel %vm1295_vm10, %v1292_v37, %v1294_v3  ;;  %v7052_v28 = vld [vmem:[%s9451_s2 + $0x38] sm:$0xff]   ;;  %v7053_v3 = vld [vmem:[%s9451_s2 + $0x40] sm:$0xff]  }
  0xb8   :  { %v1169_v50 = vpack.c.bf16 %v1162_v39, %v1162_v39  ;;  %v1171_v48 = vpack.c.bf16 %v1164_v47, %v1164_v47  ;;  %v1325_v13 = vmul.f32 %v7570_v23, %v1296_v26  ;;  %v1330_v7 = vpack.c.bf16 %v1323_v12, %v1323_v12 }
  0xb9   :  { %9511 = vst [vmem:[#allocation4_spill] sm:$0xff] %v7544_v57  ;;  %9512 = vst [vmem:[#allocation5_spill] sm:$0xff] %v7547_v58  ;;  %v1324_v10 = vmul.f32 %v7544_v57, %v1297_v30  ;;  %v1326_v11 = vmul.f32 %v7547_v58, %v1299_v31 }
  0xba   :  { %v1182_v63 = vand.u32 %v1169_v50, %v7302_v35  ;;  %v1188_v6 = vand.u32 %v1171_v48, %v7302_v35  ;;  %v1332_v8 = vpack.c.bf16 %v1325_v13, %v1325_v13 }
  0xbb   :  { %v1331_v49 = vpack.c.bf16 %v1324_v10, %v1324_v10  ;;  %v1333_v59 = vpack.c.bf16 %v1326_v11, %v1326_v11 }
  0xbc   :  { %v1349_v37 = vand.u32 %v1332_v8, %v7302_v35 }
  0xc0   :  { %6519 = vmatmul.mubr.msk.bf16.vlgmr.msra.gmra.mrb[0].mxu0 %vm149_vm5, %v7050_v27  ;;  %6520 = vmatmul.mubr.msk.bf16.vlgmr.msra.gmra.mrb[0].mxu1 %vm149_vm5, %v7050_v27  ;;  %v1346_v27 = vand.u32 %v1331_v49, %v7302_v35 }
  0xc1   :  { %1033 = vmatpush1.bf16.msra.mxu0 %v1021_v29  ;;  %1076 = vmatpush1.bf16.msra.mxu1 %v1027_v32  ;;  %v1352_v29 = vand.u32 %v1333_v59, %v7302_v35  ;;  %v1343_v32 = vand.u32 %v1330_v7, %v7302_v35  ;;  %v1453_v35 = vpop.permute.xlu0 %1452  ;;  %v1458_v40 = vpop.permute.xlu1 %1457 }
  0xc2   :  { %1064 = vmatprep.mubr.bf16.mxu0 %v9463_v4  ;;  %1107 = vmatprep.mubr.bf16.mxu1 %v9463_v4 }
  0xc3   :  { %1193 = vmatprep.subr.bf16.mxu0 %v1185_v54  ;;  %1236 = vmatprep.subr.bf16.mxu1 %v1191_v55 }
  0xcc   :  { %6525 = vmatmul.mubr.msk.bf16.vlgmr.msra.gmra.mrb[0].mxu0 %vm149_vm5, %v7051_v62  ;;  %6526 = vmatmul.mubr.msk.bf16.vlgmr.msra.gmra.mrb[0].mxu1 %vm149_vm5, %v7051_v62 }
  0xcd   :  { %1194 = vmatpush1.bf16.msra.mxu0 %v1182_v63  ;;  %1237 = vmatpush1.bf16.msra.mxu1 %v1188_v6 }
  0xce   :  { %1225 = vmatprep.mubr.bf16.mxu0 %v9463_v4  ;;  %1268 = vmatprep.mubr.bf16.mxu1 %v9463_v4 }
  0xcf   :  { %1354 = vmatprep.subr.bf16.mxu0 %v1346_v27  ;;  %1397 = vmatprep.subr.bf16.mxu1 %v1352_v29 }
  0xd8   :  { %6531 = vmatmul.mubr.msk.bf16.vlgmr.msra.gmra.mrb[0].mxu0 %vm149_vm5, %v7052_v28  ;;  %6532 = vmatmul.mubr.msk.bf16.vlgmr.msra.gmra.mrb[0].mxu1 %vm149_vm5, %v7052_v28 }
  0xd9   :  { %1355 = vmatpush1.bf16.msra.mxu0 %v1343_v32  ;;  %1398 = vmatpush1.bf16.msra.mxu1 %v1349_v37 }
  0xda   :  { %1386 = vmatprep.mubr.bf16.mxu0 %v9463_v4  ;;  %1429 = vmatprep.mubr.bf16.mxu1 %v9463_v4 }
  0xe4   :  { %6537 = vmatmul.mubr.msk.bf16.vlgmr.msra.gmra.mrb[0].mxu0 %vm149_vm5, %v7053_v3  ;;  %6538 = vmatmul.mubr.msk.bf16.vlgmr.msra.gmra.mrb[0].mxu1 %vm149_vm5, %v7053_v3 }
  0xe5   :  { %1594 = vmatprep.mubr.bf16.mxu0 %v9463_v4  ;;  %1637 = vmatprep.mubr.bf16.mxu1 %v9463_v4 }
 0x1b7   :  { %v1431_v41 = vpop.f32.mrb[0].mxu1  ;;  %v1388_v54 = vpop.f32.mrb[0].mxu0 }
 0x1b8   :  { %v1460_v55 = vadd.f32 %v1453_v35, %v1388_v54  ;;  %v1390_v30 = vpop.f32.mrb[1].mxu0  ;;  %v1433_v31 = vpop.f32.mrb[1].mxu1  ;;  %v1462_v10 = vadd.f32 %v1453_v35, %v1431_v41  ;;  %v2697_v41 = vld [vmem:[%s9455_s5] sm:$0xff] }
 0x1b9   :  { %v1392_v39 = vpop.f32.mrb[2].mxu0  ;;  %v1435_v47 = vpop.f32.mrb[2].mxu1  ;;  %v1461_v25 = vadd.f32 %v1453_v35, %v1390_v30  ;;  %v1463_v27 = vadd.f32 %v1453_v35, %v1433_v31 }
 0x1ba   :  { %v7600_v11 = vmax.f32 %v1460_v55, 0.0  ;;  %v1464_v50 = vadd.f32 %v1458_v40, %v1392_v39  ;;  %v1394_v48 = vpop.f32.mrb[3].mxu0  ;;  %v1437_v49 = vpop.f32.mrb[3].mxu1  ;;  %v1466_v62 = vadd.f32 %v1458_v40, %v1435_v47  ;;  %v7606_v63 = vmax.f32 %v1462_v10, 0.0  ;;  %v2698_v55 = vld [vmem:[%s9455_s5 + $0x8] sm:$0xff] }
 0x1bb   :  { %v1465_v26 = vadd.f32 %v1458_v40, %v1394_v48  ;;  %v1467_v29 = vadd.f32 %v1458_v40, %v1437_v49  ;;  %v7630_v12 = vmax.f32 %v1461_v25, 0.0  ;;  %v7638_v7 = vmax.f32 %v1463_v27, 0.0 }
 0x1bc   :  { %9515 = vst [vmem:[#allocation8_spill] sm:$0xff] %v7600_v11  ;;  %v7602_v59 = vmax.f32 %v1464_v50, 0.0  ;;  %1514 = vrot.lane.b32.xlu1 %v7600_v11, %s7090_s25  ;;  %9517 = vst [vmem:[#allocation10_spill] sm:$0xff] %v7606_v63  ;;  %v7610_v6 = vmax.f32 %v1466_v62, 0.0 }
 0x1bd   :  { %9519 = vst [vmem:[#allocation12_spill] sm:$0xff] %v7630_v12  ;;  %v7634_v13 = vmax.f32 %v1465_v26, 0.0  ;;  %9521 = vst [vmem:[#allocation14_spill] sm:$0xff] %v7638_v7  ;;  %v7640_v8 = vmax.f32 %v1467_v29, 0.0 }
 0x1be   :  { %9516 = vst [vmem:[#allocation9_spill] sm:$0xff] %v7602_v59  ;;  %1516 = vrot.lane.b32.xlu0 %v7602_v59, %s7090_s25  ;;  %9518 = vst [vmem:[#allocation11_spill] sm:$0xff] %v7610_v6 }
 0x1bf   :  { %9520 = vst [vmem:[#allocation13_spill] sm:$0xff] %v7634_v13  ;;  %9522 = vst [vmem:[#allocation15_spill] sm:$0xff] %v7640_v8 }
 0x1c0   :  { %1522 = vrot.lane.b32.xlu1 %v7606_v63, %s7090_s25 }
 0x1c2   :  { %1524 = vrot.lane.b32.xlu0 %v7610_v6, %s7090_s25 }
 0x1c4   :  { %1476 = vrot.lane.b32.xlu1 %v7600_v11, %s7091_s0 }
 0x1c6   :  { %1478 = vrot.lane.b32.xlu0 %v7602_v59, %s7091_s0 }
 0x1c8   :  { %1484 = vrot.lane.b32.xlu1 %v7606_v63, %s7091_s0 }
 0x1ca   :  { %1486 = vrot.lane.b32.xlu0 %v7610_v6, %s7091_s0 }
 0x1cc   :  { %1742 = vrot.lane.b32.xlu1 %v7600_v11, %s7093_s26 }
 0x1ce   :  { %1744 = vrot.lane.b32.xlu0 %v7602_v59, %s7093_s26 }
 0x1d0   :  { %1750 = vrot.lane.b32.xlu1 %v7606_v63, %s7093_s26 }
 0x1d2   :  { %1752 = vrot.lane.b32.xlu0 %v7610_v6, %s7093_s26 }
 0x1d4   :  { %1518 = vrot.lane.b32.xlu1 %v7630_v12, %s7090_s25 }
 0x1d6   :  { %1520 = vrot.lane.b32.xlu0 %v7634_v13, %s7090_s25 }
 0x1d8   :  { %1526 = vrot.lane.b32.xlu1 %v7638_v7, %s7090_s25 }
 0x1da   :  { %1528 = vrot.lane.b32.xlu0 %v7640_v8, %s7090_s25 }
 0x1dc   :  { %1883 = vrot.lane.b32.xlu1 %v7600_v11, %s7094_s27 }
 0x1de   :  { %1885 = vrot.lane.b32.xlu0 %v7602_v59, %s7094_s27 }
 0x1e0   :  { %1480 = vrot.lane.b32.xlu1 %v7630_v12, %s7091_s0 }
 0x1e2   :  { %1482 = vrot.lane.b32.xlu0 %v7634_v13, %s7091_s0 }
 0x1e4   :  { %1488 = vrot.lane.b32.xlu1 %v7638_v7, %s7091_s0 }
 0x1e6   :  { %1490 = vrot.lane.b32.xlu0 %v7640_v8, %s7091_s0 }
 0x1e8   :  { %1746 = vrot.lane.b32.xlu1 %v7630_v12, %s7093_s26 }
 0x1ea   :  { %1893 = vrot.lane.b32.xlu0 %v7610_v6, %s7094_s27 }
 0x1ec   :  { %1754 = vrot.lane.b32.xlu1 %v7638_v7, %s7093_s26 }
 0x1ee   :  { %1748 = vrot.lane.b32.xlu0 %v7634_v13, %s7093_s26 }
 0x1f0   :  { %1887 = vrot.lane.b32.xlu1 %v7630_v12, %s7094_s27 }
 0x1f2   :  { %1756 = vrot.lane.b32.xlu0 %v7640_v8, %s7093_s26 }
 0x1f4   :  { %1891 = vrot.lane.b32.xlu1 %v7606_v63, %s7094_s27 }
 0x1f6   :  { %2135 = vrot.lane.b32.xlu0 %v7602_v59, %s7095_s28 }
 0x1f8   :  { %1895 = vrot.lane.b32.xlu1 %v7638_v7, %s7094_s27 }
 0x1fa   :  { %1889 = vrot.lane.b32.xlu0 %v7634_v13, %s7094_s27 }
 0x1fc   :  { %2133 = vrot.lane.b32.xlu1 %v7600_v11, %s7095_s28 }
 0x1fe   :  { %1897 = vrot.lane.b32.xlu0 %v7640_v8, %s7094_s27 }
 0x200   :  { %2137 = vrot.lane.b32.xlu1 %v7630_v12, %s7095_s28 }
 0x202   :  { %2143 = vrot.lane.b32.xlu0 %v7610_v6, %s7095_s28 }
 0x204   :  { %2141 = vrot.lane.b32.xlu1 %v7606_v63, %s7095_s28 }
 0x206   :  { %2276 = vrot.lane.b32.xlu0 %v7602_v59, %s7096_s29 }
 0x208   :  { %2145 = vrot.lane.b32.xlu1 %v7638_v7, %s7095_s28 }
 0x20a   :  { %2284 = vrot.lane.b32.xlu0 %v7610_v6, %s7096_s29 }
 0x20c   :  { %2274 = vrot.lane.b32.xlu1 %v7600_v11, %s7096_s29 }
 0x20e   :  { %2417 = vrot.lane.b32.xlu0 %v7602_v59, %s7097_s30 }
 0x210   :  { %2278 = vrot.lane.b32.xlu1 %v7630_v12, %s7096_s29 }
 0x212   :  { %2139 = vrot.lane.b32.xlu0 %v7634_v13, %s7095_s28 }
 0x214   :  { %2282 = vrot.lane.b32.xlu1 %v7606_v63, %s7096_s29 }
 0x216   :  { %2147 = vrot.lane.b32.xlu0 %v7640_v8, %s7095_s28 }
 0x218   :  { %2286 = vrot.lane.b32.xlu1 %v7638_v7, %s7096_s29 }
 0x21a   :  { %2425 = vrot.lane.b32.xlu0 %v7610_v6, %s7097_s30 }
 0x21c   :  { %2415 = vrot.lane.b32.xlu1 %v7600_v11, %s7097_s30 }
 0x21e   :  { %2280 = vrot.lane.b32.xlu0 %v7634_v13, %s7096_s29 }
 0x220   :  { %2419 = vrot.lane.b32.xlu1 %v7630_v12, %s7097_s30 }
 0x222   :  { %2288 = vrot.lane.b32.xlu0 %v7640_v8, %s7096_s29 }
 0x224   :  { %2423 = vrot.lane.b32.xlu1 %v7606_v63, %s7097_s30 }
 0x226   :  { %2558 = vrot.lane.b32.xlu0 %v7602_v59, %s7098_s13 }
 0x228   :  { %2427 = vrot.lane.b32.xlu1 %v7638_v7, %s7097_s30 }
 0x22a   :  { %2421 = vrot.lane.b32.xlu0 %v7634_v13, %s7097_s30 }
 0x22c   :  { %2556 = vrot.lane.b32.xlu1 %v7600_v11, %s7098_s13 }
 0x22e   :  { %v1515_v28 = vpop.permute.xlu1 %1514  ;;  %2429 = vrot.lane.b32.xlu0 %v7640_v8, %s7097_s30 }
 0x230   :  { %2560 = vrot.lane.b32.xlu1 %v7630_v12, %s7098_s13  ;;  %v1517_v32 = vpop.permute.xlu0 %1516 }
 0x232   :  { %v1523_v37 = vpop.permute.xlu1 %1522  ;;  %2566 = vrot.lane.b32.xlu0 %v7610_v6, %s7098_s13 }
 0x234   :  { %2564 = vrot.lane.b32.xlu1 %v7606_v63, %s7098_s13  ;;  %v1525_v3 = vpop.permute.xlu0 %1524 }
 0x236   :  { %v1477_v35 = vpop.permute.xlu1 %1476  ;;  %2562 = vrot.lane.b32.xlu0 %v7634_v13, %s7098_s13 }
 0x238   :  { %2568 = vrot.lane.b32.xlu1 %v7638_v7, %s7098_s13  ;;  %v7742_v40 = vpop.permute.xlu0 %1478 }
 0x23a   :  { %v1485_v54 = vpop.permute.xlu1 %1484  ;;  %2570 = vrot.lane.b32.xlu0 %v7640_v8, %s7098_s13 }
 0x23c   :  { %2701 = vperm.xlu1 %7042, %v2697_v41   ;;  %v1487_v30 = vpop.permute.xlu0 %1486 }
 0x23e   :  { %v7752_v31 = vpop.permute.xlu1 %1742  ;;  %2706 = vperm.xlu0 %7041, %v2698_v55  }
 0x240   :  { %v7754_v39 = vpop.permute.xlu0 %1744 }
 0x242   :  { %v7756_v47 = vpop.permute.xlu1 %1750 }
 0x244   :  { %v7758_v10 = vpop.permute.xlu0 %1752 }
 0x246   :  { %v1519_v50 = vpop.permute.xlu1 %1518 }
 0x247   :  { %v1534_v48 = vsel %vm105_vm0, %v1515_v28, %v1519_v50  ;;  %v1532_v4 = vsel %vm105_vm0, %v1519_v50, %v1523_v37 }
 0x248   :  { %v1521_v49 = vpop.permute.xlu0 %1520  ;;  %v1539_v25 = vmul.f32 %v1534_v48, %v7278_v19 }
 0x249   :  { %v1535_v62 = vsel %vm105_vm0, %v1517_v32, %v1521_v49  ;;  %v1533_v26 = vsel %vm105_vm0, %v1521_v49, %v1525_v3 }
 0x24a   :  { %v1543_v27 = vmul.f32 %v1535_v62, %v7278_v19  ;;  %v1527_v29 = vpop.permute.xlu1 %1526  ;;  %v1544_v57 = vmul.f32 %v1533_v26, %v7284_v21 }
 0x24b   :  { %v1530_v41 = vsel %vm105_vm0, %v1523_v37, %v1527_v29  ;;  %v1536_v55 = vsel %vm105_vm0, %v1527_v29, %v1515_v28  ;;  %v1540_v37 = vmul.f32 %v1532_v4, %v7284_v21 }
 0x24c   :  { %v1529_v58 = vpop.permute.xlu0 %1528  ;;  %v1550_v23 = vpack.c.bf16 %v1543_v27, %v1539_v25  ;;  %v1538_v62 = vmul.f32 %v1536_v55, %v7281_v20  ;;  %v1541_v19 = vmul.f32 %v1530_v41, %v7275_v18  ;;  %v9523_v55 = vmov 0  }
 0x24d   :  { %v1531_v48 = vsel %vm105_vm0, %v1525_v3, %v1529_v58  ;;  %v1537_v49 = vsel %vm105_vm0, %v1529_v58, %v1517_v32  ;;  %v1551_v26 = vpack.c.bf16 %v1544_v57, %v1540_v37  ;;  %v7054_v58 = vld [vmem:[%s9454_s4 + $0x8] sm:$0xff]  }
 0x24e   :  { %v1542_v14 = vmul.f32 %v1537_v49, %v7281_v20  ;;  %v1545_v28 = vmul.f32 %v1531_v48, %v7275_v18  ;;  %v7783_v29 = vpop.permute.xlu1 %1883  ;;  %1562 = vmatprep.subr.bf16.mxu0 %v1550_v23 }
 0x250   :  { %v1549_v50 = vpack.c.bf16 %v1542_v14, %v1538_v62  ;;  %v7786_v25 = vpop.permute.xlu0 %1885  ;;  %v1552_v3 = vpack.c.bf16 %v1545_v28, %v1541_v19 }
 0x252   :  { %v1481_v32 = vpop.permute.xlu1 %1480  ;;  %1563 = vmatpush1.bf16.msra.mxu0 %v1549_v50  ;;  %1605 = vmatprep.subr.bf16.mxu1 %v1552_v3 }
 0x253   :  { %v1496_v27 = vsel %vm60_vm2, %v1477_v35, %v1481_v32  ;;  %1606 = vmatpush1.bf16.msra.mxu1 %v1551_v26  ;;  %v1494_v62 = vsel %vm60_vm2, %v1481_v32, %v1485_v54 }
 0x254   :  { %v1483_v23 = vpop.permute.xlu0 %1482  ;;  %v1501_v19 = vmul.f32 %v1496_v27, %v7288_v24  ;;  %v1502_v32 = vmul.f32 %v1494_v62, %v7310_v44 }
 0x255   :  { %v1497_v4 = vsel %vm60_vm2, %v7742_v40, %v1483_v23  ;;  %6542 = vmatmul.mubr.msk.bf16.vlgmr.msra.gmra.mrb[4].mxu0 %vm1558_vm11, %v7054_v58  ;;  %v1495_v57 = vsel %vm60_vm2, %v1483_v23, %v1487_v30 }
 0x256   :  { %v1505_v14 = vmul.f32 %v1497_v4, %v7288_v24  ;;  %v1489_v41 = vpop.permute.xlu1 %1488  ;;  %6543 = vmatmul.mubr.msk.bf16.vlgmr.msra.gmra.mrb[4].mxu1 %vm1558_vm11, %v7054_v58  ;;  %1688 = vmatprep.mubr.bf16.mxu0 %v9523_v55  ;;  %v1506_v50 = vmul.f32 %v1495_v57, %v7310_v44 }
 0x257   :  { %v1492_v48 = vsel %vm60_vm2, %v1485_v54, %v1489_v41  ;;  %v1498_v49 = vsel %vm60_vm2, %v1489_v41, %v1477_v35  ;;  %1731 = vmatprep.mubr.bf16.mxu1 %v9523_v55 }
 0x258   :  { %v1491_v28 = vpop.permute.xlu0 %1490  ;;  %v1511_v37 = vpack.c.bf16 %v1505_v14, %v1501_v19  ;;  %v1500_v58 = vmul.f32 %v1498_v49, %v7307_v43  ;;  %v1503_v35 = vmul.f32 %v1492_v48, %v7313_v45 }
 0x259   :  { %v1493_v3 = vsel %vm60_vm2, %v1487_v30, %v1491_v28  ;;  %v1499_v26 = vsel %vm60_vm2, %v1491_v28, %v7742_v40  ;;  %v1512_v30 = vpack.c.bf16 %v1506_v50, %v1502_v32  ;;  %v7055_v40 = vld [vmem:[%s9454_s4] sm:$0xff]  }
 0x25a   :  { %v1504_v27 = vmul.f32 %v1499_v26, %v7307_v43  ;;  %v1507_v23 = vmul.f32 %v1493_v3, %v7313_v45  ;;  %v1747_v54 = vpop.permute.xlu1 %1746  ;;  %1656 = vmatprep.subr.bf16.mxu0 %v1511_v37 }
 0x25b   :  { %v1762_v41 = vsel %vm369_vm4, %v7752_v31, %v1747_v54 }
 0x25c   :  { %v1510_v4 = vpack.c.bf16 %v1504_v27, %v1500_v58  ;;  %v1894_v19 = vpop.permute.xlu0 %1893  ;;  %v1513_v57 = vpack.c.bf16 %v1507_v23, %v1503_v35  ;;  %v1767_v62 = vmul.f32 %v1762_v41, %v7328_v56  ;;  %v1760_v58 = vsel %vm369_vm4, %v1747_v54, %v7756_v47 }
 0x25e   :  { %v1755_v14 = vpop.permute.xlu1 %1754  ;;  %1657 = vmatpush1.bf16.msra.mxu0 %v1510_v4  ;;  %1699 = vmatprep.subr.bf16.mxu1 %v1513_v57 }
 0x25f   :  { %1700 = vmatpush1.bf16.msra.mxu1 %v1512_v30  ;;  %v1758_v3 = vsel %vm369_vm4, %v7756_v47, %v1755_v14  ;;  %v1764_v26 = vsel %vm369_vm4, %v1755_v14, %v7752_v31 }
 0x260   :  { %v1749_v48 = vpop.permute.xlu0 %1748  ;;  %v1766_v31 = vmul.f32 %v1764_v26, %v7341_v5  ;;  %v1769_v57 = vmul.f32 %v1758_v3, %v7351_v22 }
 0x261   :  { %v1763_v49 = vsel %vm369_vm4, %v7754_v39, %v1749_v48  ;;  %6545 = vmatmul.mubr.msk.bf16.vlgmr.msra.gmra.mrb[4].mxu0 %vm1558_vm11, %v7055_v40  ;;  %v1761_v28 = vsel %vm369_vm4, %v1749_v48, %v7758_v10 }
 0x262   :  { %v1771_v37 = vmul.f32 %v1763_v49, %v7328_v56  ;;  %v1888_v50 = vpop.permute.xlu1 %1887  ;;  %6546 = vmatmul.mubr.msk.bf16.vlgmr.msra.gmra.mrb[4].mxu1 %vm1558_vm11, %v7055_v40  ;;  %1821 = vmatprep.mubr.bf16.mxu0 %v9523_v55  ;;  %v1772_v23 = vmul.f32 %v1761_v28, %v7348_v17  ;;  %v1768_v40 = vmul.f32 %v1760_v58, %v7348_v17 }
 0x263   :  { %1864 = vmatprep.mubr.bf16.mxu1 %v9523_v55 }
 0x264   :  { %v1757_v35 = vpop.permute.xlu0 %1756  ;;  %v1778_v27 = vpack.c.bf16 %v1771_v37, %v1767_v62  ;;  %v1779_v48 = vpack.c.bf16 %v1772_v23, %v1768_v40  ;;  %v1903_v62 = vsel %vm530_vm6, %v7783_v29, %v1888_v50 }
 0x265   :  { %v1759_v32 = vsel %vm369_vm4, %v7758_v10, %v1757_v35  ;;  %v1765_v4 = vsel %vm369_vm4, %v1757_v35, %v7754_v39  ;;  %v7056_v39 = vld [vmem:[%s9454_s4 + $0x10] sm:$0xff]   ;;  %v1908_v3 = vmul.f32 %v1903_v62, %v7370_v36  ;;  %v2028_v62 = vpack.c.bf16 %v7634_v13, %v7630_v12  ;;  %v9528_v12 = vld [vmem:[#allocation2_spill] sm:$0xff] }
 0x266   :  { %v1770_v30 = vmul.f32 %v1765_v4, %v7341_v5  ;;  %v1773_v47 = vmul.f32 %v1759_v32, %v7351_v22  ;;  %v1892_v54 = vpop.permute.xlu1 %1891  ;;  %1789 = vmatprep.subr.bf16.mxu0 %v1778_v27 }
 0x267   :  { %v1901_v32 = vsel %vm530_vm6, %v1888_v50, %v1892_v54 }
 0x268   :  { %v1777_v14 = vpack.c.bf16 %v1770_v30, %v1766_v31  ;;  %v7860_v41 = vpop.permute.xlu0 %2135  ;;  %v1780_v10 = vpack.c.bf16 %v1773_v47, %v1769_v57 }
 0x26a   :  { %v1896_v49 = vpop.permute.xlu1 %1895  ;;  %1790 = vmatpush1.bf16.msra.mxu0 %v1777_v14  ;;  %1832 = vmatprep.subr.bf16.mxu1 %v1780_v10 }
 0x26b   :  { %1833 = vmatpush1.bf16.msra.mxu1 %v1779_v48  ;;  %v1899_v27 = vsel %vm530_vm6, %v1892_v54, %v1896_v49  ;;  %v1905_v23 = vsel %vm530_vm6, %v1896_v49, %v7783_v29  ;;  %v1909_v54 = vmul.f32 %v1901_v32, %v7385_v52 }
 0x26c   :  { %v1890_v28 = vpop.permute.xlu0 %1889  ;;  %v1907_v40 = vmul.f32 %v1905_v23, %v7382_v51  ;;  %v1910_v29 = vmul.f32 %v1899_v27, %v7388_v53 }
 0x26d   :  { %v1904_v37 = vsel %vm530_vm6, %v7786_v25, %v1890_v28  ;;  %6550 = vmatmul.mubr.msk.bf16.vlgmr.msra.gmra.mrb[4].mxu0 %vm1558_vm11, %v7056_v39  ;;  %v1902_v26 = vsel %vm530_vm6, %v1890_v28, %v1894_v19 }
 0x26e   :  { %v1912_v58 = vmul.f32 %v1904_v37, %v7370_v36  ;;  %v2134_v35 = vpop.permute.xlu1 %2133  ;;  %6551 = vmatmul.mubr.msk.bf16.vlgmr.msra.gmra.mrb[4].mxu1 %vm1558_vm11, %v7056_v39  ;;  %1962 = vmatprep.mubr.bf16.mxu0 %v9523_v55  ;;  %v1913_v57 = vmul.f32 %v1902_v26, %v7385_v52  ;;  %v2030_v37 = vpack.c.bf16 %v7640_v8, %v7638_v7 }
 0x26f   :  { %2005 = vmatprep.mubr.bf16.mxu1 %v9523_v55  ;;  %v2027_v26 = vpack.c.bf16 %v7602_v59, %v7600_v11 }
 0x270   :  { %v1898_v4 = vpop.permute.xlu0 %1897  ;;  %v1919_v31 = vpack.c.bf16 %v1912_v58, %v1908_v3  ;;  %v2029_v58 = vpack.c.bf16 %v7610_v6, %v7606_v63 }
 0x271   :  { %v1900_v30 = vsel %vm530_vm6, %v1894_v19, %v1898_v4  ;;  %v1906_v47 = vsel %vm530_vm6, %v1898_v4, %v7786_v25  ;;  %v1920_v19 = vpack.c.bf16 %v1913_v57, %v1909_v54  ;;  %v7057_v25 = vld [vmem:[%s9454_s4 + $0x18] sm:$0xff]  }
 0x272   :  { %v1911_v14 = vmul.f32 %v1906_v47, %v7382_v51  ;;  %v1914_v10 = vmul.f32 %v1900_v30, %v7388_v53  ;;  %v2138_v50 = vpop.permute.xlu1 %2137  ;;  %1930 = vmatprep.subr.bf16.mxu0 %v1919_v31  ;;  %v7058_v31 = vld [vmem:[%s9454_s4 + $0x20] sm:$0xff]  }
 0x273   :  { %v2153_v57 = vsel %vm812_vm7, %v2134_v35, %v2138_v50 }
 0x274   :  { %v1918_v48 = vpack.c.bf16 %v1911_v14, %v1907_v40  ;;  %v2144_v39 = vpop.permute.xlu0 %2143  ;;  %v1921_v49 = vpack.c.bf16 %v1914_v10, %v1910_v29  ;;  %v2157_v29 = vmul.f32 %v2153_v57, %v7452_v60 }
 0x276   :  { %v2142_v28 = vpop.permute.xlu1 %2141  ;;  %1931 = vmatpush1.bf16.msra.mxu0 %v1918_v48  ;;  %1973 = vmatprep.subr.bf16.mxu1 %v1921_v49 }
 0x277   :  { %1974 = vmatpush1.bf16.msra.mxu1 %v1920_v19  ;;  %2039 = vmatprep.subr.bf16.mxu0 %v2028_v62  ;;  %v2151_v47 = vsel %vm812_vm7, %v2138_v50, %v2142_v28 }
 0x278   :  { %2082 = vmatprep.subr.bf16.mxu1 %v2030_v37  ;;  %v7904_v3 = vpop.permute.xlu0 %2276  ;;  %v2158_v54 = vmul.f32 %v2151_v47, %v7423_v38 }
 0x279   :  { %6555 = vmatmul.mubr.msk.bf16.vlgmr.msra.gmra.mrb[4].mxu0 %vm1558_vm11, %v7057_v25 }
 0x27a   :  { %v2146_v27 = vpop.permute.xlu1 %2145  ;;  %6556 = vmatmul.mubr.msk.bf16.vlgmr.msra.gmra.mrb[4].mxu1 %vm1558_vm11, %v7057_v25  ;;  %2040 = vmatpush1.bf16.msra.mxu0 %v2027_v26 }
 0x27b   :  { %2083 = vmatpush1.bf16.msra.mxu1 %v2029_v58  ;;  %2071 = vmatprep.mubr.bf16.mxu0 %v9523_v55  ;;  %v2149_v50 = vsel %vm812_vm7, %v2142_v28, %v2146_v27  ;;  %v2155_v62 = vsel %vm812_vm7, %v2146_v27, %v2134_v35 }
 0x27c   :  { %v2285_v23 = vpop.permute.xlu0 %2284  ;;  %2114 = vmatprep.mubr.bf16.mxu1 %v9523_v55  ;;  %v2159_v57 = vmul.f32 %v2149_v50, %v7455_v1  ;;  %v2160_v47 = vmul.f32 %v2155_v62, %v7426_v2 }
 0x27e   :  { %v2275_v32 = vpop.permute.xlu1 %2274 }
 0x280   :  { %v7914_v4 = vpop.permute.xlu0 %2417 }
 0x282   :  { %v2279_v30 = vpop.permute.xlu1 %2278 }
 0x284   :  { %v2140_v40 = vpop.permute.xlu0 %2139 }
 0x285   :  { %v2152_v14 = vsel %vm812_vm7, %v2140_v40, %v2144_v39  ;;  %v2154_v10 = vsel %vm812_vm7, %v7860_v41, %v2140_v40  ;;  %6560 = vmatmul.mubr.msk.bf16.vlgmr.msra.gmra.mrb[4].mxu0 %vm1558_vm11, %v7058_v31 }
 0x286   :  { %v2161_v48 = vmul.f32 %v2154_v10, %v7452_v60  ;;  %v2162_v49 = vmul.f32 %v2152_v14, %v7423_v38  ;;  %v2283_v19 = vpop.permute.xlu1 %2282  ;;  %6561 = vmatmul.mubr.msk.bf16.vlgmr.msra.gmra.mrb[4].mxu1 %vm1558_vm11, %v7058_v31  ;;  %2212 = vmatprep.mubr.bf16.mxu0 %v9523_v55 }
 0x287   :  { %2255 = vmatprep.mubr.bf16.mxu1 %v9523_v55 }
 0x288   :  { %v2168_v25 = vpack.c.bf16 %v2161_v48, %v2157_v29  ;;  %v2148_v37 = vpop.permute.xlu0 %2147  ;;  %v2169_v26 = vpack.c.bf16 %v2162_v49, %v2158_v54  ;;  %v2292_v54 = vsel %vm973_vm8, %v2279_v30, %v2283_v19 }
 0x289   :  { %v2150_v58 = vsel %vm812_vm7, %v2144_v39, %v2148_v37  ;;  %v2156_v31 = vsel %vm812_vm7, %v2148_v37, %v7860_v41  ;;  %v7059_v39 = vld [vmem:[%s9454_s4 + $0x28] sm:$0xff]   ;;  %v2294_v41 = vsel %vm973_vm8, %v2275_v32, %v2279_v30 }
 0x28a   :  { %v2163_v28 = vmul.f32 %v2150_v58, %v7455_v1  ;;  %v2164_v35 = vmul.f32 %v2156_v31, %v7426_v2  ;;  %v2287_v27 = vpop.permute.xlu1 %2286  ;;  %2180 = vmatprep.subr.bf16.mxu0 %v2169_v26  ;;  %v2298_v49 = vmul.f32 %v2294_v41, %v7493_v42 }
 0x28b   :  { %2181 = vmatpush1.bf16.msra.mxu0 %v2168_v25  ;;  %v2299_v25 = vmul.f32 %v2292_v54, %v7466_v15  ;;  %v2290_v58 = vsel %vm973_vm8, %v2283_v19, %v2287_v27  ;;  %v2296_v31 = vsel %vm973_vm8, %v2287_v27, %v2275_v32 }
 0x28c   :  { %v2170_v40 = vpack.c.bf16 %v2163_v28, %v2159_v57  ;;  %v2426_v29 = vpop.permute.xlu0 %2425  ;;  %v2171_v14 = vpack.c.bf16 %v2164_v35, %v2160_v47 }
 0x28e   :  { %v2416_v10 = vpop.permute.xlu1 %2415  ;;  %2223 = vmatprep.subr.bf16.mxu1 %v2171_v14  ;;  %v2300_v14 = vmul.f32 %v2290_v58, %v7496_v46 }
 0x28f   :  { %2224 = vmatpush1.bf16.msra.mxu1 %v2170_v40 }
 0x290   :  { %v2281_v48 = vpop.permute.xlu0 %2280 }
 0x291   :  { %v2293_v50 = vsel %vm973_vm8, %v2281_v48, %v2285_v23  ;;  %v2295_v62 = vsel %vm973_vm8, %v7904_v3, %v2281_v48  ;;  %6565 = vmatmul.mubr.msk.bf16.vlgmr.msra.gmra.mrb[4].mxu0 %vm1558_vm11, %v7059_v39 }
 0x292   :  { %v2302_v37 = vmul.f32 %v2295_v62, %v7493_v42  ;;  %v2303_v26 = vmul.f32 %v2293_v50, %v7466_v15  ;;  %v2420_v30 = vpop.permute.xlu1 %2419  ;;  %6566 = vmatmul.mubr.msk.bf16.vlgmr.msra.gmra.mrb[4].mxu1 %vm1558_vm11, %v7059_v39  ;;  %2353 = vmatprep.mubr.bf16.mxu0 %v9523_v55  ;;  %v2301_v39 = vmul.f32 %v2296_v31, %v7469_v16 }
 0x293   :  { %2396 = vmatprep.mubr.bf16.mxu1 %v9523_v55 }
 0x294   :  { %v2309_v57 = vpack.c.bf16 %v2302_v37, %v2298_v49  ;;  %v2289_v47 = vpop.permute.xlu0 %2288  ;;  %v2310_v28 = vpack.c.bf16 %v2303_v26, %v2299_v25 }
 0x295   :  { %v2291_v35 = vsel %vm973_vm8, %v2285_v23, %v2289_v47  ;;  %v2297_v40 = vsel %vm973_vm8, %v2289_v47, %v7904_v3  ;;  %v7060_v23 = vld [vmem:[%s9454_s4 + $0x30] sm:$0xff]   ;;  %v2435_v3 = vsel %vm1134_vm9, %v2416_v10, %v2420_v30 }
 0x296   :  { %v2304_v19 = vmul.f32 %v2291_v35, %v7496_v46  ;;  %v2305_v32 = vmul.f32 %v2297_v40, %v7469_v16  ;;  %v2424_v27 = vpop.permute.xlu1 %2423  ;;  %2321 = vmatprep.subr.bf16.mxu0 %v2310_v28  ;;  %v2439_v25 = vmul.f32 %v2435_v3, %v7532_v33 }
 0x297   :  { %2322 = vmatpush1.bf16.msra.mxu0 %v2309_v57  ;;  %v2433_v50 = vsel %vm1134_vm9, %v2420_v30, %v2424_v27 }
 0x298   :  { %v2311_v41 = vpack.c.bf16 %v2304_v19, %v2300_v14  ;;  %v2559_v54 = vpop.permute.xlu0 %2558  ;;  %v2312_v48 = vpack.c.bf16 %v2305_v32, %v2301_v39  ;;  %v2440_v58 = vmul.f32 %v2433_v50, %v7505_v0 }
 0x29a   :  { %v2428_v49 = vpop.permute.xlu1 %2427  ;;  %2364 = vmatprep.subr.bf16.mxu1 %v2312_v48 }
 0x29b   :  { %2365 = vmatpush1.bf16.msra.mxu1 %v2311_v41  ;;  %v2431_v47 = vsel %vm1134_vm9, %v2424_v27, %v2428_v49  ;;  %v2437_v28 = vsel %vm1134_vm9, %v2428_v49, %v2416_v10 }
 0x29c   :  { %v2422_v62 = vpop.permute.xlu0 %2421  ;;  %v2441_v32 = vmul.f32 %v2431_v47, %v7535_v34  ;;  %v2442_v41 = vmul.f32 %v2437_v28, %v7508_v61 }
 0x29d   :  { %v2434_v37 = vsel %vm1134_vm9, %v2422_v62, %v2426_v29  ;;  %v2436_v26 = vsel %vm1134_vm9, %v7914_v4, %v2422_v62  ;;  %6570 = vmatmul.mubr.msk.bf16.vlgmr.msra.gmra.mrb[4].mxu0 %vm1558_vm11, %v7060_v23 }
 0x29e   :  { %v2443_v31 = vmul.f32 %v2436_v26, %v7532_v33  ;;  %v2444_v57 = vmul.f32 %v2434_v37, %v7505_v0  ;;  %v2557_v30 = vpop.permute.xlu1 %2556  ;;  %6571 = vmatmul.mubr.msk.bf16.vlgmr.msra.gmra.mrb[4].mxu1 %vm1558_vm11, %v7060_v23  ;;  %2494 = vmatprep.mubr.bf16.mxu0 %v9523_v55  ;;  %v9524_v37 = vld [vmem:[#allocation6_spill] sm:$0xff] }
 0x29f   :  { %2537 = vmatprep.mubr.bf16.mxu1 %v9523_v55 }
 0x2a0   :  { %v2450_v35 = vpack.c.bf16 %v2443_v31, %v2439_v25  ;;  %v2430_v40 = vpop.permute.xlu0 %2429  ;;  %v2451_v14 = vpack.c.bf16 %v2444_v57, %v2440_v58  ;;  %v9525_v57 = vld [vmem:[#allocation4_spill] sm:$0xff] }
 0x2a1   :  { %v2432_v39 = vsel %vm1134_vm9, %v2426_v29, %v2430_v40  ;;  %v2438_v19 = vsel %vm1134_vm9, %v2430_v40, %v7914_v4  ;;  %v7061_v29 = vld [vmem:[%s9454_s4 + $0x38] sm:$0xff]  }
 0x2a2   :  { %v2445_v27 = vmul.f32 %v2432_v39, %v7535_v34  ;;  %v2446_v10 = vmul.f32 %v2438_v19, %v7508_v61  ;;  %v2561_v48 = vpop.permute.xlu1 %2560  ;;  %2462 = vmatprep.subr.bf16.mxu0 %v2451_v14 }
 0x2a3   :  { %2463 = vmatpush1.bf16.msra.mxu0 %v2450_v35  ;;  %v2576_v4 = vsel %vm1295_vm10, %v2557_v30, %v2561_v48 }
 0x2a4   :  { %v2452_v23 = vpack.c.bf16 %v2445_v27, %v2441_v32  ;;  %v2567_v3 = vpop.permute.xlu0 %2566  ;;  %v2453_v49 = vpack.c.bf16 %v2446_v10, %v2442_v41  ;;  %v2580_v26 = vmul.f32 %v2576_v4, %v9524_v37 }
 0x2a6   :  { %v2565_v50 = vpop.permute.xlu1 %2564  ;;  %2505 = vmatprep.subr.bf16.mxu1 %v2453_v49  ;;  %v9527_v49 = vld [vmem:[#allocation5_spill] sm:$0xff] }
 0x2a7   :  { %v2574_v62 = vsel %vm1295_vm10, %v2561_v48, %v2565_v50  ;;  %2506 = vmatpush1.bf16.msra.mxu1 %v2452_v23  ;;  %v9526_v48 = vld [vmem:[#allocation7_spill] sm:$0xff] }
 0x2a8   :  { %v2563_v25 = vpop.permute.xlu0 %2562  ;;  %v2581_v47 = vmul.f32 %v2574_v62, %v9525_v57 }
 0x2a9   :  { %v2575_v58 = vsel %vm1295_vm10, %v2563_v25, %v2567_v3  ;;  %v2577_v31 = vsel %vm1295_vm10, %v2559_v54, %v2563_v25  ;;  %6575 = vmatmul.mubr.msk.bf16.vlgmr.msra.gmra.mrb[4].mxu0 %vm1558_vm11, %v7061_v29  ;;  %v7062_v25 = vld [vmem:[%s9454_s4 + $0x40] sm:$0xff]  }
 0x2aa   :  { %v2584_v28 = vmul.f32 %v2577_v31, %v9524_v37  ;;  %v2585_v35 = vmul.f32 %v2575_v58, %v9525_v57  ;;  %v2569_v40 = vpop.permute.xlu1 %2568  ;;  %6576 = vmatmul.mubr.msk.bf16.vlgmr.msra.gmra.mrb[4].mxu1 %vm1558_vm11, %v7061_v29  ;;  %2635 = vmatprep.mubr.bf16.mxu0 %v9523_v55 }
 0x2ab   :  { %v2572_v14 = vsel %vm1295_vm10, %v2565_v50, %v2569_v40  ;;  %v2578_v39 = vsel %vm1295_vm10, %v2569_v40, %v2557_v30  ;;  %2678 = vmatprep.mubr.bf16.mxu1 %v9523_v55 }
 0x2ac   :  { %v2591_v19 = vpack.c.bf16 %v2584_v28, %v2580_v26  ;;  %v2571_v32 = vpop.permute.xlu0 %2570  ;;  %v2592_v41 = vpack.c.bf16 %v2585_v35, %v2581_v47  ;;  %v2582_v23 = vmul.f32 %v2572_v14, %v9526_v48  ;;  %v2583_v29 = vmul.f32 %v2578_v39, %v9527_v49 }
 0x2ad   :  { %v2573_v27 = vsel %vm1295_vm10, %v2567_v3, %v2571_v32  ;;  %v2579_v10 = vsel %vm1295_vm10, %v2571_v32, %v2559_v54 }
 0x2ae   :  { %v2586_v4 = vmul.f32 %v2573_v27, %v9526_v48  ;;  %v2587_v50 = vmul.f32 %v2579_v10, %v9527_v49  ;;  %2603 = vmatprep.subr.bf16.mxu0 %v2592_v41 }
 0x2af   :  { %2604 = vmatpush1.bf16.msra.mxu0 %v2591_v19 }
 0x2b0   :  { %v2593_v30 = vpack.c.bf16 %v2586_v4, %v2582_v23  ;;  %v2594_v62 = vpack.c.bf16 %v2587_v50, %v2583_v29 }
 0x2b2   :  { %2646 = vmatprep.subr.bf16.mxu1 %v2594_v62 }
 0x2b3   :  { %2647 = vmatpush1.bf16.msra.mxu1 %v2593_v30 }
 0x2b5   :  { %6580 = vmatmul.mubr.msk.bf16.vlgmr.msra.gmra.mrb[4].mxu0 %vm1558_vm11, %v7062_v25 }
 0x2b6   :  { %6581 = vmatmul.mubr.msk.bf16.vlgmr.msra.gmra.mrb[4].mxu1 %vm1558_vm11, %v7062_v25  ;;  %2842 = vmatprep.mubr.bf16.mxu0 %v9523_v55 }
 0x2b7   :  { %2885 = vmatprep.mubr.bf16.mxu1 %v9523_v55 }
 0x2bb   :  { %v2702_v54 = vpop.permute.xlu1 %2701 }
 0x2bd   :  { %v2707_v3 = vpop.permute.xlu0 %2706 }
 0x388   :  { %v2637_v26 = vpop.f32.mrb[4].mxu0 }
 0x389   :  { %v2709_v58 = vadd.f32 %v2702_v54, %v2637_v26  ;;  %v2639_v31 = vpop.f32.mrb[5].mxu0  ;;  %v2680_v47 = vpop.f32.mrb[4].mxu1 }
 0x38a   :  { %v2641_v28 = vpop.f32.mrb[6].mxu0  ;;  %v2682_v35 = vpop.f32.mrb[5].mxu1  ;;  %v2711_v14 = vadd.f32 %v2702_v54, %v2680_v47  ;;  %v2710_v4 = vadd.f32 %v2702_v54, %v2639_v31 }
 0x38b   :  { %v8053_v40 = vmax.f32 %v2709_v58, 0.0  ;;  %v2713_v39 = vadd.f32 %v2707_v3, %v2641_v28  ;;  %v2643_v19 = vpop.f32.mrb[7].mxu0  ;;  %v2684_v32 = vpop.f32.mrb[6].mxu1  ;;  %v2712_v50 = vadd.f32 %v2702_v54, %v2682_v35 }
 0x38c   :  { %v2686_v41 = vpop.f32.mrb[7].mxu1  ;;  %v2715_v10 = vadd.f32 %v2707_v3, %v2684_v32  ;;  %v8059_v23 = vmax.f32 %v2711_v14, 0.0  ;;  %v2714_v30 = vadd.f32 %v2707_v3, %v2643_v19  ;;  %v8083_v25 = vmax.f32 %v2710_v4, 0.0  ;;  %v3946_v32 = vld [vmem:[%s9457_s7 + $0x8] sm:$0xff] }
 0x38d   :  { %v8055_v27 = vmax.f32 %v2713_v39, 0.0  ;;  %2763 = vrot.lane.b32.xlu1 %v8053_v40, %s7090_s25  ;;  %v2716_v62 = vadd.f32 %v2707_v3, %v2686_v41  ;;  %v8087_v26 = vmax.f32 %v2712_v50, 0.0  ;;  %v3945_v39 = vld [vmem:[%s9457_s7] sm:$0xff] }
 0x38e   :  { %v8063_v29 = vmax.f32 %v2715_v10, 0.0  ;;  %v8089_v58 = vmax.f32 %v2714_v30, 0.0 }
 0x38f   :  { %2765 = vrot.lane.b32.xlu0 %v8055_v27, %s7090_s25  ;;  %v8091_v47 = vmax.f32 %v2716_v62, 0.0 }
 0x391   :  { %2771 = vrot.lane.b32.xlu1 %v8059_v23, %s7090_s25 }
 0x393   :  { %2773 = vrot.lane.b32.xlu0 %v8063_v29, %s7090_s25 }
 0x395   :  { %2725 = vrot.lane.b32.xlu1 %v8053_v40, %s7091_s0 }
 0x397   :  { %2727 = vrot.lane.b32.xlu0 %v8055_v27, %s7091_s0 }
 0x399   :  { %2733 = vrot.lane.b32.xlu1 %v8059_v23, %s7091_s0 }
 0x39b   :  { %2735 = vrot.lane.b32.xlu0 %v8063_v29, %s7091_s0 }
 0x39d   :  { %2990 = vrot.lane.b32.xlu1 %v8053_v40, %s7093_s26 }
 0x39f   :  { %2992 = vrot.lane.b32.xlu0 %v8055_v27, %s7093_s26 }
 0x3a1   :  { %2998 = vrot.lane.b32.xlu1 %v8059_v23, %s7093_s26 }
 0x3a3   :  { %3000 = vrot.lane.b32.xlu0 %v8063_v29, %s7093_s26 }
 0x3a5   :  { %2767 = vrot.lane.b32.xlu1 %v8083_v25, %s7090_s25 }
 0x3a7   :  { %2769 = vrot.lane.b32.xlu0 %v8089_v58, %s7090_s25 }
 0x3a9   :  { %2775 = vrot.lane.b32.xlu1 %v8087_v26, %s7090_s25 }
 0x3ab   :  { %2777 = vrot.lane.b32.xlu0 %v8091_v47, %s7090_s25 }
 0x3ad   :  { %3131 = vrot.lane.b32.xlu1 %v8053_v40, %s7094_s27 }
 0x3af   :  { %3133 = vrot.lane.b32.xlu0 %v8055_v27, %s7094_s27 }
 0x3b1   :  { %2729 = vrot.lane.b32.xlu1 %v8083_v25, %s7091_s0 }
 0x3b3   :  { %2731 = vrot.lane.b32.xlu0 %v8089_v58, %s7091_s0 }
 0x3b5   :  { %2737 = vrot.lane.b32.xlu1 %v8087_v26, %s7091_s0 }
 0x3b7   :  { %2739 = vrot.lane.b32.xlu0 %v8091_v47, %s7091_s0 }
 0x3b9   :  { %2994 = vrot.lane.b32.xlu1 %v8083_v25, %s7093_s26 }
 0x3bb   :  { %3141 = vrot.lane.b32.xlu0 %v8063_v29, %s7094_s27 }
 0x3bd   :  { %3002 = vrot.lane.b32.xlu1 %v8087_v26, %s7093_s26 }
 0x3bf   :  { %2996 = vrot.lane.b32.xlu0 %v8089_v58, %s7093_s26 }
 0x3c1   :  { %3135 = vrot.lane.b32.xlu1 %v8083_v25, %s7094_s27 }
 0x3c3   :  { %3004 = vrot.lane.b32.xlu0 %v8091_v47, %s7093_s26 }
 0x3c5   :  { %3139 = vrot.lane.b32.xlu1 %v8059_v23, %s7094_s27 }
 0x3c7   :  { %3383 = vrot.lane.b32.xlu0 %v8055_v27, %s7095_s28 }
 0x3c9   :  { %3143 = vrot.lane.b32.xlu1 %v8087_v26, %s7094_s27 }
 0x3cb   :  { %3137 = vrot.lane.b32.xlu0 %v8089_v58, %s7094_s27 }
 0x3cd   :  { %3381 = vrot.lane.b32.xlu1 %v8053_v40, %s7095_s28 }
 0x3cf   :  { %3145 = vrot.lane.b32.xlu0 %v8091_v47, %s7094_s27 }
 0x3d1   :  { %3385 = vrot.lane.b32.xlu1 %v8083_v25, %s7095_s28 }
 0x3d3   :  { %3391 = vrot.lane.b32.xlu0 %v8063_v29, %s7095_s28 }
 0x3d5   :  { %3389 = vrot.lane.b32.xlu1 %v8059_v23, %s7095_s28 }
 0x3d7   :  { %3524 = vrot.lane.b32.xlu0 %v8055_v27, %s7096_s29 }
 0x3d9   :  { %3393 = vrot.lane.b32.xlu1 %v8087_v26, %s7095_s28 }
 0x3db   :  { %3532 = vrot.lane.b32.xlu0 %v8063_v29, %s7096_s29 }
 0x3dd   :  { %3522 = vrot.lane.b32.xlu1 %v8053_v40, %s7096_s29 }
 0x3df   :  { %3665 = vrot.lane.b32.xlu0 %v8055_v27, %s7097_s30 }
 0x3e1   :  { %3526 = vrot.lane.b32.xlu1 %v8083_v25, %s7096_s29 }
 0x3e3   :  { %3387 = vrot.lane.b32.xlu0 %v8089_v58, %s7095_s28 }
 0x3e5   :  { %3530 = vrot.lane.b32.xlu1 %v8059_v23, %s7096_s29 }
 0x3e7   :  { %3395 = vrot.lane.b32.xlu0 %v8091_v47, %s7095_s28 }
 0x3e9   :  { %3534 = vrot.lane.b32.xlu1 %v8087_v26, %s7096_s29 }
 0x3eb   :  { %3673 = vrot.lane.b32.xlu0 %v8063_v29, %s7097_s30 }
 0x3ed   :  { %3663 = vrot.lane.b32.xlu1 %v8053_v40, %s7097_s30 }
 0x3ef   :  { %3528 = vrot.lane.b32.xlu0 %v8089_v58, %s7096_s29 }
 0x3f1   :  { %3667 = vrot.lane.b32.xlu1 %v8083_v25, %s7097_s30 }
 0x3f3   :  { %3536 = vrot.lane.b32.xlu0 %v8091_v47, %s7096_s29 }
 0x3f5   :  { %3671 = vrot.lane.b32.xlu1 %v8059_v23, %s7097_s30 }
 0x3f7   :  { %3806 = vrot.lane.b32.xlu0 %v8055_v27, %s7098_s13 }
 0x3f9   :  { %3675 = vrot.lane.b32.xlu1 %v8087_v26, %s7097_s30 }
 0x3fb   :  { %3669 = vrot.lane.b32.xlu0 %v8089_v58, %s7097_s30 }
 0x3fd   :  { %3804 = vrot.lane.b32.xlu1 %v8053_v40, %s7098_s13 }
 0x3ff   :  { %v2764_v54 = vpop.permute.xlu1 %2763  ;;  %3677 = vrot.lane.b32.xlu0 %v8091_v47, %s7097_s30 }
 0x401   :  { %3808 = vrot.lane.b32.xlu1 %v8083_v25, %s7098_s13  ;;  %v2766_v3 = vpop.permute.xlu0 %2765 }
 0x403   :  { %v2772_v31 = vpop.permute.xlu1 %2771  ;;  %3814 = vrot.lane.b32.xlu0 %v8063_v29, %s7098_s13 }
 0x405   :  { %3812 = vrot.lane.b32.xlu1 %v8059_v23, %s7098_s13  ;;  %v2774_v28 = vpop.permute.xlu0 %2773 }
 0x407   :  { %v2726_v35 = vpop.permute.xlu1 %2725  ;;  %3810 = vrot.lane.b32.xlu0 %v8089_v58, %s7098_s13 }
 0x409   :  { %3816 = vrot.lane.b32.xlu1 %v8087_v26, %s7098_s13  ;;  %v8195_v14 = vpop.permute.xlu0 %2727 }
 0x40b   :  { %v2734_v19 = vpop.permute.xlu1 %2733  ;;  %3818 = vrot.lane.b32.xlu0 %v8091_v47, %s7098_s13 }
 0x40d   :  { %3949 = vperm.xlu1 %7042, %v3945_v39   ;;  %v2736_v41 = vpop.permute.xlu0 %2735 }
 0x40f   :  { %v8205_v10 = vpop.permute.xlu1 %2990  ;;  %3954 = vperm.xlu0 %7041, %v3946_v32  }
 0x411   :  { %v8207_v4 = vpop.permute.xlu0 %2992 }
 0x413   :  { %v8209_v50 = vpop.permute.xlu1 %2998 }
 0x415   :  { %v8211_v30 = vpop.permute.xlu0 %3000 }
 0x417   :  { %v2768_v62 = vpop.permute.xlu1 %2767 }
 0x418   :  { %v2783_v8 = vsel %vm105_vm0, %v2764_v54, %v2768_v62  ;;  %v2781_v49 = vsel %vm105_vm0, %v2768_v62, %v2772_v31 }
 0x419   :  { %v2770_v13 = vpop.permute.xlu0 %2769  ;;  %v2788_v39 = vmul.f32 %v2783_v8, %v9528_v12 }
 0x41a   :  { %v2784_v7 = vsel %vm105_vm0, %v2766_v3, %v2770_v13  ;;  %v2782_v6 = vsel %vm105_vm0, %v2770_v13, %v2774_v28 }
 0x41b   :  { %v2792_v32 = vmul.f32 %v2784_v7, %v9528_v12  ;;  %v2776_v59 = vpop.permute.xlu1 %2775  ;;  %v2793_v37 = vmul.f32 %v2782_v6, %v7284_v21 }
 0x41c   :  { %v2779_v63 = vsel %vm105_vm0, %v2772_v31, %v2776_v59  ;;  %v2785_v11 = vsel %vm105_vm0, %v2776_v59, %v2764_v54  ;;  %v2789_v31 = vmul.f32 %v2781_v49, %v7284_v21 }
 0x41d   :  { %v2778_v48 = vpop.permute.xlu0 %2777  ;;  %v2799_v57 = vpack.c.bf16 %v2792_v32, %v2788_v39  ;;  %v2787_v7 = vmul.f32 %v2785_v11, %v7281_v20  ;;  %v2790_v12 = vmul.f32 %v2779_v63, %v7275_v18  ;;  %v7063_v11 = vld [vmem:[%s9456_s6 + $0x8] sm:$0xff]  }
 0x41e   :  { %v2780_v8 = vsel %vm105_vm0, %v2774_v28, %v2778_v48  ;;  %v2786_v13 = vsel %vm105_vm0, %v2778_v48, %v2766_v3  ;;  %v2800_v39 = vpack.c.bf16 %v2793_v37, %v2789_v31 }
 0x41f   :  { %v2791_v61 = vmul.f32 %v2786_v13, %v7281_v20  ;;  %v2794_v59 = vmul.f32 %v2780_v8, %v7275_v18  ;;  %v8236_v54 = vpop.permute.xlu1 %3131  ;;  %2810 = vmatprep.subr.bf16.mxu0 %v2799_v57 }
 0x421   :  { %v2798_v6 = vpack.c.bf16 %v2791_v61, %v2787_v7  ;;  %v8239_v62 = vpop.permute.xlu0 %3133  ;;  %v2801_v28 = vpack.c.bf16 %v2794_v59, %v2790_v12 }
 0x423   :  { %v2730_v48 = vpop.permute.xlu1 %2729  ;;  %2811 = vmatpush1.bf16.msra.mxu0 %v2798_v6  ;;  %2853 = vmatprep.subr.bf16.mxu1 %v2801_v28 }
 0x424   :  { %v2745_v63 = vsel %vm60_vm2, %v2726_v35, %v2730_v48  ;;  %2854 = vmatpush1.bf16.msra.mxu1 %v2800_v39  ;;  %v2743_v13 = vsel %vm60_vm2, %v2730_v48, %v2734_v19 }
 0x425   :  { %v2732_v3 = vpop.permute.xlu0 %2731  ;;  %v2750_v12 = vmul.f32 %v2745_v63, %v7288_v24  ;;  %v2751_v48 = vmul.f32 %v2743_v13, %v7310_v44 }
 0x426   :  { %v2746_v61 = vsel %vm60_vm2, %v8195_v14, %v2732_v3  ;;  %6585 = vmatmul.mubr.msk.bf16.vlgmr.msra.gmra.mrb[8].mxu0 %vm1558_vm11, %v7063_v11  ;;  %v2744_v37 = vsel %vm60_vm2, %v2732_v3, %v2736_v41 }
 0x427   :  { %v2754_v57 = vmul.f32 %v2746_v61, %v7288_v24  ;;  %v2738_v49 = vpop.permute.xlu1 %2737  ;;  %6586 = vmatmul.mubr.msk.bf16.vlgmr.msra.gmra.mrb[8].mxu1 %vm1558_vm11, %v7063_v11  ;;  %2936 = vmatprep.mubr.bf16.mxu0 %v9523_v55  ;;  %v2755_v31 = vmul.f32 %v2744_v37, %v7310_v44 }
 0x428   :  { %v2741_v32 = vsel %vm60_vm2, %v2734_v19, %v2738_v49  ;;  %v2747_v8 = vsel %vm60_vm2, %v2738_v49, %v2726_v35  ;;  %2979 = vmatprep.mubr.bf16.mxu1 %v9523_v55 }
 0x429   :  { %v2740_v7 = vpop.permute.xlu0 %2739  ;;  %v2760_v59 = vpack.c.bf16 %v2754_v57, %v2750_v12  ;;  %v2749_v39 = vmul.f32 %v2747_v8, %v7307_v43  ;;  %v2752_v35 = vmul.f32 %v2741_v32, %v7313_v45 }
 0x42a   :  { %v2742_v6 = vsel %vm60_vm2, %v2736_v41, %v2740_v7  ;;  %v2748_v28 = vsel %vm60_vm2, %v2740_v7, %v8195_v14  ;;  %v2761_v41 = vpack.c.bf16 %v2755_v31, %v2751_v48  ;;  %v7064_v14 = vld [vmem:[%s9456_s6] sm:$0xff]  }
 0x42b   :  { %v2753_v11 = vmul.f32 %v2748_v28, %v7307_v43  ;;  %v2756_v63 = vmul.f32 %v2742_v6, %v7313_v45  ;;  %v2995_v19 = vpop.permute.xlu1 %2994  ;;  %2904 = vmatprep.subr.bf16.mxu0 %v2760_v59 }
 0x42c   :  { %v3010_v57 = vsel %vm369_vm4, %v8205_v10, %v2995_v19  ;;  %v3008_v28 = vsel %vm369_vm4, %v2995_v19, %v8209_v50 }
 0x42d   :  { %v2759_v3 = vpack.c.bf16 %v2753_v11, %v2749_v39  ;;  %v3142_v61 = vpop.permute.xlu0 %3141  ;;  %v2762_v12 = vpack.c.bf16 %v2756_v63, %v2752_v35  ;;  %v3015_v8 = vmul.f32 %v3010_v57, %v7328_v56 }
 0x42f   :  { %v3003_v37 = vpop.permute.xlu1 %3002  ;;  %2905 = vmatpush1.bf16.msra.mxu0 %v2759_v3  ;;  %2947 = vmatprep.subr.bf16.mxu1 %v2762_v12 }
 0x430   :  { %2948 = vmatpush1.bf16.msra.mxu1 %v2761_v41  ;;  %v3006_v31 = vsel %vm369_vm4, %v8209_v50, %v3003_v37  ;;  %v3012_v6 = vsel %vm369_vm4, %v3003_v37, %v8205_v10  ;;  %v3016_v41 = vmul.f32 %v3008_v28, %v7348_v17 }
 0x431   :  { %v2997_v49 = vpop.permute.xlu0 %2996  ;;  %v3014_v10 = vmul.f32 %v3012_v6, %v7341_v5  ;;  %v3017_v3 = vmul.f32 %v3006_v31, %v7351_v22 }
 0x432   :  { %v3011_v32 = vsel %vm369_vm4, %v8207_v4, %v2997_v49  ;;  %6588 = vmatmul.mubr.msk.bf16.vlgmr.msra.gmra.mrb[8].mxu0 %vm1558_vm11, %v7064_v14  ;;  %v3009_v13 = vsel %vm369_vm4, %v2997_v49, %v8211_v30 }
 0x433   :  { %v3019_v7 = vmul.f32 %v3011_v32, %v7328_v56  ;;  %v3136_v59 = vpop.permute.xlu1 %3135  ;;  %6589 = vmatmul.mubr.msk.bf16.vlgmr.msra.gmra.mrb[8].mxu1 %vm1558_vm11, %v7064_v14  ;;  %3069 = vmatprep.mubr.bf16.mxu0 %v9523_v55  ;;  %v3020_v11 = vmul.f32 %v3009_v13, %v7348_v17 }
 0x434   :  { %3112 = vmatprep.mubr.bf16.mxu1 %v9523_v55  ;;  %v3151_v32 = vsel %vm530_vm6, %v8236_v54, %v3136_v59 }
 0x435   :  { %v3005_v39 = vpop.permute.xlu0 %3004  ;;  %v3026_v35 = vpack.c.bf16 %v3019_v7, %v3015_v8  ;;  %v3027_v57 = vpack.c.bf16 %v3020_v11, %v3016_v41  ;;  %v3156_v7 = vmul.f32 %v3151_v32, %v7370_v36 }
 0x436   :  { %v3007_v63 = vsel %vm369_vm4, %v8211_v30, %v3005_v39  ;;  %v3013_v48 = vsel %vm369_vm4, %v3005_v39, %v8207_v4  ;;  %v7065_v4 = vld [vmem:[%s9456_s6 + $0x10] sm:$0xff]  }
 0x437   :  { %v3018_v12 = vmul.f32 %v3013_v48, %v7341_v5  ;;  %v3021_v50 = vmul.f32 %v3007_v63, %v7351_v22  ;;  %v3140_v19 = vpop.permute.xlu1 %3139  ;;  %3037 = vmatprep.subr.bf16.mxu0 %v3026_v35 }
 0x438   :  { %v3149_v11 = vsel %vm530_vm6, %v3136_v59, %v3140_v19 }
 0x439   :  { %v3025_v14 = vpack.c.bf16 %v3018_v12, %v3014_v10  ;;  %v8313_v37 = vpop.permute.xlu0 %3383  ;;  %v3028_v30 = vpack.c.bf16 %v3021_v50, %v3017_v3 }
 0x43b   :  { %v3144_v49 = vpop.permute.xlu1 %3143  ;;  %3038 = vmatpush1.bf16.msra.mxu0 %v3025_v14  ;;  %3080 = vmatprep.subr.bf16.mxu1 %v3028_v30 }
 0x43c   :  { %3081 = vmatpush1.bf16.msra.mxu1 %v3027_v57  ;;  %v3147_v39 = vsel %vm530_vm6, %v3140_v19, %v3144_v49  ;;  %v3153_v35 = vsel %vm530_vm6, %v3144_v49, %v8236_v54  ;;  %v3157_v19 = vmul.f32 %v3149_v11, %v7385_v52  ;;  %v3276_v49 = vpack.c.bf16 %v8089_v58, %v8083_v25 }
 0x43d   :  { %v3138_v8 = vpop.permute.xlu0 %3137  ;;  %v3155_v50 = vmul.f32 %v3153_v35, %v7382_v51  ;;  %v3158_v54 = vmul.f32 %v3147_v39, %v7388_v53  ;;  %v3277_v25 = vpack.c.bf16 %v8063_v29, %v8059_v23 }
 0x43e   :  { %v3152_v13 = vsel %vm530_vm6, %v8239_v62, %v3138_v8  ;;  %6593 = vmatmul.mubr.msk.bf16.vlgmr.msra.gmra.mrb[8].mxu0 %vm1558_vm11, %v7065_v4  ;;  %v3150_v31 = vsel %vm530_vm6, %v3138_v8, %v3142_v61  ;;  %v3278_v8 = vpack.c.bf16 %v8091_v47, %v8087_v26 }
 0x43f   :  { %v3160_v6 = vmul.f32 %v3152_v13, %v7370_v36  ;;  %v3382_v28 = vpop.permute.xlu1 %3381  ;;  %6594 = vmatmul.mubr.msk.bf16.vlgmr.msra.gmra.mrb[8].mxu1 %vm1558_vm11, %v7065_v4  ;;  %3210 = vmatprep.mubr.bf16.mxu0 %v9523_v55  ;;  %v3161_v10 = vmul.f32 %v3150_v31, %v7385_v52 }
 0x440   :  { %3253 = vmatprep.mubr.bf16.mxu1 %v9523_v55 }
 0x441   :  { %v3146_v63 = vpop.permute.xlu0 %3145  ;;  %v3167_v48 = vpack.c.bf16 %v3160_v6, %v3156_v7  ;;  %v3275_v7 = vpack.c.bf16 %v8055_v27, %v8053_v40  ;;  %v7067_v40 = vld [vmem:[%s9456_s6 + $0x20] sm:$0xff]  }
 0x442   :  { %v3148_v3 = vsel %vm530_vm6, %v3142_v61, %v3146_v63  ;;  %v3154_v12 = vsel %vm530_vm6, %v3146_v63, %v8239_v62  ;;  %v3168_v61 = vpack.c.bf16 %v3161_v10, %v3157_v19  ;;  %v7066_v62 = vld [vmem:[%s9456_s6 + $0x18] sm:$0xff]  }
 0x443   :  { %v3159_v41 = vmul.f32 %v3154_v12, %v7382_v51  ;;  %v3162_v14 = vmul.f32 %v3148_v3, %v7388_v53  ;;  %v3386_v59 = vpop.permute.xlu1 %3385  ;;  %3178 = vmatprep.subr.bf16.mxu0 %v3167_v48 }
 0x444   :  { %v3401_v27 = vsel %vm812_vm7, %v3382_v28, %v3386_v59 }
 0x445   :  { %v3166_v30 = vpack.c.bf16 %v3159_v41, %v3155_v50  ;;  %v3392_v57 = vpop.permute.xlu0 %3391  ;;  %v3169_v4 = vpack.c.bf16 %v3162_v14, %v3158_v54  ;;  %v3405_v39 = vmul.f32 %v3401_v27, %v7452_v60 }
 0x447   :  { %v3390_v32 = vpop.permute.xlu1 %3389  ;;  %3179 = vmatpush1.bf16.msra.mxu0 %v3166_v30  ;;  %3221 = vmatprep.subr.bf16.mxu1 %v3169_v4 }
 0x448   :  { %3222 = vmatpush1.bf16.msra.mxu1 %v3168_v61  ;;  %3287 = vmatprep.subr.bf16.mxu0 %v3276_v49  ;;  %v3399_v29 = vsel %vm812_vm7, %v3386_v59, %v3390_v32 }
 0x449   :  { %3330 = vmatprep.subr.bf16.mxu1 %v3278_v8  ;;  %v8357_v13 = vpop.permute.xlu0 %3524  ;;  %v3406_v63 = vmul.f32 %v3399_v29, %v7423_v38 }
 0x44a   :  { %6598 = vmatmul.mubr.msk.bf16.vlgmr.msra.gmra.mrb[8].mxu0 %vm1558_vm11, %v7066_v62 }
 0x44b   :  { %v3394_v58 = vpop.permute.xlu1 %3393  ;;  %6599 = vmatmul.mubr.msk.bf16.vlgmr.msra.gmra.mrb[8].mxu1 %vm1558_vm11, %v7066_v62  ;;  %3288 = vmatpush1.bf16.msra.mxu0 %v3275_v7 }
 0x44c   :  { %3331 = vmatpush1.bf16.msra.mxu1 %v3277_v25  ;;  %3319 = vmatprep.mubr.bf16.mxu0 %v9523_v55  ;;  %v3397_v12 = vsel %vm812_vm7, %v3390_v32, %v3394_v58  ;;  %v3403_v50 = vsel %vm812_vm7, %v3394_v58, %v3382_v28 }
 0x44d   :  { %v3533_v26 = vpop.permute.xlu0 %3532  ;;  %3362 = vmatprep.mubr.bf16.mxu1 %v9523_v55  ;;  %v3407_v30 = vmul.f32 %v3397_v12, %v7455_v1  ;;  %v3408_v4 = vmul.f32 %v3403_v50, %v7426_v2 }
 0x44f   :  { %v3523_v47 = vpop.permute.xlu1 %3522 }
 0x451   :  { %v8367_v31 = vpop.permute.xlu0 %3665 }
 0x453   :  { %v3527_v23 = vpop.permute.xlu1 %3526 }
 0x455   :  { %v3388_v6 = vpop.permute.xlu0 %3387 }
 0x456   :  { %v3400_v35 = vsel %vm812_vm7, %v3388_v6, %v3392_v57  ;;  %v3402_v11 = vsel %vm812_vm7, %v8313_v37, %v3388_v6  ;;  %6603 = vmatmul.mubr.msk.bf16.vlgmr.msra.gmra.mrb[8].mxu0 %vm1558_vm11, %v7067_v40 }
 0x457   :  { %v3409_v48 = vmul.f32 %v3402_v11, %v7452_v60  ;;  %v3410_v10 = vmul.f32 %v3400_v35, %v7423_v38  ;;  %v3531_v3 = vpop.permute.xlu1 %3530  ;;  %6604 = vmatmul.mubr.msk.bf16.vlgmr.msra.gmra.mrb[8].mxu1 %vm1558_vm11, %v7067_v40  ;;  %3460 = vmatprep.mubr.bf16.mxu0 %v9523_v55 }
 0x458   :  { %3503 = vmatprep.mubr.bf16.mxu1 %v9523_v55  ;;  %v3540_v25 = vsel %vm973_vm8, %v3527_v23, %v3531_v3 }
 0x459   :  { %v3416_v54 = vpack.c.bf16 %v3409_v48, %v3405_v39  ;;  %v3396_v41 = vpop.permute.xlu0 %3395  ;;  %v3417_v14 = vpack.c.bf16 %v3410_v10, %v3406_v63  ;;  %v3547_v6 = vmul.f32 %v3540_v25, %v7466_v15 }
 0x45a   :  { %v3398_v59 = vsel %vm812_vm7, %v3392_v57, %v3396_v41  ;;  %v3404_v19 = vsel %vm812_vm7, %v3396_v41, %v8313_v37  ;;  %v7068_v57 = vld [vmem:[%s9456_s6 + $0x28] sm:$0xff]   ;;  %v3542_v37 = vsel %vm973_vm8, %v3523_v47, %v3527_v23 }
 0x45b   :  { %v3411_v61 = vmul.f32 %v3398_v59, %v7455_v1  ;;  %v3412_v28 = vmul.f32 %v3404_v19, %v7426_v2  ;;  %v3535_v49 = vpop.permute.xlu1 %3534  ;;  %3428 = vmatprep.subr.bf16.mxu0 %v3417_v14  ;;  %v3546_v40 = vmul.f32 %v3542_v37, %v7493_v42 }
 0x45c   :  { %3429 = vmatpush1.bf16.msra.mxu0 %v3416_v54  ;;  %v3538_v11 = vsel %vm973_vm8, %v3531_v3, %v3535_v49  ;;  %v3544_v63 = vsel %vm973_vm8, %v3535_v49, %v3523_v47 }
 0x45d   :  { %v3418_v62 = vpack.c.bf16 %v3411_v61, %v3407_v30  ;;  %v3674_v32 = vpop.permute.xlu0 %3673  ;;  %v3419_v8 = vpack.c.bf16 %v3412_v28, %v3408_v4  ;;  %v3548_v41 = vmul.f32 %v3538_v11, %v7496_v46  ;;  %v3549_v14 = vmul.f32 %v3544_v63, %v7469_v16 }
 0x45f   :  { %v3664_v7 = vpop.permute.xlu1 %3663  ;;  %3471 = vmatprep.subr.bf16.mxu1 %v3419_v8 }
 0x460   :  { %3472 = vmatpush1.bf16.msra.mxu1 %v3418_v62 }
 0x461   :  { %v3529_v58 = vpop.permute.xlu0 %3528 }
 0x462   :  { %v3541_v27 = vsel %vm973_vm8, %v3529_v58, %v3533_v26  ;;  %v3543_v29 = vsel %vm973_vm8, %v8357_v13, %v3529_v58  ;;  %6608 = vmatmul.mubr.msk.bf16.vlgmr.msra.gmra.mrb[8].mxu0 %vm1558_vm11, %v7068_v57 }
 0x463   :  { %v3550_v39 = vmul.f32 %v3543_v29, %v7493_v42  ;;  %v3551_v35 = vmul.f32 %v3541_v27, %v7466_v15  ;;  %v3668_v23 = vpop.permute.xlu1 %3667  ;;  %6609 = vmatmul.mubr.msk.bf16.vlgmr.msra.gmra.mrb[8].mxu1 %vm1558_vm11, %v7068_v57  ;;  %3601 = vmatprep.mubr.bf16.mxu0 %v9523_v55 }
 0x464   :  { %3644 = vmatprep.mubr.bf16.mxu1 %v9523_v55 }
 0x465   :  { %v3557_v48 = vpack.c.bf16 %v3550_v39, %v3546_v40  ;;  %v3537_v10 = vpop.permute.xlu0 %3536  ;;  %v3558_v12 = vpack.c.bf16 %v3551_v35, %v3547_v6 }
 0x466   :  { %v3539_v50 = vsel %vm973_vm8, %v3533_v26, %v3537_v10  ;;  %v3545_v54 = vsel %vm973_vm8, %v3537_v10, %v8357_v13  ;;  %v7069_v26 = vld [vmem:[%s9456_s6 + $0x30] sm:$0xff]   ;;  %v3683_v13 = vsel %vm1134_vm9, %v3664_v7, %v3668_v23 }
 0x467   :  { %v3552_v3 = vmul.f32 %v3539_v50, %v7496_v46  ;;  %v3553_v47 = vmul.f32 %v3545_v54, %v7469_v16  ;;  %v3672_v59 = vpop.permute.xlu1 %3671  ;;  %3569 = vmatprep.subr.bf16.mxu0 %v3558_v12  ;;  %v3687_v62 = vmul.f32 %v3683_v13, %v7532_v33 }
 0x468   :  { %3570 = vmatpush1.bf16.msra.mxu0 %v3557_v48  ;;  %v3681_v28 = vsel %vm1134_vm9, %v3668_v23, %v3672_v59  ;;  %v9529_v48 = vld [vmem:[#allocation3_spill] sm:$0xff] }
 0x469   :  { %v3559_v19 = vpack.c.bf16 %v3552_v3, %v3548_v41  ;;  %v3807_v30 = vpop.permute.xlu0 %3806  ;;  %v3560_v4 = vpack.c.bf16 %v3553_v47, %v3549_v14  ;;  %v3688_v37 = vmul.f32 %v3681_v28, %v7505_v0 }
 0x46b   :  { %v3676_v61 = vpop.permute.xlu1 %3675  ;;  %3612 = vmatprep.subr.bf16.mxu1 %v3560_v4 }
 0x46c   :  { %3613 = vmatpush1.bf16.msra.mxu1 %v3559_v19  ;;  %v3679_v27 = vsel %vm1134_vm9, %v3672_v59, %v3676_v61  ;;  %v3685_v29 = vsel %vm1134_vm9, %v3676_v61, %v3664_v7  ;;  %v9530_v19 = vld [vmem:[#allocation6_spill] sm:$0xff]  ;;  %v9531_v61 = vld [vmem:[#allocation4_spill] sm:$0xff] }
 0x46d   :  { %v3670_v49 = vpop.permute.xlu0 %3669  ;;  %v3689_v63 = vmul.f32 %v3679_v27, %v7535_v34  ;;  %v3690_v10 = vmul.f32 %v3685_v29, %v9529_v48 }
 0x46e   :  { %v3682_v8 = vsel %vm1134_vm9, %v3670_v49, %v3674_v32  ;;  %v3684_v57 = vsel %vm1134_vm9, %v8367_v31, %v3670_v49  ;;  %6613 = vmatmul.mubr.msk.bf16.vlgmr.msra.gmra.mrb[8].mxu0 %vm1558_vm11, %v7069_v26 }
 0x46f   :  { %v3691_v25 = vmul.f32 %v3684_v57, %v7532_v33  ;;  %v3692_v58 = vmul.f32 %v3682_v8, %v7505_v0  ;;  %v3805_v40 = vpop.permute.xlu1 %3804  ;;  %6614 = vmatmul.mubr.msk.bf16.vlgmr.msra.gmra.mrb[8].mxu1 %vm1558_vm11, %v7069_v26  ;;  %3742 = vmatprep.mubr.bf16.mxu0 %v9523_v55 }
 0x470   :  { %3785 = vmatprep.mubr.bf16.mxu1 %v9523_v55 }
 0x471   :  { %v3698_v6 = vpack.c.bf16 %v3691_v25, %v3687_v62  ;;  %v3678_v39 = vpop.permute.xlu0 %3677  ;;  %v3699_v35 = vpack.c.bf16 %v3692_v58, %v3688_v37 }
 0x472   :  { %v3680_v23 = vsel %vm1134_vm9, %v3674_v32, %v3678_v39  ;;  %v3686_v11 = vsel %vm1134_vm9, %v3678_v39, %v8367_v31  ;;  %v7070_v32 = vld [vmem:[%s9456_s6 + $0x38] sm:$0xff]   ;;  %v9532_v39 = vld [vmem:[#allocation7_spill] sm:$0xff] }
 0x473   :  { %v3693_v12 = vmul.f32 %v3680_v23, %v7535_v34  ;;  %v3694_v7 = vmul.f32 %v3686_v11, %v9529_v48  ;;  %v3809_v50 = vpop.permute.xlu1 %3808  ;;  %3710 = vmatprep.subr.bf16.mxu0 %v3699_v35  ;;  %v9533_v23 = vld [vmem:[#allocation5_spill] sm:$0xff] }
 0x474   :  { %3711 = vmatpush1.bf16.msra.mxu0 %v3698_v6  ;;  %v3824_v31 = vsel %vm1295_vm10, %v3805_v40, %v3809_v50 }
 0x475   :  { %v3700_v54 = vpack.c.bf16 %v3693_v12, %v3689_v63  ;;  %v3815_v41 = vpop.permute.xlu0 %3814  ;;  %v3701_v14 = vpack.c.bf16 %v3694_v7, %v3690_v10  ;;  %v3828_v4 = vmul.f32 %v3824_v31, %v9530_v19  ;;  %v7071_v7 = vld [vmem:[%s9456_s6 + $0x40] sm:$0xff]  }
 0x477   :  { %v3813_v3 = vpop.permute.xlu1 %3812  ;;  %3753 = vmatprep.subr.bf16.mxu1 %v3701_v14 }
 0x478   :  { %v3822_v47 = vsel %vm1295_vm10, %v3809_v50, %v3813_v3  ;;  %3754 = vmatpush1.bf16.msra.mxu1 %v3700_v54 }
 0x479   :  { %v3811_v59 = vpop.permute.xlu0 %3810  ;;  %v3829_v28 = vmul.f32 %v3822_v47, %v9531_v61 }
 0x47a   :  { %v3823_v26 = vsel %vm1295_vm10, %v3811_v59, %v3815_v41  ;;  %v3825_v13 = vsel %vm1295_vm10, %v3807_v30, %v3811_v59  ;;  %6618 = vmatmul.mubr.msk.bf16.vlgmr.msra.gmra.mrb[8].mxu0 %vm1558_vm11, %v7070_v32  ;;  %v9534_v59 = vld [vmem:[#allocation8_spill] sm:$0xff] }
 0x47b   :  { %v3832_v49 = vmul.f32 %v3825_v13, %v9530_v19  ;;  %v3833_v62 = vmul.f32 %v3823_v26, %v9531_v61  ;;  %v3817_v8 = vpop.permute.xlu1 %3816  ;;  %6619 = vmatmul.mubr.msk.bf16.vlgmr.msra.gmra.mrb[8].mxu1 %vm1558_vm11, %v7070_v32  ;;  %3883 = vmatprep.mubr.bf16.mxu0 %v9523_v55 }
 0x47c   :  { %v3820_v57 = vsel %vm1295_vm10, %v3813_v3, %v3817_v8  ;;  %v3826_v37 = vsel %vm1295_vm10, %v3817_v8, %v3805_v40  ;;  %3926 = vmatprep.mubr.bf16.mxu1 %v9523_v55 }
 0x47d   :  { %v3839_v25 = vpack.c.bf16 %v3832_v49, %v3828_v4  ;;  %v3819_v58 = vpop.permute.xlu0 %3818  ;;  %v3840_v27 = vpack.c.bf16 %v3833_v62, %v3829_v28  ;;  %v3830_v35 = vmul.f32 %v3820_v57, %v9532_v39  ;;  %v3831_v11 = vmul.f32 %v3826_v37, %v9533_v23  ;;  %v9536_v57 = vld [vmem:[#allocation10_spill] sm:$0xff] }
 0x47e   :  { %v3821_v29 = vsel %vm1295_vm10, %v3815_v41, %v3819_v58  ;;  %v3827_v6 = vsel %vm1295_vm10, %v3819_v58, %v3807_v30 }
 0x47f   :  { %v3834_v63 = vmul.f32 %v3821_v29, %v9532_v39  ;;  %v3835_v10 = vmul.f32 %v3827_v6, %v9533_v23  ;;  %3851 = vmatprep.subr.bf16.mxu0 %v3840_v27  ;;  %v9539_v29 = vld [vmem:[#allocation11_spill] sm:$0xff] }
 0x480   :  { %3852 = vmatpush1.bf16.msra.mxu0 %v3839_v25  ;;  %v9537_v25 = vld [vmem:[#allocation9_spill] sm:$0xff] }
 0x481   :  { %v3841_v40 = vpack.c.bf16 %v3834_v63, %v3830_v35  ;;  %v3842_v12 = vpack.c.bf16 %v3835_v10, %v3831_v11 }
 0x483   :  { %3894 = vmatprep.subr.bf16.mxu1 %v3842_v12 }
 0x484   :  { %3895 = vmatpush1.bf16.msra.mxu1 %v3841_v40 }
 0x486   :  { %6623 = vmatmul.mubr.msk.bf16.vlgmr.msra.gmra.mrb[8].mxu0 %vm1558_vm11, %v7071_v7 }
 0x487   :  { %6624 = vmatmul.mubr.msk.bf16.vlgmr.msra.gmra.mrb[8].mxu1 %vm1558_vm11, %v7071_v7  ;;  %4098 = vmatprep.mubr.bf16.mxu0 %v9523_v55  ;;  %v9542_v7 = vld [vmem:[#allocation12_spill] sm:$0xff] }
 0x488   :  { %4141 = vmatprep.mubr.bf16.mxu1 %v9523_v55 }
 0x48c   :  { %v3950_v30 = vpop.permute.xlu1 %3949 }
 0x48e   :  { %v3955_v50 = vpop.permute.xlu0 %3954 }
 0x559   :  { %v3885_v54 = vpop.f32.mrb[8].mxu0 }
 0x55a   :  { %v3957_v41 = vadd.f32 %v3950_v30, %v3885_v54  ;;  %v3887_v14 = vpop.f32.mrb[9].mxu0  ;;  %v3928_v32 = vpop.f32.mrb[8].mxu1 }
 0x55b   :  { %v3959_v31 = vadd.f32 %v3950_v30, %v3928_v32  ;;  %v3889_v3 = vpop.f32.mrb[10].mxu0  ;;  %v3930_v47 = vpop.f32.mrb[9].mxu1  ;;  %v3958_v63 = vadd.f32 %v3950_v30, %v3887_v14 }
 0x55c   :  { %v3965_v4 = vadd.f32 %v3957_v41, %v9534_v59  ;;  %v3961_v26 = vadd.f32 %v3955_v50, %v3889_v3  ;;  %v3891_v13 = vpop.f32.mrb[11].mxu0  ;;  %v3932_v28 = vpop.f32.mrb[10].mxu1  ;;  %v3960_v10 = vadd.f32 %v3950_v30, %v3930_v47  ;;  %v9543_v41 = vld [vmem:[#allocation14_spill] sm:$0xff]  ;;  %v9545_v59 = vld [vmem:[#allocation15_spill] sm:$0xff] }
 0x55d   :  { %v3963_v49 = vadd.f32 %v3955_v50, %v3932_v28  ;;  %v3934_v62 = vpop.f32.mrb[11].mxu1  ;;  %v3967_v37 = vadd.f32 %v3959_v31, %v9536_v57  ;;  %v3962_v40 = vadd.f32 %v3955_v50, %v3891_v13  ;;  %v3966_v54 = vadd.f32 %v3958_v63, %v9542_v7  ;;  %v9544_v31 = vld [vmem:[#allocation13_spill] sm:$0xff] }
 0x55e   :  { %v8507_v8 = vmax.f32 %v3965_v4, 0.0  ;;  %v3969_v58 = vadd.f32 %v3961_v26, %v9537_v25  ;;  %v3964_v12 = vadd.f32 %v3955_v50, %v3934_v62  ;;  %v3968_v32 = vadd.f32 %v3960_v10, %v9543_v41 }
 0x55f   :  { %v3971_v6 = vadd.f32 %v3963_v49, %v9539_v29  ;;  %v8516_v35 = vmax.f32 %v3967_v37, 0.0  ;;  %v3970_v3 = vadd.f32 %v3962_v40, %v9544_v31  ;;  %v8544_v30 = vmax.f32 %v3966_v54, 0.0  ;;  %v5201_v37 = vld [vmem:[%s9459_s9] sm:$0xff] }
 0x560   :  { %9535 = vst [vmem:[#allocation8_spill] sm:$0xff] %v8507_v8  ;;  %v8511_v27 = vmax.f32 %v3969_v58, 0.0  ;;  %4019 = vrot.lane.b32.xlu1 %v8507_v8, %s7090_s25  ;;  %v3972_v14 = vadd.f32 %v3964_v12, %v9545_v59  ;;  %v8548_v50 = vmax.f32 %v3968_v32, 0.0  ;;  %v5202_v58 = vld [vmem:[%s9459_s9 + $0x8] sm:$0xff]  ;;  %v9550_v32 = vld [vmem:[#allocation2_spill] sm:$0xff] }
 0x561   :  { %9540 = vst [vmem:[#allocation9_spill] sm:$0xff] %v8516_v35  ;;  %v8520_v11 = vmax.f32 %v3971_v6, 0.0  ;;  %9546 = vst [vmem:[#allocation12_spill] sm:$0xff] %v8544_v30  ;;  %v8550_v47 = vmax.f32 %v3970_v3, 0.0 }
 0x562   :  { %9538 = vst [vmem:[#allocation10_spill] sm:$0xff] %v8511_v27  ;;  %4021 = vrot.lane.b32.xlu0 %v8511_v27, %s7090_s25  ;;  %9547 = vst [vmem:[#allocation14_spill] sm:$0xff] %v8548_v50  ;;  %v8552_v4 = vmax.f32 %v3972_v14, 0.0 }
 0x563   :  { %9541 = vst [vmem:[#allocation11_spill] sm:$0xff] %v8520_v11  ;;  %9548 = vst [vmem:[#allocation13_spill] sm:$0xff] %v8550_v47 }
 0x564   :  { %4027 = vrot.lane.b32.xlu1 %v8516_v35, %s7090_s25  ;;  %9549 = vst [vmem:[#allocation15_spill] sm:$0xff] %v8552_v4 }
 0x566   :  { %4029 = vrot.lane.b32.xlu0 %v8520_v11, %s7090_s25 }
 0x568   :  { %3981 = vrot.lane.b32.xlu1 %v8507_v8, %s7091_s0 }
 0x56a   :  { %3983 = vrot.lane.b32.xlu0 %v8511_v27, %s7091_s0 }
 0x56c   :  { %3989 = vrot.lane.b32.xlu1 %v8516_v35, %s7091_s0 }
 0x56e   :  { %3991 = vrot.lane.b32.xlu0 %v8520_v11, %s7091_s0 }
 0x570   :  { %4246 = vrot.lane.b32.xlu1 %v8507_v8, %s7093_s26 }
 0x572   :  { %4248 = vrot.lane.b32.xlu0 %v8511_v27, %s7093_s26 }
 0x574   :  { %4254 = vrot.lane.b32.xlu1 %v8516_v35, %s7093_s26 }
 0x576   :  { %4256 = vrot.lane.b32.xlu0 %v8520_v11, %s7093_s26 }
 0x578   :  { %4023 = vrot.lane.b32.xlu1 %v8544_v30, %s7090_s25 }
 0x57a   :  { %4025 = vrot.lane.b32.xlu0 %v8550_v47, %s7090_s25 }
 0x57c   :  { %4031 = vrot.lane.b32.xlu1 %v8548_v50, %s7090_s25 }
 0x57e   :  { %4033 = vrot.lane.b32.xlu0 %v8552_v4, %s7090_s25 }
 0x580   :  { %4387 = vrot.lane.b32.xlu1 %v8507_v8, %s7094_s27 }
 0x582   :  { %4389 = vrot.lane.b32.xlu0 %v8511_v27, %s7094_s27 }
 0x584   :  { %3985 = vrot.lane.b32.xlu1 %v8544_v30, %s7091_s0 }
 0x586   :  { %3987 = vrot.lane.b32.xlu0 %v8550_v47, %s7091_s0 }
 0x588   :  { %3993 = vrot.lane.b32.xlu1 %v8548_v50, %s7091_s0 }
 0x58a   :  { %3995 = vrot.lane.b32.xlu0 %v8552_v4, %s7091_s0 }
 0x58c   :  { %4250 = vrot.lane.b32.xlu1 %v8544_v30, %s7093_s26 }
 0x58e   :  { %4397 = vrot.lane.b32.xlu0 %v8520_v11, %s7094_s27 }
 0x590   :  { %4258 = vrot.lane.b32.xlu1 %v8548_v50, %s7093_s26 }
 0x592   :  { %4252 = vrot.lane.b32.xlu0 %v8550_v47, %s7093_s26 }
 0x594   :  { %4391 = vrot.lane.b32.xlu1 %v8544_v30, %s7094_s27 }
 0x596   :  { %4260 = vrot.lane.b32.xlu0 %v8552_v4, %s7093_s26 }
 0x598   :  { %4395 = vrot.lane.b32.xlu1 %v8516_v35, %s7094_s27 }
 0x59a   :  { %4639 = vrot.lane.b32.xlu0 %v8511_v27, %s7095_s28 }
 0x59c   :  { %4399 = vrot.lane.b32.xlu1 %v8548_v50, %s7094_s27 }
 0x59e   :  { %4393 = vrot.lane.b32.xlu0 %v8550_v47, %s7094_s27 }
 0x5a0   :  { %4637 = vrot.lane.b32.xlu1 %v8507_v8, %s7095_s28 }
 0x5a2   :  { %4401 = vrot.lane.b32.xlu0 %v8552_v4, %s7094_s27 }
 0x5a4   :  { %4641 = vrot.lane.b32.xlu1 %v8544_v30, %s7095_s28 }
 0x5a6   :  { %4647 = vrot.lane.b32.xlu0 %v8520_v11, %s7095_s28 }
 0x5a8   :  { %4645 = vrot.lane.b32.xlu1 %v8516_v35, %s7095_s28 }
 0x5aa   :  { %4780 = vrot.lane.b32.xlu0 %v8511_v27, %s7096_s29 }
 0x5ac   :  { %4649 = vrot.lane.b32.xlu1 %v8548_v50, %s7095_s28 }
 0x5ae   :  { %4788 = vrot.lane.b32.xlu0 %v8520_v11, %s7096_s29 }
 0x5b0   :  { %4778 = vrot.lane.b32.xlu1 %v8507_v8, %s7096_s29 }
 0x5b2   :  { %4921 = vrot.lane.b32.xlu0 %v8511_v27, %s7097_s30 }
 0x5b4   :  { %4782 = vrot.lane.b32.xlu1 %v8544_v30, %s7096_s29 }
 0x5b6   :  { %4643 = vrot.lane.b32.xlu0 %v8550_v47, %s7095_s28 }
 0x5b8   :  { %4786 = vrot.lane.b32.xlu1 %v8516_v35, %s7096_s29 }
 0x5ba   :  { %4651 = vrot.lane.b32.xlu0 %v8552_v4, %s7095_s28 }
 0x5bc   :  { %4790 = vrot.lane.b32.xlu1 %v8548_v50, %s7096_s29 }
 0x5be   :  { %4929 = vrot.lane.b32.xlu0 %v8520_v11, %s7097_s30 }
 0x5c0   :  { %4919 = vrot.lane.b32.xlu1 %v8507_v8, %s7097_s30 }
 0x5c2   :  { %4784 = vrot.lane.b32.xlu0 %v8550_v47, %s7096_s29 }
 0x5c4   :  { %4923 = vrot.lane.b32.xlu1 %v8544_v30, %s7097_s30 }
 0x5c6   :  { %4792 = vrot.lane.b32.xlu0 %v8552_v4, %s7096_s29 }
 0x5c8   :  { %4927 = vrot.lane.b32.xlu1 %v8516_v35, %s7097_s30 }
 0x5ca   :  { %5062 = vrot.lane.b32.xlu0 %v8511_v27, %s7098_s13 }
 0x5cc   :  { %4931 = vrot.lane.b32.xlu1 %v8548_v50, %s7097_s30 }
 0x5ce   :  { %4925 = vrot.lane.b32.xlu0 %v8550_v47, %s7097_s30 }
 0x5d0   :  { %5060 = vrot.lane.b32.xlu1 %v8507_v8, %s7098_s13 }
 0x5d2   :  { %v4020_v26 = vpop.permute.xlu1 %4019  ;;  %4933 = vrot.lane.b32.xlu0 %v8552_v4, %s7097_s30 }
 0x5d4   :  { %5064 = vrot.lane.b32.xlu1 %v8544_v30, %s7098_s13  ;;  %v4022_v13 = vpop.permute.xlu0 %4021 }
 0x5d6   :  { %v4028_v28 = vpop.permute.xlu1 %4027  ;;  %5070 = vrot.lane.b32.xlu0 %v8520_v11, %s7098_s13 }
 0x5d8   :  { %5068 = vrot.lane.b32.xlu1 %v8516_v35, %s7098_s13  ;;  %v4030_v49 = vpop.permute.xlu0 %4029 }
 0x5da   :  { %v3982_v62 = vpop.permute.xlu1 %3981  ;;  %5066 = vrot.lane.b32.xlu0 %v8550_v47, %s7098_s13 }
 0x5dc   :  { %5072 = vrot.lane.b32.xlu1 %v8548_v50, %s7098_s13  ;;  %v8656_v57 = vpop.permute.xlu0 %3983 }
 0x5de   :  { %v3990_v25 = vpop.permute.xlu1 %3989  ;;  %5074 = vrot.lane.b32.xlu0 %v8552_v4, %s7098_s13 }
 0x5e0   :  { %5205 = vperm.xlu1 %7042, %v5201_v37   ;;  %v3992_v29 = vpop.permute.xlu0 %3991 }
 0x5e2   :  { %v8666_v6 = vpop.permute.xlu1 %4246  ;;  %5210 = vperm.xlu0 %7041, %v5202_v58  }
 0x5e4   :  { %v8668_v63 = vpop.permute.xlu0 %4248 }
 0x5e6   :  { %v8670_v10 = vpop.permute.xlu1 %4254 }
 0x5e8   :  { %v8672_v40 = vpop.permute.xlu0 %4256 }
 0x5ea   :  { %v4024_v12 = vpop.permute.xlu1 %4023 }
 0x5eb   :  { %v4039_v7 = vsel %vm105_vm0, %v4020_v26, %v4024_v12  ;;  %v4037_v23 = vsel %vm105_vm0, %v4024_v12, %v4028_v28 }
 0x5ec   :  { %v4026_v54 = vpop.permute.xlu0 %4025  ;;  %v4044_v31 = vmul.f32 %v4039_v7, %v9550_v32 }
 0x5ed   :  { %v4040_v41 = vsel %vm105_vm0, %v4022_v13, %v4026_v54  ;;  %v4038_v3 = vsel %vm105_vm0, %v4026_v54, %v4030_v49 }
 0x5ee   :  { %v4048_v59 = vmul.f32 %v4040_v41, %v9550_v32  ;;  %v4032_v14 = vpop.permute.xlu1 %4031  ;;  %v4049_v19 = vmul.f32 %v4038_v3, %v7284_v21 }
 0x5ef   :  { %v4035_v37 = vsel %vm105_vm0, %v4028_v28, %v4032_v14  ;;  %v4041_v58 = vsel %vm105_vm0, %v4032_v14, %v4020_v26  ;;  %v4045_v28 = vmul.f32 %v4037_v23, %v7284_v21 }
 0x5f0   :  { %v4034_v39 = vpop.permute.xlu0 %4033  ;;  %v4055_v61 = vpack.c.bf16 %v4048_v59, %v4044_v31  ;;  %v4043_v41 = vmul.f32 %v4041_v58, %v7281_v20  ;;  %v4046_v32 = vmul.f32 %v4035_v37, %v7275_v18 }
 0x5f1   :  { %v4036_v7 = vsel %vm105_vm0, %v4030_v49, %v4034_v39  ;;  %v4042_v54 = vsel %vm105_vm0, %v4034_v39, %v4022_v13  ;;  %v4056_v3 = vpack.c.bf16 %v4049_v19, %v4045_v28  ;;  %v7072_v39 = vld [vmem:[%s9458_s8 + $0x8] sm:$0xff]  }
 0x5f2   :  { %v4047_v48 = vmul.f32 %v4042_v54, %v7281_v20  ;;  %v4050_v26 = vmul.f32 %v4036_v7, %v7275_v18  ;;  %v8697_v14 = vpop.permute.xlu1 %4387  ;;  %4066 = vmatprep.subr.bf16.mxu0 %v4055_v61 }
 0x5f4   :  { %v4054_v12 = vpack.c.bf16 %v4047_v48, %v4043_v41  ;;  %v8700_v31 = vpop.permute.xlu0 %4389  ;;  %v4057_v49 = vpack.c.bf16 %v4050_v26, %v4046_v32 }
 0x5f6   :  { %v3986_v13 = vpop.permute.xlu1 %3985  ;;  %4067 = vmatpush1.bf16.msra.mxu0 %v4054_v12  ;;  %4109 = vmatprep.subr.bf16.mxu1 %v4057_v49 }
 0x5f7   :  { %v4001_v59 = vsel %vm60_vm2, %v3982_v62, %v3986_v13  ;;  %4110 = vmatpush1.bf16.msra.mxu1 %v4056_v3  ;;  %v3999_v54 = vsel %vm60_vm2, %v3986_v13, %v3990_v25 }
 0x5f8   :  { %v3988_v37 = vpop.permute.xlu0 %3987  ;;  %v4006_v19 = vmul.f32 %v4001_v59, %v7288_v24  ;;  %v4007_v13 = vmul.f32 %v3999_v54, %v7310_v44 }
 0x5f9   :  { %v4002_v48 = vsel %vm60_vm2, %v8656_v57, %v3988_v37  ;;  %6628 = vmatmul.mubr.msk.bf16.vlgmr.msra.gmra.mrb[12].mxu0 %vm1558_vm11, %v7072_v39  ;;  %v4000_v61 = vsel %vm60_vm2, %v3988_v37, %v3992_v29 }
 0x5fa   :  { %v4010_v23 = vmul.f32 %v4002_v48, %v7288_v24  ;;  %v3994_v32 = vpop.permute.xlu1 %3993  ;;  %6629 = vmatmul.mubr.msk.bf16.vlgmr.msra.gmra.mrb[12].mxu1 %vm1558_vm11, %v7072_v39  ;;  %4192 = vmatprep.mubr.bf16.mxu0 %v9523_v55  ;;  %v4011_v28 = vmul.f32 %v4000_v61, %v7310_v44 }
 0x5fb   :  { %v3997_v58 = vsel %vm60_vm2, %v3990_v25, %v3994_v32  ;;  %v4003_v7 = vsel %vm60_vm2, %v3994_v32, %v3982_v62  ;;  %4235 = vmatprep.mubr.bf16.mxu1 %v9523_v55 }
 0x5fc   :  { %v3996_v41 = vpop.permute.xlu0 %3995  ;;  %v4016_v26 = vpack.c.bf16 %v4010_v23, %v4006_v19  ;;  %v4005_v3 = vmul.f32 %v4003_v7, %v7307_v43  ;;  %v4008_v62 = vmul.f32 %v3997_v58, %v7313_v45 }
 0x5fd   :  { %v3998_v12 = vsel %vm60_vm2, %v3992_v29, %v3996_v41  ;;  %v4004_v49 = vsel %vm60_vm2, %v3996_v41, %v8656_v57  ;;  %v4017_v29 = vpack.c.bf16 %v4011_v28, %v4007_v13  ;;  %v7073_v57 = vld [vmem:[%s9458_s8] sm:$0xff]  }
 0x5fe   :  { %v4009_v39 = vmul.f32 %v4004_v49, %v7307_v43  ;;  %v4012_v59 = vmul.f32 %v3998_v12, %v7313_v45  ;;  %v4251_v25 = vpop.permute.xlu1 %4250  ;;  %4160 = vmatprep.subr.bf16.mxu0 %v4016_v26 }
 0x5ff   :  { %v4266_v23 = vsel %vm369_vm4, %v8666_v6, %v4251_v25  ;;  %v4264_v49 = vsel %vm369_vm4, %v4251_v25, %v8670_v10 }
 0x600   :  { %v4015_v37 = vpack.c.bf16 %v4009_v39, %v4005_v3  ;;  %v4398_v48 = vpop.permute.xlu0 %4397  ;;  %v4018_v19 = vpack.c.bf16 %v4012_v59, %v4008_v62  ;;  %v4271_v7 = vmul.f32 %v4266_v23, %v7328_v56 }
 0x602   :  { %v4259_v61 = vpop.permute.xlu1 %4258  ;;  %4161 = vmatpush1.bf16.msra.mxu0 %v4015_v37  ;;  %4203 = vmatprep.subr.bf16.mxu1 %v4018_v19 }
 0x603   :  { %4204 = vmatpush1.bf16.msra.mxu1 %v4017_v29  ;;  %v4262_v28 = vsel %vm369_vm4, %v8670_v10, %v4259_v61  ;;  %v4268_v12 = vsel %vm369_vm4, %v4259_v61, %v8666_v6  ;;  %v4272_v29 = vmul.f32 %v4264_v49, %v7348_v17 }
 0x604   :  { %v4253_v32 = vpop.permute.xlu0 %4252  ;;  %v4270_v6 = vmul.f32 %v4268_v12, %v7341_v5  ;;  %v4273_v37 = vmul.f32 %v4262_v28, %v7351_v22 }
 0x605   :  { %v4267_v58 = vsel %vm369_vm4, %v8668_v63, %v4253_v32  ;;  %6631 = vmatmul.mubr.msk.bf16.vlgmr.msra.gmra.mrb[12].mxu0 %vm1558_vm11, %v7073_v57  ;;  %v4265_v54 = vsel %vm369_vm4, %v4253_v32, %v8672_v40 }
 0x606   :  { %v4275_v41 = vmul.f32 %v4267_v58, %v7328_v56  ;;  %v4392_v26 = vpop.permute.xlu1 %4391  ;;  %6632 = vmatmul.mubr.msk.bf16.vlgmr.msra.gmra.mrb[12].mxu1 %vm1558_vm11, %v7073_v57  ;;  %4325 = vmatprep.mubr.bf16.mxu0 %v9523_v55  ;;  %v4276_v39 = vmul.f32 %v4265_v54, %v7348_v17 }
 0x607   :  { %4368 = vmatprep.mubr.bf16.mxu1 %v9523_v55  ;;  %v4407_v58 = vsel %vm530_vm6, %v8697_v14, %v4392_v26 }
 0x608   :  { %v4261_v3 = vpop.permute.xlu0 %4260  ;;  %v4282_v62 = vpack.c.bf16 %v4275_v41, %v4271_v7  ;;  %v4283_v23 = vpack.c.bf16 %v4276_v39, %v4272_v29  ;;  %v4412_v41 = vmul.f32 %v4407_v58, %v7370_v36 }
 0x609   :  { %v4263_v59 = vsel %vm369_vm4, %v8672_v40, %v4261_v3  ;;  %v4269_v13 = vsel %vm369_vm4, %v4261_v3, %v8668_v63  ;;  %v7074_v63 = vld [vmem:[%s9458_s8 + $0x10] sm:$0xff]  }
 0x60a   :  { %v4274_v19 = vmul.f32 %v4269_v13, %v7341_v5  ;;  %v4277_v10 = vmul.f32 %v4263_v59, %v7351_v22  ;;  %v4396_v25 = vpop.permute.xlu1 %4395  ;;  %4293 = vmatprep.subr.bf16.mxu0 %v4282_v62 }
 0x60b   :  { %v4405_v39 = vsel %vm530_vm6, %v4392_v26, %v4396_v25 }
 0x60c   :  { %v4281_v57 = vpack.c.bf16 %v4274_v19, %v4270_v6  ;;  %v8774_v61 = vpop.permute.xlu0 %4639  ;;  %v4284_v40 = vpack.c.bf16 %v4277_v10, %v4273_v37 }
 0x60e   :  { %v4400_v32 = vpop.permute.xlu1 %4399  ;;  %4294 = vmatpush1.bf16.msra.mxu0 %v4281_v57  ;;  %4336 = vmatprep.subr.bf16.mxu1 %v4284_v40 }
 0x60f   :  { %4337 = vmatpush1.bf16.msra.mxu1 %v4283_v23  ;;  %v4403_v3 = vsel %vm530_vm6, %v4396_v25, %v4400_v32  ;;  %v4409_v62 = vsel %vm530_vm6, %v4400_v32, %v8697_v14  ;;  %v4413_v25 = vmul.f32 %v4405_v39, %v7385_v52  ;;  %v4532_v32 = vpack.c.bf16 %v8550_v47, %v8544_v30 }
 0x610   :  { %v4394_v7 = vpop.permute.xlu0 %4393  ;;  %v4411_v10 = vmul.f32 %v4409_v62, %v7382_v51  ;;  %v4414_v14 = vmul.f32 %v4403_v3, %v7388_v53 }
 0x611   :  { %v4408_v54 = vsel %vm530_vm6, %v8700_v31, %v4394_v7  ;;  %6636 = vmatmul.mubr.msk.bf16.vlgmr.msra.gmra.mrb[12].mxu0 %vm1558_vm11, %v7074_v63  ;;  %v4406_v28 = vsel %vm530_vm6, %v4394_v7, %v4398_v48  ;;  %v4534_v7 = vpack.c.bf16 %v8552_v4, %v8548_v50  ;;  %v9556_v50 = vld [vmem:[#allocation2_spill] sm:$0xff] }
 0x612   :  { %v4416_v12 = vmul.f32 %v4408_v54, %v7370_v36  ;;  %v4638_v49 = vpop.permute.xlu1 %4637  ;;  %6637 = vmatmul.mubr.msk.bf16.vlgmr.msra.gmra.mrb[12].mxu1 %vm1558_vm11, %v7074_v63  ;;  %4466 = vmatprep.mubr.bf16.mxu0 %v9523_v55  ;;  %v4417_v6 = vmul.f32 %v4406_v28, %v7385_v52  ;;  %v4533_v28 = vpack.c.bf16 %v8520_v11, %v8516_v35 }
 0x613   :  { %4509 = vmatprep.mubr.bf16.mxu1 %v9523_v55 }
 0x614   :  { %v4402_v59 = vpop.permute.xlu0 %4401  ;;  %v4423_v13 = vpack.c.bf16 %v4416_v12, %v4412_v41  ;;  %v4531_v41 = vpack.c.bf16 %v8511_v27, %v8507_v8 }
 0x615   :  { %v4404_v37 = vsel %vm530_vm6, %v4398_v48, %v4402_v59  ;;  %v4410_v19 = vsel %vm530_vm6, %v4402_v59, %v8700_v31  ;;  %v4424_v48 = vpack.c.bf16 %v4417_v6, %v4413_v25  ;;  %v7075_v31 = vld [vmem:[%s9458_s8 + $0x18] sm:$0xff]   ;;  %v7076_v59 = vld [vmem:[%s9458_s8 + $0x20] sm:$0xff]  }
 0x616   :  { %v4415_v29 = vmul.f32 %v4410_v19, %v7382_v51  ;;  %v4418_v57 = vmul.f32 %v4404_v37, %v7388_v53  ;;  %v4642_v26 = vpop.permute.xlu1 %4641  ;;  %4434 = vmatprep.subr.bf16.mxu0 %v4423_v13 }
 0x617   :  { %v4657_v13 = vsel %vm812_vm7, %v4638_v49, %v4642_v26 }
 0x618   :  { %v4422_v40 = vpack.c.bf16 %v4415_v29, %v4411_v10  ;;  %v4648_v23 = vpop.permute.xlu0 %4647  ;;  %v4425_v63 = vpack.c.bf16 %v4418_v57, %v4414_v14  ;;  %v4661_v10 = vmul.f32 %v4657_v13, %v7452_v60 }
 0x61a   :  { %v4646_v58 = vpop.permute.xlu1 %4645  ;;  %4435 = vmatpush1.bf16.msra.mxu0 %v4422_v40  ;;  %4477 = vmatprep.subr.bf16.mxu1 %v4425_v63 }
 0x61b   :  { %4478 = vmatpush1.bf16.msra.mxu1 %v4424_v48  ;;  %4543 = vmatprep.subr.bf16.mxu0 %v4532_v32  ;;  %v4655_v37 = vsel %vm812_vm7, %v4642_v26, %v4646_v58 }
 0x61c   :  { %4586 = vmatprep.subr.bf16.mxu1 %v4534_v7  ;;  %v8818_v54 = vpop.permute.xlu0 %4780  ;;  %v4662_v57 = vmul.f32 %v4655_v37, %v7423_v38 }
 0x61d   :  { %6641 = vmatmul.mubr.msk.bf16.vlgmr.msra.gmra.mrb[12].mxu0 %vm1558_vm11, %v7075_v31 }
 0x61e   :  { %v4650_v12 = vpop.permute.xlu1 %4649  ;;  %6642 = vmatmul.mubr.msk.bf16.vlgmr.msra.gmra.mrb[12].mxu1 %vm1558_vm11, %v7075_v31  ;;  %4544 = vmatpush1.bf16.msra.mxu0 %v4531_v41 }
 0x61f   :  { %4587 = vmatpush1.bf16.msra.mxu1 %v4533_v28  ;;  %4575 = vmatprep.mubr.bf16.mxu0 %v9523_v55  ;;  %v4653_v26 = vsel %vm812_vm7, %v4646_v58, %v4650_v12  ;;  %v4659_v48 = vsel %vm812_vm7, %v4650_v12, %v4638_v49 }
 0x620   :  { %v4789_v3 = vpop.permute.xlu0 %4788  ;;  %4618 = vmatprep.mubr.bf16.mxu1 %v9523_v55  ;;  %v4664_v13 = vmul.f32 %v4659_v48, %v7426_v2 }
 0x622   :  { %v4779_v62 = vpop.permute.xlu1 %4778 }
 0x624   :  { %v8828_v39 = vpop.permute.xlu0 %4921 }
 0x626   :  { %v4783_v6 = vpop.permute.xlu1 %4782 }
 0x628   :  { %v4644_v19 = vpop.permute.xlu0 %4643 }
 0x629   :  { %v4656_v14 = vsel %vm812_vm7, %v4644_v19, %v4648_v23  ;;  %v4658_v29 = vsel %vm812_vm7, %v8774_v61, %v4644_v19  ;;  %6646 = vmatmul.mubr.msk.bf16.vlgmr.msra.gmra.mrb[12].mxu0 %vm1558_vm11, %v7076_v59 }
 0x62a   :  { %v4665_v25 = vmul.f32 %v4658_v29, %v7452_v60  ;;  %v4666_v40 = vmul.f32 %v4656_v14, %v7423_v38  ;;  %v4787_v63 = vpop.permute.xlu1 %4786  ;;  %6647 = vmatmul.mubr.msk.bf16.vlgmr.msra.gmra.mrb[12].mxu1 %vm1558_vm11, %v7076_v59  ;;  %4716 = vmatprep.mubr.bf16.mxu0 %v9523_v55  ;;  %v4663_v59 = vmul.f32 %v4653_v26, %v7455_v1 }
 0x62b   :  { %4759 = vmatprep.mubr.bf16.mxu1 %v9523_v55  ;;  %v4796_v29 = vsel %vm973_vm8, %v4783_v6, %v4787_v63 }
 0x62c   :  { %v4672_v32 = vpack.c.bf16 %v4665_v25, %v4661_v10  ;;  %v4652_v31 = vpop.permute.xlu0 %4651  ;;  %v4673_v7 = vpack.c.bf16 %v4666_v40, %v4662_v57  ;;  %v4803_v48 = vmul.f32 %v4796_v29, %v7466_v15 }
 0x62d   :  { %v4654_v41 = vsel %vm812_vm7, %v4648_v23, %v4652_v31  ;;  %v4660_v28 = vsel %vm812_vm7, %v4652_v31, %v8774_v61  ;;  %v7077_v23 = vld [vmem:[%s9458_s8 + $0x28] sm:$0xff]   ;;  %v4798_v61 = vsel %vm973_vm8, %v4779_v62, %v4783_v6 }
 0x62e   :  { %v4667_v58 = vmul.f32 %v4654_v41, %v7455_v1  ;;  %v4668_v49 = vmul.f32 %v4660_v28, %v7426_v2  ;;  %v4791_v12 = vpop.permute.xlu1 %4790  ;;  %4684 = vmatprep.subr.bf16.mxu0 %v4673_v7  ;;  %v4802_v25 = vmul.f32 %v4798_v61, %v7493_v42 }
 0x62f   :  { %4685 = vmatpush1.bf16.msra.mxu0 %v4672_v32  ;;  %v4794_v7 = vsel %vm973_vm8, %v4787_v63, %v4791_v12  ;;  %v4800_v41 = vsel %vm973_vm8, %v4791_v12, %v4779_v62 }
 0x630   :  { %v4674_v37 = vpack.c.bf16 %v4667_v58, %v4663_v59  ;;  %v4930_v19 = vpop.permute.xlu0 %4929  ;;  %v4675_v10 = vpack.c.bf16 %v4668_v49, %v4664_v13 }
 0x632   :  { %v4920_v14 = vpop.permute.xlu1 %4919  ;;  %4727 = vmatprep.subr.bf16.mxu1 %v4675_v10  ;;  %v4805_v10 = vmul.f32 %v4800_v41, %v7469_v16 }
 0x633   :  { %4728 = vmatpush1.bf16.msra.mxu1 %v4674_v37  ;;  %v4804_v37 = vmul.f32 %v4794_v7, %v7496_v46 }
 0x634   :  { %v4785_v57 = vpop.permute.xlu0 %4784 }
 0x635   :  { %v4797_v40 = vsel %vm973_vm8, %v4785_v57, %v4789_v3  ;;  %v4799_v26 = vsel %vm973_vm8, %v8818_v54, %v4785_v57  ;;  %6651 = vmatmul.mubr.msk.bf16.vlgmr.msra.gmra.mrb[12].mxu0 %vm1558_vm11, %v7077_v23 }
 0x636   :  { %v4806_v32 = vmul.f32 %v4799_v26, %v7493_v42  ;;  %v4807_v31 = vmul.f32 %v4797_v40, %v7466_v15  ;;  %v4924_v6 = vpop.permute.xlu1 %4923  ;;  %6652 = vmatmul.mubr.msk.bf16.vlgmr.msra.gmra.mrb[12].mxu1 %vm1558_vm11, %v7077_v23  ;;  %4857 = vmatprep.mubr.bf16.mxu0 %v9523_v55 }
 0x637   :  { %4900 = vmatprep.mubr.bf16.mxu1 %v9523_v55 }
 0x638   :  { %v4813_v28 = vpack.c.bf16 %v4806_v32, %v4802_v25  ;;  %v4793_v59 = vpop.permute.xlu0 %4792  ;;  %v4814_v13 = vpack.c.bf16 %v4807_v31, %v4803_v48 }
 0x639   :  { %v4795_v58 = vsel %vm973_vm8, %v4789_v3, %v4793_v59  ;;  %v4801_v49 = vsel %vm973_vm8, %v4793_v59, %v8818_v54  ;;  %v7078_v3 = vld [vmem:[%s9458_s8 + $0x30] sm:$0xff]   ;;  %v4939_v54 = vsel %vm1134_vm9, %v4920_v14, %v4924_v6 }
 0x63a   :  { %v4808_v63 = vmul.f32 %v4795_v58, %v7496_v46  ;;  %v4809_v62 = vmul.f32 %v4801_v49, %v7469_v16  ;;  %v4928_v12 = vpop.permute.xlu1 %4927  ;;  %4825 = vmatprep.subr.bf16.mxu0 %v4814_v13  ;;  %v4943_v26 = vmul.f32 %v4939_v54, %v7532_v33 }
 0x63b   :  { %4826 = vmatpush1.bf16.msra.mxu0 %v4813_v28  ;;  %v4937_v25 = vsel %vm1134_vm9, %v4924_v6, %v4928_v12 }
 0x63c   :  { %v4815_v23 = vpack.c.bf16 %v4808_v63, %v4804_v37  ;;  %v5063_v61 = vpop.permute.xlu0 %5062  ;;  %v4816_v29 = vpack.c.bf16 %v4809_v62, %v4805_v10  ;;  %v4944_v31 = vmul.f32 %v4937_v25, %v7505_v0  ;;  %v9551_v62 = vld [vmem:[#allocation3_spill] sm:$0xff] }
 0x63e   :  { %v4932_v57 = vpop.permute.xlu1 %4931  ;;  %4868 = vmatprep.subr.bf16.mxu1 %v4816_v29 }
 0x63f   :  { %4869 = vmatpush1.bf16.msra.mxu1 %v4815_v23  ;;  %v4935_v28 = vsel %vm1134_vm9, %v4928_v12, %v4932_v57  ;;  %v4941_v59 = vsel %vm1134_vm9, %v4932_v57, %v4920_v14 }
 0x640   :  { %v4926_v40 = vpop.permute.xlu0 %4925  ;;  %v4945_v63 = vmul.f32 %v4935_v28, %v7535_v34  ;;  %v4946_v23 = vmul.f32 %v4941_v59, %v9551_v62 }
 0x641   :  { %v4938_v48 = vsel %vm1134_vm9, %v4926_v40, %v4930_v19  ;;  %v4940_v32 = vsel %vm1134_vm9, %v8828_v39, %v4926_v40  ;;  %6656 = vmatmul.mubr.msk.bf16.vlgmr.msra.gmra.mrb[12].mxu0 %vm1558_vm11, %v7078_v3 }
 0x642   :  { %v4947_v7 = vmul.f32 %v4940_v32, %v7532_v33  ;;  %v4948_v41 = vmul.f32 %v4938_v48, %v7505_v0  ;;  %v5061_v6 = vpop.permute.xlu1 %5060  ;;  %6657 = vmatmul.mubr.msk.bf16.vlgmr.msra.gmra.mrb[12].mxu1 %vm1558_vm11, %v7078_v3  ;;  %4998 = vmatprep.mubr.bf16.mxu0 %v9523_v55  ;;  %v9552_v48 = vld [vmem:[#allocation6_spill] sm:$0xff] }
 0x643   :  { %5041 = vmatprep.mubr.bf16.mxu1 %v9523_v55 }
 0x644   :  { %v4954_v13 = vpack.c.bf16 %v4947_v7, %v4943_v26  ;;  %v4934_v58 = vpop.permute.xlu0 %4933  ;;  %v4955_v49 = vpack.c.bf16 %v4948_v41, %v4944_v31  ;;  %v9553_v41 = vld [vmem:[#allocation4_spill] sm:$0xff] }
 0x645   :  { %v4936_v37 = vsel %vm1134_vm9, %v4930_v19, %v4934_v58  ;;  %v4942_v10 = vsel %vm1134_vm9, %v4934_v58, %v8828_v39  ;;  %v7079_v19 = vld [vmem:[%s9458_s8 + $0x38] sm:$0xff]  }
 0x646   :  { %v4949_v12 = vmul.f32 %v4936_v37, %v7535_v34  ;;  %v4950_v14 = vmul.f32 %v4942_v10, %v9551_v62  ;;  %v5065_v29 = vpop.permute.xlu1 %5064  ;;  %4966 = vmatprep.subr.bf16.mxu0 %v4955_v49 }
 0x647   :  { %4967 = vmatpush1.bf16.msra.mxu0 %v4954_v13  ;;  %v5080_v39 = vsel %vm1295_vm10, %v5061_v6, %v5065_v29 }
 0x648   :  { %v4956_v3 = vpack.c.bf16 %v4949_v12, %v4945_v63  ;;  %v5071_v54 = vpop.permute.xlu0 %5070  ;;  %v4957_v57 = vpack.c.bf16 %v4950_v14, %v4946_v23  ;;  %v5084_v32 = vmul.f32 %v5080_v39, %v9552_v48 }
 0x64a   :  { %v5069_v25 = vpop.permute.xlu1 %5068  ;;  %5009 = vmatprep.subr.bf16.mxu1 %v4957_v57  ;;  %v9555_v57 = vld [vmem:[#allocation5_spill] sm:$0xff] }
 0x64b   :  { %v5078_v40 = vsel %vm1295_vm10, %v5065_v29, %v5069_v25  ;;  %5010 = vmatpush1.bf16.msra.mxu1 %v4956_v3  ;;  %v9554_v29 = vld [vmem:[#allocation7_spill] sm:$0xff] }
 0x64c   :  { %v5067_v26 = vpop.permute.xlu0 %5066  ;;  %v5085_v28 = vmul.f32 %v5078_v40, %v9553_v41 }
 0x64d   :  { %v5079_v31 = vsel %vm1295_vm10, %v5067_v26, %v5071_v54  ;;  %v5081_v7 = vsel %vm1295_vm10, %v5063_v61, %v5067_v26  ;;  %6661 = vmatmul.mubr.msk.bf16.vlgmr.msra.gmra.mrb[12].mxu0 %vm1558_vm11, %v7079_v19  ;;  %v7080_v26 = vld [vmem:[%s9458_s8 + $0x40] sm:$0xff]  }
 0x64e   :  { %v5088_v59 = vmul.f32 %v5081_v7, %v9552_v48  ;;  %v5089_v13 = vmul.f32 %v5079_v31, %v9553_v41  ;;  %v5073_v58 = vpop.permute.xlu1 %5072  ;;  %6662 = vmatmul.mubr.msk.bf16.vlgmr.msra.gmra.mrb[12].mxu1 %vm1558_vm11, %v7079_v19  ;;  %5139 = vmatprep.mubr.bf16.mxu0 %v9523_v55 }
 0x64f   :  { %v5076_v49 = vsel %vm1295_vm10, %v5069_v25, %v5073_v58  ;;  %v5082_v37 = vsel %vm1295_vm10, %v5073_v58, %v5061_v6  ;;  %5182 = vmatprep.mubr.bf16.mxu1 %v9523_v55 }
 0x650   :  { %v5095_v10 = vpack.c.bf16 %v5088_v59, %v5084_v32  ;;  %v5075_v63 = vpop.permute.xlu0 %5074  ;;  %v5096_v23 = vpack.c.bf16 %v5089_v13, %v5085_v28  ;;  %v5086_v3 = vmul.f32 %v5076_v49, %v9554_v29  ;;  %v5087_v19 = vmul.f32 %v5082_v37, %v9555_v57 }
 0x651   :  { %v5077_v12 = vsel %vm1295_vm10, %v5071_v54, %v5075_v63  ;;  %v5083_v14 = vsel %vm1295_vm10, %v5075_v63, %v5063_v61 }
 0x652   :  { %v5090_v39 = vmul.f32 %v5077_v12, %v9554_v29  ;;  %v5091_v25 = vmul.f32 %v5083_v14, %v9555_v57  ;;  %5107 = vmatprep.subr.bf16.mxu0 %v5096_v23 }
 0x653   :  { %5108 = vmatpush1.bf16.msra.mxu0 %v5095_v10 }
 0x654   :  { %v5097_v6 = vpack.c.bf16 %v5090_v39, %v5086_v3  ;;  %v5098_v40 = vpack.c.bf16 %v5091_v25, %v5087_v19 }
 0x656   :  { %5150 = vmatprep.subr.bf16.mxu1 %v5098_v40 }
 0x657   :  { %5151 = vmatpush1.bf16.msra.mxu1 %v5097_v6 }
 0x659   :  { %6666 = vmatmul.mubr.msk.bf16.vlgmr.msra.gmra.mrb[12].mxu0 %vm1558_vm11, %v7080_v26 }
 0x65a   :  { %6667 = vmatmul.mubr.msk.bf16.vlgmr.msra.gmra.mrb[12].mxu1 %vm1558_vm11, %v7080_v26  ;;  %5346 = vmatprep.mubr.bf16.mxu0 %v9523_v55 }
 0x65b   :  { %5389 = vmatprep.mubr.bf16.mxu1 %v9523_v55 }
 0x65f   :  { %v5206_v61 = vpop.permute.xlu1 %5205 }
 0x661   :  { %v5211_v54 = vpop.permute.xlu0 %5210 }
 0x72c   :  { %v5141_v32 = vpop.f32.mrb[12].mxu0 }
 0x72d   :  { %v5213_v31 = vadd.f32 %v5206_v61, %v5141_v32  ;;  %v5143_v7 = vpop.f32.mrb[13].mxu0  ;;  %v5184_v28 = vpop.f32.mrb[12].mxu1 }
 0x72e   :  { %v5145_v59 = vpop.f32.mrb[14].mxu0  ;;  %v5186_v13 = vpop.f32.mrb[13].mxu1  ;;  %v5215_v49 = vadd.f32 %v5206_v61, %v5184_v28  ;;  %v5214_v39 = vadd.f32 %v5206_v61, %v5143_v7 }
 0x72f   :  { %v8967_v58 = vmax.f32 %v5213_v31, 0.0  ;;  %v5217_v37 = vadd.f32 %v5211_v54, %v5145_v59  ;;  %v5147_v10 = vpop.f32.mrb[15].mxu0  ;;  %v5188_v63 = vpop.f32.mrb[14].mxu1  ;;  %v5216_v25 = vadd.f32 %v5206_v61, %v5186_v13 }
 0x730   :  { %v5190_v23 = vpop.f32.mrb[15].mxu1  ;;  %v5219_v14 = vadd.f32 %v5211_v54, %v5188_v63  ;;  %v8973_v3 = vmax.f32 %v5215_v49, 0.0  ;;  %v5218_v6 = vadd.f32 %v5211_v54, %v5147_v10  ;;  %v8997_v26 = vmax.f32 %v5214_v39, 0.0  ;;  %v6450_v63 = vld [vmem:[%s9461_s11 + $0x8] sm:$0xff] }
 0x731   :  { %v8969_v12 = vmax.f32 %v5217_v37, 0.0  ;;  %5267 = vrot.lane.b32.xlu1 %v8967_v58, %s7090_s25  ;;  %v5220_v40 = vadd.f32 %v5211_v54, %v5190_v23  ;;  %v9001_v32 = vmax.f32 %v5216_v25, 0.0  ;;  %v6449_v37 = vld [vmem:[%s9461_s11] sm:$0xff] }
 0x732   :  { %v8977_v19 = vmax.f32 %v5219_v14, 0.0  ;;  %v9003_v31 = vmax.f32 %v5218_v6, 0.0 }
 0x733   :  { %5269 = vrot.lane.b32.xlu0 %v8969_v12, %s7090_s25  ;;  %v9005_v28 = vmax.f32 %v5220_v40, 0.0 }
 0x735   :  { %5275 = vrot.lane.b32.xlu1 %v8973_v3, %s7090_s25 }
 0x737   :  { %5277 = vrot.lane.b32.xlu0 %v8977_v19, %s7090_s25 }
 0x739   :  { %5229 = vrot.lane.b32.xlu1 %v8967_v58, %s7091_s0 }
 0x73b   :  { %5231 = vrot.lane.b32.xlu0 %v8969_v12, %s7091_s0 }
 0x73d   :  { %5237 = vrot.lane.b32.xlu1 %v8973_v3, %s7091_s0 }
 0x73f   :  { %5239 = vrot.lane.b32.xlu0 %v8977_v19, %s7091_s0 }
 0x741   :  { %5494 = vrot.lane.b32.xlu1 %v8967_v58, %s7093_s26 }
 0x743   :  { %5496 = vrot.lane.b32.xlu0 %v8969_v12, %s7093_s26 }
 0x745   :  { %5502 = vrot.lane.b32.xlu1 %v8973_v3, %s7093_s26 }
 0x747   :  { %5504 = vrot.lane.b32.xlu0 %v8977_v19, %s7093_s26 }
 0x749   :  { %5271 = vrot.lane.b32.xlu1 %v8997_v26, %s7090_s25 }
 0x74b   :  { %5273 = vrot.lane.b32.xlu0 %v9003_v31, %s7090_s25 }
 0x74d   :  { %5279 = vrot.lane.b32.xlu1 %v9001_v32, %s7090_s25 }
 0x74f   :  { %5281 = vrot.lane.b32.xlu0 %v9005_v28, %s7090_s25 }
 0x751   :  { %5635 = vrot.lane.b32.xlu1 %v8967_v58, %s7094_s27 }
 0x753   :  { %5637 = vrot.lane.b32.xlu0 %v8969_v12, %s7094_s27 }
 0x755   :  { %5233 = vrot.lane.b32.xlu1 %v8997_v26, %s7091_s0 }
 0x757   :  { %5235 = vrot.lane.b32.xlu0 %v9003_v31, %s7091_s0 }
 0x759   :  { %5241 = vrot.lane.b32.xlu1 %v9001_v32, %s7091_s0 }
 0x75b   :  { %5243 = vrot.lane.b32.xlu0 %v9005_v28, %s7091_s0 }
 0x75d   :  { %5498 = vrot.lane.b32.xlu1 %v8997_v26, %s7093_s26 }
 0x75f   :  { %5645 = vrot.lane.b32.xlu0 %v8977_v19, %s7094_s27 }
 0x761   :  { %5506 = vrot.lane.b32.xlu1 %v9001_v32, %s7093_s26 }
 0x763   :  { %5500 = vrot.lane.b32.xlu0 %v9003_v31, %s7093_s26 }
 0x765   :  { %5639 = vrot.lane.b32.xlu1 %v8997_v26, %s7094_s27 }
 0x767   :  { %5508 = vrot.lane.b32.xlu0 %v9005_v28, %s7093_s26 }
 0x769   :  { %5643 = vrot.lane.b32.xlu1 %v8973_v3, %s7094_s27 }
 0x76b   :  { %5887 = vrot.lane.b32.xlu0 %v8969_v12, %s7095_s28 }
 0x76d   :  { %5647 = vrot.lane.b32.xlu1 %v9001_v32, %s7094_s27 }
 0x76f   :  { %5641 = vrot.lane.b32.xlu0 %v9003_v31, %s7094_s27 }
 0x771   :  { %5885 = vrot.lane.b32.xlu1 %v8967_v58, %s7095_s28 }
 0x773   :  { %5649 = vrot.lane.b32.xlu0 %v9005_v28, %s7094_s27 }
 0x775   :  { %5889 = vrot.lane.b32.xlu1 %v8997_v26, %s7095_s28 }
 0x777   :  { %5895 = vrot.lane.b32.xlu0 %v8977_v19, %s7095_s28 }
 0x779   :  { %5893 = vrot.lane.b32.xlu1 %v8973_v3, %s7095_s28 }
 0x77b   :  { %6028 = vrot.lane.b32.xlu0 %v8969_v12, %s7096_s29 }
 0x77d   :  { %5897 = vrot.lane.b32.xlu1 %v9001_v32, %s7095_s28 }
 0x77f   :  { %6036 = vrot.lane.b32.xlu0 %v8977_v19, %s7096_s29 }
 0x781   :  { %6026 = vrot.lane.b32.xlu1 %v8967_v58, %s7096_s29 }
 0x783   :  { %6169 = vrot.lane.b32.xlu0 %v8969_v12, %s7097_s30 }
 0x785   :  { %6030 = vrot.lane.b32.xlu1 %v8997_v26, %s7096_s29 }
 0x787   :  { %5891 = vrot.lane.b32.xlu0 %v9003_v31, %s7095_s28 }
 0x789   :  { %6034 = vrot.lane.b32.xlu1 %v8973_v3, %s7096_s29 }
 0x78b   :  { %5899 = vrot.lane.b32.xlu0 %v9005_v28, %s7095_s28 }
 0x78d   :  { %6038 = vrot.lane.b32.xlu1 %v9001_v32, %s7096_s29 }
 0x78f   :  { %6177 = vrot.lane.b32.xlu0 %v8977_v19, %s7097_s30 }
 0x791   :  { %6167 = vrot.lane.b32.xlu1 %v8967_v58, %s7097_s30 }
 0x793   :  { %6032 = vrot.lane.b32.xlu0 %v9003_v31, %s7096_s29 }
 0x795   :  { %6171 = vrot.lane.b32.xlu1 %v8997_v26, %s7097_s30 }
 0x797   :  { %6040 = vrot.lane.b32.xlu0 %v9005_v28, %s7096_s29 }
 0x799   :  { %6175 = vrot.lane.b32.xlu1 %v8973_v3, %s7097_s30 }
 0x79b   :  { %6310 = vrot.lane.b32.xlu0 %v8969_v12, %s7098_s13 }
 0x79d   :  { %6179 = vrot.lane.b32.xlu1 %v9001_v32, %s7097_s30 }
 0x79f   :  { %6173 = vrot.lane.b32.xlu0 %v9003_v31, %s7097_s30 }
 0x7a1   :  { %6308 = vrot.lane.b32.xlu1 %v8967_v58, %s7098_s13 }
 0x7a3   :  { %v5268_v61 = vpop.permute.xlu1 %5267  ;;  %6181 = vrot.lane.b32.xlu0 %v9005_v28, %s7097_s30 }
 0x7a5   :  { %6312 = vrot.lane.b32.xlu1 %v8997_v26, %s7098_s13  ;;  %v5270_v54 = vpop.permute.xlu0 %5269 }
 0x7a7   :  { %v5276_v7 = vpop.permute.xlu1 %5275  ;;  %6318 = vrot.lane.b32.xlu0 %v8977_v19, %s7098_s13 }
 0x7a9   :  { %6316 = vrot.lane.b32.xlu1 %v8973_v3, %s7098_s13  ;;  %v5278_v59 = vpop.permute.xlu0 %5277 }
 0x7ab   :  { %v5230_v13 = vpop.permute.xlu1 %5229  ;;  %6314 = vrot.lane.b32.xlu0 %v9003_v31, %s7098_s13 }
 0x7ad   :  { %6320 = vrot.lane.b32.xlu1 %v9001_v32, %s7098_s13  ;;  %v9109_v49 = vpop.permute.xlu0 %5231 }
 0x7af   :  { %v5238_v10 = vpop.permute.xlu1 %5237  ;;  %6322 = vrot.lane.b32.xlu0 %v9005_v28, %s7098_s13 }
 0x7b1   :  { %6453 = vperm.xlu1 %7042, %v6449_v37   ;;  %v5240_v23 = vpop.permute.xlu0 %5239 }
 0x7b3   :  { %v9119_v14 = vpop.permute.xlu1 %5494  ;;  %6458 = vperm.xlu0 %7041, %v6450_v63  }
 0x7b5   :  { %v9121_v39 = vpop.permute.xlu0 %5496 }
 0x7b7   :  { %v9123_v25 = vpop.permute.xlu1 %5502 }
 0x7b9   :  { %v9125_v6 = vpop.permute.xlu0 %5504 }
 0x7bb   :  { %v5272_v40 = vpop.permute.xlu1 %5271 }
 0x7bc   :  { %v5287_v4 = vsel %vm105_vm0, %v5268_v61, %v5272_v40  ;;  %v5285_v57 = vsel %vm105_vm0, %v5272_v40, %v5276_v7 }
 0x7bd   :  { %v5274_v11 = vpop.permute.xlu0 %5273  ;;  %v5292_v37 = vmul.f32 %v5287_v4, %v9556_v50 }
 0x7be   :  { %v5288_v47 = vsel %vm105_vm0, %v5270_v54, %v5274_v11  ;;  %v5286_v27 = vsel %vm105_vm0, %v5274_v11, %v5278_v59 }
 0x7bf   :  { %v5296_v63 = vmul.f32 %v5288_v47, %v9556_v50  ;;  %v5280_v35 = vpop.permute.xlu1 %5279  ;;  %v5297_v48 = vmul.f32 %v5286_v27, %v7284_v21 }
 0x7c0   :  { %v5283_v30 = vsel %vm105_vm0, %v5276_v7, %v5280_v35  ;;  %v5289_v8 = vsel %vm105_vm0, %v5280_v35, %v5268_v61  ;;  %v5293_v7 = vmul.f32 %v5285_v57, %v7284_v21 }
 0x7c1   :  { %v5282_v29 = vpop.permute.xlu0 %5281  ;;  %v5303_v41 = vpack.c.bf16 %v5296_v63, %v5292_v37  ;;  %v5291_v50 = vmul.f32 %v5289_v8, %v7281_v20  ;;  %v5294_v47 = vmul.f32 %v5283_v30, %v7275_v18  ;;  %v7081_v8 = vld [vmem:[%s9460_s10 + $0x8] sm:$0xff]  }
 0x7c2   :  { %v5284_v4 = vsel %vm105_vm0, %v5278_v59, %v5282_v29  ;;  %v5290_v11 = vsel %vm105_vm0, %v5282_v29, %v5270_v54  ;;  %v5304_v37 = vpack.c.bf16 %v5297_v48, %v5293_v7 }
 0x7c3   :  { %v5295_v62 = vmul.f32 %v5290_v11, %v7281_v20  ;;  %v5298_v35 = vmul.f32 %v5284_v4, %v7275_v18  ;;  %v9150_v61 = vpop.permute.xlu1 %5635  ;;  %5314 = vmatprep.subr.bf16.mxu0 %v5303_v41 }
 0x7c5   :  { %v5302_v27 = vpack.c.bf16 %v5295_v62, %v5291_v50  ;;  %v9153_v40 = vpop.permute.xlu0 %5637  ;;  %v5305_v59 = vpack.c.bf16 %v5298_v35, %v5294_v47 }
 0x7c7   :  { %v5234_v29 = vpop.permute.xlu1 %5233  ;;  %5315 = vmatpush1.bf16.msra.mxu0 %v5302_v27  ;;  %5357 = vmatprep.subr.bf16.mxu1 %v5305_v59 }
 0x7c8   :  { %v5249_v18 = vsel %vm60_vm2, %v5230_v13, %v5234_v29  ;;  %5358 = vmatpush1.bf16.msra.mxu1 %v5304_v37  ;;  %v5247_v63 = vsel %vm60_vm2, %v5234_v29, %v5238_v10 }
 0x7c9   :  { %v5236_v20 = vpop.permute.xlu0 %5235  ;;  %v5254_v30 = vmul.f32 %v5249_v18, %v7288_v24  ;;  %v5255_v59 = vmul.f32 %v5247_v63, %v7310_v44 }
 0x7ca   :  { %v5250_v21 = vsel %vm60_vm2, %v9109_v49, %v5236_v20  ;;  %6671 = vmatmul.mubr.msk.bf16.vlgmr.msra.gmra.mrb[16].mxu0 %vm1558_vm11, %v7081_v8  ;;  %v5248_v62 = vsel %vm60_vm2, %v5236_v20, %v5240_v23 }
 0x7cb   :  { %v5258_v48 = vmul.f32 %v5250_v21, %v7288_v24  ;;  %v5242_v41 = vpop.permute.xlu1 %5241  ;;  %6672 = vmatmul.mubr.msk.bf16.vlgmr.msra.gmra.mrb[16].mxu1 %vm1558_vm11, %v7081_v8  ;;  %5440 = vmatprep.mubr.bf16.mxu0 %v9523_v55  ;;  %v5259_v24 = vmul.f32 %v5248_v62, %v7310_v44 }
 0x7cc   :  { %v5245_v57 = vsel %vm60_vm2, %v5238_v10, %v5242_v41  ;;  %v5251_v54 = vsel %vm60_vm2, %v5242_v41, %v5230_v13  ;;  %5483 = vmatprep.mubr.bf16.mxu1 %v9523_v55 }
 0x7cd   :  { %v5244_v4 = vpop.permute.xlu0 %5243  ;;  %v5264_v11 = vpack.c.bf16 %v5258_v48, %v5254_v30  ;;  %v5253_v35 = vmul.f32 %v5251_v54, %v7307_v43  ;;  %v5256_v13 = vmul.f32 %v5245_v57, %v7313_v45 }
 0x7ce   :  { %v5246_v50 = vsel %vm60_vm2, %v5240_v23, %v5244_v4  ;;  %v5252_v47 = vsel %vm60_vm2, %v5244_v4, %v9109_v49  ;;  %v5265_v23 = vpack.c.bf16 %v5259_v24, %v5255_v59  ;;  %v7082_v49 = vld [vmem:[%s9460_s10] sm:$0xff]  }
 0x7cf   :  { %v5257_v7 = vmul.f32 %v5252_v47, %v7307_v43  ;;  %v5260_v27 = vmul.f32 %v5246_v50, %v7313_v45  ;;  %v5499_v10 = vpop.permute.xlu1 %5498  ;;  %5408 = vmatprep.subr.bf16.mxu0 %v5264_v11 }
 0x7d0   :  { %v5514_v43 = vsel %vm369_vm4, %v9119_v14, %v5499_v10  ;;  %v5512_v57 = vsel %vm369_vm4, %v5499_v10, %v9123_v25 }
 0x7d1   :  { %v5263_v37 = vpack.c.bf16 %v5257_v7, %v5253_v35  ;;  %v5646_v8 = vpop.permute.xlu0 %5645  ;;  %v5266_v29 = vpack.c.bf16 %v5260_v27, %v5256_v13  ;;  %v5519_v20 = vmul.f32 %v5514_v43, %v7328_v56  ;;  %v5520_v35 = vmul.f32 %v5512_v57, %v7348_v17 }
 0x7d3   :  { %v5507_v18 = vpop.permute.xlu1 %5506  ;;  %5409 = vmatpush1.bf16.msra.mxu0 %v5263_v37  ;;  %5451 = vmatprep.subr.bf16.mxu1 %v5266_v29 }
 0x7d4   :  { %5452 = vmatpush1.bf16.msra.mxu1 %v5265_v23  ;;  %v5510_v48 = vsel %vm369_vm4, %v9123_v25, %v5507_v18  ;;  %v5516_v41 = vsel %vm369_vm4, %v5507_v18, %v9119_v14 }
 0x7d5   :  { %v5501_v45 = vpop.permute.xlu0 %5500  ;;  %v5518_v14 = vmul.f32 %v5516_v41, %v7341_v5  ;;  %v5521_v24 = vmul.f32 %v5510_v48, %v7351_v22 }
 0x7d6   :  { %v5515_v44 = vsel %vm369_vm4, %v9121_v39, %v5501_v45  ;;  %6674 = vmatmul.mubr.msk.bf16.vlgmr.msra.gmra.mrb[16].mxu0 %vm1558_vm11, %v7082_v49  ;;  %v5513_v21 = vsel %vm369_vm4, %v5501_v45, %v9125_v6 }
 0x7d7   :  { %v5523_v30 = vmul.f32 %v5515_v44, %v7328_v56  ;;  %v5640_v62 = vpop.permute.xlu1 %5639  ;;  %6675 = vmatmul.mubr.msk.bf16.vlgmr.msra.gmra.mrb[16].mxu1 %vm1558_vm11, %v7082_v49  ;;  %5573 = vmatprep.mubr.bf16.mxu0 %v9523_v55  ;;  %v5524_v63 = vmul.f32 %v5513_v21, %v7348_v17 }
 0x7d8   :  { %5616 = vmatprep.mubr.bf16.mxu1 %v9523_v55 }
 0x7d9   :  { %v5509_v56 = vpop.permute.xlu0 %5508  ;;  %v5530_v54 = vpack.c.bf16 %v5523_v30, %v5519_v20  ;;  %v5531_v27 = vpack.c.bf16 %v5524_v63, %v5520_v35 }
 0x7da   :  { %v5511_v4 = vsel %vm369_vm4, %v9125_v6, %v5509_v56  ;;  %v5517_v11 = vsel %vm369_vm4, %v5509_v56, %v9121_v39  ;;  %v7083_v39 = vld [vmem:[%s9460_s10 + $0x10] sm:$0xff]  }
 0x7db   :  { %v5522_v50 = vmul.f32 %v5517_v11, %v7341_v5  ;;  %v5525_v25 = vmul.f32 %v5511_v4, %v7351_v22  ;;  %v5644_v47 = vpop.permute.xlu1 %5643  ;;  %5541 = vmatprep.subr.bf16.mxu0 %v5530_v54  ;;  %v5655_v5 = vsel %vm530_vm6, %v9150_v61, %v5640_v62  ;;  %v5780_v4 = vpack.c.bf16 %v9003_v31, %v8997_v26 }
 0x7dc   :  { %v5660_v59 = vmul.f32 %v5655_v5, %v7370_v36  ;;  %v5653_v43 = vsel %vm530_vm6, %v5640_v62, %v5644_v47  ;;  %v5781_v26 = vpack.c.bf16 %v8977_v19, %v8973_v3 }
 0x7dd   :  { %v5529_v13 = vpack.c.bf16 %v5522_v50, %v5518_v14  ;;  %v9227_v7 = vpop.permute.xlu0 %5887  ;;  %v5532_v6 = vpack.c.bf16 %v5525_v25, %v5521_v24  ;;  %v5661_v57 = vmul.f32 %v5653_v43, %v7385_v52 }
 0x7df   :  { %v5648_v10 = vpop.permute.xlu1 %5647  ;;  %5542 = vmatpush1.bf16.msra.mxu0 %v5529_v13  ;;  %5584 = vmatprep.subr.bf16.mxu1 %v5532_v6 }
 0x7e0   :  { %5585 = vmatpush1.bf16.msra.mxu1 %v5531_v27  ;;  %v5651_v49 = vsel %vm530_vm6, %v5644_v47, %v5648_v10  ;;  %v5657_v18 = vsel %vm530_vm6, %v5648_v10, %v9150_v61 }
 0x7e1   :  { %v5642_v22 = vpop.permute.xlu0 %5641  ;;  %v5659_v30 = vmul.f32 %v5657_v18, %v7382_v51  ;;  %v5662_v61 = vmul.f32 %v5651_v49, %v7388_v53 }
 0x7e2   :  { %v5656_v17 = vsel %vm530_vm6, %v9153_v40, %v5642_v22  ;;  %6679 = vmatmul.mubr.msk.bf16.vlgmr.msra.gmra.mrb[16].mxu0 %vm1558_vm11, %v7083_v39  ;;  %v5654_v37 = vsel %vm530_vm6, %v5642_v22, %v5646_v8 }
 0x7e3   :  { %v5664_v29 = vmul.f32 %v5656_v17, %v7370_v36  ;;  %v5886_v23 = vpop.permute.xlu1 %5885  ;;  %6680 = vmatmul.mubr.msk.bf16.vlgmr.msra.gmra.mrb[16].mxu1 %vm1558_vm11, %v7083_v39  ;;  %5714 = vmatprep.mubr.bf16.mxu0 %v9523_v55  ;;  %v5665_v36 = vmul.f32 %v5654_v37, %v7385_v52 }
 0x7e4   :  { %5757 = vmatprep.mubr.bf16.mxu1 %v9523_v55 }
 0x7e5   :  { %v5650_v45 = vpop.permute.xlu0 %5649  ;;  %v5671_v44 = vpack.c.bf16 %v5664_v29, %v5660_v59 }
 0x7e6   :  { %v5652_v20 = vsel %vm530_vm6, %v5646_v8, %v5650_v45  ;;  %v5658_v21 = vsel %vm530_vm6, %v5650_v45, %v9153_v40  ;;  %v5672_v8 = vpack.c.bf16 %v5665_v36, %v5661_v57  ;;  %v7084_v40 = vld [vmem:[%s9460_s10 + $0x18] sm:$0xff]  }
 0x7e7   :  { %v5663_v48 = vmul.f32 %v5658_v21, %v7382_v51  ;;  %v5666_v41 = vmul.f32 %v5652_v20, %v7388_v53  ;;  %v5890_v62 = vpop.permute.xlu1 %5889  ;;  %5682 = vmatprep.subr.bf16.mxu0 %v5671_v44  ;;  %v5782_v51 = vpack.c.bf16 %v9005_v28, %v9001_v32  ;;  %v5779_v53 = vpack.c.bf16 %v8969_v12, %v8967_v58  ;;  %v7085_v58 = vld [vmem:[%s9460_s10 + $0x20] sm:$0xff]   ;;  %v7086_v44 = vld [vmem:[%s9460_s10 + $0x28] sm:$0xff]  }
 0x7e8   :  { %v5905_v12 = vsel %vm812_vm7, %v5886_v23, %v5890_v62 }
 0x7e9   :  { %v5670_v56 = vpack.c.bf16 %v5663_v48, %v5659_v30  ;;  %v5896_v54 = vpop.permute.xlu0 %5895  ;;  %v5673_v63 = vpack.c.bf16 %v5666_v41, %v5662_v61  ;;  %v5909_v50 = vmul.f32 %v5905_v12, %v7452_v60 }
 0x7eb   :  { %v5894_v11 = vpop.permute.xlu1 %5893  ;;  %5683 = vmatpush1.bf16.msra.mxu0 %v5670_v56  ;;  %5725 = vmatprep.subr.bf16.mxu1 %v5673_v63 }
 0x7ec   :  { %5726 = vmatpush1.bf16.msra.mxu1 %v5672_v8  ;;  %5791 = vmatprep.subr.bf16.mxu0 %v5780_v4  ;;  %v5903_v19 = vsel %vm812_vm7, %v5890_v62, %v5894_v11 }
 0x7ed   :  { %5834 = vmatprep.subr.bf16.mxu1 %v5782_v51  ;;  %v9271_v52 = vpop.permute.xlu0 %6028  ;;  %v5910_v35 = vmul.f32 %v5903_v19, %v7423_v38 }
 0x7ee   :  { %6684 = vmatmul.mubr.msk.bf16.vlgmr.msra.gmra.mrb[16].mxu0 %vm1558_vm11, %v7084_v40 }
 0x7ef   :  { %v5898_v31 = vpop.permute.xlu1 %5897  ;;  %6685 = vmatmul.mubr.msk.bf16.vlgmr.msra.gmra.mrb[16].mxu1 %vm1558_vm11, %v7084_v40  ;;  %5792 = vmatpush1.bf16.msra.mxu0 %v5779_v53 }
 0x7f0   :  { %5835 = vmatpush1.bf16.msra.mxu1 %v5781_v26  ;;  %5823 = vmatprep.mubr.bf16.mxu0 %v9523_v55  ;;  %v5901_v39 = vsel %vm812_vm7, %v5894_v11, %v5898_v31  ;;  %v5907_v10 = vsel %vm812_vm7, %v5898_v31, %v5886_v23 }
 0x7f1   :  { %v6037_v32 = vpop.permute.xlu0 %6036  ;;  %5866 = vmatprep.mubr.bf16.mxu1 %v9523_v55  ;;  %v5911_v59 = vmul.f32 %v5901_v39, %v7455_v1  ;;  %v5912_v37 = vmul.f32 %v5907_v10, %v7426_v2 }
 0x7f3   :  { %v6027_v28 = vpop.permute.xlu1 %6026 }
 0x7f5   :  { %v9281_v14 = vpop.permute.xlu0 %6169 }
 0x7f7   :  { %v6031_v3 = vpop.permute.xlu1 %6030 }
 0x7f9   :  { %v5892_v24 = vpop.permute.xlu0 %5891 }
 0x7fa   :  { %v5904_v25 = vsel %vm812_vm7, %v5892_v24, %v5896_v54  ;;  %v5906_v47 = vsel %vm812_vm7, %v9227_v7, %v5892_v24  ;;  %6689 = vmatmul.mubr.msk.bf16.vlgmr.msra.gmra.mrb[16].mxu0 %vm1558_vm11, %v7085_v58 }
 0x7fb   :  { %v5913_v13 = vmul.f32 %v5906_v47, %v7452_v60  ;;  %v5914_v6 = vmul.f32 %v5904_v25, %v7423_v38  ;;  %v6035_v27 = vpop.permute.xlu1 %6034  ;;  %6690 = vmatmul.mubr.msk.bf16.vlgmr.msra.gmra.mrb[16].mxu1 %vm1558_vm11, %v7085_v58  ;;  %5964 = vmatprep.mubr.bf16.mxu0 %v9523_v55 }
 0x7fc   :  { %6007 = vmatprep.mubr.bf16.mxu1 %v9523_v55 }
 0x7fd   :  { %v5920_v5 = vpack.c.bf16 %v5913_v13, %v5909_v50  ;;  %v5900_v22 = vpop.permute.xlu0 %5899  ;;  %v5921_v17 = vpack.c.bf16 %v5914_v6, %v5910_v35 }
 0x7fe   :  { %v5902_v60 = vsel %vm812_vm7, %v5896_v54, %v5900_v22  ;;  %v5908_v38 = vsel %vm812_vm7, %v5900_v22, %v9227_v7  ;;  %v6046_v7 = vsel %vm973_vm8, %v6027_v28, %v6031_v3 }
 0x7ff   :  { %v5915_v29 = vmul.f32 %v5902_v60, %v7455_v1  ;;  %v5916_v23 = vmul.f32 %v5908_v38, %v7426_v2  ;;  %v6039_v49 = vpop.permute.xlu1 %6038  ;;  %5932 = vmatprep.subr.bf16.mxu0 %v5921_v17  ;;  %v6044_v1 = vsel %vm973_vm8, %v6031_v3, %v6035_v27  ;;  %v6050_v20 = vmul.f32 %v6046_v7, %v7493_v42 }
 0x800   :  { %5933 = vmatpush1.bf16.msra.mxu0 %v5920_v5  ;;  %v6051_v61 = vmul.f32 %v6044_v1, %v7466_v15  ;;  %v6042_v57 = vsel %vm973_vm8, %v6035_v27, %v6039_v49  ;;  %v6048_v56 = vsel %vm973_vm8, %v6039_v49, %v6027_v28  ;;  %v9557_v5 = vld [vmem:[#allocation3_spill] sm:$0xff] }
 0x801   :  { %v5922_v18 = vpack.c.bf16 %v5915_v29, %v5911_v59  ;;  %v6178_v43 = vpop.permute.xlu0 %6177  ;;  %v5923_v45 = vpack.c.bf16 %v5916_v23, %v5912_v37  ;;  %v6052_v4 = vmul.f32 %v6042_v57, %v7496_v46  ;;  %v6053_v40 = vmul.f32 %v6048_v56, %v7469_v16  ;;  %v7088_v23 = vld [vmem:[%s9460_s10 + $0x38] sm:$0xff]  }
 0x803   :  { %v6168_v36 = vpop.permute.xlu1 %6167  ;;  %5975 = vmatprep.subr.bf16.mxu1 %v5923_v45 }
 0x804   :  { %5976 = vmatpush1.bf16.msra.mxu1 %v5922_v18 }
 0x805   :  { %v6033_v2 = vpop.permute.xlu0 %6032 }
 0x806   :  { %v6045_v21 = vsel %vm973_vm8, %v6033_v2, %v6037_v32  ;;  %v6047_v30 = vsel %vm973_vm8, %v9271_v52, %v6033_v2  ;;  %6694 = vmatmul.mubr.msk.bf16.vlgmr.msra.gmra.mrb[16].mxu0 %vm1558_vm11, %v7086_v44 }
 0x807   :  { %v6054_v48 = vmul.f32 %v6047_v30, %v7493_v42  ;;  %v6055_v41 = vmul.f32 %v6045_v21, %v7466_v15  ;;  %v6172_v62 = vpop.permute.xlu1 %6171  ;;  %6695 = vmatmul.mubr.msk.bf16.vlgmr.msra.gmra.mrb[16].mxu1 %vm1558_vm11, %v7086_v44  ;;  %6105 = vmatprep.mubr.bf16.mxu0 %v9523_v55 }
 0x808   :  { %6148 = vmatprep.mubr.bf16.mxu1 %v9523_v55 }
 0x809   :  { %v6061_v54 = vpack.c.bf16 %v6054_v48, %v6050_v20  ;;  %v6041_v63 = vpop.permute.xlu0 %6040  ;;  %v6062_v8 = vpack.c.bf16 %v6055_v41, %v6051_v61 }
 0x80a   :  { %v6043_v42 = vsel %vm973_vm8, %v6037_v32, %v6041_v63  ;;  %v6049_v15 = vsel %vm973_vm8, %v6041_v63, %v9271_v52  ;;  %v7087_v32 = vld [vmem:[%s9460_s10 + $0x30] sm:$0xff]   ;;  %v6187_v52 = vsel %vm1134_vm9, %v6168_v36, %v6172_v62 }
 0x80b   :  { %v6056_v11 = vmul.f32 %v6043_v42, %v7496_v46  ;;  %v6057_v51 = vmul.f32 %v6049_v15, %v7469_v16  ;;  %v6176_v53 = vpop.permute.xlu1 %6175  ;;  %6073 = vmatprep.subr.bf16.mxu0 %v6062_v8  ;;  %v6191_v12 = vmul.f32 %v6187_v52, %v7532_v33  ;;  %v9561_v8 = vld [vmem:[#allocation5_spill] sm:$0xff] }
 0x80c   :  { %6074 = vmatpush1.bf16.msra.mxu0 %v6061_v54  ;;  %v6185_v46 = vsel %vm1134_vm9, %v6172_v62, %v6176_v53  ;;  %v9560_v54 = vld [vmem:[#allocation7_spill] sm:$0xff] }
 0x80d   :  { %v6063_v26 = vpack.c.bf16 %v6056_v11, %v6052_v4  ;;  %v6311_v31 = vpop.permute.xlu0 %6310  ;;  %v6064_v28 = vpack.c.bf16 %v6057_v51, %v6053_v40  ;;  %v6192_v24 = vmul.f32 %v6185_v46, %v7505_v0  ;;  %v7089_v11 = vld [vmem:[%s9460_s10 + $0x40] sm:$0xff]  }
 0x80f   :  { %v6180_v58 = vpop.permute.xlu1 %6179  ;;  %6116 = vmatprep.subr.bf16.mxu1 %v6064_v28 }
 0x810   :  { %6117 = vmatpush1.bf16.msra.mxu1 %v6063_v26  ;;  %v6183_v35 = vsel %vm1134_vm9, %v6176_v53, %v6180_v58  ;;  %v6189_v13 = vsel %vm1134_vm9, %v6180_v58, %v6168_v36  ;;  %v9559_v36 = vld [vmem:[#allocation4_spill] sm:$0xff] }
 0x811   :  { %v6174_v16 = vpop.permute.xlu0 %6173  ;;  %v6193_v10 = vmul.f32 %v6183_v35, %v7535_v34  ;;  %v6194_v22 = vmul.f32 %v6189_v13, %v9557_v5  ;;  %v9564_v35 = vld [vmem:[#allocation9_spill] sm:$0xff] }
 0x812   :  { %v6186_v3 = vsel %vm1134_vm9, %v6174_v16, %v6178_v43  ;;  %v6188_v19 = vsel %vm1134_vm9, %v9281_v14, %v6174_v16  ;;  %6699 = vmatmul.mubr.msk.bf16.vlgmr.msra.gmra.mrb[16].mxu0 %vm1558_vm11, %v7087_v32  ;;  %v9562_v16 = vld [vmem:[#allocation8_spill] sm:$0xff] }
 0x813   :  { %v6195_v50 = vmul.f32 %v6188_v19, %v7532_v33  ;;  %v6196_v25 = vmul.f32 %v6186_v3, %v7505_v0  ;;  %v6309_v47 = vpop.permute.xlu1 %6308  ;;  %6700 = vmatmul.mubr.msk.bf16.vlgmr.msra.gmra.mrb[16].mxu1 %vm1558_vm11, %v7087_v32  ;;  %6246 = vmatprep.mubr.bf16.mxu0 %v9523_v55 }
 0x814   :  { %6289 = vmatprep.mubr.bf16.mxu1 %v9523_v55 }
 0x815   :  { %v6202_v6 = vpack.c.bf16 %v6195_v50, %v6191_v12  ;;  %v6182_v27 = vpop.permute.xlu0 %6181  ;;  %v6203_v39 = vpack.c.bf16 %v6196_v25, %v6192_v24  ;;  %v9563_v25 = vld [vmem:[#allocation12_spill] sm:$0xff] }
 0x816   :  { %v6184_v33 = vsel %vm1134_vm9, %v6178_v43, %v6182_v27  ;;  %v6190_v0 = vsel %vm1134_vm9, %v6182_v27, %v9281_v14  ;;  %v9558_v43 = vld [vmem:[#allocation6_spill] sm:$0xff] }
 0x817   :  { %v6197_v17 = vmul.f32 %v6184_v33, %v7535_v34  ;;  %v6198_v60 = vmul.f32 %v6190_v0, %v9557_v5  ;;  %v6313_v38 = vpop.permute.xlu1 %6312  ;;  %6214 = vmatprep.subr.bf16.mxu0 %v6203_v39  ;;  %v9565_v33 = vld [vmem:[#allocation10_spill] sm:$0xff] }
 0x818   :  { %6215 = vmatpush1.bf16.msra.mxu0 %v6202_v6  ;;  %v6328_v14 = vsel %vm1295_vm10, %v6309_v47, %v6313_v38 }
 0x819   :  { %v6204_v59 = vpack.c.bf16 %v6197_v17, %v6193_v10  ;;  %v6319_v37 = vpop.permute.xlu0 %6318  ;;  %v6205_v29 = vpack.c.bf16 %v6198_v60, %v6194_v22  ;;  %v6332_v45 = vmul.f32 %v6328_v14, %v9558_v43  ;;  %v9566_v10 = vld [vmem:[#allocation14_spill] sm:$0xff]  ;;  %v9567_v17 = vld [vmem:[#allocation13_spill] sm:$0xff] }
 0x81b   :  { %v6317_v49 = vpop.permute.xlu1 %6316  ;;  %6257 = vmatprep.subr.bf16.mxu1 %v6205_v29 }
 0x81c   :  { %v6326_v34 = vsel %vm1295_vm10, %v6313_v38, %v6317_v49  ;;  %6258 = vmatpush1.bf16.msra.mxu1 %v6204_v59  ;;  %v9568_v38 = vld [vmem:[#allocation11_spill] sm:$0xff] }
 0x81d   :  { %v6315_v18 = vpop.permute.xlu0 %6314  ;;  %v6333_v1 = vmul.f32 %v6326_v34, %v9559_v36 }
 0x81e   :  { %v6327_v44 = vsel %vm1295_vm10, %v6315_v18, %v6319_v37  ;;  %v6329_v7 = vsel %vm1295_vm10, %v6311_v31, %v6315_v18  ;;  %6704 = vmatmul.mubr.msk.bf16.vlgmr.msra.gmra.mrb[16].mxu0 %vm1558_vm11, %v7088_v23 }
 0x81f   :  { %v6336_v2 = vmul.f32 %v6329_v7, %v9558_v43  ;;  %v6337_v20 = vmul.f32 %v6327_v44, %v9559_v36  ;;  %v6321_v21 = vpop.permute.xlu1 %6320  ;;  %6705 = vmatmul.mubr.msk.bf16.vlgmr.msra.gmra.mrb[16].mxu1 %vm1558_vm11, %v7088_v23  ;;  %6387 = vmatprep.mubr.bf16.mxu0 %v9523_v55 }
 0x820   :  { %v6324_v30 = vsel %vm1295_vm10, %v6317_v49, %v6321_v21  ;;  %v6330_v61 = vsel %vm1295_vm10, %v6321_v21, %v6309_v47  ;;  %6430 = vmatprep.mubr.bf16.mxu1 %v9523_v55 }
 0x821   :  { %v6343_v48 = vpack.c.bf16 %v6336_v2, %v6332_v45  ;;  %v6323_v41 = vpop.permute.xlu0 %6322  ;;  %v6344_v62 = vpack.c.bf16 %v6337_v20, %v6333_v1  ;;  %v6334_v63 = vmul.f32 %v6324_v30, %v9560_v54  ;;  %v6335_v42 = vmul.f32 %v6330_v61, %v9561_v8 }
 0x822   :  { %v6325_v57 = vsel %vm1295_vm10, %v6319_v37, %v6323_v41  ;;  %v6331_v56 = vsel %vm1295_vm10, %v6323_v41, %v6311_v31  ;;  %v9569_v37 = vld [vmem:[#allocation15_spill] sm:$0xff] }
 0x823   :  { %v6338_v15 = vmul.f32 %v6325_v57, %v9560_v54  ;;  %v6339_v4 = vmul.f32 %v6331_v56, %v9561_v8  ;;  %6355 = vmatprep.subr.bf16.mxu0 %v6344_v62 }
 0x824   :  { %6356 = vmatpush1.bf16.msra.mxu0 %v6343_v48 }
 0x825   :  { %v6345_v55 = vpack.c.bf16 %v6338_v15, %v6334_v63  ;;  %v6346_v40 = vpack.c.bf16 %v6339_v4, %v6335_v42 }
 0x827   :  { %6398 = vmatprep.subr.bf16.mxu1 %v6346_v40 }
 0x828   :  { %6399 = vmatpush1.bf16.msra.mxu1 %v6345_v55 }
 0x82a   :  { %6709 = vmatmul.mubr.msk.bf16.vlgmr.msra.gmra.mrb[16].mxu0 %vm1558_vm11, %v7089_v11 }
 0x82b   :  { %6710 = vmatmul.mubr.msk.bf16.vlgmr.msra.gmra.mrb[16].mxu1 %vm1558_vm11, %v7089_v11 }
 0x830   :  { %v6454_v9 = vpop.permute.xlu1 %6453 }
 0x832   :  { %v6459_v51 = vpop.permute.xlu0 %6458 }
 0x8fd   :  { %v6389_v53 = vpop.f32.mrb[16].mxu0 }
 0x8fe   :  { %v6461_v26 = vadd.f32 %v6454_v9, %v6389_v53  ;;  %v6391_v31 = vpop.f32.mrb[17].mxu0  ;;  %v6432_v28 = vpop.f32.mrb[16].mxu1 }
 0x8ff   :  { %v6462_v32 = vadd.f32 %v6454_v9, %v6391_v31  ;;  %v6463_v52 = vadd.f32 %v6454_v9, %v6432_v28  ;;  %v6393_v58 = vpop.f32.mrb[18].mxu0  ;;  %v6434_v46 = vpop.f32.mrb[17].mxu1 }
 0x900   :  { %v6469_v12 = vadd.f32 %v6461_v26, %v9562_v16  ;;  %v6465_v3 = vadd.f32 %v6459_v51, %v6393_v58  ;;  %v6464_v19 = vadd.f32 %v6454_v9, %v6434_v46  ;;  %v6395_v24 = vpop.f32.mrb[19].mxu0  ;;  %v6436_v50 = vpop.f32.mrb[18].mxu1 }
 0x901   :  { %v6470_v47 = vadd.f32 %v6462_v32, %v9563_v25  ;;  %v6471_v13 = vadd.f32 %v6463_v52, %v9564_v35  ;;  %v6466_v6 = vadd.f32 %v6459_v51, %v6395_v24  ;;  %v6467_v27 = vadd.f32 %v6459_v51, %v6436_v50  ;;  %v6438_v39 = vpop.f32.mrb[19].mxu1 }
 0x902   :  { %6477 = vst [vmem:[%s9462_s12] sm:$0xff] %v6469_v12  ;;  %v6473_v0 = vadd.f32 %v6465_v3, %v9565_v33  ;;  %v6472_v5 = vadd.f32 %v6464_v19, %v9566_v10  ;;  %v6468_v22 = vadd.f32 %v6459_v51, %v6438_v39 }
 0x903   :  { %6478 = vst [vmem:[%s9462_s12 + $0x8] sm:$0xff] %v6470_v47  ;;  %6479 = vst [vmem:[%s9462_s12 + $0x10] sm:$0xff] %v6471_v13  ;;  %v6474_v60 = vadd.f32 %v6466_v6, %v9567_v17  ;;  %v6475_v59 = vadd.f32 %v6467_v27, %v9568_v38 }
 0x904   :  { %6481 = vst [vmem:[%s9462_s12 + $0x20] sm:$0xff] %v6473_v0  ;;  %6480 = vst [vmem:[%s9462_s12 + $0x18] sm:$0xff] %v6472_v5  ;;  %v6476_v29 = vadd.f32 %v6468_v22, %v9569_v37 }
 0x905   :  { %6482 = vst [vmem:[%s9462_s12 + $0x28] sm:$0xff] %v6474_v60  ;;  %6483 = vst [vmem:[%s9462_s12 + $0x30] sm:$0xff] %v6475_v59 }
 0x906   :  { %6484 = vst [vmem:[%s9462_s12 + $0x38] sm:$0xff] %v6476_v29 }

// kernel: podnet_resnet_cifar_forward.5
= control target key start
LH: loop header
LB: loop body
LE: loop exit
PB: predicated region body
PF: predicated region fallthrough
CT: control target
= control target key end

     0   :  { %v6117_v1 = vmov 0   ;;  %vm307_vm0 = vcmask 261120   ;;  %s6119_s16 = smov 31   ;;  %vm458_vm1 = vcmask 1047808   ;;  %s6120_s21 = smov 1   ;;  %vm602_vm2 = vcmask 523264   ;;  %s7697_s0 = inlined_call_operand.vmem [shape: bf16[288,32], index: 0, kind: input, shape index: {}]   ;;  %s7698_s3 = inlined_call_operand.vmem [shape: bf16[64,288], index: 3, kind: input, shape index: {}]   ;;  %s7699_s4 = inlined_call_operand.vmem [shape: f32[64,1], index: 4, kind: input, shape index: {}]   ;;  %s7700_s2 = inlined_call_operand.vmem [shape: f32[9,32], index: 2, kind: input, shape index: {}]   ;;  %s7701_s5 = inlined_call_operand.vmem [shape: bf16[9,64,64], index: 5, kind: input, shape index: {}]   ;;  %s7702_s6 = inlined_call_operand.vmem [shape: f32[64,1], index: 6, kind: input, shape index: {}]   ;;  %s7703_s1 = inlined_call_operand.vmem [shape: f32[64,32], index: 1, kind: input, shape index: {}]   ;;  %s7704_s7 = inlined_call_operand.vmem [shape: bf16[9,64,64], index: 7, kind: input, shape index: {}]   ;;  %s7705_s8 = inlined_call_operand.vmem [shape: f32[64,1], index: 8, kind: input, shape index: {}]   ;;  %s7706_s9 = inlined_call_operand.vmem [shape: bf16[9,64,64], index: 9, kind: input, shape index: {}]   ;;  %s7707_s10 = inlined_call_operand.vmem [shape: f32[64,1], index: 10, kind: input, shape index: {}]   ;;  %s7708_s11 = inlined_call_operand.vmem [shape: f32[64,32], index: 11, kind: output, shape index: {}]  }
   0x1   :  { %v5975_v0 = vld [vmem:[%s7697_s0 + $0x40] sm:$0xff]   ;;  %5973 = vset.pattern.permute.xlu0 %v6117_v1  ;;  %5974 = vset.pattern.permute.xlu1 %v6117_v1  ;;  %v5977_v3 = vld [vmem:[%s7697_s0 + $0x48] sm:$0xff]   ;;  %v5979_v5 = vld [vmem:[%s7697_s0 + $0x50] sm:$0xff]   ;;  %s6121_s24 = smov 28   ;;  %s6122_s25 = smov 3  }
   0x2   :  { %v5976_v2 = vld [vmem:[%s7697_s0] sm:$0xff]   ;;  %5057 = vmatprep.subr.bf16.mxu0 %v5975_v0  ;;  %v5978_v4 = vld [vmem:[%s7697_s0 + $0x8] sm:$0xff]   ;;  %v5980_v6 = vld [vmem:[%s7697_s0 + $0x10] sm:$0xff]   ;;  %s6123_s28 = smov 27   ;;  %s6124_s29 = smov 97  }
   0x3   :  { %5058 = vmatpush3.bf16.msra.mxu0 %v5976_v2  ;;  %v5981_v7 = vld [vmem:[%s7697_s0 + $0x58] sm:$0xff]   ;;  %v5983_v9 = vld [vmem:[%s7697_s0 + $0x60] sm:$0xff]   ;;  %v5985_v12 = vld [vmem:[%s7697_s0 + $0x68] sm:$0xff]   ;;  %s6125_s12 = smov 4   ;;  %s6127_s19 = smov 127  }
   0x4   :  { %5059 = vmatprep.subr.bf16.mxu0 %v5977_v3  ;;  %v5982_v8 = vld [vmem:[%s7697_s0 + $0x18] sm:$0xff]   ;;  %v5984_v10 = vld [vmem:[%s7697_s0 + $0x20] sm:$0xff]   ;;  %v5986_v13 = vld [vmem:[%s7697_s0 + $0x28] sm:$0xff]   ;;  %s6129_s20 = smov 100   ;;  %s6130_s23 = smov 125  }
   0x5   :  { %v5990_v11 = vld [vmem:[%s7697_s0 + $0x80] sm:$0xff]   ;;  %v5987_v14 = vld [vmem:[%s7697_s0 + $0x70] sm:$0xff]   ;;  %v5995_v16 = vld [vmem:[%s7697_s0 + $0x88] sm:$0xff]   ;;  %s6133_s26 = smov 99  }
   0x6   :  { %5319 = vmatprep.subr.bf16.mxu1 %v5990_v11  ;;  %v5994_v15 = vld [vmem:[%s7698_s3 + $0x4] ss:$12 sps:$4 sm:$0xff]   ;;  %v5996_v17 = vld [vmem:[%s7698_s3 + $0x8] ss:$12 sps:$4 sm:$0xff]   ;;  %v5997_v18 = vld [vmem:[%s7698_s3 + $0x20] ss:$12 sps:$4 sm:$0xff]  }
   0x7   :  { %5060 = vmatpush3.bf16.msra.mxu0 %v5978_v4  ;;  %5320 = vmatpush3.bf16.msra.mxu1 %v5990_v11  ;;  %v5988_v19 = vld [vmem:[%s7697_s0 + $0x30] sm:$0xff]   ;;  %v5989_v20 = vld [vmem:[%s7697_s0 + $0x78] sm:$0xff]   ;;  %v91_v23 = vld [vmem:[%s7699_s4] sm:$0xff] }
   0x8   :  { %5061 = vmatprep.subr.bf16.mxu0 %v5979_v5  ;;  %352 = vmatprep.mubr.bf16.mxu0 %v5994_v15  ;;  %v6004_v21 = vld [vmem:[%s7698_s3 + $0x38] ss:$12 sps:$4 sm:$0xff]   ;;  %v93_v24 = vld [vmem:[%s7699_s4 + $0x10] sm:$0xff]  ;;  %v92_v26 = vld [vmem:[%s7699_s4 + $0x8] sm:$0xff] }
   0x9   :  { %5321 = vmatprep.subr.bf16.mxu1 %v5995_v16  ;;  %5323 = vmatprep.mubr.msk.bf16.mxu1 %vm307_vm0, %v5996_v17  ;;  %v5991_v22 = vld [vmem:[%s7697_s0 + $0x38] sm:$0xff]   ;;  %v5992_v27 = vld [vmem:[%s7698_s3] ss:$12 sps:$4 sm:$0xff]   ;;  %v97_v32 = vld [vmem:[%s7699_s4 + $0x30] sm:$0xff] }
   0xa   :  { %101 = vperm.xlu0 %5973, %v91_v23   ;;  %v6005_v25 = vld [vmem:[%s7698_s3 + $0x50] ss:$12 sps:$4 sm:$0xff]   ;;  %111 = vperm.xlu1 %5974, %v93_v24   ;;  %v95_v30 = vld [vmem:[%s7699_s4 + $0x20] sm:$0xff]  ;;  %v96_v31 = vld [vmem:[%s7699_s4 + $0x28] sm:$0xff] }
   0xb   :  { %5062 = vmatpush3.bf16.msra.mxu0 %v5980_v6  ;;  %5322 = vmatpush3.bf16.msra.mxu1 %v5995_v16  ;;  %v94_v28 = vld [vmem:[%s7699_s4 + $0x18] sm:$0xff]  ;;  %v6001_v35 = vld [vmem:[%s7698_s3 + $0x34] ss:$12 sps:$4 sm:$0xff]  }
   0xc   :  { %5063 = vmatprep.subr.bf16.mxu0 %v5981_v7  ;;  %v5998_v29 = vld [vmem:[%s7698_s3 + $0x1c] ss:$12 sps:$4 sm:$0xff]   ;;  %v6000_v33 = vld [vmem:[%s7698_s3 + $0x18] ss:$12 sps:$4 sm:$0xff]  }
   0xd   :  { %v98_v34 = vld [vmem:[%s7699_s4 + $0x38] sm:$0xff]  ;;  %v6008_v38 = vld [vmem:[%s7698_s3 + $0x48] ss:$12 sps:$4 sm:$0xff]  }
   0xe   :  { %5324 = vmatmul.mubr.msk.bf16.vlgmr.msra.gmra.mrb[0].mxu1 %vm307_vm0, %v5997_v18  ;;  %106 = vperm.xlu0 %5973, %v92_v26   ;;  %v6003_v36 = vld [vmem:[%s7698_s3 + $0x30] ss:$12 sps:$4 sm:$0xff]   ;;  %v6006_v37 = vld [vmem:[%s7698_s3 + $0x4c] ss:$12 sps:$4 sm:$0xff]   ;;  %s6118_s3 = smov 32  }
   0xf   :  { %5064 = vmatpush3.bf16.msra.mxu0 %v5982_v8  ;;  %5327 = vmatprep.mubr.msk.bf16.mxu1 %vm307_vm0, %v6004_v21 }
  0x10   :  { %5065 = vmatprep.subr.bf16.mxu0 %v5983_v9  ;;  %116 = vperm.xlu1 %5974, %v94_v28  }
  0x12   :  { %121 = vperm.xlu0 %5973, %v95_v30  }
  0x13   :  { %5066 = vmatpush3.bf16.msra.mxu0 %v5984_v10 }
  0x14   :  { %5067 = vmatprep.subr.bf16.mxu0 %v5985_v12  ;;  %126 = vperm.xlu1 %5974, %v96_v31  }
  0x16   :  { %5328 = vmatmul.mubr.msk.bf16.gmra.mrb[4].mxu1 %vm307_vm0, %v6005_v25  ;;  %131 = vperm.xlu0 %5973, %v97_v32  }
  0x17   :  { %5068 = vmatpush3.bf16.msra.mxu0 %v5986_v13 }
  0x18   :  { %5069 = vmatprep.subr.bf16.mxu0 %v5987_v14  ;;  %136 = vperm.xlu1 %5974, %v98_v34  }
  0x1b   :  { %5070 = vmatpush3.bf16.msra.mxu0 %v5988_v19 }
  0x1c   :  { %5071 = vmatprep.subr.bf16.mxu0 %v5989_v20 }
  0x1f   :  { %5072 = vmatpush3.bf16.msra.mxu0 %v5991_v22 }
  0x22   :  { %353 = vmatmul.mubr.bf16.vlgmr.msra.gmra.mrb[0].mxu0 %v5992_v27 }
  0x23   :  { %360 = vmatprep.mubr.bf16.mxu0 %v5998_v29 }
  0x2a   :  { %361 = vmatmul.mubr.bf16.gmra.mrb[4].mxu0 %v6000_v33 }
  0x2b   :  { %368 = vmatprep.mubr.bf16.mxu0 %v6001_v35 }
  0x32   :  { %369 = vmatmul.mubr.bf16.gmra.mrb[8].mxu0 %v6003_v36 }
  0x33   :  { %376 = vmatprep.mubr.bf16.mxu0 %v6006_v37 }
  0x3a   :  { %377 = vmatmul.mubr.bf16.gmra.mrb[12].mxu0 %v6008_v38 }
  0x89   :  { %v102_v43 = vpop.permute.xlu0 %101  ;;  %v112_v58 = vpop.permute.xlu1 %111 }
  0x8d   :  { %v107_v55 = vpop.permute.xlu0 %106 }
  0x8f   :  { %v117_v5 = vpop.permute.xlu1 %116 }
  0x91   :  { %v122_v15 = vpop.permute.xlu0 %121 }
  0x93   :  { %v127_v19 = vpop.permute.xlu1 %126 }
  0x95   :  { %v132_v29 = vpop.permute.xlu0 %131 }
  0x97   :  { %v137_v33 = vpop.permute.xlu1 %136 }
  0xe1   :  { %v5325_v39 = vpop.f32.mrb[0].mxu1 }
  0xe2   :  { %v419_v40 = vpop.f32.mrb[1].mxu1 }
  0xe3   :  { %v5326_v41 = vpop.f32.mrb[2].mxu1 }
  0xe4   :  { %v422_v42 = vpop.f32.mrb[3].mxu1 }
  0xe9   :  { %v5329_v44 = vpop.f32.mrb[4].mxu1 }
  0xea   :  { %v435_v46 = vpop.f32.mrb[5].mxu1 }
  0xeb   :  { %v5330_v48 = vpop.f32.mrb[6].mxu1 }
  0xec   :  { %v438_v51 = vpop.f32.mrb[7].mxu1 }
  0xf5   :  { %v5073_v45 = vpop.f32.mrb[0].mxu0 }
  0xf6   :  { %v5074_v47 = vpop.f32.mrb[1].mxu0 }
  0xf7   :  { %v5075_v49 = vadd.f32 %v5074_v47, %v5073_v45  ;;  %v5076_v50 = vpop.f32.mrb[2].mxu0 }
  0xf8   :  { %v5077_v52 = vpop.f32.mrb[3].mxu0 }
  0xf9   :  { %v5078_v53 = vadd.f32 %v5077_v52, %v5076_v50  ;;  %v355_v54 = vadd.f32 %v5075_v49, %v102_v43 }
  0xfb   :  { %v420_v56 = vadd.f32 %v419_v40, %v355_v54  ;;  %v358_v57 = vadd.f32 %v5078_v53, %v107_v55 }
  0xfd   :  { %v6313_v59 = vmax.f32 %v420_v56, 0.0  ;;  %v423_v60 = vadd.f32 %v422_v42, %v358_v57  ;;  %v5079_v61 = vpop.f32.mrb[4].mxu0  ;;  %v4717_v56 = vld [vmem:[%s7700_s2 + $0x5] ss:$0 sm:$0xff]  ;;  %v4642_v57 = vld [vmem:[%s7700_s2 + $0x1] ss:$0 sm:$0xff] }
  0xfe   :  { %v5080_v62 = vpop.f32.mrb[5].mxu0 }
  0xff   :  { %v6315_v63 = vmax.f32 %v423_v60, 0.0  ;;  %v5081_v0 = vadd.f32 %v5080_v62, %v5079_v61  ;;  %v5082_v1 = vpop.f32.mrb[6].mxu0  ;;  %459 = vrot.lane.b32.xlu0 %v6313_v59, %s6118_s3  ;;  %v4641_v60 = vld [vmem:[%s7700_s2] ss:$0 sm:$0xff] }
 0x100   :  { %v5083_v2 = vpop.f32.mrb[7].mxu0 }
 0x101   :  { %v363_v3 = vadd.f32 %v5081_v0, %v112_v58  ;;  %v5084_v4 = vadd.f32 %v5083_v2, %v5082_v1  ;;  %462 = vrot.lane.b32.xlu1 %v6315_v63, %s6118_s3  ;;  %v4734_v58 = vld [vmem:[%s7700_s2 + $0x6] ss:$0 sm:$0xff] }
 0x103   :  { %v428_v6 = vadd.f32 %v5325_v39, %v363_v3  ;;  %v366_v7 = vadd.f32 %v5084_v4, %v117_v5  ;;  %v4684_v39 = vld [vmem:[%s7700_s2 + $0x3] ss:$0 sm:$0xff] }
 0x105   :  { %v6321_v8 = vmax.f32 %v428_v6, 0.0  ;;  %v431_v9 = vadd.f32 %v5326_v41, %v366_v7  ;;  %v5085_v10 = vpop.f32.mrb[8].mxu0 }
 0x106   :  { %v5086_v11 = vpop.f32.mrb[9].mxu0 }
 0x107   :  { %v6323_v12 = vmax.f32 %v431_v9, 0.0  ;;  %v5087_v13 = vadd.f32 %v5086_v11, %v5085_v10  ;;  %v5088_v14 = vpop.f32.mrb[10].mxu0  ;;  %465 = vrot.lane.b32.xlu0 %v6321_v8, %s6118_s3  ;;  %v4751_v9 = vld [vmem:[%s7700_s2 + $0x7] ss:$0 sm:$0xff] }
 0x108   :  { %v5089_v16 = vpop.f32.mrb[11].mxu0 }
 0x109   :  { %v5090_v17 = vadd.f32 %v5089_v16, %v5088_v14  ;;  %468 = vrot.lane.b32.xlu1 %v6323_v12, %s6118_s3  ;;  %v371_v18 = vadd.f32 %v5087_v13, %v122_v15 }
 0x10b   :  { %v436_v20 = vadd.f32 %v435_v46, %v371_v18  ;;  %v374_v21 = vadd.f32 %v5090_v17, %v127_v19 }
 0x10d   :  { %v6329_v22 = vmax.f32 %v436_v20, 0.0  ;;  %v439_v23 = vadd.f32 %v438_v51, %v374_v21  ;;  %v5091_v24 = vpop.f32.mrb[12].mxu0 }
 0x10e   :  { %v5092_v25 = vpop.f32.mrb[13].mxu0 }
 0x10f   :  { %v6331_v26 = vmax.f32 %v439_v23, 0.0  ;;  %v5093_v27 = vadd.f32 %v5092_v25, %v5091_v24  ;;  %v5094_v28 = vpop.f32.mrb[14].mxu0  ;;  %471 = vrot.lane.b32.xlu0 %v6329_v22, %s6118_s3  ;;  %v4667_v24 = vld [vmem:[%s7700_s2 + $0x2] ss:$0 sm:$0xff] }
 0x110   :  { %v5095_v30 = vpop.f32.mrb[15].mxu0  ;;  %v6009_v25 = vld [vmem:[%s7701_s5 + $0x60] sm:$0xff]  }
 0x111   :  { %v379_v31 = vadd.f32 %v5093_v27, %v132_v29  ;;  %v5096_v32 = vadd.f32 %v5095_v30, %v5094_v28  ;;  %474 = vrot.lane.b32.xlu1 %v6331_v26, %s6118_s3  ;;  %5387 = vmatprep.mubr.msk.bf16.mxu1 %vm602_vm2, %v6009_v25 }
 0x113   :  { %v444_v34 = vadd.f32 %v5329_v44, %v379_v31  ;;  %v382_v35 = vadd.f32 %v5096_v32, %v137_v33 }
 0x115   :  { %v6337_v36 = vmax.f32 %v444_v34, 0.0  ;;  %v447_v37 = vadd.f32 %v5330_v48, %v382_v35 }
 0x117   :  { %v6339_v38 = vmax.f32 %v447_v37, 0.0  ;;  %477 = vrot.lane.b32.xlu0 %v6337_v36, %s6118_s3 }
 0x119   :  { %480 = vrot.lane.b32.xlu1 %v6339_v38, %s6118_s3 }
 0x11b   :  { %950 = vrot.lane.b32.xlu0 %v4684_v39, %s6119_s16  ;;  %s6126_s16 = smov 29  }
 0x171   :  { %v460_v40 = vpop.permute.xlu0 %459 }
 0x172   :  { %v461_v41 = vsel %vm458_vm1, %v460_v40, %v6313_v59  ;;  %v4768_v40 = vld [vmem:[%s7700_s2 + $0x8] ss:$0 sm:$0xff]  ;;  %s6128_s2 = smov 5  }
 0x173   :  { %v463_v42 = vpop.permute.xlu1 %462  ;;  %483 = vrot.lane.b32.xlu0 %v461_v41, %s6118_s3 }
 0x174   :  { %v464_v43 = vsel %vm458_vm1, %v463_v42, %v6315_v63 }
 0x175   :  { %485 = vrot.lane.b32.xlu1 %v464_v43, %s6118_s3 }
 0x179   :  { %v466_v44 = vpop.permute.xlu0 %465 }
 0x17a   :  { %v467_v45 = vsel %vm458_vm1, %v466_v44, %v6321_v8 }
 0x17b   :  { %v469_v46 = vpop.permute.xlu1 %468  ;;  %487 = vrot.lane.b32.xlu1 %v467_v45, %s6118_s3 }
 0x17c   :  { %v470_v47 = vsel %vm458_vm1, %v469_v46, %v6323_v12 }
 0x17d   :  { %489 = vrot.lane.b32.xlu0 %v470_v47, %s6118_s3 }
 0x181   :  { %v472_v48 = vpop.permute.xlu0 %471 }
 0x182   :  { %v473_v49 = vsel %vm458_vm1, %v472_v48, %v6329_v22 }
 0x183   :  { %v475_v50 = vpop.permute.xlu1 %474  ;;  %491 = vrot.lane.b32.xlu1 %v473_v49, %s6118_s3 }
 0x184   :  { %v476_v51 = vsel %vm458_vm1, %v475_v50, %v6331_v26 }
 0x185   :  { %493 = vrot.lane.b32.xlu0 %v476_v51, %s6118_s3 }
 0x189   :  { %v478_v52 = vpop.permute.xlu0 %477 }
 0x18a   :  { %v479_v53 = vsel %vm458_vm1, %v478_v52, %v6337_v36 }
 0x18b   :  { %v481_v54 = vpop.permute.xlu1 %480  ;;  %495 = vrot.lane.b32.xlu1 %v479_v53, %s6118_s3 }
 0x18c   :  { %v482_v55 = vsel %vm458_vm1, %v481_v54, %v6339_v38 }
 0x18d   :  { %497 = vrot.lane.b32.xlu0 %v482_v55, %s6118_s3  ;;  %v6384_v61 = vpop.permute.xlu0 %950 }
 0x18f   :  { %1219 = vrot.lane.b32.xlu1 %v4717_v56, %s6120_s21 }
 0x191   :  { %542 = vrot.lane.b32.xlu0 %v4642_v57, %s6121_s24  ;;  %s6131_s24 = smov 101  }
 0x193   :  { %1370 = vrot.lane.b32.xlu1 %v4734_v58, %s6122_s25  ;;  %s6132_s25 = smov 124  }
 0x197   :  { %513 = vrot.lane.b32.xlu1 %v4641_v60, %s6123_s28 }
 0x1e5   :  { %v484_v62 = vpop.permute.xlu0 %483 }
 0x1e6   :  { %v6388_v0 = vsel %vm458_vm1, %v484_v62, %v6313_v59 }
 0x1e7   :  { %v486_v1 = vpop.permute.xlu1 %485  ;;  %v953_v3 = vmul.f32 %v6384_v61, %v6388_v0 }
 0x1e8   :  { %v6392_v2 = vsel %vm458_vm1, %v486_v1, %v6315_v63 }
 0x1e9   :  { %v954_v4 = vmul.f32 %v6384_v61, %v6392_v2 }
 0x1eb   :  { %v970_v5 = vpack.c.bf16 %v954_v4, %v953_v3  ;;  %v6015_v3 = vld [vmem:[%s7701_s5 + $0x20] sm:$0xff]  }
 0x1ec   :  { %5339 = vmatprep.mubr.msk.bf16.mxu0 %vm602_vm2, %v6015_v3 }
 0x1ed   :  { %v488_v6 = vpop.permute.xlu1 %487  ;;  %998 = vrot.lane.b32.xlu0 %v970_v5, %s6124_s29 }
 0x1ee   :  { %v6401_v7 = vsel %vm458_vm1, %v488_v6, %v6321_v8 }
 0x1ef   :  { %v490_v10 = vpop.permute.xlu0 %489  ;;  %v955_v13 = vmul.f32 %v6384_v61, %v6401_v7 }
 0x1f0   :  { %v6408_v11 = vsel %vm458_vm1, %v490_v10, %v6323_v12 }
 0x1f1   :  { %1521 = vrot.lane.b32.xlu0 %v4751_v9, %s6125_s12  ;;  %v956_v14 = vmul.f32 %v6384_v61, %v6408_v11  ;;  %s6134_s12 = smov 123  }
 0x1f3   :  { %v971_v15 = vpack.c.bf16 %v956_v14, %v955_v13 }
 0x1f5   :  { %v492_v16 = vpop.permute.xlu1 %491  ;;  %1000 = vrot.lane.b32.xlu1 %v971_v15, %s6124_s29 }
 0x1f6   :  { %v6417_v17 = vsel %vm458_vm1, %v492_v16, %v6329_v22 }
 0x1f7   :  { %v494_v18 = vpop.permute.xlu0 %493  ;;  %v957_v20 = vmul.f32 %v6384_v61, %v6417_v17 }
 0x1f8   :  { %v6421_v19 = vsel %vm458_vm1, %v494_v18, %v6331_v26 }
 0x1f9   :  { %v958_v21 = vmul.f32 %v6384_v61, %v6421_v19 }
 0x1fb   :  { %v972_v23 = vpack.c.bf16 %v958_v21, %v957_v20 }
 0x1fd   :  { %v496_v27 = vpop.permute.xlu1 %495  ;;  %1002 = vrot.lane.b32.xlu0 %v972_v23, %s6124_s29 }
 0x1fe   :  { %v6436_v28 = vsel %vm458_vm1, %v496_v27, %v6337_v36 }
 0x1ff   :  { %v498_v29 = vpop.permute.xlu0 %497  ;;  %v959_v32 = vmul.f32 %v6384_v61, %v6436_v28 }
 0x200   :  { %v6441_v30 = vsel %vm458_vm1, %v498_v29, %v6339_v38 }
 0x201   :  { %v6443_v31 = vpop.permute.xlu1 %1219  ;;  %799 = vrot.lane.b32.xlu0 %v4667_v24, %s6126_s16  ;;  %v960_v33 = vmul.f32 %v6384_v61, %v6441_v30 }
 0x202   :  { %v1222_v34 = vmul.f32 %v6443_v31, %v6388_v0  ;;  %v1223_v35 = vmul.f32 %v6443_v31, %v6392_v2  ;;  %v1226_v41 = vmul.f32 %v6443_v31, %v6417_v17  ;;  %v1227_v42 = vmul.f32 %v6443_v31, %v6421_v19 }
 0x203   :  { %v973_v37 = vpack.c.bf16 %v960_v33, %v959_v32  ;;  %v6460_v43 = vpop.permute.xlu0 %542  ;;  %v1224_v44 = vmul.f32 %v6443_v31, %v6401_v7  ;;  %v1225_v45 = vmul.f32 %v6443_v31, %v6408_v11  ;;  %v1228_v50 = vmul.f32 %v6443_v31, %v6436_v28 }
 0x204   :  { %v1239_v39 = vpack.c.bf16 %v1223_v35, %v1222_v34  ;;  %v1241_v46 = vpack.c.bf16 %v1227_v42, %v1226_v41  ;;  %v545_v47 = vmul.f32 %v6460_v43, %v6388_v0  ;;  %v546_v48 = vmul.f32 %v6460_v43, %v6392_v2 }
 0x205   :  { %1004 = vrot.lane.b32.xlu1 %v973_v37, %s6124_s29  ;;  %v1240_v49 = vpack.c.bf16 %v1225_v45, %v1224_v44  ;;  %v1229_v51 = vmul.f32 %v6443_v31, %v6441_v30  ;;  %v6477_v52 = vpop.permute.xlu1 %1370  ;;  %v547_v54 = vmul.f32 %v6460_v43, %v6401_v7  ;;  %v548_v55 = vmul.f32 %v6460_v43, %v6408_v11 }
 0x206   :  { %1267 = vrot.lane.b32.xlu0 %v1239_v39, %s6127_s19  ;;  %v562_v53 = vpack.c.bf16 %v546_v48, %v545_v47  ;;  %v1373_v57 = vmul.f32 %v6477_v52, %v6388_v0  ;;  %v1374_v58 = vmul.f32 %v6477_v52, %v6392_v2  ;;  %v549_v62 = vmul.f32 %v6460_v43, %v6417_v17 }
 0x207   :  { %v1242_v56 = vpack.c.bf16 %v1229_v51, %v1228_v50  ;;  %v563_v60 = vpack.c.bf16 %v548_v55, %v547_v54  ;;  %v550_v1 = vmul.f32 %v6460_v43, %v6421_v19  ;;  %v1375_v5 = vmul.f32 %v6477_v52, %v6401_v7 }
 0x208   :  { %v1390_v4 = vpack.c.bf16 %v1374_v58, %v1373_v57  ;;  %v1376_v6 = vmul.f32 %v6477_v52, %v6408_v11  ;;  %v551_v10 = vmul.f32 %v6460_v43, %v6436_v28  ;;  %v552_v13 = vmul.f32 %v6460_v43, %v6441_v30 }
 0x209   :  { %1672 = vrot.lane.b32.xlu1 %v4768_v40, %s6128_s2  ;;  %v564_v9 = vpack.c.bf16 %v550_v1, %v549_v62  ;;  %v6507_v14 = vpop.permute.xlu1 %513  ;;  %v1377_v16 = vmul.f32 %v6477_v52, %v6417_v17  ;;  %v1378_v18 = vmul.f32 %v6477_v52, %v6421_v19  ;;  %v1379_v25 = vmul.f32 %v6477_v52, %v6436_v28 }
 0x20a   :  { %1271 = vrot.lane.b32.xlu0 %v1241_v46, %s6127_s19  ;;  %v1391_v15 = vpack.c.bf16 %v1376_v6, %v1375_v5  ;;  %v565_v20 = vpack.c.bf16 %v552_v13, %v551_v10  ;;  %v516_v21 = vmul.f32 %v6507_v14, %v6388_v0  ;;  %v517_v23 = vmul.f32 %v6507_v14, %v6392_v2 }
 0x20b   :  { %v1392_v24 = vpack.c.bf16 %v1378_v18, %v1377_v16  ;;  %v1380_v27 = vmul.f32 %v6477_v52, %v6441_v30  ;;  %v518_v32 = vmul.f32 %v6507_v14, %v6401_v7  ;;  %v519_v33 = vmul.f32 %v6507_v14, %v6408_v11  ;;  %v6010_v18 = vld [vmem:[%s7701_s5 + $0x68] sm:$0xff]  }
 0x20c   :  { %v532_v29 = vpack.c.bf16 %v517_v23, %v516_v21  ;;  %v520_v37 = vmul.f32 %v6507_v14, %v6417_v17  ;;  %v521_v39 = vmul.f32 %v6507_v14, %v6421_v19  ;;  %v522_v41 = vmul.f32 %v6507_v14, %v6436_v28 }
 0x20d   :  { %1269 = vrot.lane.b32.xlu1 %v1240_v49, %s6127_s19  ;;  %v1393_v34 = vpack.c.bf16 %v1380_v27, %v1379_v25  ;;  %v533_v35 = vpack.c.bf16 %v519_v33, %v518_v32  ;;  %v523_v42 = vmul.f32 %v6507_v14, %v6441_v30  ;;  %v1104_v16 = vpack.c.bf16 %v6315_v63, %v6313_v59 }
 0x20e   :  { %590 = vrot.lane.b32.xlu0 %v562_v53, %s6129_s20  ;;  %v534_v40 = vpack.c.bf16 %v521_v39, %v520_v37  ;;  %v1105_v63 = vpack.c.bf16 %v6323_v12, %v6321_v8  ;;  %v6012_v39 = vld [vmem:[%s7701_s5 + $0x78] sm:$0xff]  }
 0x20f   :  { %v535_v44 = vpack.c.bf16 %v523_v42, %v522_v41  ;;  %v1107_v41 = vpack.c.bf16 %v6339_v38, %v6337_v36  ;;  %v1819_v38 = vld [vmem:[%s7702_s6 + $0x10] sm:$0xff] }
 0x211   :  { %1273 = vrot.lane.b32.xlu1 %v1242_v56, %s6127_s19 }
 0x212   :  { %592 = vrot.lane.b32.xlu0 %v563_v60, %s6129_s20 }
 0x215   :  { %1418 = vrot.lane.b32.xlu1 %v1390_v4, %s6130_s23 }
 0x216   :  { %594 = vrot.lane.b32.xlu0 %v564_v9, %s6129_s20 }
 0x219   :  { %1420 = vrot.lane.b32.xlu1 %v1391_v15, %s6130_s23 }
 0x21a   :  { %596 = vrot.lane.b32.xlu0 %v565_v20, %s6129_s20  ;;  %v6011_v20 = vld [vmem:[%s7701_s5 + $0x70] sm:$0xff]  }
 0x21d   :  { %1422 = vrot.lane.b32.xlu1 %v1392_v24, %s6130_s23 }
 0x21e   :  { %704 = vrot.lane.b32.xlu0 %v532_v29, %s6131_s24 }
 0x221   :  { %1424 = vrot.lane.b32.xlu1 %v1393_v34, %s6130_s23 }
 0x222   :  { %706 = vrot.lane.b32.xlu0 %v533_v35, %s6131_s24 }
 0x226   :  { %708 = vrot.lane.b32.xlu0 %v534_v40, %s6131_s24 }
 0x22a   :  { %710 = vrot.lane.b32.xlu0 %v535_v44, %s6131_s24 }
 0x25f   :  { %v999_v45 = vpop.permute.xlu0 %998 }
 0x260   :  { %5379 = vmatprep.subr.bf16.mxu1 %v999_v45 }
 0x261   :  { %5380 = vmatpush3.bf16.msra.mxu1 %v999_v45 }
 0x263   :  { %v6543_v46 = vpop.permute.xlu0 %1521 }
 0x264   :  { %v1524_v47 = vmul.f32 %v6543_v46, %v6388_v0  ;;  %v1525_v48 = vmul.f32 %v6543_v46, %v6392_v2  ;;  %v1526_v50 = vmul.f32 %v6543_v46, %v6401_v7  ;;  %v1527_v51 = vmul.f32 %v6543_v46, %v6408_v11 }
 0x265   :  { %v1528_v55 = vmul.f32 %v6543_v46, %v6417_v17  ;;  %v1529_v56 = vmul.f32 %v6543_v46, %v6421_v19  ;;  %v1530_v58 = vmul.f32 %v6543_v46, %v6436_v28  ;;  %v1531_v60 = vmul.f32 %v6543_v46, %v6441_v30 }
 0x266   :  { %v1541_v49 = vpack.c.bf16 %v1525_v48, %v1524_v47  ;;  %v1542_v54 = vpack.c.bf16 %v1527_v51, %v1526_v50  ;;  %v6017_v47 = vld [vmem:[%s7701_s5 + $0x90] sm:$0xff]   ;;  %v1821_v50 = vld [vmem:[%s7702_s6 + $0x20] sm:$0xff]  ;;  %v6016_v51 = vld [vmem:[%s7701_s5 + $0x28] sm:$0xff]  }
 0x267   :  { %v1001_v53 = vpop.permute.xlu1 %1000  ;;  %v1543_v57 = vpack.c.bf16 %v1529_v56, %v1528_v55  ;;  %v1544_v1 = vpack.c.bf16 %v1531_v60, %v1530_v58  ;;  %v1820_v56 = vld [vmem:[%s7702_s6 + $0x18] sm:$0xff]  ;;  %v6019_v60 = vld [vmem:[%s7701_s5 + $0xa0] sm:$0xff]  }
 0x268   :  { %5381 = vmatprep.subr.bf16.mxu1 %v1001_v53  ;;  %1569 = vrot.lane.b32.xlu1 %v1541_v49, %s6132_s25  ;;  %v1818_v49 = vld [vmem:[%s7702_s6 + $0x8] sm:$0xff]  ;;  %v6018_v58 = vld [vmem:[%s7701_s5 + $0x98] sm:$0xff]  }
 0x269   :  { %5382 = vmatpush3.bf16.msra.mxu1 %v1001_v53 }
 0x26c   :  { %1571 = vrot.lane.b32.xlu1 %v1542_v54, %s6132_s25  ;;  %v6025_v54 = vld [vmem:[%s7701_s5 + $0x30] sm:$0xff]  }
 0x26f   :  { %v1003_v62 = vpop.permute.xlu0 %1002 }
 0x270   :  { %1573 = vrot.lane.b32.xlu1 %v1543_v57, %s6132_s25  ;;  %5383 = vmatprep.subr.bf16.mxu1 %v1003_v62  ;;  %v1823_v57 = vld [vmem:[%s7702_s6 + $0x30] sm:$0xff] }
 0x271   :  { %5384 = vmatpush3.bf16.msra.mxu1 %v1003_v62 }
 0x273   :  { %v6564_v3 = vpop.permute.xlu0 %799 }
 0x274   :  { %1575 = vrot.lane.b32.xlu1 %v1544_v1, %s6132_s25  ;;  %v802_v4 = vmul.f32 %v6564_v3, %v6388_v0  ;;  %v803_v5 = vmul.f32 %v6564_v3, %v6392_v2  ;;  %v804_v9 = vmul.f32 %v6564_v3, %v6401_v7  ;;  %v805_v10 = vmul.f32 %v6564_v3, %v6408_v11 }
 0x275   :  { %v806_v23 = vmul.f32 %v6564_v3, %v6417_v17  ;;  %v807_v24 = vmul.f32 %v6564_v3, %v6421_v19  ;;  %v808_v32 = vmul.f32 %v6564_v3, %v6436_v28  ;;  %v809_v33 = vmul.f32 %v6564_v3, %v6441_v30 }
 0x276   :  { %v819_v6 = vpack.c.bf16 %v803_v5, %v802_v4  ;;  %v820_v21 = vpack.c.bf16 %v805_v10, %v804_v9  ;;  %v1822_v4 = vld [vmem:[%s7702_s6 + $0x28] sm:$0xff]  ;;  %v6026_v5 = vld [vmem:[%s7701_s5 + $0x38] sm:$0xff]  }
 0x277   :  { %v1005_v13 = vpop.permute.xlu1 %1004  ;;  %v821_v35 = vpack.c.bf16 %v807_v24, %v806_v23  ;;  %v822_v37 = vpack.c.bf16 %v809_v33, %v808_v32  ;;  %v1824_v10 = vld [vmem:[%s7702_s6 + $0x38] sm:$0xff]  ;;  %v6024_v32 = vld [vmem:[%s7701_s5 + $0xc8] sm:$0xff]   ;;  %v6028_v33 = vld [vmem:[%s7701_s5 + $0xd0] sm:$0xff]  }
 0x278   :  { %5385 = vmatprep.subr.bf16.mxu1 %v1005_v13  ;;  %847 = vrot.lane.b32.xlu0 %v819_v6, %s6133_s26  ;;  %v6576_v15 = vpop.permute.xlu0 %1267  ;;  %v6027_v6 = vld [vmem:[%s7701_s5] sm:$0xff]   ;;  %v6022_v24 = vld [vmem:[%s7701_s5 + $0xb8] sm:$0xff]  }
 0x279   :  { %5386 = vmatpush3.bf16.msra.mxu1 %v1005_v13  ;;  %v6020_v13 = vld [vmem:[%s7701_s5 + $0xa8] sm:$0xff]  }
 0x27a   :  { %5395 = vmatprep.subr.bf16.mxu1 %v1104_v16 }
 0x27b   :  { %v6590_v25 = vpop.permute.xlu1 %1672 }
 0x27c   :  { %849 = vrot.lane.b32.xlu0 %v820_v21, %s6133_s26  ;;  %v6593_v59 = vpop.permute.xlu0 %1271  ;;  %5388 = vmatmul.mubr.msk.bf16.vlgmr.msra.gmra.mrb[8].mxu1 %vm602_vm2, %v6010_v18  ;;  %v1675_v27 = vmul.f32 %v6590_v25, %v6388_v0  ;;  %v1676_v29 = vmul.f32 %v6590_v25, %v6392_v2  ;;  %v1677_v8 = vmul.f32 %v6590_v25, %v6401_v7  ;;  %v6031_v21 = vld [vmem:[%s7701_s5 + $0x10] sm:$0xff]  }
 0x27d   :  { %5396 = vmatpush3.bf16.msra.mxu1 %v1104_v16  ;;  %5391 = vmatprep.mubr.msk.bf16.mxu1 %vm602_vm2, %v6011_v20  ;;  %v1678_v12 = vmul.f32 %v6590_v25, %v6408_v11  ;;  %v1106_v2 = vpack.c.bf16 %v6331_v26, %v6329_v22  ;;  %v1679_v11 = vmul.f32 %v6590_v25, %v6417_v17  ;;  %v6013_v22 = vld [vmem:[%s7701_s5 + $0x80] sm:$0xff]   ;;  %v6021_v16 = vld [vmem:[%s7701_s5 + $0xb0] sm:$0xff]   ;;  %v6029_v20 = vld [vmem:[%s7701_s5 + $0x8] sm:$0xff]  }
 0x27e   :  { %5397 = vmatprep.subr.bf16.mxu1 %v1105_v63  ;;  %v1692_v34 = vpack.c.bf16 %v1676_v29, %v1675_v27  ;;  %v1680_v40 = vmul.f32 %v6590_v25, %v6421_v19  ;;  %v1817_v17 = vld [vmem:[%s7702_s6] sm:$0xff]  ;;  %v1681_v42 = vmul.f32 %v6590_v25, %v6436_v28  ;;  %v1682_v44 = vmul.f32 %v6590_v25, %v6441_v30  ;;  %v6014_v28 = vld [vmem:[%s7701_s5 + $0x88] sm:$0xff]  }
 0x27f   :  { %v1693_v7 = vpack.c.bf16 %v1678_v12, %v1677_v8  ;;  %v1270_v45 = vpop.permute.xlu1 %1269  ;;  %v6035_v29 = vld [vmem:[%s7701_s5 + $0x40] sm:$0xff]  }
 0x280   :  { %1720 = vrot.lane.b32.xlu1 %v1692_v34, %s6134_s12  ;;  %851 = vrot.lane.b32.xlu0 %v821_v35, %s6133_s26  ;;  %v591_v0 = vpop.permute.xlu0 %590  ;;  %v1694_v19 = vpack.c.bf16 %v1680_v40, %v1679_v11  ;;  %v1695_v30 = vpack.c.bf16 %v1682_v44, %v1681_v42  ;;  %v6030_v34 = vld [vmem:[%s7701_s5 + $0xd8] sm:$0xff]   ;;  %v6032_v35 = vld [vmem:[%s7701_s5 + $0xe0] sm:$0xff]  }
 0x281   :  { %5331 = vmatprep.subr.bf16.mxu0 %v591_v0  ;;  %5398 = vmatpush3.bf16.msra.mxu1 %v1105_v63  ;;  %v6033_v63 = vld [vmem:[%s7701_s5 + $0x18] sm:$0xff]   ;;  %v6037_v42 = vld [vmem:[%s7701_s5 + $0x48] sm:$0xff]   ;;  %v6039_v44 = vld [vmem:[%s7701_s5 + $0x50] sm:$0xff]  }
 0x282   :  { %5332 = vmatpush3.bf16.msra.mxu0 %v591_v0  ;;  %5399 = vmatprep.subr.bf16.mxu1 %v1106_v2  ;;  %v6038_v40 = vld [vmem:[%s7701_s5 + $0xf8] sm:$0xff]  }
 0x283   :  { %v1274_v53 = vpop.permute.xlu1 %1273 }
 0x284   :  { %1722 = vrot.lane.b32.xlu1 %v1693_v7, %s6134_s12  ;;  %853 = vrot.lane.b32.xlu0 %v822_v37, %s6133_s26  ;;  %v593_v26 = vpop.permute.xlu0 %592  ;;  %v6034_v37 = vld [vmem:[%s7701_s5 + $0xe8] sm:$0xff]  }
 0x285   :  { %5333 = vmatprep.subr.bf16.mxu0 %v593_v26  ;;  %5392 = vmatmul.mubr.msk.bf16.gmra.mrb[12].mxu1 %vm602_vm2, %v6012_v39  ;;  %v6036_v39 = vld [vmem:[%s7701_s5 + $0xf0] sm:$0xff]  }
 0x286   :  { %5400 = vmatpush3.bf16.msra.mxu1 %v1106_v2  ;;  %5334 = vmatpush3.bf16.msra.mxu0 %v593_v26 }
 0x287   :  { %5401 = vmatprep.subr.bf16.mxu1 %v1107_v41  ;;  %5403 = vmatprep.mubr.msk.bf16.mxu1 %vm602_vm2, %v6013_v22  ;;  %v1419_v62 = vpop.permute.xlu1 %1418 }
 0x288   :  { %1724 = vrot.lane.b32.xlu1 %v1694_v19, %s6134_s12  ;;  %1827 = vperm.xlu0 %5973, %v1817_v17   ;;  %v595_v36 = vpop.permute.xlu0 %594 }
 0x289   :  { %5335 = vmatprep.subr.bf16.mxu0 %v595_v36 }
 0x28a   :  { %5402 = vmatpush3.bf16.msra.mxu1 %v1107_v41  ;;  %5336 = vmatpush3.bf16.msra.mxu0 %v595_v36  ;;  %v6040_v41 = vld [vmem:[%s7701_s5 + $0x100] sm:$0xff]  }
 0x28b   :  { %5411 = vmatprep.subr.bf16.mxu1 %v6576_v15 }
 0x28c   :  { %1726 = vrot.lane.b32.xlu1 %v1695_v30, %s6134_s12  ;;  %1837 = vperm.xlu0 %5973, %v1819_v38   ;;  %v597_v48 = vpop.permute.xlu0 %596  ;;  %v6041_v38 = vld [vmem:[%s7701_s5 + $0x58] sm:$0xff]   ;;  %v6043_v30 = vld [vmem:[%s7701_s5 + $0x110] sm:$0xff]  }
 0x28d   :  { %5337 = vmatprep.subr.bf16.mxu0 %v597_v48  ;;  %5404 = vmatmul.mubr.msk.bf16.vlgmr.msra.gmra.mrb[8].mxu1 %vm602_vm2, %v6014_v28  ;;  %v6042_v28 = vld [vmem:[%s7701_s5 + $0x108] sm:$0xff]  }
 0x28e   :  { %5412 = vmatpush3.bf16.msra.mxu1 %v6576_v15  ;;  %5338 = vmatpush3.bf16.msra.mxu0 %v597_v48  ;;  %v1421_v15 = vpop.permute.xlu1 %1420 }
 0x28f   :  { %5413 = vmatprep.subr.bf16.mxu1 %v1270_v45  ;;  %5407 = vmatprep.mubr.msk.bf16.mxu1 %vm602_vm2, %v6017_v47  ;;  %v6044_v47 = vld [vmem:[%s7701_s5 + $0x118] sm:$0xff]  }
 0x290   :  { %1832 = vperm.xlu1 %5974, %v1818_v49   ;;  %1847 = vperm.xlu0 %5973, %v1821_v50   ;;  %v705_v55 = vpop.permute.xlu0 %704 }
 0x291   :  { %5347 = vmatprep.subr.bf16.mxu0 %v705_v55  ;;  %5340 = vmatmul.mubr.msk.bf16.vlgmr.msra.gmra.mrb[16].mxu0 %vm602_vm2, %v6016_v51 }
 0x292   :  { %5414 = vmatpush3.bf16.msra.mxu1 %v1270_v45  ;;  %5348 = vmatpush3.bf16.msra.mxu0 %v705_v55  ;;  %v1423_v23 = vpop.permute.xlu1 %1422 }
 0x293   :  { %5415 = vmatprep.subr.bf16.mxu1 %v6593_v59  ;;  %5343 = vmatprep.mubr.msk.bf16.mxu0 %vm602_vm2, %v6025_v54 }
 0x294   :  { %1842 = vperm.xlu1 %5974, %v1820_v56   ;;  %1857 = vperm.xlu0 %5973, %v1823_v57   ;;  %v707_v1 = vpop.permute.xlu0 %706 }
 0x295   :  { %5349 = vmatprep.subr.bf16.mxu0 %v707_v1  ;;  %5408 = vmatmul.mubr.msk.bf16.gmra.mrb[12].mxu1 %vm602_vm2, %v6018_v58 }
 0x296   :  { %5416 = vmatpush3.bf16.msra.mxu1 %v6593_v59  ;;  %5350 = vmatpush3.bf16.msra.mxu0 %v707_v1  ;;  %v6023_v59 = vld [vmem:[%s7701_s5 + $0xc0] sm:$0xff]   ;;  %v1425_v27 = vpop.permute.xlu1 %1424 }
 0x297   :  { %5417 = vmatprep.subr.bf16.mxu1 %v1274_v53  ;;  %5419 = vmatprep.mubr.msk.bf16.mxu1 %vm602_vm2, %v6019_v60 }
 0x298   :  { %1852 = vperm.xlu1 %5974, %v1822_v4   ;;  %v709_v9 = vpop.permute.xlu0 %708 }
 0x299   :  { %5351 = vmatprep.subr.bf16.mxu0 %v709_v9  ;;  %5344 = vmatmul.mubr.msk.bf16.gmra.mrb[20].mxu0 %vm602_vm2, %v6026_v5 }
 0x29a   :  { %5418 = vmatpush3.bf16.msra.mxu1 %v1274_v53  ;;  %5352 = vmatpush3.bf16.msra.mxu0 %v709_v9  ;;  %v1873_v9 = vld [vmem:[%s7703_s1] sm:$0xff] }
 0x29b   :  { %5427 = vmatprep.subr.bf16.mxu1 %v1419_v62  ;;  %5355 = vmatprep.mubr.msk.bf16.mxu0 %vm602_vm2, %v6027_v6 }
 0x29c   :  { %1862 = vperm.xlu1 %5974, %v1824_v10   ;;  %v711_v18 = vpop.permute.xlu0 %710 }
 0x29d   :  { %5353 = vmatprep.subr.bf16.mxu0 %v711_v18  ;;  %5420 = vmatmul.mubr.msk.bf16.vlgmr.msra.gmra.mrb[8].mxu1 %vm602_vm2, %v6020_v13 }
 0x29e   :  { %5428 = vmatpush3.bf16.msra.mxu1 %v1419_v62  ;;  %5354 = vmatpush3.bf16.msra.mxu0 %v711_v18 }
 0x29f   :  { %5429 = vmatprep.subr.bf16.mxu1 %v1421_v15  ;;  %5423 = vmatprep.mubr.msk.bf16.mxu1 %vm602_vm2, %v6021_v16 }
 0x2a1   :  { %5356 = vmatmul.mubr.msk.bf16.vlgmr.msra.gmra.mrb[16].mxu0 %vm602_vm2, %v6029_v20 }
 0x2a2   :  { %5430 = vmatpush3.bf16.msra.mxu1 %v1421_v15  ;;  %5359 = vmatprep.mubr.msk.bf16.mxu0 %vm602_vm2, %v6031_v21 }
 0x2a3   :  { %5431 = vmatprep.subr.bf16.mxu1 %v1423_v23 }
 0x2a5   :  { %5424 = vmatmul.mubr.msk.bf16.gmra.mrb[12].mxu1 %vm602_vm2, %v6022_v24  ;;  %v1874_v24 = vld [vmem:[%s7703_s1 + $0x8] sm:$0xff] }
 0x2a6   :  { %5432 = vmatpush3.bf16.msra.mxu1 %v1423_v23  ;;  %5435 = vmatprep.mubr.msk.bf16.mxu1 %vm602_vm2, %v6023_v59  ;;  %v1875_v23 = vld [vmem:[%s7703_s1 + $0x10] sm:$0xff] }
 0x2a7   :  { %5433 = vmatprep.subr.bf16.mxu1 %v1425_v27 }
 0x2a9   :  { %5360 = vmatmul.mubr.msk.bf16.gmra.mrb[20].mxu0 %vm602_vm2, %v6033_v63 }
 0x2aa   :  { %5434 = vmatpush3.bf16.msra.mxu1 %v1425_v27  ;;  %5371 = vmatprep.mubr.msk.bf16.mxu0 %vm602_vm2, %v6035_v29 }
 0x2ad   :  { %5436 = vmatmul.mubr.msk.bf16.vlgmr.msra.gmra.mrb[8].mxu1 %vm602_vm2, %v6024_v32  ;;  %v1876_v32 = vld [vmem:[%s7703_s1 + $0x18] sm:$0xff] }
 0x2ae   :  { %5439 = vmatprep.mubr.msk.bf16.mxu1 %vm602_vm2, %v6028_v33 }
 0x2b5   :  { %5440 = vmatmul.mubr.msk.bf16.gmra.mrb[12].mxu1 %vm602_vm2, %v6030_v34 }
 0x2b6   :  { %5451 = vmatprep.mubr.msk.bf16.mxu1 %vm602_vm2, %v6032_v35 }
 0x2da   :  { %v1570_v8 = vpop.permute.xlu1 %1569 }
 0x2db   :  { %5443 = vmatprep.subr.bf16.mxu1 %v1570_v8 }
 0x2dc   :  { %5444 = vmatpush3.bf16.msra.mxu1 %v1570_v8 }
 0x2de   :  { %v1572_v12 = vpop.permute.xlu1 %1571 }
 0x2df   :  { %5445 = vmatprep.subr.bf16.mxu1 %v1572_v12 }
 0x2e0   :  { %5446 = vmatpush3.bf16.msra.mxu1 %v1572_v12 }
 0x2e2   :  { %v1574_v0 = vpop.permute.xlu1 %1573 }
 0x2e3   :  { %5447 = vmatprep.subr.bf16.mxu1 %v1574_v0 }
 0x2e4   :  { %5448 = vmatpush3.bf16.msra.mxu1 %v1574_v0 }
 0x2e6   :  { %v1576_v2 = vpop.permute.xlu1 %1575 }
 0x2e7   :  { %5449 = vmatprep.subr.bf16.mxu1 %v1576_v2 }
 0x2e8   :  { %5450 = vmatpush3.bf16.msra.mxu1 %v1576_v2 }
 0x2ea   :  { %v848_v7 = vpop.permute.xlu0 %847 }
 0x2eb   :  { %5363 = vmatprep.subr.bf16.mxu0 %v848_v7  ;;  %5452 = vmatmul.mubr.msk.bf16.vlgmr.msra.gmra.mrb[8].mxu1 %vm602_vm2, %v6034_v37 }
 0x2ec   :  { %5364 = vmatpush3.bf16.msra.mxu0 %v848_v7  ;;  %5455 = vmatprep.mubr.msk.bf16.mxu1 %vm602_vm2, %v6036_v39 }
 0x2ee   :  { %v850_v11 = vpop.permute.xlu0 %849 }
 0x2ef   :  { %5365 = vmatprep.subr.bf16.mxu0 %v850_v11 }
 0x2f0   :  { %5366 = vmatpush3.bf16.msra.mxu0 %v850_v11 }
 0x2f2   :  { %v1721_v22 = vpop.permute.xlu1 %1720  ;;  %v852_v26 = vpop.permute.xlu0 %851 }
 0x2f3   :  { %5367 = vmatprep.subr.bf16.mxu0 %v852_v26  ;;  %5459 = vmatprep.subr.bf16.mxu1 %v1721_v22 }
 0x2f4   :  { %5368 = vmatpush3.bf16.msra.mxu0 %v852_v26  ;;  %5460 = vmatpush3.bf16.msra.mxu1 %v1721_v22 }
 0x2f5   :  { %5456 = vmatmul.mubr.msk.bf16.gmra.mrb[12].mxu1 %vm602_vm2, %v6038_v40  ;;  %v1877_v40 = vld [vmem:[%s7703_s1 + $0x20] sm:$0xff] }
 0x2f6   :  { %v1723_v17 = vpop.permute.xlu1 %1722  ;;  %v854_v19 = vpop.permute.xlu0 %853  ;;  %5467 = vmatprep.mubr.msk.bf16.mxu1 %vm602_vm2, %v6040_v41 }
 0x2f7   :  { %5369 = vmatprep.subr.bf16.mxu0 %v854_v19  ;;  %5461 = vmatprep.subr.bf16.mxu1 %v1723_v17 }
 0x2f8   :  { %5370 = vmatpush3.bf16.msra.mxu0 %v854_v19  ;;  %5462 = vmatpush3.bf16.msra.mxu1 %v1723_v17 }
 0x2fa   :  { %v1725_v45 = vpop.permute.xlu1 %1724 }
 0x2fb   :  { %5372 = vmatmul.mubr.msk.bf16.vlgmr.msra.gmra.mrb[16].mxu0 %vm602_vm2, %v6037_v42  ;;  %5463 = vmatprep.subr.bf16.mxu1 %v1725_v45 }
 0x2fc   :  { %5464 = vmatpush3.bf16.msra.mxu1 %v1725_v45  ;;  %5375 = vmatprep.mubr.msk.bf16.mxu0 %vm602_vm2, %v6039_v44  ;;  %v1879_v45 = vld [vmem:[%s7703_s1 + $0x30] sm:$0xff] }
 0x2fe   :  { %v1727_v36 = vpop.permute.xlu1 %1726 }
 0x2ff   :  { %5465 = vmatprep.subr.bf16.mxu1 %v1727_v36 }
 0x300   :  { %5466 = vmatpush3.bf16.msra.mxu1 %v1727_v36  ;;  %v1878_v36 = vld [vmem:[%s7703_s1 + $0x28] sm:$0xff] }
 0x303   :  { %5376 = vmatmul.mubr.msk.bf16.gmra.mrb[20].mxu0 %vm602_vm2, %v6041_v38  ;;  %5468 = vmatmul.mubr.msk.bf16.vlgmr.msra.gmra.mrb[8].mxu1 %vm602_vm2, %v6042_v28 }
 0x304   :  { %5471 = vmatprep.mubr.msk.bf16.mxu1 %vm602_vm2, %v6043_v30 }
 0x307   :  { %v1828_v48 = vpop.permute.xlu0 %1827 }
 0x30b   :  { %5472 = vmatmul.mubr.msk.bf16.gmra.mrb[12].mxu1 %vm602_vm2, %v6044_v47  ;;  %v1838_v55 = vpop.permute.xlu0 %1837 }
 0x30f   :  { %v1833_v50 = vpop.permute.xlu1 %1832  ;;  %v1848_v21 = vpop.permute.xlu0 %1847 }
 0x313   :  { %v1843_v56 = vpop.permute.xlu1 %1842  ;;  %v1858_v11 = vpop.permute.xlu0 %1857 }
 0x317   :  { %v1853_v29 = vpop.permute.xlu1 %1852 }
 0x31b   :  { %v1863_v44 = vpop.permute.xlu1 %1862 }
 0x3ce   :  { %v5373_v49 = vpop.f32.mrb[16].mxu0 }
 0x3cf   :  { %v905_v51 = vpop.f32.mrb[17].mxu0 }
 0x3d0   :  { %v5374_v53 = vpop.f32.mrb[18].mxu0 }
 0x3d1   :  { %v908_v54 = vpop.f32.mrb[19].mxu0 }
 0x3d6   :  { %v5377_v57 = vpop.f32.mrb[20].mxu0  ;;  %v5469_v58 = vpop.f32.mrb[8].mxu1 }
 0x3d7   :  { %v5763_v60 = vadd.f32 %v5469_v58, %v5373_v49  ;;  %v921_v62 = vpop.f32.mrb[21].mxu0  ;;  %v1778_v1 = vpop.f32.mrb[9].mxu1 }
 0x3d8   :  { %v5764_v4 = vadd.f32 %v1778_v1, %v905_v51  ;;  %v5378_v5 = vpop.f32.mrb[22].mxu0  ;;  %v5470_v6 = vpop.f32.mrb[10].mxu1 }
 0x3d9   :  { %v5765_v10 = vadd.f32 %v5470_v6, %v5374_v53  ;;  %v924_v13 = vpop.f32.mrb[23].mxu0  ;;  %v1781_v15 = vpop.f32.mrb[11].mxu1  ;;  %v1867_v16 = vadd.f32 %v5763_v60, %v1838_v55 }
 0x3da   :  { %v1865_v18 = vadd.f32 %v5764_v4, %v1828_v48  ;;  %v5766_v20 = vadd.f32 %v1781_v15, %v908_v54  ;;  %v1880_v48 = vld [vmem:[%s7703_s1 + $0x38] sm:$0xff] }
 0x3db   :  { %v1868_v63 = vadd.f32 %v5765_v10, %v1843_v56  ;;  %v1883_v33 = vadd.f32 %v1875_v23, %v1867_v16 }
 0x3dc   :  { %v1881_v59 = vadd.f32 %v1873_v9, %v1865_v18  ;;  %v1866_v27 = vadd.f32 %v5766_v20, %v1833_v50 }
 0x3dd   :  { %v1884_v2 = vadd.f32 %v1876_v32, %v1868_v63  ;;  %v6806_v41 = vmax.f32 %v1883_v33, 0.0 }
 0x3de   :  { %v6797_v34 = vmax.f32 %v1881_v59, 0.0  ;;  %v1882_v35 = vadd.f32 %v1874_v24, %v1866_v27  ;;  %v5473_v8 = vpop.f32.mrb[12].mxu1 }
 0x3df   :  { %v5767_v12 = vadd.f32 %v5473_v8, %v5377_v57  ;;  %v1794_v0 = vpop.f32.mrb[13].mxu1  ;;  %v6816_v38 = vmax.f32 %v1884_v2, 0.0 }
 0x3e0   :  { %v6799_v37 = vmax.f32 %v1882_v35, 0.0  ;;  %v5768_v39 = vadd.f32 %v1794_v0, %v921_v62  ;;  %1897 = vrot.lane.b32.xlu0 %v6797_v34, %s6118_s3  ;;  %v5474_v7 = vpop.f32.mrb[14].mxu1 }
 0x3e1   :  { %v5769_v22 = vadd.f32 %v5474_v7, %v5378_v5  ;;  %v1797_v26 = vpop.f32.mrb[15].mxu1  ;;  %v1871_v17 = vadd.f32 %v5767_v12, %v1858_v11 }
 0x3e2   :  { %v1869_v19 = vadd.f32 %v5768_v39, %v1848_v21  ;;  %v5770_v42 = vadd.f32 %v1797_v26, %v924_v13  ;;  %1900 = vrot.lane.b32.xlu1 %v6799_v37, %s6118_s3 }
 0x3e3   :  { %v1872_v30 = vadd.f32 %v5769_v22, %v1863_v44  ;;  %v1887_v49 = vadd.f32 %v1879_v45, %v1871_v17  ;;  %v6045_v22 = vld [vmem:[%s7704_s7 + $0x20] sm:$0xff]  }
 0x3e4   :  { %v1885_v28 = vadd.f32 %v1877_v40, %v1869_v19  ;;  %v1870_v47 = vadd.f32 %v5770_v42, %v1853_v29  ;;  %1903 = vrot.lane.b32.xlu0 %v6806_v41, %s6118_s3  ;;  %5483 = vmatprep.mubr.msk.bf16.mxu0 %vm602_vm2, %v6045_v22 }
 0x3e5   :  { %v1888_v53 = vadd.f32 %v1880_v48, %v1872_v30  ;;  %v6831_v55 = vmax.f32 %v1887_v49, 0.0 }
 0x3e6   :  { %v6823_v50 = vmax.f32 %v1885_v28, 0.0  ;;  %v1886_v51 = vadd.f32 %v1878_v36, %v1870_v47  ;;  %1906 = vrot.lane.b32.xlu1 %v6816_v38, %s6118_s3 }
 0x3e7   :  { %v6835_v56 = vmax.f32 %v1888_v53, 0.0 }
 0x3e8   :  { %v6827_v54 = vmax.f32 %v1886_v51, 0.0  ;;  %1909 = vrot.lane.b32.xlu0 %v6823_v50, %s6118_s3 }
 0x3ea   :  { %1912 = vrot.lane.b32.xlu1 %v6827_v54, %s6118_s3 }
 0x3ec   :  { %1915 = vrot.lane.b32.xlu0 %v6831_v55, %s6118_s3 }
 0x3ee   :  { %1918 = vrot.lane.b32.xlu1 %v6835_v56, %s6118_s3 }
 0x452   :  { %v1898_v57 = vpop.permute.xlu0 %1897 }
 0x453   :  { %v1899_v58 = vsel %vm458_vm1, %v1898_v57, %v6797_v34 }
 0x454   :  { %v1901_v60 = vpop.permute.xlu1 %1900  ;;  %1921 = vrot.lane.b32.xlu0 %v1899_v58, %s6118_s3 }
 0x455   :  { %v1902_v62 = vsel %vm458_vm1, %v1901_v60, %v6799_v37 }
 0x456   :  { %v1904_v1 = vpop.permute.xlu0 %1903  ;;  %1923 = vrot.lane.b32.xlu1 %v1902_v62, %s6118_s3 }
 0x457   :  { %v1905_v4 = vsel %vm458_vm1, %v1904_v1, %v6806_v41 }
 0x458   :  { %v1907_v5 = vpop.permute.xlu1 %1906  ;;  %1925 = vrot.lane.b32.xlu0 %v1905_v4, %s6118_s3 }
 0x459   :  { %v1908_v6 = vsel %vm458_vm1, %v1907_v5, %v6816_v38 }
 0x45a   :  { %v1910_v9 = vpop.permute.xlu0 %1909  ;;  %1927 = vrot.lane.b32.xlu1 %v1908_v6, %s6118_s3 }
 0x45b   :  { %v1911_v10 = vsel %vm458_vm1, %v1910_v9, %v6823_v50 }
 0x45c   :  { %1929 = vrot.lane.b32.xlu0 %v1911_v10, %s6118_s3  ;;  %v1913_v13 = vpop.permute.xlu1 %1912 }
 0x45d   :  { %v1914_v15 = vsel %vm458_vm1, %v1913_v13, %v6827_v54 }
 0x45e   :  { %v1916_v16 = vpop.permute.xlu0 %1915  ;;  %1931 = vrot.lane.b32.xlu1 %v1914_v15, %s6118_s3 }
 0x45f   :  { %v1917_v18 = vsel %vm458_vm1, %v1916_v16, %v6831_v55 }
 0x460   :  { %1933 = vrot.lane.b32.xlu0 %v1917_v18, %s6118_s3  ;;  %v1919_v20 = vpop.permute.xlu1 %1918 }
 0x461   :  { %v1920_v21 = vsel %vm458_vm1, %v1919_v20, %v6835_v56 }
 0x462   :  { %1935 = vrot.lane.b32.xlu1 %v1920_v21, %s6118_s3 }
 0x4c6   :  { %v1922_v23 = vpop.permute.xlu0 %1921 }
 0x4c7   :  { %v6867_v24 = vsel %vm458_vm1, %v1922_v23, %v6797_v34 }
 0x4c8   :  { %v1924_v59 = vpop.permute.xlu1 %1923  ;;  %v1965_v29 = vmul.f32 %v6867_v24, %v6460_v43  ;;  %v1945_v47 = vmul.f32 %v6867_v24, %v6507_v14  ;;  %v2212_v9 = vmul.f32 %v6867_v24, %v6564_v3 }
 0x4c9   :  { %v6871_v63 = vsel %vm458_vm1, %v1924_v59, %v6799_v37 }
 0x4ca   :  { %v1926_v27 = vpop.permute.xlu0 %1925  ;;  %v1966_v32 = vmul.f32 %v6871_v63, %v6460_v43  ;;  %v1946_v28 = vmul.f32 %v6871_v63, %v6507_v14  ;;  %v2213_v5 = vmul.f32 %v6871_v63, %v6564_v3 }
 0x4cb   :  { %v6879_v33 = vsel %vm458_vm1, %v1926_v27, %v6806_v41  ;;  %v2355_v27 = vmul.f32 %v6871_v63, %v6384_v61 }
 0x4cc   :  { %v1928_v35 = vpop.permute.xlu1 %1927  ;;  %v1982_v8 = vpack.c.bf16 %v1966_v32, %v1965_v29  ;;  %v1967_v2 = vmul.f32 %v6879_v33, %v6460_v43  ;;  %v1961_v51 = vpack.c.bf16 %v1946_v28, %v1945_v47  ;;  %v1947_v62 = vmul.f32 %v6879_v33, %v6507_v14 }
 0x4cd   :  { %v6883_v12 = vsel %vm458_vm1, %v1928_v35, %v6816_v38  ;;  %v2229_v13 = vpack.c.bf16 %v2213_v5, %v2212_v9  ;;  %v2214_v21 = vmul.f32 %v6879_v33, %v6564_v3  ;;  %v2354_v32 = vmul.f32 %v6867_v24, %v6384_v61 }
 0x4ce   :  { %v1930_v0 = vpop.permute.xlu0 %1929  ;;  %2010 = vrot.lane.b32.xlu0 %v1982_v8, %s6129_s20  ;;  %v1968_v39 = vmul.f32 %v6883_v12, %v6460_v43  ;;  %v1948_v58 = vmul.f32 %v6883_v12, %v6507_v14  ;;  %v2215_v18 = vmul.f32 %v6883_v12, %v6564_v3 }
 0x4cf   :  { %v6892_v7 = vsel %vm458_vm1, %v1930_v0, %v6823_v50  ;;  %v2371_v8 = vpack.c.bf16 %v2355_v27, %v2354_v32 }
 0x4d0   :  { %v1932_v11 = vpop.permute.xlu1 %1931  ;;  %v1983_v40 = vpack.c.bf16 %v1968_v39, %v1967_v2  ;;  %v1969_v19 = vmul.f32 %v6892_v7, %v6460_v43  ;;  %v1949_v60 = vmul.f32 %v6892_v7, %v6507_v14  ;;  %v1962_v4 = vpack.c.bf16 %v1948_v58, %v1947_v62 }
 0x4d1   :  { %v6899_v26 = vsel %vm458_vm1, %v1932_v11, %v6827_v54  ;;  %v2216_v20 = vmul.f32 %v6892_v7, %v6564_v3  ;;  %v2230_v59 = vpack.c.bf16 %v2215_v18, %v2214_v21  ;;  %v2357_v39 = vmul.f32 %v6883_v12, %v6384_v61 }
 0x4d2   :  { %v1934_v17 = vpop.permute.xlu0 %1933  ;;  %2012 = vrot.lane.b32.xlu1 %v1983_v40, %s6129_s20  ;;  %v1970_v42 = vmul.f32 %v6899_v26, %v6460_v43  ;;  %v1950_v57 = vmul.f32 %v6899_v26, %v6507_v14  ;;  %v2217_v16 = vmul.f32 %v6899_v26, %v6564_v3  ;;  %v2359_v2 = vmul.f32 %v6899_v26, %v6384_v61 }
 0x4d3   :  { %v6908_v44 = vsel %vm458_vm1, %v1934_v17, %v6831_v55  ;;  %v2358_v11 = vmul.f32 %v6892_v7, %v6384_v61  ;;  %v2356_v40 = vmul.f32 %v6879_v33, %v6384_v61  ;;  %v2761_v9 = vmul.f32 %v6899_v26, %v6477_v52 }
 0x4d4   :  { %v1936_v45 = vpop.permute.xlu1 %1935  ;;  %v1984_v36 = vpack.c.bf16 %v1970_v42, %v1969_v19  ;;  %v1971_v48 = vmul.f32 %v6908_v44, %v6460_v43  ;;  %v1963_v1 = vpack.c.bf16 %v1950_v57, %v1949_v60  ;;  %v1951_v10 = vmul.f32 %v6908_v44, %v6507_v14 }
 0x4d5   :  { %v6915_v30 = vsel %vm458_vm1, %v1936_v45, %v6835_v56  ;;  %v2231_v23 = vpack.c.bf16 %v2217_v16, %v2216_v20  ;;  %v2218_v35 = vmul.f32 %v6908_v44, %v6564_v3  ;;  %v2373_v22 = vpack.c.bf16 %v2359_v2, %v2358_v11 }
 0x4d6   :  { %2014 = vrot.lane.b32.xlu0 %v1984_v36, %s6129_s20  ;;  %v1972_v49 = vmul.f32 %v6915_v30, %v6460_v43  ;;  %v1952_v6 = vmul.f32 %v6915_v30, %v6507_v14  ;;  %v2219_v29 = vmul.f32 %v6915_v30, %v6564_v3  ;;  %v2372_v17 = vpack.c.bf16 %v2357_v39, %v2356_v40 }
 0x4d7   :  { %v2615_v19 = vmul.f32 %v6871_v63, %v6443_v31  ;;  %v2361_v42 = vmul.f32 %v6915_v30, %v6384_v61  ;;  %v2614_v45 = vmul.f32 %v6867_v24, %v6443_v31  ;;  %v2360_v36 = vmul.f32 %v6908_v44, %v6384_v61 }
 0x4d8   :  { %v1985_v53 = vpack.c.bf16 %v1972_v49, %v1971_v48  ;;  %v1964_v15 = vpack.c.bf16 %v1952_v6, %v1951_v10  ;;  %v2232_v0 = vpack.c.bf16 %v2219_v29, %v2218_v35  ;;  %v2619_v48 = vmul.f32 %v6899_v26, %v6443_v31 }
 0x4d9   :  { %v2631_v28 = vpack.c.bf16 %v2615_v19, %v2614_v45  ;;  %v2374_v47 = vpack.c.bf16 %v2361_v42, %v2360_v36  ;;  %v2617_v49 = vmul.f32 %v6883_v12, %v6443_v31  ;;  %v2757_v60 = vmul.f32 %v6871_v63, %v6477_v52 }
 0x4da   :  { %2123 = vrot.lane.b32.xlu0 %v1961_v51, %s6131_s24  ;;  %2016 = vrot.lane.b32.xlu1 %v1985_v53, %s6129_s20  ;;  %v2618_v51 = vmul.f32 %v6892_v7, %v6443_v31  ;;  %v2616_v53 = vmul.f32 %v6879_v33, %v6443_v31  ;;  %v2621_v62 = vmul.f32 %v6915_v30, %v6443_v31 }
 0x4db   :  { %v2759_v10 = vmul.f32 %v6883_v12, %v6477_v52  ;;  %v2899_v20 = vmul.f32 %v6871_v63, %v6543_v46  ;;  %v2763_v21 = vmul.f32 %v6915_v30, %v6477_v52  ;;  %v2903_v32 = vmul.f32 %v6899_v26, %v6543_v46 }
 0x4dc   :  { %v2633_v57 = vpack.c.bf16 %v2619_v48, %v2618_v51  ;;  %v2632_v58 = vpack.c.bf16 %v2617_v49, %v2616_v53  ;;  %v2901_v35 = vmul.f32 %v6883_v12, %v6543_v46  ;;  %v3041_v11 = vmul.f32 %v6871_v63, %v6590_v25  ;;  %v3185_v49 = vld [vmem:[%s7705_s8 + $0x18] sm:$0xff]  ;;  %v3188_v51 = vld [vmem:[%s7705_s8 + $0x30] sm:$0xff]  ;;  %v3187_v53 = vld [vmem:[%s7705_s8 + $0x28] sm:$0xff] }
 0x4dd   :  { %v2905_v40 = vmul.f32 %v6915_v30, %v6543_v46  ;;  %v3045_v45 = vmul.f32 %v6899_v26, %v6590_v25  ;;  %v3043_v63 = vmul.f32 %v6883_v12, %v6590_v25  ;;  %v3044_v36 = vmul.f32 %v6892_v7, %v6590_v25  ;;  %v3182_v26 = vld [vmem:[%s7705_s8] sm:$0xff] }
 0x4de   :  { %2127 = vrot.lane.b32.xlu0 %v1963_v1, %s6131_s24  ;;  %2125 = vrot.lane.b32.xlu1 %v1962_v4, %s6131_s24  ;;  %v2756_v1 = vmul.f32 %v6867_v24, %v6477_v52  ;;  %v2620_v4 = vmul.f32 %v6908_v44, %v6443_v31  ;;  %v3047_v48 = vmul.f32 %v6915_v30, %v6590_v25  ;;  %v3183_v30 = vld [vmem:[%s7705_s8 + $0x8] sm:$0xff] }
 0x4df   :  { %v3046_v12 = vmul.f32 %v6908_v44, %v6590_v25 }
 0x4e0   :  { %v2773_v5 = vpack.c.bf16 %v2757_v60, %v2756_v1  ;;  %v2634_v6 = vpack.c.bf16 %v2621_v62, %v2620_v4  ;;  %v6046_v4 = vld [vmem:[%s7704_s7 + $0x28] sm:$0xff]  }
 0x4e2   :  { %2257 = vrot.lane.b32.xlu0 %v2229_v13, %s6133_s26  ;;  %2129 = vrot.lane.b32.xlu1 %v1964_v15, %s6131_s24  ;;  %v2760_v13 = vmul.f32 %v6892_v7, %v6477_v52  ;;  %v2758_v15 = vmul.f32 %v6879_v33, %v6477_v52 }
 0x4e4   :  { %v2775_v16 = vpack.c.bf16 %v2761_v9, %v2760_v13  ;;  %v2774_v18 = vpack.c.bf16 %v2759_v10, %v2758_v15  ;;  %v6048_v10 = vld [vmem:[%s7704_s7 + $0x38] sm:$0xff]   ;;  %v6049_v15 = vld [vmem:[%s7704_s7] sm:$0xff]  }
 0x4e6   :  { %2261 = vrot.lane.b32.xlu0 %v2231_v23, %s6133_s26  ;;  %2259 = vrot.lane.b32.xlu1 %v2230_v59, %s6133_s26  ;;  %v2898_v23 = vmul.f32 %v6867_v24, %v6543_v46  ;;  %v2762_v59 = vmul.f32 %v6908_v44, %v6477_v52 }
 0x4e8   :  { %v2915_v27 = vpack.c.bf16 %v2899_v20, %v2898_v23  ;;  %v2776_v29 = vpack.c.bf16 %v2763_v21, %v2762_v59  ;;  %v6051_v21 = vld [vmem:[%s7704_s7 + $0x10] sm:$0xff]   ;;  %v6052_v59 = vld [vmem:[%s7704_s7 + $0x18] sm:$0xff]  }
 0x4ea   :  { %2399 = vrot.lane.b32.xlu0 %v2371_v8, %s6124_s29  ;;  %2263 = vrot.lane.b32.xlu1 %v2232_v0, %s6133_s26  ;;  %v2902_v8 = vmul.f32 %v6892_v7, %v6543_v46  ;;  %v2900_v0 = vmul.f32 %v6879_v33, %v6543_v46  ;;  %v3060_v7 = vpack.c.bf16 %v3047_v48, %v3046_v12  ;;  %v6063_v12 = vld [vmem:[%s7704_s7 + $0x90] sm:$0xff]  }
 0x4ec   :  { %v2917_v2 = vpack.c.bf16 %v2903_v32, %v2902_v8  ;;  %v2916_v39 = vpack.c.bf16 %v2901_v35, %v2900_v0  ;;  %v6054_v35 = vld [vmem:[%s7704_s7 + $0x48] sm:$0xff]   ;;  %v6055_v0 = vld [vmem:[%s7704_s7 + $0x50] sm:$0xff]  }
 0x4ee   :  { %2403 = vrot.lane.b32.xlu0 %v2373_v22, %s6124_s29  ;;  %2401 = vrot.lane.b32.xlu1 %v2372_v17, %s6124_s29  ;;  %v3040_v22 = vmul.f32 %v6867_v24, %v6590_v25  ;;  %v2904_v17 = vmul.f32 %v6908_v44, %v6543_v46  ;;  %v3042_v24 = vmul.f32 %v6879_v33, %v6590_v25  ;;  %v3184_v33 = vld [vmem:[%s7705_s8 + $0x10] sm:$0xff]  ;;  %v3186_v44 = vld [vmem:[%s7705_s8 + $0x20] sm:$0xff] }
 0x4f0   :  { %v3057_v19 = vpack.c.bf16 %v3041_v11, %v3040_v22  ;;  %v2918_v42 = vpack.c.bf16 %v2905_v40, %v2904_v17  ;;  %v6057_v40 = vld [vmem:[%s7704_s7 + $0x60] sm:$0xff]   ;;  %v2505_v17 = vpack.c.bf16 %v6799_v37, %v6797_v34 }
 0x4f2   :  { %2659 = vrot.lane.b32.xlu0 %v2631_v28, %s6127_s19  ;;  %2405 = vrot.lane.b32.xlu1 %v2374_v47, %s6124_s29  ;;  %v3059_v28 = vpack.c.bf16 %v3045_v45, %v3044_v36  ;;  %v3058_v47 = vpack.c.bf16 %v3043_v63, %v3042_v24  ;;  %v2506_v45 = vpack.c.bf16 %v6816_v38, %v6806_v41  ;;  %v6060_v36 = vld [vmem:[%s7704_s7 + $0x78] sm:$0xff]   ;;  %v6061_v24 = vld [vmem:[%s7704_s7 + $0x80] sm:$0xff]  }
 0x4f3   :  { %v2507_v63 = vpack.c.bf16 %v6827_v54, %v6823_v50 }
 0x4f6   :  { %2663 = vrot.lane.b32.xlu0 %v2633_v57, %s6127_s19  ;;  %2661 = vrot.lane.b32.xlu1 %v2632_v58, %s6127_s19  ;;  %v3189_v57 = vld [vmem:[%s7705_s8 + $0x38] sm:$0xff] }
 0x4fa   :  { %2801 = vrot.lane.b32.xlu0 %v2773_v5, %s6130_s23  ;;  %2665 = vrot.lane.b32.xlu1 %v2634_v6, %s6127_s19  ;;  %v6047_v6 = vld [vmem:[%s7704_s7 + $0x30] sm:$0xff]  }
 0x4fe   :  { %2805 = vrot.lane.b32.xlu0 %v2775_v16, %s6130_s23  ;;  %2803 = vrot.lane.b32.xlu1 %v2774_v18, %s6130_s23  ;;  %v6050_v18 = vld [vmem:[%s7704_s7 + $0x8] sm:$0xff]  }
 0x502   :  { %2943 = vrot.lane.b32.xlu0 %v2915_v27, %s6132_s25  ;;  %2807 = vrot.lane.b32.xlu1 %v2776_v29, %s6130_s23  ;;  %v6053_v29 = vld [vmem:[%s7704_s7 + $0x40] sm:$0xff]  }
 0x506   :  { %2947 = vrot.lane.b32.xlu0 %v2917_v2, %s6132_s25  ;;  %2945 = vrot.lane.b32.xlu1 %v2916_v39, %s6132_s25  ;;  %v6056_v39 = vld [vmem:[%s7704_s7 + $0x58] sm:$0xff]  }
 0x50a   :  { %3085 = vrot.lane.b32.xlu0 %v3057_v19, %s6134_s12  ;;  %2949 = vrot.lane.b32.xlu1 %v2918_v42, %s6132_s25  ;;  %v6058_v19 = vld [vmem:[%s7704_s7 + $0x68] sm:$0xff]   ;;  %v6059_v42 = vld [vmem:[%s7704_s7 + $0x70] sm:$0xff]  }
 0x50e   :  { %3089 = vrot.lane.b32.xlu0 %v3059_v28, %s6134_s12  ;;  %3087 = vrot.lane.b32.xlu1 %v3058_v47, %s6134_s12  ;;  %v2508_v28 = vpack.c.bf16 %v6835_v56, %v6831_v55  ;;  %v6062_v47 = vld [vmem:[%s7704_s7 + $0x88] sm:$0xff]  }
 0x512   :  { %3192 = vperm.xlu0 %5973, %v3182_v26   ;;  %3091 = vrot.lane.b32.xlu1 %v3060_v7, %s6134_s12  ;;  %v6064_v7 = vld [vmem:[%s7704_s7 + $0x98] sm:$0xff]  }
 0x516   :  { %3202 = vperm.xlu0 %5973, %v3184_v33   ;;  %3197 = vperm.xlu1 %5974, %v3183_v30   ;;  %v6065_v30 = vld [vmem:[%s7704_s7 + $0xa0] sm:$0xff]  }
 0x51a   :  { %3212 = vperm.xlu0 %5973, %v3186_v44   ;;  %3207 = vperm.xlu1 %5974, %v3185_v49   ;;  %v6066_v49 = vld [vmem:[%s7704_s7 + $0xa8] sm:$0xff]  }
 0x51e   :  { %3222 = vperm.xlu0 %5973, %v3188_v51   ;;  %3217 = vperm.xlu1 %5974, %v3187_v53   ;;  %v6067_v53 = vld [vmem:[%s7704_s7 + $0xb0] sm:$0xff]  }
 0x522   :  { %3227 = vperm.xlu1 %5974, %v3189_v57  }
 0x540   :  { %v2011_v58 = vpop.permute.xlu0 %2010 }
 0x541   :  { %5475 = vmatprep.subr.bf16.mxu0 %v2011_v58 }
 0x542   :  { %5476 = vmatpush3.bf16.msra.mxu0 %v2011_v58  ;;  %v6068_v58 = vld [vmem:[%s7704_s7 + $0xb8] sm:$0xff]  }
 0x544   :  { %v2013_v60 = vpop.permute.xlu1 %2012 }
 0x545   :  { %5477 = vmatprep.subr.bf16.mxu0 %v2013_v60 }
 0x546   :  { %5478 = vmatpush3.bf16.msra.mxu0 %v2013_v60 }
 0x548   :  { %v2015_v62 = vpop.permute.xlu0 %2014 }
 0x549   :  { %5479 = vmatprep.subr.bf16.mxu0 %v2015_v62 }
 0x54a   :  { %5480 = vmatpush3.bf16.msra.mxu0 %v2015_v62  ;;  %v6069_v62 = vld [vmem:[%s7704_s7 + $0xc0] sm:$0xff]  }
 0x54c   :  { %v2017_v1 = vpop.permute.xlu1 %2016  ;;  %v2124_v5 = vpop.permute.xlu0 %2123 }
 0x54d   :  { %5481 = vmatprep.subr.bf16.mxu0 %v2017_v1 }
 0x54e   :  { %5482 = vmatpush3.bf16.msra.mxu0 %v2017_v1 }
 0x54f   :  { %5491 = vmatprep.subr.bf16.mxu0 %v2124_v5 }
 0x550   :  { %v2126_v9 = vpop.permute.xlu1 %2125  ;;  %v2128_v13 = vpop.permute.xlu0 %2127 }
 0x551   :  { %5484 = vmatmul.mubr.msk.bf16.vlgmr.msra.gmra.mrb[24].mxu0 %vm602_vm2, %v6046_v4  ;;  %v6070_v4 = vld [vmem:[%s7704_s7 + $0xc8] sm:$0xff]  }
 0x552   :  { %5492 = vmatpush3.bf16.msra.mxu0 %v2124_v5  ;;  %5487 = vmatprep.mubr.msk.bf16.mxu0 %vm602_vm2, %v6047_v6  ;;  %v6071_v6 = vld [vmem:[%s7704_s7 + $0xd0] sm:$0xff]  }
 0x553   :  { %5493 = vmatprep.subr.bf16.mxu0 %v2126_v9 }
 0x554   :  { %v2130_v16 = vpop.permute.xlu1 %2129  ;;  %v2258_v20 = vpop.permute.xlu0 %2257 }
 0x556   :  { %5494 = vmatpush3.bf16.msra.mxu0 %v2126_v9 }
 0x557   :  { %5495 = vmatprep.subr.bf16.mxu0 %v2128_v13 }
 0x558   :  { %v2260_v23 = vpop.permute.xlu1 %2259  ;;  %v2262_v27 = vpop.permute.xlu0 %2261 }
 0x559   :  { %5488 = vmatmul.mubr.msk.bf16.gmra.mrb[28].mxu0 %vm602_vm2, %v6048_v10  ;;  %v6072_v10 = vld [vmem:[%s7704_s7 + $0xd8] sm:$0xff]  }
 0x55a   :  { %5496 = vmatpush3.bf16.msra.mxu0 %v2128_v13  ;;  %5499 = vmatprep.mubr.msk.bf16.mxu0 %vm602_vm2, %v6049_v15  ;;  %v6073_v15 = vld [vmem:[%s7704_s7 + $0xe0] sm:$0xff]  }
 0x55b   :  { %5497 = vmatprep.subr.bf16.mxu0 %v2130_v16 }
 0x55c   :  { %v2264_v32 = vpop.permute.xlu1 %2263  ;;  %v2400_v8 = vpop.permute.xlu0 %2399 }
 0x55e   :  { %5498 = vmatpush3.bf16.msra.mxu0 %v2130_v16 }
 0x55f   :  { %5507 = vmatprep.subr.bf16.mxu0 %v2258_v20 }
 0x560   :  { %v2402_v2 = vpop.permute.xlu1 %2401  ;;  %v2404_v11 = vpop.permute.xlu0 %2403 }
 0x561   :  { %5500 = vmatmul.mubr.msk.bf16.vlgmr.msra.gmra.mrb[24].mxu0 %vm602_vm2, %v6050_v18  ;;  %v6074_v18 = vld [vmem:[%s7704_s7 + $0xe8] sm:$0xff]  }
 0x562   :  { %5508 = vmatpush3.bf16.msra.mxu0 %v2258_v20  ;;  %5503 = vmatprep.mubr.msk.bf16.mxu0 %vm602_vm2, %v6051_v21  ;;  %v6075_v21 = vld [vmem:[%s7704_s7 + $0xf0] sm:$0xff]  }
 0x563   :  { %5509 = vmatprep.subr.bf16.mxu0 %v2260_v23 }
 0x564   :  { %v2406_v22 = vpop.permute.xlu1 %2405  ;;  %v2660_v48 = vpop.permute.xlu0 %2659 }
 0x566   :  { %5510 = vmatpush3.bf16.msra.mxu0 %v2260_v23 }
 0x567   :  { %5511 = vmatprep.subr.bf16.mxu0 %v2262_v27 }
 0x568   :  { %v2662_v26 = vpop.permute.xlu1 %2661  ;;  %v2664_v33 = vpop.permute.xlu0 %2663 }
 0x569   :  { %5504 = vmatmul.mubr.msk.bf16.gmra.mrb[28].mxu0 %vm602_vm2, %v6052_v59  ;;  %v6076_v59 = vld [vmem:[%s7704_s7 + $0xf8] sm:$0xff]  }
 0x56a   :  { %5512 = vmatpush3.bf16.msra.mxu0 %v2262_v27  ;;  %5515 = vmatprep.mubr.msk.bf16.mxu0 %vm602_vm2, %v6053_v29  ;;  %v6077_v29 = vld [vmem:[%s7704_s7 + $0x100] sm:$0xff]  }
 0x56b   :  { %5513 = vmatprep.subr.bf16.mxu0 %v2264_v32 }
 0x56c   :  { %v2666_v44 = vpop.permute.xlu1 %2665  ;;  %v2802_v51 = vpop.permute.xlu0 %2801 }
 0x56e   :  { %5514 = vmatpush3.bf16.msra.mxu0 %v2264_v32 }
 0x56f   :  { %5523 = vmatprep.subr.bf16.mxu0 %v2400_v8 }
 0x570   :  { %v2804_v57 = vpop.permute.xlu1 %2803  ;;  %v2806_v60 = vpop.permute.xlu0 %2805 }
 0x571   :  { %5516 = vmatmul.mubr.msk.bf16.vlgmr.msra.gmra.mrb[24].mxu0 %vm602_vm2, %v6054_v35  ;;  %v6078_v35 = vld [vmem:[%s7704_s7 + $0x108] sm:$0xff]  }
 0x572   :  { %5524 = vmatpush3.bf16.msra.mxu0 %v2400_v8  ;;  %5519 = vmatprep.mubr.msk.bf16.mxu0 %vm602_vm2, %v6055_v0  ;;  %v6079_v8 = vld [vmem:[%s7704_s7 + $0x110] sm:$0xff]   ;;  %v6080_v0 = vld [vmem:[%s7704_s7 + $0x118] sm:$0xff]  }
 0x573   :  { %5525 = vmatprep.subr.bf16.mxu0 %v2402_v2 }
 0x574   :  { %v2808_v1 = vpop.permute.xlu1 %2807  ;;  %v2944_v5 = vpop.permute.xlu0 %2943 }
 0x576   :  { %5526 = vmatpush3.bf16.msra.mxu0 %v2402_v2 }
 0x577   :  { %5527 = vmatprep.subr.bf16.mxu0 %v2404_v11 }
 0x578   :  { %v2946_v9 = vpop.permute.xlu1 %2945  ;;  %v2948_v13 = vpop.permute.xlu0 %2947 }
 0x579   :  { %5520 = vmatmul.mubr.msk.bf16.gmra.mrb[28].mxu0 %vm602_vm2, %v6056_v39 }
 0x57a   :  { %5528 = vmatpush3.bf16.msra.mxu0 %v2404_v11  ;;  %5531 = vmatprep.mubr.msk.bf16.mxu0 %vm602_vm2, %v6057_v40 }
 0x57b   :  { %5529 = vmatprep.subr.bf16.mxu0 %v2406_v22 }
 0x57c   :  { %v2950_v16 = vpop.permute.xlu1 %2949  ;;  %v3086_v20 = vpop.permute.xlu0 %3085 }
 0x57e   :  { %5530 = vmatpush3.bf16.msra.mxu0 %v2406_v22 }
 0x57f   :  { %5539 = vmatprep.subr.bf16.mxu0 %v2505_v17 }
 0x580   :  { %v3088_v23 = vpop.permute.xlu1 %3087  ;;  %v3090_v27 = vpop.permute.xlu0 %3089 }
 0x581   :  { %5532 = vmatmul.mubr.msk.bf16.vlgmr.msra.gmra.mrb[24].mxu0 %vm602_vm2, %v6058_v19 }
 0x582   :  { %5540 = vmatpush3.bf16.msra.mxu0 %v2505_v17  ;;  %5535 = vmatprep.mubr.msk.bf16.mxu0 %vm602_vm2, %v6059_v42 }
 0x583   :  { %5541 = vmatprep.subr.bf16.mxu0 %v2506_v45 }
 0x584   :  { %v3092_v32 = vpop.permute.xlu1 %3091 }
 0x586   :  { %5542 = vmatpush3.bf16.msra.mxu0 %v2506_v45 }
 0x587   :  { %5543 = vmatprep.subr.bf16.mxu0 %v2507_v63 }
 0x589   :  { %5536 = vmatmul.mubr.msk.bf16.gmra.mrb[28].mxu0 %vm602_vm2, %v6060_v36 }
 0x58a   :  { %5544 = vmatpush3.bf16.msra.mxu0 %v2507_v63  ;;  %5547 = vmatprep.mubr.msk.bf16.mxu0 %vm602_vm2, %v6061_v24 }
 0x58b   :  { %5545 = vmatprep.subr.bf16.mxu0 %v2508_v28 }
 0x58e   :  { %5546 = vmatpush3.bf16.msra.mxu0 %v2508_v28 }
 0x58f   :  { %5555 = vmatprep.subr.bf16.mxu0 %v2660_v48 }
 0x591   :  { %5548 = vmatmul.mubr.msk.bf16.vlgmr.msra.gmra.mrb[24].mxu0 %vm602_vm2, %v6062_v47  ;;  %v3193_v2 = vpop.permute.xlu0 %3192 }
 0x592   :  { %5556 = vmatpush3.bf16.msra.mxu0 %v2660_v48  ;;  %5551 = vmatprep.mubr.msk.bf16.mxu0 %vm602_vm2, %v6063_v12 }
 0x593   :  { %5557 = vmatprep.subr.bf16.mxu0 %v2662_v26 }
 0x595   :  { %v3198_v39 = vpop.permute.xlu1 %3197  ;;  %v3203_v11 = vpop.permute.xlu0 %3202 }
 0x596   :  { %5558 = vmatpush3.bf16.msra.mxu0 %v2662_v26 }
 0x597   :  { %5559 = vmatprep.subr.bf16.mxu0 %v2664_v33 }
 0x599   :  { %5552 = vmatmul.mubr.msk.bf16.gmra.mrb[28].mxu0 %vm602_vm2, %v6064_v7  ;;  %v3208_v22 = vpop.permute.xlu1 %3207  ;;  %v3213_v28 = vpop.permute.xlu0 %3212 }
 0x59a   :  { %5560 = vmatpush3.bf16.msra.mxu0 %v2664_v33  ;;  %5563 = vmatprep.mubr.msk.bf16.mxu0 %vm602_vm2, %v6065_v30 }
 0x59b   :  { %5561 = vmatprep.subr.bf16.mxu0 %v2666_v44 }
 0x59d   :  { %v3218_v12 = vpop.permute.xlu1 %3217 }
 0x59e   :  { %5562 = vmatpush3.bf16.msra.mxu0 %v2666_v44 }
 0x59f   :  { %5571 = vmatprep.subr.bf16.mxu0 %v2802_v51 }
 0x5a1   :  { %5564 = vmatmul.mubr.msk.bf16.vlgmr.msra.gmra.mrb[24].mxu0 %vm602_vm2, %v6066_v49 }
 0x5a2   :  { %5572 = vmatpush3.bf16.msra.mxu0 %v2802_v51  ;;  %5567 = vmatprep.mubr.msk.bf16.mxu0 %vm602_vm2, %v6067_v53  ;;  %v3223_v51 = vpop.permute.xlu0 %3222 }
 0x5a3   :  { %5573 = vmatprep.subr.bf16.mxu0 %v2804_v57 }
 0x5a6   :  { %5574 = vmatpush3.bf16.msra.mxu0 %v2804_v57 }
 0x5a7   :  { %5575 = vmatprep.subr.bf16.mxu0 %v2806_v60 }
 0x5a9   :  { %5568 = vmatmul.mubr.msk.bf16.gmra.mrb[28].mxu0 %vm602_vm2, %v6068_v58 }
 0x5aa   :  { %5576 = vmatpush3.bf16.msra.mxu0 %v2806_v60  ;;  %5579 = vmatprep.mubr.msk.bf16.mxu0 %vm602_vm2, %v6069_v62  ;;  %v3228_v62 = vpop.permute.xlu1 %3227 }
 0x5ab   :  { %5577 = vmatprep.subr.bf16.mxu0 %v2808_v1 }
 0x5ae   :  { %5578 = vmatpush3.bf16.msra.mxu0 %v2808_v1 }
 0x5af   :  { %5587 = vmatprep.subr.bf16.mxu0 %v2944_v5 }
 0x5b1   :  { %5580 = vmatmul.mubr.msk.bf16.vlgmr.msra.gmra.mrb[24].mxu0 %vm602_vm2, %v6070_v4 }
 0x5b2   :  { %5588 = vmatpush3.bf16.msra.mxu0 %v2944_v5  ;;  %5583 = vmatprep.mubr.msk.bf16.mxu0 %vm602_vm2, %v6071_v6 }
 0x5b3   :  { %5589 = vmatprep.subr.bf16.mxu0 %v2946_v9 }
 0x5b6   :  { %5590 = vmatpush3.bf16.msra.mxu0 %v2946_v9 }
 0x5b7   :  { %5591 = vmatprep.subr.bf16.mxu0 %v2948_v13 }
 0x5b9   :  { %5584 = vmatmul.mubr.msk.bf16.gmra.mrb[28].mxu0 %vm602_vm2, %v6072_v10 }
 0x5ba   :  { %5592 = vmatpush3.bf16.msra.mxu0 %v2948_v13  ;;  %5595 = vmatprep.mubr.msk.bf16.mxu0 %vm602_vm2, %v6073_v15 }
 0x5bb   :  { %5593 = vmatprep.subr.bf16.mxu0 %v2950_v16 }
 0x5be   :  { %5594 = vmatpush3.bf16.msra.mxu0 %v2950_v16 }
 0x5bf   :  { %5603 = vmatprep.subr.bf16.mxu0 %v3086_v20 }
 0x5c1   :  { %5596 = vmatmul.mubr.msk.bf16.vlgmr.msra.gmra.mrb[24].mxu0 %vm602_vm2, %v6074_v18 }
 0x5c2   :  { %5604 = vmatpush3.bf16.msra.mxu0 %v3086_v20  ;;  %5599 = vmatprep.mubr.msk.bf16.mxu0 %vm602_vm2, %v6075_v21 }
 0x5c3   :  { %5605 = vmatprep.subr.bf16.mxu0 %v3088_v23 }
 0x5c6   :  { %5606 = vmatpush3.bf16.msra.mxu0 %v3088_v23 }
 0x5c7   :  { %5607 = vmatprep.subr.bf16.mxu0 %v3090_v27 }
 0x5c9   :  { %5600 = vmatmul.mubr.msk.bf16.gmra.mrb[28].mxu0 %vm602_vm2, %v6076_v59 }
 0x5ca   :  { %5608 = vmatpush3.bf16.msra.mxu0 %v3090_v27  ;;  %5611 = vmatprep.mubr.msk.bf16.mxu0 %vm602_vm2, %v6077_v29 }
 0x5cb   :  { %5609 = vmatprep.subr.bf16.mxu0 %v3092_v32 }
 0x5ce   :  { %5610 = vmatpush3.bf16.msra.mxu0 %v3092_v32 }
 0x5d1   :  { %5612 = vmatmul.mubr.msk.bf16.vlgmr.msra.gmra.mrb[24].mxu0 %vm602_vm2, %v6078_v35 }
 0x5d2   :  { %5615 = vmatprep.mubr.msk.bf16.mxu0 %vm602_vm2, %v6079_v8 }
 0x5d9   :  { %5616 = vmatmul.mubr.msk.bf16.gmra.mrb[28].mxu0 %vm602_vm2, %v6080_v0 }
 0x6a4   :  { %v5613_v40 = vpop.f32.mrb[24].mxu0 }
 0x6a5   :  { %v3143_v17 = vpop.f32.mrb[25].mxu0  ;;  %v3232_v63 = vadd.f32 %v5613_v40, %v3203_v11 }
 0x6a6   :  { %v3230_v19 = vadd.f32 %v3193_v2, %v3143_v17  ;;  %v5614_v42 = vpop.f32.mrb[26].mxu0 }
 0x6a7   :  { %v3146_v45 = vpop.f32.mrb[27].mxu0  ;;  %v3233_v47 = vadd.f32 %v5614_v42, %v3208_v22  ;;  %v7239_v26 = vmax.f32 %v3232_v63, 0.0 }
 0x6a8   :  { %v7233_v36 = vmax.f32 %v3230_v19, 0.0  ;;  %v3231_v24 = vadd.f32 %v3198_v39, %v3146_v45 }
 0x6a9   :  { %v7243_v30 = vmax.f32 %v3233_v47, 0.0 }
 0x6aa   :  { %v7235_v48 = vmax.f32 %v3231_v24, 0.0  ;;  %3246 = vrot.lane.b32.xlu0 %v7233_v36, %s6118_s3 }
 0x6ac   :  { %3249 = vrot.lane.b32.xlu1 %v7235_v48, %s6118_s3  ;;  %v5617_v7 = vpop.f32.mrb[28].mxu0 }
 0x6ad   :  { %v3159_v33 = vpop.f32.mrb[29].mxu0  ;;  %v3236_v57 = vadd.f32 %v5617_v7, %v3223_v51 }
 0x6ae   :  { %v3234_v44 = vadd.f32 %v3213_v28, %v3159_v33  ;;  %3252 = vrot.lane.b32.xlu0 %v7239_v26, %s6118_s3  ;;  %v5618_v49 = vpop.f32.mrb[30].mxu0 }
 0x6af   :  { %v3162_v53 = vpop.f32.mrb[31].mxu0  ;;  %v3237_v1 = vadd.f32 %v5618_v49, %v3228_v62  ;;  %v7255_v5 = vmax.f32 %v3236_v57, 0.0  ;;  %v6081_v49 = vld [vmem:[%s7706_s9 + $0x20] sm:$0xff]  }
 0x6b0   :  { %v7247_v58 = vmax.f32 %v3234_v44, 0.0  ;;  %v3235_v60 = vadd.f32 %v3218_v12, %v3162_v53  ;;  %3255 = vrot.lane.b32.xlu1 %v7243_v30, %s6118_s3  ;;  %5627 = vmatprep.mubr.msk.bf16.mxu1 %vm602_vm2, %v6081_v49 }
 0x6b1   :  { %v7259_v6 = vmax.f32 %v3237_v1, 0.0 }
 0x6b2   :  { %v7251_v4 = vmax.f32 %v3235_v60, 0.0  ;;  %3258 = vrot.lane.b32.xlu0 %v7247_v58, %s6118_s3 }
 0x6b4   :  { %3261 = vrot.lane.b32.xlu1 %v7251_v4, %s6118_s3 }
 0x6b6   :  { %3264 = vrot.lane.b32.xlu0 %v7255_v5, %s6118_s3 }
 0x6b8   :  { %3267 = vrot.lane.b32.xlu1 %v7259_v6, %s6118_s3 }
 0x71c   :  { %v3247_v9 = vpop.permute.xlu0 %3246 }
 0x71d   :  { %v3248_v10 = vsel %vm458_vm1, %v3247_v9, %v7233_v36 }
 0x71e   :  { %v3250_v13 = vpop.permute.xlu1 %3249  ;;  %3270 = vrot.lane.b32.xlu0 %v3248_v10, %s6118_s3 }
 0x71f   :  { %v3251_v15 = vsel %vm458_vm1, %v3250_v13, %v7235_v48 }
 0x720   :  { %v3253_v16 = vpop.permute.xlu0 %3252  ;;  %3272 = vrot.lane.b32.xlu1 %v3251_v15, %s6118_s3 }
 0x721   :  { %v3254_v18 = vsel %vm458_vm1, %v3253_v16, %v7239_v26 }
 0x722   :  { %v3256_v20 = vpop.permute.xlu1 %3255  ;;  %3274 = vrot.lane.b32.xlu0 %v3254_v18, %s6118_s3 }
 0x723   :  { %v3257_v21 = vsel %vm458_vm1, %v3256_v20, %v7243_v30 }
 0x724   :  { %v3259_v23 = vpop.permute.xlu0 %3258  ;;  %3276 = vrot.lane.b32.xlu1 %v3257_v21, %s6118_s3 }
 0x725   :  { %v3260_v59 = vsel %vm458_vm1, %v3259_v23, %v7247_v58 }
 0x726   :  { %3278 = vrot.lane.b32.xlu0 %v3260_v59, %s6118_s3  ;;  %v3262_v27 = vpop.permute.xlu1 %3261 }
 0x727   :  { %v3263_v29 = vsel %vm458_vm1, %v3262_v27, %v7251_v4 }
 0x728   :  { %v3265_v32 = vpop.permute.xlu0 %3264  ;;  %3280 = vrot.lane.b32.xlu1 %v3263_v29, %s6118_s3 }
 0x729   :  { %v3266_v35 = vsel %vm458_vm1, %v3265_v32, %v7255_v5 }
 0x72a   :  { %3282 = vrot.lane.b32.xlu0 %v3266_v35, %s6118_s3  ;;  %v3268_v8 = vpop.permute.xlu1 %3267 }
 0x72b   :  { %v3269_v0 = vsel %vm458_vm1, %v3268_v8, %v7259_v6 }
 0x72c   :  { %3284 = vrot.lane.b32.xlu1 %v3269_v0, %s6118_s3 }
 0x790   :  { %v3271_v2 = vpop.permute.xlu0 %3270 }
 0x791   :  { %v7291_v39 = vsel %vm458_vm1, %v3271_v2, %v7233_v36 }
 0x792   :  { %v3273_v11 = vpop.permute.xlu1 %3272  ;;  %v3314_v17 = vmul.f32 %v7291_v39, %v6460_v43  ;;  %v3294_v15 = vmul.f32 %v7291_v39, %v6507_v14  ;;  %v3561_v0 = vmul.f32 %v7291_v39, %v6564_v3 }
 0x793   :  { %v7295_v40 = vsel %vm458_vm1, %v3273_v11, %v7235_v48 }
 0x794   :  { %v3275_v22 = vpop.permute.xlu0 %3274  ;;  %v3315_v19 = vmul.f32 %v7295_v40, %v6460_v43  ;;  %v3295_v10 = vmul.f32 %v7295_v40, %v6507_v14  ;;  %v3562_v35 = vmul.f32 %v7295_v40, %v6564_v3 }
 0x795   :  { %v7303_v42 = vsel %vm458_vm1, %v3275_v22, %v7239_v26 }
 0x796   :  { %v3277_v45 = vpop.permute.xlu1 %3276  ;;  %v3331_v63 = vpack.c.bf16 %v3315_v19, %v3314_v17  ;;  %v3316_v47 = vmul.f32 %v7303_v42, %v6460_v43  ;;  %v3310_v20 = vpack.c.bf16 %v3295_v10, %v3294_v15  ;;  %v3296_v29 = vmul.f32 %v7303_v42, %v6507_v14 }
 0x797   :  { %v7307_v24 = vsel %vm458_vm1, %v3277_v45, %v7243_v30  ;;  %v3578_v11 = vpack.c.bf16 %v3562_v35, %v3561_v0  ;;  %v3964_v15 = vmul.f32 %v7295_v40, %v6443_v31  ;;  %v4106_v35 = vmul.f32 %v7295_v40, %v6477_v52 }
 0x798   :  { %v3279_v28 = vpop.permute.xlu0 %3278  ;;  %3359 = vrot.lane.b32.xlu0 %v3331_v63, %s6129_s20  ;;  %v3317_v12 = vmul.f32 %v7307_v24, %v6460_v43  ;;  %v3297_v59 = vmul.f32 %v7307_v24, %v6507_v14  ;;  %v3564_v19 = vmul.f32 %v7307_v24, %v6564_v3  ;;  %v3563_v63 = vmul.f32 %v7303_v42, %v6564_v3 }
 0x799   :  { %v7316_v7 = vsel %vm458_vm1, %v3279_v28, %v7247_v58  ;;  %v4105_v0 = vmul.f32 %v7291_v39, %v6477_v52 }
 0x79a   :  { %v3281_v33 = vpop.permute.xlu1 %3280  ;;  %v3332_v44 = vpack.c.bf16 %v3317_v12, %v3316_v47  ;;  %v3318_v57 = vmul.f32 %v7316_v7, %v6460_v43  ;;  %v3298_v27 = vmul.f32 %v7316_v7, %v6507_v14  ;;  %v3565_v45 = vmul.f32 %v7316_v7, %v6564_v3 }
 0x79b   :  { %v7323_v51 = vsel %vm458_vm1, %v3281_v33, %v7251_v4  ;;  %v3704_v47 = vmul.f32 %v7295_v40, %v6384_v61  ;;  %v3703_v33 = vmul.f32 %v7291_v39, %v6384_v61 }
 0x79c   :  { %v3283_v53 = vpop.permute.xlu0 %3282  ;;  %3361 = vrot.lane.b32.xlu1 %v3332_v44, %s6129_s20  ;;  %v3319_v60 = vmul.f32 %v7323_v51, %v6460_v43  ;;  %v3299_v23 = vmul.f32 %v7323_v51, %v6507_v14  ;;  %v3566_v17 = vmul.f32 %v7323_v51, %v6564_v3 }
 0x79d   :  { %v7332_v62 = vsel %vm458_vm1, %v3283_v53, %v7255_v5  ;;  %v3720_v49 = vpack.c.bf16 %v3704_v47, %v3703_v33 }
 0x79e   :  { %v3285_v1 = vpop.permute.xlu1 %3284  ;;  %v3333_v9 = vpack.c.bf16 %v3319_v60, %v3318_v57  ;;  %v3320_v16 = vmul.f32 %v7332_v62, %v6460_v43  ;;  %v3312_v32 = vpack.c.bf16 %v3299_v23, %v3298_v27  ;;  %v3300_v2 = vmul.f32 %v7332_v62, %v6507_v14 }
 0x79f   :  { %v7339_v13 = vsel %vm458_vm1, %v3285_v1, %v7259_v6  ;;  %v3580_v28 = vpack.c.bf16 %v3566_v17, %v3565_v45  ;;  %v3567_v44 = vmul.f32 %v7332_v62, %v6564_v3  ;;  %v3708_v57 = vmul.f32 %v7323_v51, %v6384_v61 }
 0x7a0   :  { %3363 = vrot.lane.b32.xlu0 %v3333_v9, %s6129_s20  ;;  %v3321_v18 = vmul.f32 %v7339_v13, %v6460_v43  ;;  %v3311_v43 = vpack.c.bf16 %v3297_v59, %v3296_v29  ;;  %v3301_v8 = vmul.f32 %v7339_v13, %v6507_v14  ;;  %v3579_v14 = vpack.c.bf16 %v3564_v19, %v3563_v63 }
 0x7a1   :  { %v3568_v12 = vmul.f32 %v7339_v13, %v6564_v3  ;;  %v3706_v60 = vmul.f32 %v7307_v24, %v6384_v61  ;;  %v3707_v1 = vmul.f32 %v7316_v7, %v6384_v61  ;;  %v3705_v9 = vmul.f32 %v7303_v42, %v6384_v61 }
 0x7a2   :  { %v3334_v21 = vpack.c.bf16 %v3321_v18, %v3320_v16  ;;  %v3313_v22 = vpack.c.bf16 %v3301_v8, %v3300_v2  ;;  %v3710_v16 = vmul.f32 %v7339_v13, %v6384_v61  ;;  %v3963_v18 = vmul.f32 %v7291_v39, %v6443_v31 }
 0x7a3   :  { %v3581_v53 = vpack.c.bf16 %v3568_v12, %v3567_v44  ;;  %v3722_v10 = vpack.c.bf16 %v3708_v57, %v3707_v1  ;;  %v3721_v3 = vpack.c.bf16 %v3706_v60, %v3705_v9  ;;  %v3968_v59 = vmul.f32 %v7323_v51, %v6443_v31 }
 0x7a4   :  { %3472 = vrot.lane.b32.xlu0 %v3310_v20, %s6131_s24  ;;  %3365 = vrot.lane.b32.xlu1 %v3334_v21, %s6129_s20  ;;  %v3709_v20 = vmul.f32 %v7332_v62, %v6384_v61  ;;  %v3980_v21 = vpack.c.bf16 %v3964_v15, %v3963_v18  ;;  %v3966_v27 = vmul.f32 %v7307_v24, %v6443_v31 }
 0x7a5   :  { %v3967_v29 = vmul.f32 %v7316_v7, %v6443_v31  ;;  %v3970_v8 = vmul.f32 %v7339_v13, %v6443_v31  ;;  %v3969_v2 = vmul.f32 %v7332_v62, %v6443_v31  ;;  %v4110_v17 = vmul.f32 %v7323_v51, %v6477_v52 }
 0x7a6   :  { %v3723_v23 = vpack.c.bf16 %v3710_v16, %v3709_v20  ;;  %v4108_v19 = vmul.f32 %v7307_v24, %v6477_v52  ;;  %v4109_v45 = vmul.f32 %v7316_v7, %v6477_v52  ;;  %v4107_v63 = vmul.f32 %v7303_v42, %v6477_v52 }
 0x7a7   :  { %v4112_v47 = vmul.f32 %v7339_v13, %v6477_v52  ;;  %v4247_v12 = vmul.f32 %v7291_v39, %v6543_v46  ;;  %v4111_v33 = vmul.f32 %v7332_v62, %v6477_v52  ;;  %v4250_v57 = vmul.f32 %v7307_v24, %v6543_v46 }
 0x7a8   :  { %3476 = vrot.lane.b32.xlu0 %v3312_v32, %s6131_s24  ;;  %3474 = vrot.lane.b32.xlu1 %v3311_v43, %s6131_s24  ;;  %v3965_v32 = vmul.f32 %v7303_v42, %v6443_v31  ;;  %v3982_v43 = vpack.c.bf16 %v3968_v59, %v3967_v29  ;;  %v4123_v31 = vpack.c.bf16 %v4108_v19, %v4107_v63  ;;  %v4537_v29 = vld [vmem:[%s7707_s10 + $0x30] sm:$0xff]  ;;  %v6084_v19 = vld [vmem:[%s7706_s9 + $0x38] sm:$0xff]  }
 0x7a9   :  { %v4251_v60 = vmul.f32 %v7316_v7, %v6543_v46  ;;  %v4249_v1 = vmul.f32 %v7303_v42, %v6543_v46  ;;  %v4389_v15 = vmul.f32 %v7291_v39, %v6590_v25  ;;  %v4253_v16 = vmul.f32 %v7332_v62, %v6543_v46  ;;  %v6085_v63 = vld [vmem:[%s7706_s9] sm:$0xff]  }
 0x7aa   :  { %v3981_v61 = vpack.c.bf16 %v3966_v27, %v3965_v32  ;;  %v4391_v39 = vmul.f32 %v7303_v42, %v6590_v25  ;;  %v4396_v27 = vmul.f32 %v7339_v13, %v6590_v25  ;;  %v4533_v42 = vld [vmem:[%s7707_s10 + $0x10] sm:$0xff]  ;;  %v4536_v32 = vld [vmem:[%s7707_s10 + $0x28] sm:$0xff] }
 0x7ab   :  { %v4265_v52 = vpack.c.bf16 %v4250_v57, %v4249_v1  ;;  %v6090_v57 = vld [vmem:[%s7706_s9 + $0x48] sm:$0xff]   ;;  %v6091_v1 = vld [vmem:[%s7706_s9 + $0x50] sm:$0xff]  }
 0x7ac   :  { %3606 = vrot.lane.b32.xlu0 %v3578_v11, %s6133_s26  ;;  %3478 = vrot.lane.b32.xlu1 %v3313_v22, %s6131_s24  ;;  %v4122_v11 = vpack.c.bf16 %v4106_v35, %v4105_v0  ;;  %v3983_v22 = vpack.c.bf16 %v3970_v8, %v3969_v2  ;;  %v6082_v2 = vld [vmem:[%s7706_s9 + $0x28] sm:$0xff]  }
 0x7b0   :  { %3610 = vrot.lane.b32.xlu0 %v3580_v28, %s6133_s26  ;;  %3608 = vrot.lane.b32.xlu1 %v3579_v14, %s6133_s26  ;;  %v4124_v28 = vpack.c.bf16 %v4110_v17, %v4109_v45  ;;  %v4248_v14 = vmul.f32 %v7295_v40, %v6543_v46 }
 0x7b2   :  { %v4264_v44 = vpack.c.bf16 %v4248_v14, %v4247_v12 }
 0x7b4   :  { %3748 = vrot.lane.b32.xlu0 %v3720_v49, %s6124_s29  ;;  %3612 = vrot.lane.b32.xlu1 %v3581_v53, %s6133_s26  ;;  %v4125_v49 = vpack.c.bf16 %v4112_v47, %v4111_v33  ;;  %v4252_v53 = vmul.f32 %v7323_v51, %v6543_v46  ;;  %v6087_v47 = vld [vmem:[%s7706_s9 + $0x10] sm:$0xff]   ;;  %v6088_v33 = vld [vmem:[%s7706_s9 + $0x18] sm:$0xff]  }
 0x7b6   :  { %v4266_v9 = vpack.c.bf16 %v4252_v53, %v4251_v60 }
 0x7b8   :  { %3752 = vrot.lane.b32.xlu0 %v3722_v10, %s6124_s29  ;;  %3750 = vrot.lane.b32.xlu1 %v3721_v3, %s6124_s29  ;;  %v4390_v10 = vmul.f32 %v7295_v40, %v6590_v25  ;;  %v4254_v3 = vmul.f32 %v7339_v13, %v6543_v46  ;;  %v4392_v40 = vmul.f32 %v7307_v24, %v6590_v25  ;;  %v4532_v13 = vld [vmem:[%s7707_s10 + $0x8] sm:$0xff] }
 0x7b9   :  { %v4395_v24 = vmul.f32 %v7332_v62, %v6590_v25  ;;  %v4534_v62 = vld [vmem:[%s7707_s10 + $0x18] sm:$0xff] }
 0x7ba   :  { %v4406_v18 = vpack.c.bf16 %v4390_v10, %v4389_v15  ;;  %v4267_v20 = vpack.c.bf16 %v4254_v3, %v4253_v16  ;;  %v4407_v46 = vpack.c.bf16 %v4392_v40, %v4391_v39  ;;  %v6093_v3 = vld [vmem:[%s7706_s9 + $0x60] sm:$0xff]   ;;  %v3854_v16 = vpack.c.bf16 %v7235_v48, %v7233_v36  ;;  %v6096_v48 = vld [vmem:[%s7706_s9 + $0x78] sm:$0xff]  }
 0x7bb   :  { %v3856_v36 = vpack.c.bf16 %v7251_v4, %v7247_v58  ;;  %v6097_v40 = vld [vmem:[%s7706_s9 + $0x80] sm:$0xff]   ;;  %v6099_v4 = vld [vmem:[%s7706_s9 + $0x90] sm:$0xff]  }
 0x7bc   :  { %4008 = vrot.lane.b32.xlu0 %v3980_v21, %s6127_s19  ;;  %3754 = vrot.lane.b32.xlu1 %v3723_v23, %s6124_s29  ;;  %v4394_v21 = vmul.f32 %v7323_v51, %v6590_v25  ;;  %v4393_v23 = vmul.f32 %v7316_v7, %v6590_v25  ;;  %v4531_v51 = vld [vmem:[%s7707_s10] sm:$0xff]  ;;  %v4409_v7 = vpack.c.bf16 %v4396_v27, %v4395_v24  ;;  %v6103_v24 = vld [vmem:[%s7706_s9 + $0xb0] sm:$0xff]  }
 0x7bd   :  { %v4535_v25 = vld [vmem:[%s7707_s10 + $0x20] sm:$0xff] }
 0x7be   :  { %v4408_v59 = vpack.c.bf16 %v4394_v21, %v4393_v23  ;;  %v3855_v21 = vpack.c.bf16 %v7243_v30, %v7239_v26  ;;  %v3857_v26 = vpack.c.bf16 %v7259_v6, %v7255_v5  ;;  %v6098_v30 = vld [vmem:[%s7706_s9 + $0x88] sm:$0xff]   ;;  %v6100_v5 = vld [vmem:[%s7706_s9 + $0x98] sm:$0xff]   ;;  %v6101_v39 = vld [vmem:[%s7706_s9 + $0xa0] sm:$0xff]  }
 0x7c0   :  { %4012 = vrot.lane.b32.xlu0 %v3982_v43, %s6127_s19  ;;  %4010 = vrot.lane.b32.xlu1 %v3981_v61, %s6127_s19  ;;  %v4538_v43 = vld [vmem:[%s7707_s10 + $0x38] sm:$0xff] }
 0x7c4   :  { %4150 = vrot.lane.b32.xlu0 %v4122_v11, %s6130_s23  ;;  %4014 = vrot.lane.b32.xlu1 %v3983_v22, %s6127_s19  ;;  %v6083_v22 = vld [vmem:[%s7706_s9 + $0x30] sm:$0xff]  }
 0x7c8   :  { %4154 = vrot.lane.b32.xlu0 %v4124_v28, %s6130_s23  ;;  %4152 = vrot.lane.b32.xlu1 %v4123_v31, %s6130_s23  ;;  %v6086_v31 = vld [vmem:[%s7706_s9 + $0x8] sm:$0xff]  }
 0x7cc   :  { %4292 = vrot.lane.b32.xlu0 %v4264_v44, %s6132_s25  ;;  %4156 = vrot.lane.b32.xlu1 %v4125_v49, %s6130_s23  ;;  %v6089_v49 = vld [vmem:[%s7706_s9 + $0x40] sm:$0xff]  }
 0x7d0   :  { %4296 = vrot.lane.b32.xlu0 %v4266_v9, %s6132_s25  ;;  %4294 = vrot.lane.b32.xlu1 %v4265_v52, %s6132_s25  ;;  %v6092_v52 = vld [vmem:[%s7706_s9 + $0x58] sm:$0xff]  }
 0x7d4   :  { %4434 = vrot.lane.b32.xlu0 %v4406_v18, %s6134_s12  ;;  %4298 = vrot.lane.b32.xlu1 %v4267_v20, %s6132_s25  ;;  %v6094_v18 = vld [vmem:[%s7706_s9 + $0x68] sm:$0xff]   ;;  %v6095_v20 = vld [vmem:[%s7706_s9 + $0x70] sm:$0xff]  }
 0x7d8   :  { %4438 = vrot.lane.b32.xlu0 %v4408_v59, %s6134_s12  ;;  %4436 = vrot.lane.b32.xlu1 %v4407_v46, %s6134_s12  ;;  %v6102_v46 = vld [vmem:[%s7706_s9 + $0xa8] sm:$0xff]  }
 0x7dc   :  { %4541 = vperm.xlu0 %5973, %v4531_v51   ;;  %4440 = vrot.lane.b32.xlu1 %v4409_v7, %s6134_s12  ;;  %v6104_v7 = vld [vmem:[%s7706_s9 + $0xb8] sm:$0xff]  }
 0x7e0   :  { %4551 = vperm.xlu0 %5973, %v4533_v42   ;;  %4546 = vperm.xlu1 %5974, %v4532_v13   ;;  %v6105_v13 = vld [vmem:[%s7706_s9 + $0xc0] sm:$0xff]  }
 0x7e4   :  { %4561 = vperm.xlu0 %5973, %v4535_v25   ;;  %4556 = vperm.xlu1 %5974, %v4534_v62   ;;  %v6106_v62 = vld [vmem:[%s7706_s9 + $0xc8] sm:$0xff]  }
 0x7e8   :  { %4571 = vperm.xlu0 %5973, %v4537_v29   ;;  %4566 = vperm.xlu1 %5974, %v4536_v32   ;;  %v6107_v32 = vld [vmem:[%s7706_s9 + $0xd0] sm:$0xff]  }
 0x7ec   :  { %4576 = vperm.xlu1 %5974, %v4538_v43  }
 0x80a   :  { %v3360_v61 = vpop.permute.xlu0 %3359 }
 0x80b   :  { %5619 = vmatprep.subr.bf16.mxu1 %v3360_v61 }
 0x80c   :  { %5620 = vmatpush3.bf16.msra.mxu1 %v3360_v61  ;;  %v6108_v61 = vld [vmem:[%s7706_s9 + $0xd8] sm:$0xff]  }
 0x80e   :  { %v3362_v35 = vpop.permute.xlu1 %3361 }
 0x80f   :  { %5621 = vmatprep.subr.bf16.mxu1 %v3362_v35 }
 0x810   :  { %5622 = vmatpush3.bf16.msra.mxu1 %v3362_v35 }
 0x812   :  { %v3364_v8 = vpop.permute.xlu0 %3363 }
 0x813   :  { %5623 = vmatprep.subr.bf16.mxu1 %v3364_v8 }
 0x814   :  { %5624 = vmatpush3.bf16.msra.mxu1 %v3364_v8  ;;  %v6109_v8 = vld [vmem:[%s7706_s9 + $0xe0] sm:$0xff]  }
 0x816   :  { %v3366_v0 = vpop.permute.xlu1 %3365  ;;  %v3473_v11 = vpop.permute.xlu0 %3472 }
 0x817   :  { %5625 = vmatprep.subr.bf16.mxu1 %v3366_v0 }
 0x818   :  { %5626 = vmatpush3.bf16.msra.mxu1 %v3366_v0 }
 0x819   :  { %5635 = vmatprep.subr.bf16.mxu1 %v3473_v11 }
 0x81a   :  { %v3475_v17 = vpop.permute.xlu1 %3474  ;;  %v3477_v45 = vpop.permute.xlu0 %3476 }
 0x81b   :  { %5628 = vmatmul.mubr.msk.bf16.vlgmr.msra.gmra.mrb[16].mxu1 %vm602_vm2, %v6082_v2  ;;  %v6110_v2 = vld [vmem:[%s7706_s9 + $0xe8] sm:$0xff]  }
 0x81c   :  { %5636 = vmatpush3.bf16.msra.mxu1 %v3473_v11  ;;  %5631 = vmatprep.mubr.msk.bf16.mxu1 %vm602_vm2, %v6083_v22  ;;  %v6111_v22 = vld [vmem:[%s7706_s9 + $0xf0] sm:$0xff]  }
 0x81d   :  { %5637 = vmatprep.subr.bf16.mxu1 %v3475_v17 }
 0x81e   :  { %v3479_v28 = vpop.permute.xlu1 %3478  ;;  %v3607_v14 = vpop.permute.xlu0 %3606 }
 0x820   :  { %5638 = vmatpush3.bf16.msra.mxu1 %v3475_v17 }
 0x821   :  { %5639 = vmatprep.subr.bf16.mxu1 %v3477_v45 }
 0x822   :  { %v3609_v12 = vpop.permute.xlu1 %3608  ;;  %v3611_v44 = vpop.permute.xlu0 %3610 }
 0x823   :  { %5632 = vmatmul.mubr.msk.bf16.gmra.mrb[20].mxu1 %vm602_vm2, %v6084_v19  ;;  %v6112_v19 = vld [vmem:[%s7706_s9 + $0xf8] sm:$0xff]  }
 0x824   :  { %5640 = vmatpush3.bf16.msra.mxu1 %v3477_v45  ;;  %5643 = vmatprep.mubr.msk.bf16.mxu1 %vm602_vm2, %v6085_v63  ;;  %v6113_v63 = vld [vmem:[%s7706_s9 + $0x100] sm:$0xff]  }
 0x825   :  { %5641 = vmatprep.subr.bf16.mxu1 %v3479_v28 }
 0x826   :  { %v3613_v53 = vpop.permute.xlu1 %3612  ;;  %v3749_v60 = vpop.permute.xlu0 %3748 }
 0x828   :  { %5642 = vmatpush3.bf16.msra.mxu1 %v3479_v28 }
 0x829   :  { %5651 = vmatprep.subr.bf16.mxu1 %v3607_v14 }
 0x82a   :  { %v3751_v9 = vpop.permute.xlu1 %3750  ;;  %v3753_v10 = vpop.permute.xlu0 %3752 }
 0x82b   :  { %5644 = vmatmul.mubr.msk.bf16.vlgmr.msra.gmra.mrb[16].mxu1 %vm602_vm2, %v6086_v31  ;;  %v6114_v31 = vld [vmem:[%s7706_s9 + $0x108] sm:$0xff]  }
 0x82c   :  { %5652 = vmatpush3.bf16.msra.mxu1 %v3607_v14  ;;  %5647 = vmatprep.mubr.msk.bf16.mxu1 %vm602_vm2, %v6087_v47  ;;  %v6115_v14 = vld [vmem:[%s7706_s9 + $0x110] sm:$0xff]   ;;  %v6116_v47 = vld [vmem:[%s7706_s9 + $0x118] sm:$0xff]  }
 0x82d   :  { %5653 = vmatprep.subr.bf16.mxu1 %v3609_v12 }
 0x82e   :  { %v3755_v15 = vpop.permute.xlu1 %3754  ;;  %v4009_v58 = vpop.permute.xlu0 %4008 }
 0x830   :  { %5654 = vmatpush3.bf16.msra.mxu1 %v3609_v12 }
 0x831   :  { %5655 = vmatprep.subr.bf16.mxu1 %v3611_v44 }
 0x832   :  { %v4011_v23 = vpop.permute.xlu1 %4010  ;;  %v4013_v6 = vpop.permute.xlu0 %4012 }
 0x833   :  { %5648 = vmatmul.mubr.msk.bf16.gmra.mrb[20].mxu1 %vm602_vm2, %v6088_v33 }
 0x834   :  { %5656 = vmatpush3.bf16.msra.mxu1 %v3611_v44  ;;  %5659 = vmatprep.mubr.msk.bf16.mxu1 %vm602_vm2, %v6089_v49 }
 0x835   :  { %5657 = vmatprep.subr.bf16.mxu1 %v3613_v53 }
 0x836   :  { %v4015_v59 = vpop.permute.xlu1 %4014  ;;  %v4151_v27 = vpop.permute.xlu0 %4150 }
 0x838   :  { %5658 = vmatpush3.bf16.msra.mxu1 %v3613_v53 }
 0x839   :  { %5667 = vmatprep.subr.bf16.mxu1 %v3749_v60 }
 0x83a   :  { %v4153_v51 = vpop.permute.xlu1 %4152  ;;  %v4155_v42 = vpop.permute.xlu0 %4154 }
 0x83b   :  { %5660 = vmatmul.mubr.msk.bf16.vlgmr.msra.gmra.mrb[16].mxu1 %vm602_vm2, %v6090_v57 }
 0x83c   :  { %5668 = vmatpush3.bf16.msra.mxu1 %v3749_v60  ;;  %5663 = vmatprep.mubr.msk.bf16.mxu1 %vm602_vm2, %v6091_v1 }
 0x83d   :  { %5669 = vmatprep.subr.bf16.mxu1 %v3751_v9 }
 0x83e   :  { %v4157_v25 = vpop.permute.xlu1 %4156  ;;  %v4293_v29 = vpop.permute.xlu0 %4292 }
 0x840   :  { %5670 = vmatpush3.bf16.msra.mxu1 %v3751_v9 }
 0x841   :  { %5671 = vmatprep.subr.bf16.mxu1 %v3753_v10 }
 0x842   :  { %v4295_v43 = vpop.permute.xlu1 %4294  ;;  %v4297_v35 = vpop.permute.xlu0 %4296 }
 0x843   :  { %5664 = vmatmul.mubr.msk.bf16.gmra.mrb[20].mxu1 %vm602_vm2, %v6092_v52 }
 0x844   :  { %5672 = vmatpush3.bf16.msra.mxu1 %v3753_v10  ;;  %5675 = vmatprep.mubr.msk.bf16.mxu1 %vm602_vm2, %v6093_v3 }
 0x845   :  { %5673 = vmatprep.subr.bf16.mxu1 %v3755_v15 }
 0x846   :  { %v4299_v0 = vpop.permute.xlu1 %4298  ;;  %v4435_v11 = vpop.permute.xlu0 %4434 }
 0x848   :  { %5674 = vmatpush3.bf16.msra.mxu1 %v3755_v15 }
 0x849   :  { %5683 = vmatprep.subr.bf16.mxu1 %v3854_v16 }
 0x84a   :  { %v4437_v17 = vpop.permute.xlu1 %4436  ;;  %v4439_v45 = vpop.permute.xlu0 %4438 }
 0x84b   :  { %5676 = vmatmul.mubr.msk.bf16.vlgmr.msra.gmra.mrb[16].mxu1 %vm602_vm2, %v6094_v18 }
 0x84c   :  { %5684 = vmatpush3.bf16.msra.mxu1 %v3854_v16  ;;  %5679 = vmatprep.mubr.msk.bf16.mxu1 %vm602_vm2, %v6095_v20 }
 0x84d   :  { %5685 = vmatprep.subr.bf16.mxu1 %v3855_v21 }
 0x84e   :  { %v4441_v28 = vpop.permute.xlu1 %4440 }
 0x850   :  { %5686 = vmatpush3.bf16.msra.mxu1 %v3855_v21 }
 0x851   :  { %5687 = vmatprep.subr.bf16.mxu1 %v3856_v36 }
 0x853   :  { %5680 = vmatmul.mubr.msk.bf16.gmra.mrb[20].mxu1 %vm602_vm2, %v6096_v48 }
 0x854   :  { %5688 = vmatpush3.bf16.msra.mxu1 %v3856_v36  ;;  %5691 = vmatprep.mubr.msk.bf16.mxu1 %vm602_vm2, %v6097_v40 }
 0x855   :  { %5689 = vmatprep.subr.bf16.mxu1 %v3857_v26 }
 0x858   :  { %5690 = vmatpush3.bf16.msra.mxu1 %v3857_v26 }
 0x859   :  { %5699 = vmatprep.subr.bf16.mxu1 %v4009_v58 }
 0x85b   :  { %5692 = vmatmul.mubr.msk.bf16.vlgmr.msra.gmra.mrb[16].mxu1 %vm602_vm2, %v6098_v30  ;;  %v4542_v12 = vpop.permute.xlu0 %4541 }
 0x85c   :  { %5700 = vmatpush3.bf16.msra.mxu1 %v4009_v58  ;;  %5695 = vmatprep.mubr.msk.bf16.mxu1 %vm602_vm2, %v6099_v4 }
 0x85d   :  { %5701 = vmatprep.subr.bf16.mxu1 %v4011_v23 }
 0x85f   :  { %v4547_v33 = vpop.permute.xlu1 %4546  ;;  %v4552_v44 = vpop.permute.xlu0 %4551 }
 0x860   :  { %5702 = vmatpush3.bf16.msra.mxu1 %v4011_v23 }
 0x861   :  { %5703 = vmatprep.subr.bf16.mxu1 %v4013_v6 }
 0x863   :  { %5696 = vmatmul.mubr.msk.bf16.gmra.mrb[20].mxu1 %vm602_vm2, %v6100_v5  ;;  %v4557_v49 = vpop.permute.xlu1 %4556  ;;  %v4562_v1 = vpop.permute.xlu0 %4561 }
 0x864   :  { %5704 = vmatpush3.bf16.msra.mxu1 %v4013_v6  ;;  %5707 = vmatprep.mubr.msk.bf16.mxu1 %vm602_vm2, %v6101_v39 }
 0x865   :  { %5705 = vmatprep.subr.bf16.mxu1 %v4015_v59 }
 0x867   :  { %v4567_v16 = vpop.permute.xlu1 %4566 }
 0x868   :  { %5706 = vmatpush3.bf16.msra.mxu1 %v4015_v59 }
 0x869   :  { %5715 = vmatprep.subr.bf16.mxu1 %v4151_v27 }
 0x86b   :  { %5708 = vmatmul.mubr.msk.bf16.vlgmr.msra.gmra.mrb[16].mxu1 %vm602_vm2, %v6102_v46  ;;  %v4577_v40 = vpop.permute.xlu1 %4576 }
 0x86c   :  { %5716 = vmatpush3.bf16.msra.mxu1 %v4151_v27  ;;  %5711 = vmatprep.mubr.msk.bf16.mxu1 %vm602_vm2, %v6103_v24 }
 0x86d   :  { %5717 = vmatprep.subr.bf16.mxu1 %v4153_v51 }
 0x870   :  { %5718 = vmatpush3.bf16.msra.mxu1 %v4153_v51 }
 0x871   :  { %5719 = vmatprep.subr.bf16.mxu1 %v4155_v42 }
 0x873   :  { %5712 = vmatmul.mubr.msk.bf16.gmra.mrb[20].mxu1 %vm602_vm2, %v6104_v7 }
 0x874   :  { %5720 = vmatpush3.bf16.msra.mxu1 %v4155_v42  ;;  %5723 = vmatprep.mubr.msk.bf16.mxu1 %vm602_vm2, %v6105_v13 }
 0x875   :  { %5721 = vmatprep.subr.bf16.mxu1 %v4157_v25 }
 0x878   :  { %5722 = vmatpush3.bf16.msra.mxu1 %v4157_v25 }
 0x879   :  { %5731 = vmatprep.subr.bf16.mxu1 %v4293_v29 }
 0x87b   :  { %5724 = vmatmul.mubr.msk.bf16.vlgmr.msra.gmra.mrb[16].mxu1 %vm602_vm2, %v6106_v62 }
 0x87c   :  { %5732 = vmatpush3.bf16.msra.mxu1 %v4293_v29  ;;  %5727 = vmatprep.mubr.msk.bf16.mxu1 %vm602_vm2, %v6107_v32 }
 0x87d   :  { %5733 = vmatprep.subr.bf16.mxu1 %v4295_v43 }
 0x880   :  { %5734 = vmatpush3.bf16.msra.mxu1 %v4295_v43 }
 0x881   :  { %5735 = vmatprep.subr.bf16.mxu1 %v4297_v35 }
 0x883   :  { %5728 = vmatmul.mubr.msk.bf16.gmra.mrb[20].mxu1 %vm602_vm2, %v6108_v61 }
 0x884   :  { %5736 = vmatpush3.bf16.msra.mxu1 %v4297_v35  ;;  %5739 = vmatprep.mubr.msk.bf16.mxu1 %vm602_vm2, %v6109_v8 }
 0x885   :  { %5737 = vmatprep.subr.bf16.mxu1 %v4299_v0 }
 0x888   :  { %5738 = vmatpush3.bf16.msra.mxu1 %v4299_v0 }
 0x889   :  { %5747 = vmatprep.subr.bf16.mxu1 %v4435_v11 }
 0x88b   :  { %5740 = vmatmul.mubr.msk.bf16.vlgmr.msra.gmra.mrb[16].mxu1 %vm602_vm2, %v6110_v2 }
 0x88c   :  { %5748 = vmatpush3.bf16.msra.mxu1 %v4435_v11  ;;  %5743 = vmatprep.mubr.msk.bf16.mxu1 %vm602_vm2, %v6111_v22 }
 0x88d   :  { %5749 = vmatprep.subr.bf16.mxu1 %v4437_v17 }
 0x890   :  { %5750 = vmatpush3.bf16.msra.mxu1 %v4437_v17 }
 0x891   :  { %5751 = vmatprep.subr.bf16.mxu1 %v4439_v45 }
 0x893   :  { %5744 = vmatmul.mubr.msk.bf16.gmra.mrb[20].mxu1 %vm602_vm2, %v6112_v19 }
 0x894   :  { %5752 = vmatpush3.bf16.msra.mxu1 %v4439_v45  ;;  %5755 = vmatprep.mubr.msk.bf16.mxu1 %vm602_vm2, %v6113_v63 }
 0x895   :  { %5753 = vmatprep.subr.bf16.mxu1 %v4441_v28 }
 0x898   :  { %5754 = vmatpush3.bf16.msra.mxu1 %v4441_v28 }
 0x89b   :  { %5756 = vmatmul.mubr.msk.bf16.vlgmr.msra.gmra.mrb[16].mxu1 %vm602_vm2, %v6114_v31 }
 0x89c   :  { %5759 = vmatprep.mubr.msk.bf16.mxu1 %vm602_vm2, %v6115_v14 }
 0x8a3   :  { %5760 = vmatmul.mubr.msk.bf16.gmra.mrb[20].mxu1 %vm602_vm2, %v6116_v47 }
 0x96e   :  { %v5757_v53 = vpop.f32.mrb[16].mxu1 }
 0x96f   :  { %v4581_v57 = vadd.f32 %v5757_v53, %v4552_v44  ;;  %v4492_v60 = vpop.f32.mrb[17].mxu1 }
 0x970   :  { %v4579_v9 = vadd.f32 %v4542_v12, %v4492_v60  ;;  %v5758_v52 = vpop.f32.mrb[18].mxu1 }
 0x971   :  { %v4589_v10 = vadd.f32 %v4581_v57, %v6806_v41  ;;  %v4582_v3 = vadd.f32 %v5758_v52, %v4557_v49  ;;  %v4495_v15 = vpop.f32.mrb[19].mxu1 }
 0x972   :  { %v4587_v18 = vadd.f32 %v4579_v9, %v6797_v34  ;;  %v4580_v20 = vadd.f32 %v4547_v33, %v4495_v15  ;;  %v4572_v34 = vpop.permute.xlu0 %4571 }
 0x973   :  { %4597 = vst.msk [vmem:[%s7708_s11 + $0x10] sm:$0xff] %vm307_vm0, %v4589_v10  ;;  %v4590_v21 = vadd.f32 %v4582_v3, %v6816_v38 }
 0x974   :  { %4595 = vst.msk [vmem:[%s7708_s11] sm:$0xff] %vm307_vm0, %v4587_v18  ;;  %v4588_v41 = vadd.f32 %v4580_v20, %v6799_v37 }
 0x975   :  { %4598 = vst.msk [vmem:[%s7708_s11 + $0x18] sm:$0xff] %vm307_vm0, %v4590_v21 }
 0x976   :  { %4596 = vst.msk [vmem:[%s7708_s11 + $0x8] sm:$0xff] %vm307_vm0, %v4588_v41  ;;  %v5761_v36 = vpop.f32.mrb[20].mxu1 }
 0x977   :  { %v4585_v38 = vadd.f32 %v5761_v36, %v4572_v34  ;;  %v4508_v48 = vpop.f32.mrb[21].mxu1 }
 0x978   :  { %v4583_v26 = vadd.f32 %v4562_v1, %v4508_v48  ;;  %v5762_v30 = vpop.f32.mrb[22].mxu1 }
 0x979   :  { %v4593_v58 = vadd.f32 %v4585_v38, %v6831_v55  ;;  %v4586_v37 = vadd.f32 %v5762_v30, %v4577_v40  ;;  %v4511_v4 = vpop.f32.mrb[23].mxu1 }
 0x97a   :  { %v4591_v23 = vadd.f32 %v4583_v26, %v6823_v50  ;;  %v4584_v5 = vadd.f32 %v4567_v16, %v4511_v4 }
 0x97b   :  { %4601 = vst.msk [vmem:[%s7708_s11 + $0x30] sm:$0xff] %vm307_vm0, %v4593_v58  ;;  %v4594_v6 = vadd.f32 %v4586_v37, %v6835_v56 }
 0x97c   :  { %4599 = vst.msk [vmem:[%s7708_s11 + $0x20] sm:$0xff] %vm307_vm0, %v4591_v23  ;;  %v4592_v39 = vadd.f32 %v4584_v5, %v6827_v54 }
 0x97d   :  { %4602 = vst.msk [vmem:[%s7708_s11 + $0x38] sm:$0xff] %vm307_vm0, %v4594_v6 }
 0x97e   :  { %4600 = vst.msk [vmem:[%s7708_s11 + $0x28] sm:$0xff] %vm307_vm0, %v4592_v39 }

</bundles_post_ra>
